<compile_context>
chip_gen: v7x
topology: tpu7x:2x2x1
jax: 0.10.0
libtpu: 0.0.40
codegen_flags: <defaults>
</compile_context>

<pallas_src>
import functools

import jax
import jax.numpy as jnp
from jax.experimental import pallas as pl
from jax.experimental.pallas import tpu as pltpu

_EPS = 1e-5


# ----------------------------- in-kernel helpers -----------------------------

def _swish(x):
    return x * jax.nn.sigmoid(x)


def _conv3x3_folded(x, w_folded, masks, tap_ref, W, cin_pad):
    """3x3 conv (stride 1, pad 1) on a flattened (Cin, H*W) tile.

    The nine masked, lane-rolled taps are packed into the (9*cin_pad, HW) VMEM
    scratch `tap_ref`, then contracted in ONE MXU matmul against the pre-folded
    weight (Cout, 9*cin_pad).  Returns a float32 (Cout, HW) accumulator (no bias).
    """
    cin, hw = x.shape
    for k in range(9):
        dy, dx = divmod(k, 3)
        off = (dy - 1) * W + (dx - 1)
        # tap[:, i] = x[:, i + off]; wrapped positions are killed by the mask.
        shifted = x if off == 0 else pltpu.roll(x, (-off) % hw, 1)
        tap_ref[k * cin_pad:k * cin_pad + cin, :] = shifted * masks[k:k + 1, :]
    return jnp.dot(w_folded, tap_ref[...], preferred_element_type=jnp.float32)


def _group_norm(x, gamma, beta, gmat, groups, eps, swish):
    """PyTorch-style GroupNorm on a float32 (C, HW) tile (one sample)."""
    c, hw = x.shape
    inv_denom = 1.0 / float((c // groups) * hw)
    ch_sum = jnp.sum(x, axis=-1, keepdims=True)                        # (C, 1)
    mean = jnp.dot(gmat, ch_sum, preferred_element_type=jnp.float32) * inv_denom
    d = x - mean
    ch_ss = jnp.sum(d * d, axis=-1, keepdims=True)
    var = jnp.dot(gmat, ch_ss, preferred_element_type=jnp.float32) * inv_denom
    y = d * jax.lax.rsqrt(var + eps) * gamma + beta
    return _swish(y) if swish else y


def _attention(x, eye, wq, bq, wk, bk, wv, bv, wf, bf, gn_g, gn_b, gmat,
               heads, groups, eps):
    """SelfAttentionBlock on a (C, HW) tile: QKV, per-head softmax attention,
    output projection, residual with the block input, GroupNorm."""
    c, hw = x.shape
    dk = c // heads
    scale = dk ** (-0.5)
    q = jnp.dot(wq, x, preferred_element_type=jnp.float32) + bq        # (C, HW)
    k = jnp.dot(wk, x, preferred_element_type=jnp.float32) + bk
    v = jnp.dot(wv, x, preferred_element_type=jnp.float32) + bv
    # One transpose of Q (C,HW)->(HW,C) via the hoisted identity (NT matmul) so
    # every remaining dot is a plain NN / NT form.
    qr = jax.lax.dot_general(eye, q, (((1,), (1,)), ((), ())),
                             preferred_element_type=jnp.float32)       # (HW, C)
    proj = None
    for h in range(heads):
        lo = h * dk
        s = jnp.dot(qr[:, lo:lo + dk], k[lo:lo + dk, :],
                    preferred_element_type=jnp.float32) * scale        # (HW, HW)
        # TODO(synk): for large H*W switch to online-softmax tiling over keys so
        # the (HW, HW) scores never exceed VMEM (v7x has only 64 MiB).
        s = s - jnp.max(s, axis=-1, keepdims=True)
        p = jnp.exp(s)
        p = p * (1.0 / jnp.sum(p, axis=-1, keepdims=True))
        oh = jax.lax.dot_general(v[lo:lo + dk, :], p, (((1,), (1,)), ((), ())),
                                 preferred_element_type=jnp.float32)   # (dk, HW)
        contrib = jnp.dot(wf[:, lo:lo + dk], oh,
                          preferred_element_type=jnp.float32)          # (C, HW)
        proj = contrib if proj is None else proj + contrib
    pre = proj + bf + x
    return _group_norm(pre, gn_g, gn_b, gmat, groups, eps, swish=False)


# --------------------------------- fused kernel ------------------------------

def _build_kernel(*, num_layers, layer_has_res, has_attn, heads, groups,
                  H, W, downsample, cin_pad, eps=_EPS):

    def kernel(*args):
        tap_ref = args[-1]                  # (9*cin_pad, HW) f32 VMEM scratch
        o_ref = args[-2]
        refs = args[:-2]
        cursor = [0]

        def nxt():
            r = refs[cursor[0]]
            cursor[0] += 1
            return r

        x_ref, t_ref, masks_ref, gmat_ref = nxt(), nxt(), nxt(), nxt()
        eye_ref = nxt() if has_attn else None
        sel_ref = nxt() if downsample else None

        # Zero once per grid step so the padded rows of the (Cin < cin_pad)
        # first conv contribute exactly zero (their weight columns are zero).
        tap_ref[...] = jnp.zeros_like(tap_ref)

        masks = masks_ref[...]
        gmat = gmat_ref[...]
        eye = eye_ref[...] if has_attn else None
        x = x_ref[0].astype(jnp.float32)                    # (Cin, HW)
        t_sw = _swish(t_ref[0].astype(jnp.float32))         # (Temb, 1)

        for li in range(num_layers):
            c1w, c1b, g1g, g1b = nxt(), nxt(), nxt(), nxt()
            tw, tb = nxt(), nxt()
            c2w, c2b, g2g, g2b = nxt(), nxt(), nxt(), nxt()
            rw = rb = None
            if layer_has_res[li]:
                rw, rb = nxt(), nxt()
            if has_attn:
                wq, bq = nxt(), nxt()
                wk, bk = nxt(), nxt()
                wv, bv = nxt(), nxt()
                wf, bf = nxt(), nxt()
                agg, agb = nxt(), nxt()

            x_in = x
            # --- ResNetBlock.block1: conv3x3 -> GroupNorm -> Swish
            acc = _conv3x3_folded(x, c1w[...], masks, tap_ref, W, cin_pad)
            acc = acc + c1b[...]
            h = _group_norm(acc, g1g[...], g1b[...], gmat, groups, eps, swish=True)
            # --- time-embedding projection: Linear(Swish(t)), broadcast over HW
            te = jnp.dot(tw[...], t_sw, preferred_element_type=jnp.float32) + tb[...]
            h = h + te
            # --- ResNetBlock.block2: conv3x3 -> GroupNorm -> Swish
            acc2 = _conv3x3_folded(h, c2w[...], masks, tap_ref, W, cin_pad)
            acc2 = acc2 + c2b[...]
            h2 = _group_norm(acc2, g2g[...], g2b[...], gmat, groups, eps, swish=True)
            # TODO(synk): nn.Dropout(0.1) is identity in eval mode; train-mode
            # stochastic dropout is not implemented here.
            if layer_has_res[li]:
                res = jnp.dot(rw[...], x_in, preferred_element_type=jnp.float32)
                res = res + rb[...]
            else:
                res = x_in
            x = h2 + res
            # --- SelfAttentionBlock (post-norm: residual added before GroupNorm)
            if has_attn:
                x = _attention(x, eye, wq[...], bq[...], wk[...], bk[...],
                               wv[...], bv[...], wf[...], bf[...], agg[...],
                               agb[...], gmat, heads, groups, eps)

        if downsample:
            dw, db = nxt(), nxt()
            acc = _conv3x3_folded(x, dw[...], masks, tap_ref, W, cin_pad)
            # stride-2 pick via the hoisted selection matrix -> lane-dense store
            out = jnp.dot(acc, sel_ref[...], preferred_element_type=jnp.float32)
            out = out + db[...]
            o_ref[0] = out.astype(o_ref.dtype)
        else:
            o_ref[0] = x.astype(o_ref.dtype)

    return kernel


# ------------------------- hoisted constants / folding -----------------------

def _make_tap_masks(H, W):
    i = jnp.arange(H * W, dtype=jnp.int32)
    row, col = i // W, i % W
    rows = []
    for k in range(9):
        oy, ox = k // 3 - 1, k % 3 - 1
        valid = ((row + oy >= 0) & (row + oy < H) &
                 (col + ox >= 0) & (col + ox < W))
        rows.append(valid)
    return jnp.stack(rows).astype(jnp.float32)               # (9, H*W)


def _make_group_mat(C, groups):
    g = jnp.arange(C, dtype=jnp.int32) // (C // groups)
    return (g[:, None] == g[None, :]).astype(jnp.float32)    # (C, C)


def _make_downsample_sel(H, W, Ho, Wo, out_lanes):
    src = jnp.arange(H * W, dtype=jnp.int32)
    o = jnp.arange(out_lanes, dtype=jnp.int32)
    tgt = 2 * (o // Wo) * W + 2 * (o % Wo)
    sel = (src[:, None] == tgt[None, :]) & (o[None, :] < Ho * Wo)
    return sel.astype(jnp.float32)                           # (H*W, out_lanes)


def _fold_conv3x3(w, cin_pad):
    """(Cout, Cin, 3, 3) -> (Cout, 9*cin_pad); column index = tap*cin_pad + cin."""
    cout, cin, kh, kw = w.shape
    w9 = jnp.transpose(w, (2, 3, 1, 0)).reshape(kh * kw, cin, cout)
    wp = jnp.zeros((kh * kw, cin_pad, cout), w.dtype).at[:, :cin, :].set(w9)
    return wp.reshape(kh * kw * cin_pad, cout).T


def _col(v):
    return v.reshape(-1, 1)


def _round_up(x, m):
    return (x + m - 1) // m * m


def _const_index_map(nd):
    zeros = (0,) * nd
    return lambda n: zeros


def _image_index_map(nd):
    zeros = (0,) * (nd - 1)
    return lambda n: (n,) + zeros


# ------------------------------ module forward --------------------------------

def conv_down_block_fwd(x_nchw, time_embedding, params, *, num_layers, num_groups,
                        num_att_heads, downsample=True):
    N, C_in, H, W = x_nchw.shape
    HW = H * W
    C_out = params['resnet'][0]['conv1_w'].shape[0]
    has_attn = num_att_heads is not None
    cin_pad = _round_up(max(C_in, C_out), 8)

    x3 = x_nchw.reshape(N, C_in, HW)            # channels-major, lane dim = H*W
    t3 = time_embedding[:, :, None]             # (N, Temb, 1)

    args, in_specs = [], []

    def add_const(a):
        args.append(a)
        in_specs.append(pl.BlockSpec(a.shape, _const_index_map(a.ndim)))

    def add_per_image(a):
        args.append(a)
        in_specs.append(pl.BlockSpec((1,) + a.shape[1:], _image_index_map(a.ndim)))

    add_per_image(x3)
    add_per_image(t3)
    add_const(_make_tap_masks(H, W))
    add_const(_make_group_mat(C_out, num_groups))
    if has_attn:
        add_const(jnp.eye(HW, dtype=jnp.float32))
    Ho = Wo = out_lanes = None
    if downsample:
        Ho, Wo = (H - 1) // 2 + 1, (W - 1) // 2 + 1
        out_lanes = _round_up(Ho * Wo, 128)
        add_const(_make_downsample_sel(H, W, Ho, Wo, out_lanes))

    layer_has_res = []
    for i in range(num_layers):
        blk = params['resnet'][i]
        add_const(_fold_conv3x3(blk['conv1_w'], cin_pad))
        add_const(_col(blk['conv1_b']))
        add_const(_col(blk['gn1_g']))
        add_const(_col(blk['gn1_b']))
        add_const(blk['time_w'])
        add_const(_col(blk['time_b']))
        add_const(_fold_conv3x3(blk['conv2_w'], cin_pad))
        add_const(_col(blk['conv2_b']))
        add_const(_col(blk['gn2_g']))
        add_const(_col(blk['gn2_b']))
        has_res = 'res_w' in blk
        layer_has_res.append(has_res)
        if has_res:
            add_const(blk['res_w'])
            add_const(_col(blk['res_b']))
        if has_attn:
            ap = params['attn'][i]
            add_const(ap['wq'])
            add_const(_col(ap['bq']))
            add_const(ap['wk'])
            add_const(_col(ap['bk']))
            add_const(ap['wv'])
            add_const(_col(ap['bv']))
            add_const(ap['wf'])
            add_const(_col(ap['bf']))
            add_const(_col(ap['gn_g']))
            add_const(_col(ap['gn_b']))
    if downsample:
        add_const(_fold_conv3x3(params['down_w'], cin_pad))
        add_const(_col(params['down_b']))

    kernel = _build_kernel(num_layers=num_layers, layer_has_res=tuple(layer_has_res),
                           has_attn=has_attn, heads=num_att_heads, groups=num_groups,
                           H=H, W=W, downsample=downsample, cin_pad=cin_pad)

    out_last = out_lanes if downsample else HW
    out = pl.pallas_call(
        kernel,
        out_shape=jax.ShapeDtypeStruct((N, C_out, out_last), x_nchw.dtype),
        grid=(N,),
        in_specs=in_specs,
        out_specs=pl.BlockSpec((1, C_out, out_last), lambda n: (n, 0, 0)),
        scratch_shapes=[pltpu.VMEM((9 * cin_pad, HW), jnp.float32)],
        compiler_params=pltpu.CompilerParams(
            dimension_semantics=("parallel",),
            vmem_limit_bytes=32 * 1024 * 1024),
    )(*args)

    if downsample:
        return out[:, :, :Ho * Wo].reshape(N, C_out, Ho, Wo)
    return out.reshape(N, C_out, H, W)


# ------------------------------ parameter init --------------------------------

def init_params(key, in_channels, out_channels, num_layers, time_emb_channels,
                num_att_heads):
    scale = 0.1

    def nrm(k, shape):
        return scale * jax.random.normal(k, shape, jnp.float32)

    params = {'resnet': [], 'attn': []}
    for i in range(num_layers):
        cin = in_channels if i == 0 else out_channels
        keys = jax.random.split(jax.random.fold_in(key, i), 8)
        blk = {
            'conv1_w': nrm(keys[0], (out_channels, cin, 3, 3)),
            'conv1_b': nrm(keys[1], (out_channels,)),
            'gn1_g': jnp.ones((out_channels,), jnp.float32),
            'gn1_b': jnp.zeros((out_channels,), jnp.float32),
            'time_w': nrm(keys[2], (out_channels, time_emb_channels)),
            'time_b': nrm(keys[3], (out_channels,)),
            'conv2_w': nrm(keys[4], (out_channels, out_channels, 3, 3)),
            'conv2_b': nrm(keys[5], (out_channels,)),
            'gn2_g': jnp.ones((out_channels,), jnp.float32),
            'gn2_b': jnp.zeros((out_channels,), jnp.float32),
        }
        if cin != out_channels:                  # 1x1 residual conv
            blk['res_w'] = nrm(keys[6], (out_channels, cin))
            blk['res_b'] = nrm(keys[7], (out_channels,))
        params['resnet'].append(blk)

        if num_att_heads is not None:
            ak = jax.random.split(jax.random.fold_in(key, 100 + i), 8)
            params['attn'].append({
                'wq': nrm(ak[0], (out_channels, out_channels)),
                'bq': nrm(ak[1], (out_channels,)),
                'wk': nrm(ak[2], (out_channels, out_channels)),
                'bk': nrm(ak[3], (out_channels,)),
                'wv': nrm(ak[4], (out_channels, out_channels)),
                'bv': nrm(ak[5], (out_channels,)),
                'wf': nrm(ak[6], (out_channels, out_channels)),
                'bf': nrm(ak[7], (out_channels,)),
                'gn_g': jnp.ones((out_channels,), jnp.float32),
                'gn_b': jnp.zeros((out_channels,), jnp.float32),
            })

    dkeys = jax.random.split(jax.random.fold_in(key, 999), 2)
    params['down_w'] = nrm(dkeys[0], (out_channels, out_channels, 3, 3))
    params['down_b'] = nrm(dkeys[1], (out_channels,))
    return params


# --------------------------- pure-JAX reference (check) ------------------------

def _ref_swish(x):
    return x * jax.nn.sigmoid(x)


def _ref_conv3x3(x, w, b, stride=1):
    y = jax.lax.conv_general_dilated(
        x, w, window_strides=(stride, stride), padding=((1, 1), (1, 1)),
        dimension_numbers=('NCHW', 'OIHW', 'NCHW'),
        precision=jax.lax.Precision.HIGHEST)
    return y + b[None, :, None, None]


def _ref_group_norm(x, gamma, beta, groups, eps=_EPS):
    N, C, H, W = x.shape
    xg = x.reshape(N, groups, C // groups, H, W)
    mean = jnp.mean(xg, axis=(2, 3, 4), keepdims=True)
    var = jnp.mean((xg - mean) ** 2, axis=(2, 3, 4), keepdims=True)
    y = ((xg - mean) / jnp.sqrt(var + eps)).reshape(N, C, H, W)
    return y * gamma[None, :, None, None] + beta[None, :, None, None]


def reference_forward(x, t, params, *, num_layers, num_groups, num_att_heads,
                      downsample=True):
    has_attn = num_att_heads is not None
    for i in range(num_layers):
        blk = params['resnet'][i]
        inp = x
        h = _ref_swish(_ref_group_norm(
            _ref_conv3x3(x, blk['conv1_w'], blk['conv1_b']),
            blk['gn1_g'], blk['gn1_b'], num_groups))
        te = _ref_swish(t) @ blk['time_w'].T + blk['time_b']
        h = h + te[:, :, None, None]
        h = _ref_swish(_ref_group_norm(
            _ref_conv3x3(h, blk['conv2_w'], blk['conv2_b']),
            blk['gn2_g'], blk['gn2_b'], num_groups))
        if 'res_w' in blk:
            res = jnp.einsum('oc,nchw->nohw', blk['res_w'], inp,
                             precision=jax.lax.Precision.HIGHEST)
            res = res + blk['res_b'][None, :, None, None]
        else:
            res = inp
        x = h + res
        if has_attn:
            ap = params['attn'][i]
            N, C, H, W = x.shape
            hw = H * W
            dk = C // num_att_heads
            xr = x.reshape(N, C, hw).transpose(0, 2, 1)         # (N, HW, C)
            q = xr @ ap['wq'].T + ap['bq']
            k = xr @ ap['wk'].T + ap['bk']
            v = xr @ ap['wv'].T + ap['bv']

            def split(z):
                return z.reshape(N, hw, num_att_heads, dk).transpose(0, 2, 1, 3)

            qh, kh, vh = split(q), split(k), split(v)
            s = jnp.einsum('nhqd,nhkd->nhqk', qh, kh,
                           precision=jax.lax.Precision.HIGHEST) * dk ** (-0.5)
            p = jax.nn.softmax(s, axis=-1)
            o = jnp.einsum('nhqk,nhkd->nhqd', p, vh,
                           precision=jax.lax.Precision.HIGHEST)
            o = o.transpose(0, 2, 1, 3).reshape(N, hw, C)
            o = o @ ap['wf'].T + ap['bf']
            o = o.transpose(0, 2, 1).reshape(N, C, H, W)
            x = _ref_group_norm(o + x, ap['gn_g'], ap['gn_b'], num_groups)
    if downsample:
        x = _ref_conv3x3(x, params['down_w'], params['down_b'], stride=2)
    return x


# ----------------------------------- main --------------------------------------

if __name__ == "__main__":
    key = jax.random.PRNGKey(0)
    kx, kt, kp = jax.random.split(key, 3)

    B, Cin, H, W = 2, 4, 16, 16
    Cout = 8
    num_layers = 2
    time_emb_channels = 16
    num_groups = 4
    num_att_heads = 2

    x_nchw = jax.random.normal(kx, (B, Cin, H, W), jnp.float32)
    time_embedding = jax.random.normal(kt, (B, time_emb_channels), jnp.float32)
    params = init_params(kp, Cin, Cout, num_layers, time_emb_channels,
                         num_att_heads)

    fwd = jax.jit(functools.partial(
        conv_down_block_fwd, num_layers=num_layers, num_groups=num_groups,
        num_att_heads=num_att_heads, downsample=True))
    out = fwd(x_nchw, time_embedding, params)
    jax.block_until_ready(out)

    assert out.shape == (B, Cout, H // 2, W // 2), out.shape
    assert bool(jnp.all(jnp.isfinite(out)))

    # Correctness against a pure-JAX reference of the PyTorch module.  Numeric
    # noise between the two f32 paths is ~1e-5; real layout/indexing bugs would
    # produce O(1) errors, so 3e-2 separates them cleanly.
    with jax.default_matmul_precision("highest"):
        ref = reference_forward(x_nchw, time_embedding, params,
                                num_layers=num_layers, num_groups=num_groups,
                                num_att_heads=num_att_heads, downsample=True)
    err = float(jnp.max(jnp.abs(out - ref)))
    assert err < 3e-2, f"max abs error vs pure-JAX reference: {err}"

    print("KERNEL_OK")
</pallas_src>

<mosaic_0001>
module attributes {stable_mosaic.version = 11 : i64} {
  func.func @kernel(%arg0: i32, %arg1: memref<1x4x256xf32, #tpu.memory_space<vmem>>, %arg2: memref<1x16x1xf32, #tpu.memory_space<vmem>>, %arg3: memref<9x256xf32, #tpu.memory_space<vmem>>, %arg4: memref<8x8xf32, #tpu.memory_space<vmem>>, %arg5: memref<256x256xf32, #tpu.memory_space<vmem>>, %arg6: memref<256x128xf32, #tpu.memory_space<vmem>>, %arg7: memref<8x72xf32, #tpu.memory_space<vmem>>, %arg8: memref<8x1xf32, #tpu.memory_space<vmem>>, %arg9: memref<8x1xf32, #tpu.memory_space<vmem>>, %arg10: memref<8x1xf32, #tpu.memory_space<vmem>>, %arg11: memref<8x16xf32, #tpu.memory_space<vmem>>, %arg12: memref<8x1xf32, #tpu.memory_space<vmem>>, %arg13: memref<8x72xf32, #tpu.memory_space<vmem>>, %arg14: memref<8x1xf32, #tpu.memory_space<vmem>>, %arg15: memref<8x1xf32, #tpu.memory_space<vmem>>, %arg16: memref<8x1xf32, #tpu.memory_space<vmem>>, %arg17: memref<8x4xf32, #tpu.memory_space<vmem>>, %arg18: memref<8x1xf32, #tpu.memory_space<vmem>>, %arg19: memref<8x8xf32, #tpu.memory_space<vmem>>, %arg20: memref<8x1xf32, #tpu.memory_space<vmem>>, %arg21: memref<8x8xf32, #tpu.memory_space<vmem>>, %arg22: memref<8x1xf32, #tpu.memory_space<vmem>>, %arg23: memref<8x8xf32, #tpu.memory_space<vmem>>, %arg24: memref<8x1xf32, #tpu.memory_space<vmem>>, %arg25: memref<8x8xf32, #tpu.memory_space<vmem>>, %arg26: memref<8x1xf32, #tpu.memory_space<vmem>>, %arg27: memref<8x1xf32, #tpu.memory_space<vmem>>, %arg28: memref<8x1xf32, #tpu.memory_space<vmem>>, %arg29: memref<8x72xf32, #tpu.memory_space<vmem>>, %arg30: memref<8x1xf32, #tpu.memory_space<vmem>>, %arg31: memref<8x1xf32, #tpu.memory_space<vmem>>, %arg32: memref<8x1xf32, #tpu.memory_space<vmem>>, %arg33: memref<8x16xf32, #tpu.memory_space<vmem>>, %arg34: memref<8x1xf32, #tpu.memory_space<vmem>>, %arg35: memref<8x72xf32, #tpu.memory_space<vmem>>, %arg36: memref<8x1xf32, #tpu.memory_space<vmem>>, %arg37: memref<8x1xf32, #tpu.memory_space<vmem>>, %arg38: memref<8x1xf32, #tpu.memory_space<vmem>>, %arg39: memref<8x8xf32, #tpu.memory_space<vmem>>, %arg40: memref<8x1xf32, #tpu.memory_space<vmem>>, %arg41: memref<8x8xf32, #tpu.memory_space<vmem>>, %arg42: memref<8x1xf32, #tpu.memory_space<vmem>>, %arg43: memref<8x8xf32, #tpu.memory_space<vmem>>, %arg44: memref<8x1xf32, #tpu.memory_space<vmem>>, %arg45: memref<8x8xf32, #tpu.memory_space<vmem>>, %arg46: memref<8x1xf32, #tpu.memory_space<vmem>>, %arg47: memref<8x1xf32, #tpu.memory_space<vmem>>, %arg48: memref<8x1xf32, #tpu.memory_space<vmem>>, %arg49: memref<8x72xf32, #tpu.memory_space<vmem>>, %arg50: memref<8x1xf32, #tpu.memory_space<vmem>>, %arg51: memref<1x8x128xf32, #tpu.memory_space<vmem>>, %arg52: memref<72x256xf32, #tpu.memory_space<vmem>>) attributes {dimension_semantics = [#tpu.dimension_semantics<parallel>], iteration_bounds = array<i64: 2>, scalar_prefetch = 0 : i64, scratch_operands = 1 : i64, tpu.core_type = #tpu.core_type<tc>, window_params = [{transform_indices = @transform_0, window_bounds = array<i64: 1, 4, 256>}, {transform_indices = @transform_1, window_bounds = array<i64: 1, 16, 1>}, {pipeline_mode = #tpu.pipeline_mode<synchronous>, transform_indices = @transform_2, window_bounds = array<i64: 9, 256>}, {pipeline_mode = #tpu.pipeline_mode<synchronous>, transform_indices = @transform_3, window_bounds = array<i64: 8, 8>}, {pipeline_mode = #tpu.pipeline_mode<synchronous>, transform_indices = @transform_4, window_bounds = array<i64: 256, 256>}, {pipeline_mode = #tpu.pipeline_mode<synchronous>, transform_indices = @transform_5, window_bounds = array<i64: 256, 128>}, {pipeline_mode = #tpu.pipeline_mode<synchronous>, transform_indices = @transform_6, window_bounds = array<i64: 8, 72>}, {pipeline_mode = #tpu.pipeline_mode<synchronous>, transform_indices = @transform_7, window_bounds = array<i64: 8, 1>}, {pipeline_mode = #tpu.pipeline_mode<synchronous>, transform_indices = @transform_8, window_bounds = array<i64: 8, 1>}, {pipeline_mode = #tpu.pipeline_mode<synchronous>, transform_indices = @transform_9, window_bounds = array<i64: 8, 1>}, {pipeline_mode = #tpu.pipeline_mode<synchronous>, transform_indices = @transform_10, window_bounds = array<i64: 8, 16>}, {pipeline_mode = #tpu.pipeline_mode<synchronous>, transform_indices = @transform_11, window_bounds = array<i64: 8, 1>}, {pipeline_mode = #tpu.pipeline_mode<synchronous>, transform_indices = @transform_12, window_bounds = array<i64: 8, 72>}, {pipeline_mode = #tpu.pipeline_mode<synchronous>, transform_indices = @transform_13, window_bounds = array<i64: 8, 1>}, {pipeline_mode = #tpu.pipeline_mode<synchronous>, transform_indices = @transform_14, window_bounds = array<i64: 8, 1>}, {pipeline_mode = #tpu.pipeline_mode<synchronous>, transform_indices = @transform_15, window_bounds = array<i64: 8, 1>}, {pipeline_mode = #tpu.pipeline_mode<synchronous>, transform_indices = @transform_16, window_bounds = array<i64: 8, 4>}, {pipeline_mode = #tpu.pipeline_mode<synchronous>, transform_indices = @transform_17, window_bounds = array<i64: 8, 1>}, {pipeline_mode = #tpu.pipeline_mode<synchronous>, transform_indices = @transform_18, window_bounds = array<i64: 8, 8>}, {pipeline_mode = #tpu.pipeline_mode<synchronous>, transform_indices = @transform_19, window_bounds = array<i64: 8, 1>}, {pipeline_mode = #tpu.pipeline_mode<synchronous>, transform_indices = @transform_20, window_bounds = array<i64: 8, 8>}, {pipeline_mode = #tpu.pipeline_mode<synchronous>, transform_indices = @transform_21, window_bounds = array<i64: 8, 1>}, {pipeline_mode = #tpu.pipeline_mode<synchronous>, transform_indices = @transform_22, window_bounds = array<i64: 8, 8>}, {pipeline_mode = #tpu.pipeline_mode<synchronous>, transform_indices = @transform_23, window_bounds = array<i64: 8, 1>}, {pipeline_mode = #tpu.pipeline_mode<synchronous>, transform_indices = @transform_24, window_bounds = array<i64: 8, 8>}, {pipeline_mode = #tpu.pipeline_mode<synchronous>, transform_indices = @transform_25, window_bounds = array<i64: 8, 1>}, {pipeline_mode = #tpu.pipeline_mode<synchronous>, transform_indices = @transform_26, window_bounds = array<i64: 8, 1>}, {pipeline_mode = #tpu.pipeline_mode<synchronous>, transform_indices = @transform_27, window_bounds = array<i64: 8, 1>}, {pipeline_mode = #tpu.pipeline_mode<synchronous>, transform_indices = @transform_28, window_bounds = array<i64: 8, 72>}, {pipeline_mode = #tpu.pipeline_mode<synchronous>, transform_indices = @transform_29, window_bounds = array<i64: 8, 1>}, {pipeline_mode = #tpu.pipeline_mode<synchronous>, transform_indices = @transform_30, window_bounds = array<i64: 8, 1>}, {pipeline_mode = #tpu.pipeline_mode<synchronous>, transform_indices = @transform_31, window_bounds = array<i64: 8, 1>}, {pipeline_mode = #tpu.pipeline_mode<synchronous>, transform_indices = @transform_32, window_bounds = array<i64: 8, 16>}, {pipeline_mode = #tpu.pipeline_mode<synchronous>, transform_indices = @transform_33, window_bounds = array<i64: 8, 1>}, {pipeline_mode = #tpu.pipeline_mode<synchronous>, transform_indices = @transform_34, window_bounds = array<i64: 8, 72>}, {pipeline_mode = #tpu.pipeline_mode<synchronous>, transform_indices = @transform_35, window_bounds = array<i64: 8, 1>}, {pipeline_mode = #tpu.pipeline_mode<synchronous>, transform_indices = @transform_36, window_bounds = array<i64: 8, 1>}, {pipeline_mode = #tpu.pipeline_mode<synchronous>, transform_indices = @transform_37, window_bounds = array<i64: 8, 1>}, {pipeline_mode = #tpu.pipeline_mode<synchronous>, transform_indices = @transform_38, window_bounds = array<i64: 8, 8>}, {pipeline_mode = #tpu.pipeline_mode<synchronous>, transform_indices = @transform_39, window_bounds = array<i64: 8, 1>}, {pipeline_mode = #tpu.pipeline_mode<synchronous>, transform_indices = @transform_40, window_bounds = array<i64: 8, 8>}, {pipeline_mode = #tpu.pipeline_mode<synchronous>, transform_indices = @transform_41, window_bounds = array<i64: 8, 1>}, {pipeline_mode = #tpu.pipeline_mode<synchronous>, transform_indices = @transform_42, window_bounds = array<i64: 8, 8>}, {pipeline_mode = #tpu.pipeline_mode<synchronous>, transform_indices = @transform_43, window_bounds = array<i64: 8, 1>}, {pipeline_mode = #tpu.pipeline_mode<synchronous>, transform_indices = @transform_44, window_bounds = array<i64: 8, 8>}, {pipeline_mode = #tpu.pipeline_mode<synchronous>, transform_indices = @transform_45, window_bounds = array<i64: 8, 1>}, {pipeline_mode = #tpu.pipeline_mode<synchronous>, transform_indices = @transform_46, window_bounds = array<i64: 8, 1>}, {pipeline_mode = #tpu.pipeline_mode<synchronous>, transform_indices = @transform_47, window_bounds = array<i64: 8, 1>}, {pipeline_mode = #tpu.pipeline_mode<synchronous>, transform_indices = @transform_48, window_bounds = array<i64: 8, 72>}, {pipeline_mode = #tpu.pipeline_mode<synchronous>, transform_indices = @transform_49, window_bounds = array<i64: 8, 1>}, {transform_indices = @transform_50, window_bounds = array<i64: 1, 8, 128>}]} {
    %cst = arith.constant 0.000000e+00 : f32
    %0 = vector.broadcast %cst : f32 to vector<72x256xf32>
    %c0 = arith.constant 0 : index
    %c0_0 = arith.constant 0 : index
    %1 = vector.load %arg52[%c0, %c0_0] : memref<72x256xf32, #tpu.memory_space<vmem>>, vector<72x256xf32>
    tpu.vector_store %arg52[%c0, %c0_0], %0 {strides = array<i32>} : memref<72x256xf32, #tpu.memory_space<vmem>>, vector<72x256xf32>,
    %c0_1 = arith.constant 0 : index
    %c0_2 = arith.constant 0 : index
    %2 = vector.load %arg3[%c0_1, %c0_2] : memref<9x256xf32, #tpu.memory_space<vmem>>, vector<9x256xf32>
    %c0_3 = arith.constant 0 : index
    %c0_4 = arith.constant 0 : index
    %3 = vector.load %arg4[%c0_3, %c0_4] : memref<8x8xf32, #tpu.memory_space<vmem>>, vector<8x8xf32>
    %c0_5 = arith.constant 0 : index
    %c0_6 = arith.constant 0 : index
    %4 = vector.load %arg5[%c0_5, %c0_6] : memref<256x256xf32, #tpu.memory_space<vmem>>, vector<256x256xf32>
    %c0_7 = arith.constant 0 : index
    %c0_8 = arith.constant 0 : index
    %c0_9 = arith.constant 0 : index
    %5 = vector.load %arg1[%c0_7, %c0_8, %c0_9] : memref<1x4x256xf32, #tpu.memory_space<vmem>>, vector<1x4x256xf32>
    %6 = vector.shape_cast %5 : vector<1x4x256xf32> to vector<4x256xf32>
    %c0_10 = arith.constant 0 : index
    %c0_11 = arith.constant 0 : index
    %c0_12 = arith.constant 0 : index
    %7 = vector.load %arg2[%c0_10, %c0_11, %c0_12] : memref<1x16x1xf32, #tpu.memory_space<vmem>>, vector<1x16x1xf32>
    %8 = vector.shape_cast %7 : vector<1x16x1xf32> to vector<16x1xf32>
    %9 = arith.negf %8 : vector<16x1xf32>
    %10 = math.exp %9 : vector<16x1xf32>
    %cst_13 = arith.constant 1.000000e+00 : f32
    %11 = vector.broadcast %cst_13 : f32 to vector<16x1xf32>
    %12 = arith.addf %11, %10 : vector<16x1xf32>
    %13 = arith.divf %11, %12 : vector<16x1xf32>
    %14 = arith.mulf %8, %13 : vector<16x1xf32>
    %c0_14 = arith.constant 0 : index
    %c0_15 = arith.constant 0 : index
    %15 = vector.load %arg7[%c0_14, %c0_15] : memref<8x72xf32, #tpu.memory_space<vmem>>, vector<8x72xf32>
    %c17_i32 = arith.constant 17 : i32
    %16 = tpu.dynamic_rotate %6 by %c17_i32 dim 1 : vector<4x256xf32>, i32 -> vector<4x256xf32>
    %17 = vector.extract_strided_slice %2 {offsets = [0, 0], sizes = [1, 256], strides = [1, 1]} : vector<9x256xf32> to vector<1x256xf32>
    %18 = vector.broadcast %17 : vector<1x256xf32> to vector<4x256xf32>
    %19 = arith.mulf %16, %18 : vector<4x256xf32>
    %c0_16 = arith.constant 0 : index
    %c0_17 = arith.constant 0 : index
    %20 = vector.load %arg52[%c0_16, %c0_17] : memref<72x256xf32, #tpu.memory_space<vmem>>, vector<4x256xf32>
    tpu.vector_store %arg52[%c0_16, %c0_17], %19 {strides = array<i32>} : memref<72x256xf32, #tpu.memory_space<vmem>>, vector<4x256xf32>,
    %c16_i32 = arith.constant 16 : i32
    %21 = tpu.dynamic_rotate %6 by %c16_i32 dim 1 : vector<4x256xf32>, i32 -> vector<4x256xf32>
    %22 = vector.extract_strided_slice %2 {offsets = [1, 0], sizes = [1, 256], strides = [1, 1]} : vector<9x256xf32> to vector<1x256xf32>
    %23 = vector.broadcast %22 : vector<1x256xf32> to vector<4x256xf32>
    %24 = arith.mulf %21, %23 : vector<4x256xf32>
    %c8 = arith.constant 8 : index
    %c0_18 = arith.constant 0 : index
    %25 = vector.load %arg52[%c8, %c0_18] : memref<72x256xf32, #tpu.memory_space<vmem>>, vector<4x256xf32>
    tpu.vector_store %arg52[%c8, %c0_18], %24 {strides = array<i32>} : memref<72x256xf32, #tpu.memory_space<vmem>>, vector<4x256xf32>,
    %c15_i32 = arith.constant 15 : i32
    %26 = tpu.dynamic_rotate %6 by %c15_i32 dim 1 : vector<4x256xf32>, i32 -> vector<4x256xf32>
    %27 = vector.extract_strided_slice %2 {offsets = [2, 0], sizes = [1, 256], strides = [1, 1]} : vector<9x256xf32> to vector<1x256xf32>
    %28 = vector.broadcast %27 : vector<1x256xf32> to vector<4x256xf32>
    %29 = arith.mulf %26, %28 : vector<4x256xf32>
    %c16 = arith.constant 16 : index
    %c0_19 = arith.constant 0 : index
    %30 = vector.load %arg52[%c16, %c0_19] : memref<72x256xf32, #tpu.memory_space<vmem>>, vector<4x256xf32>
    tpu.vector_store %arg52[%c16, %c0_19], %29 {strides = array<i32>} : memref<72x256xf32, #tpu.memory_space<vmem>>, vector<4x256xf32>,
    %c1_i32 = arith.constant 1 : i32
    %31 = tpu.dynamic_rotate %6 by %c1_i32 dim 1 : vector<4x256xf32>, i32 -> vector<4x256xf32>
    %32 = vector.extract_strided_slice %2 {offsets = [3, 0], sizes = [1, 256], strides = [1, 1]} : vector<9x256xf32> to vector<1x256xf32>
    %33 = vector.broadcast %32 : vector<1x256xf32> to vector<4x256xf32>
    %34 = arith.mulf %31, %33 : vector<4x256xf32>
    %c24 = arith.constant 24 : index
    %c0_20 = arith.constant 0 : index
    %35 = vector.load %arg52[%c24, %c0_20] : memref<72x256xf32, #tpu.memory_space<vmem>>, vector<4x256xf32>
    tpu.vector_store %arg52[%c24, %c0_20], %34 {strides = array<i32>} : memref<72x256xf32, #tpu.memory_space<vmem>>, vector<4x256xf32>,
    %36 = vector.extract_strided_slice %2 {offsets = [4, 0], sizes = [1, 256], strides = [1, 1]} : vector<9x256xf32> to vector<1x256xf32>
    %37 = vector.broadcast %36 : vector<1x256xf32> to vector<4x256xf32>
    %38 = arith.mulf %6, %37 : vector<4x256xf32>
    %c32 = arith.constant 32 : index
    %c0_21 = arith.constant 0 : index
    %39 = vector.load %arg52[%c32, %c0_21] : memref<72x256xf32, #tpu.memory_space<vmem>>, vector<4x256xf32>
    tpu.vector_store %arg52[%c32, %c0_21], %38 {strides = array<i32>} : memref<72x256xf32, #tpu.memory_space<vmem>>, vector<4x256xf32>,
    %c255_i32 = arith.constant 255 : i32
    %40 = tpu.dynamic_rotate %6 by %c255_i32 dim 1 : vector<4x256xf32>, i32 -> vector<4x256xf32>
    %41 = vector.extract_strided_slice %2 {offsets = [5, 0], sizes = [1, 256], strides = [1, 1]} : vector<9x256xf32> to vector<1x256xf32>
    %42 = vector.broadcast %41 : vector<1x256xf32> to vector<4x256xf32>
    %43 = arith.mulf %40, %42 : vector<4x256xf32>
    %c40 = arith.constant 40 : index
    %c0_22 = arith.constant 0 : index
    %44 = vector.load %arg52[%c40, %c0_22] : memref<72x256xf32, #tpu.memory_space<vmem>>, vector<4x256xf32>
    tpu.vector_store %arg52[%c40, %c0_22], %43 {strides = array<i32>} : memref<72x256xf32, #tpu.memory_space<vmem>>, vector<4x256xf32>,
    %c241_i32 = arith.constant 241 : i32
    %45 = tpu.dynamic_rotate %6 by %c241_i32 dim 1 : vector<4x256xf32>, i32 -> vector<4x256xf32>
    %46 = vector.extract_strided_slice %2 {offsets = [6, 0], sizes = [1, 256], strides = [1, 1]} : vector<9x256xf32> to vector<1x256xf32>
    %47 = vector.broadcast %46 : vector<1x256xf32> to vector<4x256xf32>
    %48 = arith.mulf %45, %47 : vector<4x256xf32>
    %c48 = arith.constant 48 : index
    %c0_23 = arith.constant 0 : index
    %49 = vector.load %arg52[%c48, %c0_23] : memref<72x256xf32, #tpu.memory_space<vmem>>, vector<4x256xf32>
    tpu.vector_store %arg52[%c48, %c0_23], %48 {strides = array<i32>} : memref<72x256xf32, #tpu.memory_space<vmem>>, vector<4x256xf32>,
    %c240_i32 = arith.constant 240 : i32
    %50 = tpu.dynamic_rotate %6 by %c240_i32 dim 1 : vector<4x256xf32>, i32 -> vector<4x256xf32>
    %51 = vector.extract_strided_slice %2 {offsets = [7, 0], sizes = [1, 256], strides = [1, 1]} : vector<9x256xf32> to vector<1x256xf32>
    %52 = vector.broadcast %51 : vector<1x256xf32> to vector<4x256xf32>
    %53 = arith.mulf %50, %52 : vector<4x256xf32>
    %c56 = arith.constant 56 : index
    %c0_24 = arith.constant 0 : index
    %54 = vector.load %arg52[%c56, %c0_24] : memref<72x256xf32, #tpu.memory_space<vmem>>, vector<4x256xf32>
    tpu.vector_store %arg52[%c56, %c0_24], %53 {strides = array<i32>} : memref<72x256xf32, #tpu.memory_space<vmem>>, vector<4x256xf32>,
    %c239_i32 = arith.constant 239 : i32
    %55 = tpu.dynamic_rotate %6 by %c239_i32 dim 1 : vector<4x256xf32>, i32 -> vector<4x256xf32>
    %56 = vector.extract_strided_slice %2 {offsets = [8, 0], sizes = [1, 256], strides = [1, 1]} : vector<9x256xf32> to vector<1x256xf32>
    %57 = vector.broadcast %56 : vector<1x256xf32> to vector<4x256xf32>
    %58 = arith.mulf %55, %57 : vector<4x256xf32>
    %c64 = arith.constant 64 : index
    %c0_25 = arith.constant 0 : index
    %59 = vector.load %arg52[%c64, %c0_25] : memref<72x256xf32, #tpu.memory_space<vmem>>, vector<4x256xf32>
    tpu.vector_store %arg52[%c64, %c0_25], %58 {strides = array<i32>} : memref<72x256xf32, #tpu.memory_space<vmem>>, vector<4x256xf32>,
    %c0_26 = arith.constant 0 : index
    %c0_27 = arith.constant 0 : index
    %60 = vector.load %arg52[%c0_26, %c0_27] : memref<72x256xf32, #tpu.memory_space<vmem>>, vector<72x256xf32>
    %cst_28 = arith.constant dense<0.000000e+00> : vector<8x256xf32>
    %61 = tpu.matmul %15, %60, %cst_28 {dimension_numbers = #tpu.dot_dimension_numbers<[1], [0], [0], [1], [0, 0, 1, 1], [], []>} : vector<8x72xf32>, vector<72x256xf32>, vector<8x256xf32> -> vector<8x256xf32>
    %c0_29 = arith.constant 0 : index
    %c0_30 = arith.constant 0 : index
    %62 = vector.load %arg8[%c0_29, %c0_30] : memref<8x1xf32, #tpu.memory_space<vmem>>, vector<8x1xf32>
    %63 = vector.broadcast %62 : vector<8x1xf32> to vector<8x256xf32>
    %64 = arith.addf %61, %63 : vector<8x256xf32>
    %c0_31 = arith.constant 0 : index
    %c0_32 = arith.constant 0 : index
    %65 = vector.load %arg9[%c0_31, %c0_32] : memref<8x1xf32, #tpu.memory_space<vmem>>, vector<8x1xf32>
    %c0_33 = arith.constant 0 : index
    %c0_34 = arith.constant 0 : index
    %66 = vector.load %arg10[%c0_33, %c0_34] : memref<8x1xf32, #tpu.memory_space<vmem>>, vector<8x1xf32>
    %cst_35 = arith.constant dense<0.000000e+00> : vector<8xf32>
    %67 = vector.multi_reduction <add>, %64, %cst_35 [1] : vector<8x256xf32> to vector<8xf32>
    %68 = vector.shape_cast %67 : vector<8xf32> to vector<8x1xf32>
    %cst_36 = arith.constant dense<0.000000e+00> : vector<8x1xf32>
    %69 = tpu.matmul %3, %68, %cst_36 {dimension_numbers = #tpu.dot_dimension_numbers<[1], [0], [0], [1], [0, 0, 1, 1], [], []>} : vector<8x8xf32>, vector<8x1xf32>, vector<8x1xf32> -> vector<8x1xf32>
    %cst_37 = arith.constant 0.001953125 : f32
    %70 = vector.broadcast %cst_37 : f32 to vector<8x1xf32>
    %71 = arith.mulf %69, %70 : vector<8x1xf32>
    %72 = vector.broadcast %71 : vector<8x1xf32> to vector<8x256xf32>
    %73 = arith.subf %64, %72 : vector<8x256xf32>
    %74 = arith.mulf %73, %73 : vector<8x256xf32>
    %cst_38 = arith.constant dense<0.000000e+00> : vector<8xf32>
    %75 = vector.multi_reduction <add>, %74, %cst_38 [1] : vector<8x256xf32> to vector<8xf32>
    %76 = vector.shape_cast %75 : vector<8xf32> to vector<8x1xf32>
    %cst_39 = arith.constant dense<0.000000e+00> : vector<8x1xf32>
    %77 = tpu.matmul %3, %76, %cst_39 {dimension_numbers = #tpu.dot_dimension_numbers<[1], [0], [0], [1], [0, 0, 1, 1], [], []>} : vector<8x8xf32>, vector<8x1xf32>, vector<8x1xf32> -> vector<8x1xf32>
    %cst_40 = arith.constant 0.001953125 : f32
    %78 = vector.broadcast %cst_40 : f32 to vector<8x1xf32>
    %79 = arith.mulf %77, %78 : vector<8x1xf32>
    %cst_41 = arith.constant 9.99999974E-6 : f32
    %80 = vector.broadcast %cst_41 : f32 to vector<8x1xf32>
    %81 = arith.addf %79, %80 : vector<8x1xf32>
    %82 = math.rsqrt %81 : vector<8x1xf32>
    %83 = vector.broadcast %82 : vector<8x1xf32> to vector<8x256xf32>
    %84 = arith.mulf %73, %83 : vector<8x256xf32>
    %85 = vector.broadcast %65 : vector<8x1xf32> to vector<8x256xf32>
    %86 = arith.mulf %84, %85 : vector<8x256xf32>
    %87 = vector.broadcast %66 : vector<8x1xf32> to vector<8x256xf32>
    %88 = arith.addf %86, %87 : vector<8x256xf32>
    %89 = arith.negf %88 : vector<8x256xf32>
    %90 = math.exp %89 : vector<8x256xf32>
    %cst_42 = arith.constant 1.000000e+00 : f32
    %91 = vector.broadcast %cst_42 : f32 to vector<8x256xf32>
    %92 = arith.addf %91, %90 : vector<8x256xf32>
    %93 = arith.divf %91, %92 : vector<8x256xf32>
    %94 = arith.mulf %88, %93 : vector<8x256xf32>
    %c0_43 = arith.constant 0 : index
    %c0_44 = arith.constant 0 : index
    %95 = vector.load %arg11[%c0_43, %c0_44] : memref<8x16xf32, #tpu.memory_space<vmem>>, vector<8x16xf32>
    %cst_45 = arith.constant dense<0.000000e+00> : vector<8x1xf32>
    %96 = tpu.matmul %95, %14, %cst_45 {dimension_numbers = #tpu.dot_dimension_numbers<[1], [0], [0], [1], [0, 0, 1, 1], [], []>} : vector<8x16xf32>, vector<16x1xf32>, vector<8x1xf32> -> vector<8x1xf32>
    %c0_46 = arith.constant 0 : index
    %c0_47 = arith.constant 0 : index
    %97 = vector.load %arg12[%c0_46, %c0_47] : memref<8x1xf32, #tpu.memory_space<vmem>>, vector<8x1xf32>
    %98 = arith.addf %96, %97 : vector<8x1xf32>
    %99 = vector.broadcast %98 : vector<8x1xf32> to vector<8x256xf32>
    %100 = arith.addf %94, %99 : vector<8x256xf32>
    %c0_48 = arith.constant 0 : index
    %c0_49 = arith.constant 0 : index
    %101 = vector.load %arg13[%c0_48, %c0_49] : memref<8x72xf32, #tpu.memory_space<vmem>>, vector<8x72xf32>
    %c17_i32_50 = arith.constant 17 : i32
    %102 = tpu.dynamic_rotate %100 by %c17_i32_50 dim 1 : vector<8x256xf32>, i32 -> vector<8x256xf32>
    %103 = vector.extract_strided_slice %2 {offsets = [0, 0], sizes = [1, 256], strides = [1, 1]} : vector<9x256xf32> to vector<1x256xf32>
    %104 = vector.broadcast %103 : vector<1x256xf32> to vector<8x256xf32>
    %105 = arith.mulf %102, %104 : vector<8x256xf32>
    %c0_51 = arith.constant 0 : index
    %c0_52 = arith.constant 0 : index
    %106 = vector.load %arg52[%c0_51, %c0_52] : memref<72x256xf32, #tpu.memory_space<vmem>>, vector<8x256xf32>
    tpu.vector_store %arg52[%c0_51, %c0_52], %105 {strides = array<i32>} : memref<72x256xf32, #tpu.memory_space<vmem>>, vector<8x256xf32>,
    %c16_i32_53 = arith.constant 16 : i32
    %107 = tpu.dynamic_rotate %100 by %c16_i32_53 dim 1 : vector<8x256xf32>, i32 -> vector<8x256xf32>
    %108 = vector.extract_strided_slice %2 {offsets = [1, 0], sizes = [1, 256], strides = [1, 1]} : vector<9x256xf32> to vector<1x256xf32>
    %109 = vector.broadcast %108 : vector<1x256xf32> to vector<8x256xf32>
    %110 = arith.mulf %107, %109 : vector<8x256xf32>
    %c8_54 = arith.constant 8 : index
    %c0_55 = arith.constant 0 : index
    %111 = vector.load %arg52[%c8_54, %c0_55] : memref<72x256xf32, #tpu.memory_space<vmem>>, vector<8x256xf32>
    tpu.vector_store %arg52[%c8_54, %c0_55], %110 {strides = array<i32>} : memref<72x256xf32, #tpu.memory_space<vmem>>, vector<8x256xf32>,
    %c15_i32_56 = arith.constant 15 : i32
    %112 = tpu.dynamic_rotate %100 by %c15_i32_56 dim 1 : vector<8x256xf32>, i32 -> vector<8x256xf32>
    %113 = vector.extract_strided_slice %2 {offsets = [2, 0], sizes = [1, 256], strides = [1, 1]} : vector<9x256xf32> to vector<1x256xf32>
    %114 = vector.broadcast %113 : vector<1x256xf32> to vector<8x256xf32>
    %115 = arith.mulf %112, %114 : vector<8x256xf32>
    %c16_57 = arith.constant 16 : index
    %c0_58 = arith.constant 0 : index
    %116 = vector.load %arg52[%c16_57, %c0_58] : memref<72x256xf32, #tpu.memory_space<vmem>>, vector<8x256xf32>
    tpu.vector_store %arg52[%c16_57, %c0_58], %115 {strides = array<i32>} : memref<72x256xf32, #tpu.memory_space<vmem>>, vector<8x256xf32>,
    %c1_i32_59 = arith.constant 1 : i32
    %117 = tpu.dynamic_rotate %100 by %c1_i32_59 dim 1 : vector<8x256xf32>, i32 -> vector<8x256xf32>
    %118 = vector.extract_strided_slice %2 {offsets = [3, 0], sizes = [1, 256], strides = [1, 1]} : vector<9x256xf32> to vector<1x256xf32>
    %119 = vector.broadcast %118 : vector<1x256xf32> to vector<8x256xf32>
    %120 = arith.mulf %117, %119 : vector<8x256xf32>
    %c24_60 = arith.constant 24 : index
    %c0_61 = arith.constant 0 : index
    %121 = vector.load %arg52[%c24_60, %c0_61] : memref<72x256xf32, #tpu.memory_space<vmem>>, vector<8x256xf32>
    tpu.vector_store %arg52[%c24_60, %c0_61], %120 {strides = array<i32>} : memref<72x256xf32, #tpu.memory_space<vmem>>, vector<8x256xf32>,
    %122 = vector.extract_strided_slice %2 {offsets = [4, 0], sizes = [1, 256], strides = [1, 1]} : vector<9x256xf32> to vector<1x256xf32>
    %123 = vector.broadcast %122 : vector<1x256xf32> to vector<8x256xf32>
    %124 = arith.mulf %100, %123 : vector<8x256xf32>
    %c32_62 = arith.constant 32 : index
    %c0_63 = arith.constant 0 : index
    %125 = vector.load %arg52[%c32_62, %c0_63] : memref<72x256xf32, #tpu.memory_space<vmem>>, vector<8x256xf32>
    tpu.vector_store %arg52[%c32_62, %c0_63], %124 {strides = array<i32>} : memref<72x256xf32, #tpu.memory_space<vmem>>, vector<8x256xf32>,
    %c255_i32_64 = arith.constant 255 : i32
    %126 = tpu.dynamic_rotate %100 by %c255_i32_64 dim 1 : vector<8x256xf32>, i32 -> vector<8x256xf32>
    %127 = vector.extract_strided_slice %2 {offsets = [5, 0], sizes = [1, 256], strides = [1, 1]} : vector<9x256xf32> to vector<1x256xf32>
    %128 = vector.broadcast %127 : vector<1x256xf32> to vector<8x256xf32>
    %129 = arith.mulf %126, %128 : vector<8x256xf32>
    %c40_65 = arith.constant 40 : index
    %c0_66 = arith.constant 0 : index
    %130 = vector.load %arg52[%c40_65, %c0_66] : memref<72x256xf32, #tpu.memory_space<vmem>>, vector<8x256xf32>
    tpu.vector_store %arg52[%c40_65, %c0_66], %129 {strides = array<i32>} : memref<72x256xf32, #tpu.memory_space<vmem>>, vector<8x256xf32>,
    %c241_i32_67 = arith.constant 241 : i32
    %131 = tpu.dynamic_rotate %100 by %c241_i32_67 dim 1 : vector<8x256xf32>, i32 -> vector<8x256xf32>
    %132 = vector.extract_strided_slice %2 {offsets = [6, 0], sizes = [1, 256], strides = [1, 1]} : vector<9x256xf32> to vector<1x256xf32>
    %133 = vector.broadcast %132 : vector<1x256xf32> to vector<8x256xf32>
    %134 = arith.mulf %131, %133 : vector<8x256xf32>
    %c48_68 = arith.constant 48 : index
    %c0_69 = arith.constant 0 : index
    %135 = vector.load %arg52[%c48_68, %c0_69] : memref<72x256xf32, #tpu.memory_space<vmem>>, vector<8x256xf32>
    tpu.vector_store %arg52[%c48_68, %c0_69], %134 {strides = array<i32>} : memref<72x256xf32, #tpu.memory_space<vmem>>, vector<8x256xf32>,
    %c240_i32_70 = arith.constant 240 : i32
    %136 = tpu.dynamic_rotate %100 by %c240_i32_70 dim 1 : vector<8x256xf32>, i32 -> vector<8x256xf32>
    %137 = vector.extract_strided_slice %2 {offsets = [7, 0], sizes = [1, 256], strides = [1, 1]} : vector<9x256xf32> to vector<1x256xf32>
    %138 = vector.broadcast %137 : vector<1x256xf32> to vector<8x256xf32>
    %139 = arith.mulf %136, %138 : vector<8x256xf32>
    %c56_71 = arith.constant 56 : index
    %c0_72 = arith.constant 0 : index
    %140 = vector.load %arg52[%c56_71, %c0_72] : memref<72x256xf32, #tpu.memory_space<vmem>>, vector<8x256xf32>
    tpu.vector_store %arg52[%c56_71, %c0_72], %139 {strides = array<i32>} : memref<72x256xf32, #tpu.memory_space<vmem>>, vector<8x256xf32>,
    %c239_i32_73 = arith.constant 239 : i32
    %141 = tpu.dynamic_rotate %100 by %c239_i32_73 dim 1 : vector<8x256xf32>, i32 -> vector<8x256xf32>
    %142 = vector.extract_strided_slice %2 {offsets = [8, 0], sizes = [1, 256], strides = [1, 1]} : vector<9x256xf32> to vector<1x256xf32>
    %143 = vector.broadcast %142 : vector<1x256xf32> to vector<8x256xf32>
    %144 = arith.mulf %141, %143 : vector<8x256xf32>
    %c64_74 = arith.constant 64 : index
    %c0_75 = arith.constant 0 : index
    %145 = vector.load %arg52[%c64_74, %c0_75] : memref<72x256xf32, #tpu.memory_space<vmem>>, vector<8x256xf32>
    tpu.vector_store %arg52[%c64_74, %c0_75], %144 {strides = array<i32>} : memref<72x256xf32, #tpu.memory_space<vmem>>, vector<8x256xf32>,
    %c0_76 = arith.constant 0 : index
    %c0_77 = arith.constant 0 : index
    %146 = vector.load %arg52[%c0_76, %c0_77] : memref<72x256xf32, #tpu.memory_space<vmem>>, vector<72x256xf32>
    %cst_78 = arith.constant dense<0.000000e+00> : vector<8x256xf32>
    %147 = tpu.matmul %101, %146, %cst_78 {dimension_numbers = #tpu.dot_dimension_numbers<[1], [0], [0], [1], [0, 0, 1, 1], [], []>} : vector<8x72xf32>, vector<72x256xf32>, vector<8x256xf32> -> vector<8x256xf32>
    %c0_79 = arith.constant 0 : index
    %c0_80 = arith.constant 0 : index
    %148 = vector.load %arg14[%c0_79, %c0_80] : memref<8x1xf32, #tpu.memory_space<vmem>>, vector<8x1xf32>
    %149 = vector.broadcast %148 : vector<8x1xf32> to vector<8x256xf32>
    %150 = arith.addf %147, %149 : vector<8x256xf32>
    %c0_81 = arith.constant 0 : index
    %c0_82 = arith.constant 0 : index
    %151 = vector.load %arg15[%c0_81, %c0_82] : memref<8x1xf32, #tpu.memory_space<vmem>>, vector<8x1xf32>
    %c0_83 = arith.constant 0 : index
    %c0_84 = arith.constant 0 : index
    %152 = vector.load %arg16[%c0_83, %c0_84] : memref<8x1xf32, #tpu.memory_space<vmem>>, vector<8x1xf32>
    %cst_85 = arith.constant dense<0.000000e+00> : vector<8xf32>
    %153 = vector.multi_reduction <add>, %150, %cst_85 [1] : vector<8x256xf32> to vector<8xf32>
    %154 = vector.shape_cast %153 : vector<8xf32> to vector<8x1xf32>
    %cst_86 = arith.constant dense<0.000000e+00> : vector<8x1xf32>
    %155 = tpu.matmul %3, %154, %cst_86 {dimension_numbers = #tpu.dot_dimension_numbers<[1], [0], [0], [1], [0, 0, 1, 1], [], []>} : vector<8x8xf32>, vector<8x1xf32>, vector<8x1xf32> -> vector<8x1xf32>
    %cst_87 = arith.constant 0.001953125 : f32
    %156 = vector.broadcast %cst_87 : f32 to vector<8x1xf32>
    %157 = arith.mulf %155, %156 : vector<8x1xf32>
    %158 = vector.broadcast %157 : vector<8x1xf32> to vector<8x256xf32>
    %159 = arith.subf %150, %158 : vector<8x256xf32>
    %160 = arith.mulf %159, %159 : vector<8x256xf32>
    %cst_88 = arith.constant dense<0.000000e+00> : vector<8xf32>
    %161 = vector.multi_reduction <add>, %160, %cst_88 [1] : vector<8x256xf32> to vector<8xf32>
    %162 = vector.shape_cast %161 : vector<8xf32> to vector<8x1xf32>
    %cst_89 = arith.constant dense<0.000000e+00> : vector<8x1xf32>
    %163 = tpu.matmul %3, %162, %cst_89 {dimension_numbers = #tpu.dot_dimension_numbers<[1], [0], [0], [1], [0, 0, 1, 1], [], []>} : vector<8x8xf32>, vector<8x1xf32>, vector<8x1xf32> -> vector<8x1xf32>
    %cst_90 = arith.constant 0.001953125 : f32
    %164 = vector.broadcast %cst_90 : f32 to vector<8x1xf32>
    %165 = arith.mulf %163, %164 : vector<8x1xf32>
    %cst_91 = arith.constant 9.99999974E-6 : f32
    %166 = vector.broadcast %cst_91 : f32 to vector<8x1xf32>
    %167 = arith.addf %165, %166 : vector<8x1xf32>
    %168 = math.rsqrt %167 : vector<8x1xf32>
    %169 = vector.broadcast %168 : vector<8x1xf32> to vector<8x256xf32>
    %170 = arith.mulf %159, %169 : vector<8x256xf32>
    %171 = vector.broadcast %151 : vector<8x1xf32> to vector<8x256xf32>
    %172 = arith.mulf %170, %171 : vector<8x256xf32>
    %173 = vector.broadcast %152 : vector<8x1xf32> to vector<8x256xf32>
    %174 = arith.addf %172, %173 : vector<8x256xf32>
    %175 = arith.negf %174 : vector<8x256xf32>
    %176 = math.exp %175 : vector<8x256xf32>
    %cst_92 = arith.constant 1.000000e+00 : f32
    %177 = vector.broadcast %cst_92 : f32 to vector<8x256xf32>
    %178 = arith.addf %177, %176 : vector<8x256xf32>
    %179 = arith.divf %177, %178 : vector<8x256xf32>
    %180 = arith.mulf %174, %179 : vector<8x256xf32>
    %c0_93 = arith.constant 0 : index
    %c0_94 = arith.constant 0 : index
    %181 = vector.load %arg17[%c0_93, %c0_94] : memref<8x4xf32, #tpu.memory_space<vmem>>, vector<8x4xf32>
    %cst_95 = arith.constant dense<0.000000e+00> : vector<8x256xf32>
    %182 = tpu.matmul %181, %6, %cst_95 {dimension_numbers = #tpu.dot_dimension_numbers<[1], [0], [0], [1], [0, 0, 1, 1], [], []>} : vector<8x4xf32>, vector<4x256xf32>, vector<8x256xf32> -> vector<8x256xf32>
    %c0_96 = arith.constant 0 : index
    %c0_97 = arith.constant 0 : index
    %183 = vector.load %arg18[%c0_96, %c0_97] : memref<8x1xf32, #tpu.memory_space<vmem>>, vector<8x1xf32>
    %184 = vector.broadcast %183 : vector<8x1xf32> to vector<8x256xf32>
    %185 = arith.addf %182, %184 : vector<8x256xf32>
    %186 = arith.addf %180, %185 : vector<8x256xf32>
    %c0_98 = arith.constant 0 : index
    %c0_99 = arith.constant 0 : index
    %187 = vector.load %arg19[%c0_98, %c0_99] : memref<8x8xf32, #tpu.memory_space<vmem>>, vector<8x8xf32>
    %c0_100 = arith.constant 0 : index
    %c0_101 = arith.constant 0 : index
    %188 = vector.load %arg20[%c0_100, %c0_101] : memref<8x1xf32, #tpu.memory_space<vmem>>, vector<8x1xf32>
    %c0_102 = arith.constant 0 : index
    %c0_103 = arith.constant 0 : index
    %189 = vector.load %arg21[%c0_102, %c0_103] : memref<8x8xf32, #tpu.memory_space<vmem>>, vector<8x8xf32>
    %c0_104 = arith.constant 0 : index
    %c0_105 = arith.constant 0 : index
    %190 = vector.load %arg22[%c0_104, %c0_105] : memref<8x1xf32, #tpu.memory_space<vmem>>, vector<8x1xf32>
    %c0_106 = arith.constant 0 : index
    %c0_107 = arith.constant 0 : index
    %191 = vector.load %arg23[%c0_106, %c0_107] : memref<8x8xf32, #tpu.memory_space<vmem>>, vector<8x8xf32>
    %c0_108 = arith.constant 0 : index
    %c0_109 = arith.constant 0 : index
    %192 = vector.load %arg24[%c0_108, %c0_109] : memref<8x1xf32, #tpu.memory_space<vmem>>, vector<8x1xf32>
    %c0_110 = arith.constant 0 : index
    %c0_111 = arith.constant 0 : index
    %193 = vector.load %arg25[%c0_110, %c0_111] : memref<8x8xf32, #tpu.memory_space<vmem>>, vector<8x8xf32>
    %c0_112 = arith.constant 0 : index
    %c0_113 = arith.constant 0 : index
    %194 = vector.load %arg26[%c0_112, %c0_113] : memref<8x1xf32, #tpu.memory_space<vmem>>, vector<8x1xf32>
    %c0_114 = arith.constant 0 : index
    %c0_115 = arith.constant 0 : index
    %195 = vector.load %arg27[%c0_114, %c0_115] : memref<8x1xf32, #tpu.memory_space<vmem>>, vector<8x1xf32>
    %c0_116 = arith.constant 0 : index
    %c0_117 = arith.constant 0 : index
    %196 = vector.load %arg28[%c0_116, %c0_117] : memref<8x1xf32, #tpu.memory_space<vmem>>, vector<8x1xf32>
    %cst_118 = arith.constant dense<0.000000e+00> : vector<8x256xf32>
    %197 = tpu.matmul %187, %186, %cst_118 {dimension_numbers = #tpu.dot_dimension_numbers<[1], [0], [0], [1], [0, 0, 1, 1], [], []>} : vector<8x8xf32>, vector<8x256xf32>, vector<8x256xf32> -> vector<8x256xf32>
    %198 = vector.broadcast %188 : vector<8x1xf32> to vector<8x256xf32>
    %199 = arith.addf %197, %198 : vector<8x256xf32>
    %cst_119 = arith.constant dense<0.000000e+00> : vector<8x256xf32>
    %200 = tpu.matmul %189, %186, %cst_119 {dimension_numbers = #tpu.dot_dimension_numbers<[1], [0], [0], [1], [0, 0, 1, 1], [], []>} : vector<8x8xf32>, vector<8x256xf32>, vector<8x256xf32> -> vector<8x256xf32>
    %201 = vector.broadcast %190 : vector<8x1xf32> to vector<8x256xf32>
    %202 = arith.addf %200, %201 : vector<8x256xf32>
    %cst_120 = arith.constant dense<0.000000e+00> : vector<8x256xf32>
    %203 = tpu.matmul %191, %186, %cst_120 {dimension_numbers = #tpu.dot_dimension_numbers<[1], [0], [0], [1], [0, 0, 1, 1], [], []>} : vector<8x8xf32>, vector<8x256xf32>, vector<8x256xf32> -> vector<8x256xf32>
    %204 = vector.broadcast %192 : vector<8x1xf32> to vector<8x256xf32>
    %205 = arith.addf %203, %204 : vector<8x256xf32>
    %cst_121 = arith.constant dense<0.000000e+00> : vector<256x8xf32>
    %206 = tpu.matmul %4, %199, %cst_121 {dimension_numbers = #tpu.dot_dimension_numbers<[1], [1], [0], [0], [0, 0, 1, 0], [], []>} : vector<256x256xf32>, vector<8x256xf32>, vector<256x8xf32> -> vector<256x8xf32>
    %207 = vector.extract_strided_slice %206 {offsets = [0, 0], sizes = [256, 4], strides = [1, 1]} : vector<256x8xf32> to vector<256x4xf32>
    %208 = vector.extract_strided_slice %202 {offsets = [0, 0], sizes = [4, 256], strides = [1, 1]} : vector<8x256xf32> to vector<4x256xf32>
    %cst_122 = arith.constant dense<0.000000e+00> : vector<256x256xf32>
    %209 = tpu.matmul %207, %208, %cst_122 {dimension_numbers = #tpu.dot_dimension_numbers<[1], [0], [0], [1], [0, 0, 1, 1], [], []>} : vector<256x4xf32>, vector<4x256xf32>, vector<256x256xf32> -> vector<256x256xf32>
    %cst_123 = arith.constant 5.000000e-01 : f32
    %210 = vector.broadcast %cst_123 : f32 to vector<256x256xf32>
    %211 = arith.mulf %209, %210 : vector<256x256xf32>
    %cst_124 = arith.constant dense<0xFF800000> : vector<256xf32>
    %212 = vector.multi_reduction <maximumf>, %211, %cst_124 [1] : vector<256x256xf32> to vector<256xf32>
    %213 = vector.shape_cast %212 : vector<256xf32> to vector<256x1xf32>
    %214 = vector.broadcast %213 : vector<256x1xf32> to vector<256x256xf32>
    %215 = arith.subf %211, %214 : vector<256x256xf32>
    %216 = math.exp %215 : vector<256x256xf32>
    %cst_125 = arith.constant dense<0.000000e+00> : vector<256xf32>
    %217 = vector.multi_reduction <add>, %216, %cst_125 [1] : vector<256x256xf32> to vector<256xf32>
    %218 = vector.shape_cast %217 : vector<256xf32> to vector<256x1xf32>
    %cst_126 = arith.constant 1.000000e+00 : f32
    %219 = vector.broadcast %cst_126 : f32 to vector<256x1xf32>
    %220 = arith.divf %219, %218 : vector<256x1xf32>
    %221 = vector.broadcast %220 : vector<256x1xf32> to vector<256x256xf32>
    %222 = arith.mulf %216, %221 : vector<256x256xf32>
    %223 = vector.extract_strided_slice %205 {offsets = [0, 0], sizes = [4, 256], strides = [1, 1]} : vector<8x256xf32> to vector<4x256xf32>
    %cst_127 = arith.constant dense<0.000000e+00> : vector<4x256xf32>
    %224 = tpu.matmul %223, %222, %cst_127 {dimension_numbers = #tpu.dot_dimension_numbers<[1], [1], [0], [0], [0, 0, 1, 0], [], []>} : vector<4x256xf32>, vector<256x256xf32>, vector<4x256xf32> -> vector<4x256xf32>
    %225 = vector.extract_strided_slice %193 {offsets = [0, 0], sizes = [8, 4], strides = [1, 1]} : vector<8x8xf32> to vector<8x4xf32>
    %cst_128 = arith.constant dense<0.000000e+00> : vector<8x256xf32>
    %226 = tpu.matmul %225, %224, %cst_128 {dimension_numbers = #tpu.dot_dimension_numbers<[1], [0], [0], [1], [0, 0, 1, 1], [], []>} : vector<8x4xf32>, vector<4x256xf32>, vector<8x256xf32> -> vector<8x256xf32>
    %227 = vector.extract_strided_slice %206 {offsets = [0, 4], sizes = [256, 4], strides = [1, 1]} : vector<256x8xf32> to vector<256x4xf32>
    %228 = vector.extract_strided_slice %202 {offsets = [4, 0], sizes = [4, 256], strides = [1, 1]} : vector<8x256xf32> to vector<4x256xf32>
    %cst_129 = arith.constant dense<0.000000e+00> : vector<256x256xf32>
    %229 = tpu.matmul %227, %228, %cst_129 {dimension_numbers = #tpu.dot_dimension_numbers<[1], [0], [0], [1], [0, 0, 1, 1], [], []>} : vector<256x4xf32>, vector<4x256xf32>, vector<256x256xf32> -> vector<256x256xf32>
    %cst_130 = arith.constant 5.000000e-01 : f32
    %230 = vector.broadcast %cst_130 : f32 to vector<256x256xf32>
    %231 = arith.mulf %229, %230 : vector<256x256xf32>
    %cst_131 = arith.constant dense<0xFF800000> : vector<256xf32>
    %232 = vector.multi_reduction <maximumf>, %231, %cst_131 [1] : vector<256x256xf32> to vector<256xf32>
    %233 = vector.shape_cast %232 : vector<256xf32> to vector<256x1xf32>
    %234 = vector.broadcast %233 : vector<256x1xf32> to vector<256x256xf32>
    %235 = arith.subf %231, %234 : vector<256x256xf32>
    %236 = math.exp %235 : vector<256x256xf32>
    %cst_132 = arith.constant dense<0.000000e+00> : vector<256xf32>
    %237 = vector.multi_reduction <add>, %236, %cst_132 [1] : vector<256x256xf32> to vector<256xf32>
    %238 = vector.shape_cast %237 : vector<256xf32> to vector<256x1xf32>
    %cst_133 = arith.constant 1.000000e+00 : f32
    %239 = vector.broadcast %cst_133 : f32 to vector<256x1xf32>
    %240 = arith.divf %239, %238 : vector<256x1xf32>
    %241 = vector.broadcast %240 : vector<256x1xf32> to vector<256x256xf32>
    %242 = arith.mulf %236, %241 : vector<256x256xf32>
    %243 = vector.extract_strided_slice %205 {offsets = [4, 0], sizes = [4, 256], strides = [1, 1]} : vector<8x256xf32> to vector<4x256xf32>
    %cst_134 = arith.constant dense<0.000000e+00> : vector<4x256xf32>
    %244 = tpu.matmul %243, %242, %cst_134 {dimension_numbers = #tpu.dot_dimension_numbers<[1], [1], [0], [0], [0, 0, 1, 0], [], []>} : vector<4x256xf32>, vector<256x256xf32>, vector<4x256xf32> -> vector<4x256xf32>
    %245 = vector.extract_strided_slice %193 {offsets = [0, 4], sizes = [8, 4], strides = [1, 1]} : vector<8x8xf32> to vector<8x4xf32>
    %cst_135 = arith.constant dense<0.000000e+00> : vector<8x256xf32>
    %246 = tpu.matmul %245, %244, %cst_135 {dimension_numbers = #tpu.dot_dimension_numbers<[1], [0], [0], [1], [0, 0, 1, 1], [], []>} : vector<8x4xf32>, vector<4x256xf32>, vector<8x256xf32> -> vector<8x256xf32>
    %247 = arith.addf %226, %246 : vector<8x256xf32>
    %248 = vector.broadcast %194 : vector<8x1xf32> to vector<8x256xf32>
    %249 = arith.addf %247, %248 : vector<8x256xf32>
    %250 = arith.addf %249, %186 : vector<8x256xf32>
    %cst_136 = arith.constant dense<0.000000e+00> : vector<8xf32>
    %251 = vector.multi_reduction <add>, %250, %cst_136 [1] : vector<8x256xf32> to vector<8xf32>
    %252 = vector.shape_cast %251 : vector<8xf32> to vector<8x1xf32>
    %cst_137 = arith.constant dense<0.000000e+00> : vector<8x1xf32>
    %253 = tpu.matmul %3, %252, %cst_137 {dimension_numbers = #tpu.dot_dimension_numbers<[1], [0], [0], [1], [0, 0, 1, 1], [], []>} : vector<8x8xf32>, vector<8x1xf32>, vector<8x1xf32> -> vector<8x1xf32>
    %cst_138 = arith.constant 0.001953125 : f32
    %254 = vector.broadcast %cst_138 : f32 to vector<8x1xf32>
    %255 = arith.mulf %253, %254 : vector<8x1xf32>
    %256 = vector.broadcast %255 : vector<8x1xf32> to vector<8x256xf32>
    %257 = arith.subf %250, %256 : vector<8x256xf32>
    %258 = arith.mulf %257, %257 : vector<8x256xf32>
    %cst_139 = arith.constant dense<0.000000e+00> : vector<8xf32>
    %259 = vector.multi_reduction <add>, %258, %cst_139 [1] : vector<8x256xf32> to vector<8xf32>
    %260 = vector.shape_cast %259 : vector<8xf32> to vector<8x1xf32>
    %cst_140 = arith.constant dense<0.000000e+00> : vector<8x1xf32>
    %261 = tpu.matmul %3, %260, %cst_140 {dimension_numbers = #tpu.dot_dimension_numbers<[1], [0], [0], [1], [0, 0, 1, 1], [], []>} : vector<8x8xf32>, vector<8x1xf32>, vector<8x1xf32> -> vector<8x1xf32>
    %cst_141 = arith.constant 0.001953125 : f32
    %262 = vector.broadcast %cst_141 : f32 to vector<8x1xf32>
    %263 = arith.mulf %261, %262 : vector<8x1xf32>
    %cst_142 = arith.constant 9.99999974E-6 : f32
    %264 = vector.broadcast %cst_142 : f32 to vector<8x1xf32>
    %265 = arith.addf %263, %264 : vector<8x1xf32>
    %266 = math.rsqrt %265 : vector<8x1xf32>
    %267 = vector.broadcast %266 : vector<8x1xf32> to vector<8x256xf32>
    %268 = arith.mulf %257, %267 : vector<8x256xf32>
    %269 = vector.broadcast %195 : vector<8x1xf32> to vector<8x256xf32>
    %270 = arith.mulf %268, %269 : vector<8x256xf32>
    %271 = vector.broadcast %196 : vector<8x1xf32> to vector<8x256xf32>
    %272 = arith.addf %270, %271 : vector<8x256xf32>
    %c0_143 = arith.constant 0 : index
    %c0_144 = arith.constant 0 : index
    %273 = vector.load %arg29[%c0_143, %c0_144] : memref<8x72xf32, #tpu.memory_space<vmem>>, vector<8x72xf32>
    %c17_i32_145 = arith.constant 17 : i32
    %274 = tpu.dynamic_rotate %272 by %c17_i32_145 dim 1 : vector<8x256xf32>, i32 -> vector<8x256xf32>
    %275 = vector.extract_strided_slice %2 {offsets = [0, 0], sizes = [1, 256], strides = [1, 1]} : vector<9x256xf32> to vector<1x256xf32>
    %276 = vector.broadcast %275 : vector<1x256xf32> to vector<8x256xf32>
    %277 = arith.mulf %274, %276 : vector<8x256xf32>
    %c0_146 = arith.constant 0 : index
    %c0_147 = arith.constant 0 : index
    %278 = vector.load %arg52[%c0_146, %c0_147] : memref<72x256xf32, #tpu.memory_space<vmem>>, vector<8x256xf32>
    tpu.vector_store %arg52[%c0_146, %c0_147], %277 {strides = array<i32>} : memref<72x256xf32, #tpu.memory_space<vmem>>, vector<8x256xf32>,
    %c16_i32_148 = arith.constant 16 : i32
    %279 = tpu.dynamic_rotate %272 by %c16_i32_148 dim 1 : vector<8x256xf32>, i32 -> vector<8x256xf32>
    %280 = vector.extract_strided_slice %2 {offsets = [1, 0], sizes = [1, 256], strides = [1, 1]} : vector<9x256xf32> to vector<1x256xf32>
    %281 = vector.broadcast %280 : vector<1x256xf32> to vector<8x256xf32>
    %282 = arith.mulf %279, %281 : vector<8x256xf32>
    %c8_149 = arith.constant 8 : index
    %c0_150 = arith.constant 0 : index
    %283 = vector.load %arg52[%c8_149, %c0_150] : memref<72x256xf32, #tpu.memory_space<vmem>>, vector<8x256xf32>
    tpu.vector_store %arg52[%c8_149, %c0_150], %282 {strides = array<i32>} : memref<72x256xf32, #tpu.memory_space<vmem>>, vector<8x256xf32>,
    %c15_i32_151 = arith.constant 15 : i32
    %284 = tpu.dynamic_rotate %272 by %c15_i32_151 dim 1 : vector<8x256xf32>, i32 -> vector<8x256xf32>
    %285 = vector.extract_strided_slice %2 {offsets = [2, 0], sizes = [1, 256], strides = [1, 1]} : vector<9x256xf32> to vector<1x256xf32>
    %286 = vector.broadcast %285 : vector<1x256xf32> to vector<8x256xf32>
    %287 = arith.mulf %284, %286 : vector<8x256xf32>
    %c16_152 = arith.constant 16 : index
    %c0_153 = arith.constant 0 : index
    %288 = vector.load %arg52[%c16_152, %c0_153] : memref<72x256xf32, #tpu.memory_space<vmem>>, vector<8x256xf32>
    tpu.vector_store %arg52[%c16_152, %c0_153], %287 {strides = array<i32>} : memref<72x256xf32, #tpu.memory_space<vmem>>, vector<8x256xf32>,
    %c1_i32_154 = arith.constant 1 : i32
    %289 = tpu.dynamic_rotate %272 by %c1_i32_154 dim 1 : vector<8x256xf32>, i32 -> vector<8x256xf32>
    %290 = vector.extract_strided_slice %2 {offsets = [3, 0], sizes = [1, 256], strides = [1, 1]} : vector<9x256xf32> to vector<1x256xf32>
    %291 = vector.broadcast %290 : vector<1x256xf32> to vector<8x256xf32>
    %292 = arith.mulf %289, %291 : vector<8x256xf32>
    %c24_155 = arith.constant 24 : index
    %c0_156 = arith.constant 0 : index
    %293 = vector.load %arg52[%c24_155, %c0_156] : memref<72x256xf32, #tpu.memory_space<vmem>>, vector<8x256xf32>
    tpu.vector_store %arg52[%c24_155, %c0_156], %292 {strides = array<i32>} : memref<72x256xf32, #tpu.memory_space<vmem>>, vector<8x256xf32>,
    %294 = vector.extract_strided_slice %2 {offsets = [4, 0], sizes = [1, 256], strides = [1, 1]} : vector<9x256xf32> to vector<1x256xf32>
    %295 = vector.broadcast %294 : vector<1x256xf32> to vector<8x256xf32>
    %296 = arith.mulf %272, %295 : vector<8x256xf32>
    %c32_157 = arith.constant 32 : index
    %c0_158 = arith.constant 0 : index
    %297 = vector.load %arg52[%c32_157, %c0_158] : memref<72x256xf32, #tpu.memory_space<vmem>>, vector<8x256xf32>
    tpu.vector_store %arg52[%c32_157, %c0_158], %296 {strides = array<i32>} : memref<72x256xf32, #tpu.memory_space<vmem>>, vector<8x256xf32>,
    %c255_i32_159 = arith.constant 255 : i32
    %298 = tpu.dynamic_rotate %272 by %c255_i32_159 dim 1 : vector<8x256xf32>, i32 -> vector<8x256xf32>
    %299 = vector.extract_strided_slice %2 {offsets = [5, 0], sizes = [1, 256], strides = [1, 1]} : vector<9x256xf32> to vector<1x256xf32>
    %300 = vector.broadcast %299 : vector<1x256xf32> to vector<8x256xf32>
    %301 = arith.mulf %298, %300 : vector<8x256xf32>
    %c40_160 = arith.constant 40 : index
    %c0_161 = arith.constant 0 : index
    %302 = vector.load %arg52[%c40_160, %c0_161] : memref<72x256xf32, #tpu.memory_space<vmem>>, vector<8x256xf32>
    tpu.vector_store %arg52[%c40_160, %c0_161], %301 {strides = array<i32>} : memref<72x256xf32, #tpu.memory_space<vmem>>, vector<8x256xf32>,
    %c241_i32_162 = arith.constant 241 : i32
    %303 = tpu.dynamic_rotate %272 by %c241_i32_162 dim 1 : vector<8x256xf32>, i32 -> vector<8x256xf32>
    %304 = vector.extract_strided_slice %2 {offsets = [6, 0], sizes = [1, 256], strides = [1, 1]} : vector<9x256xf32> to vector<1x256xf32>
    %305 = vector.broadcast %304 : vector<1x256xf32> to vector<8x256xf32>
    %306 = arith.mulf %303, %305 : vector<8x256xf32>
    %c48_163 = arith.constant 48 : index
    %c0_164 = arith.constant 0 : index
    %307 = vector.load %arg52[%c48_163, %c0_164] : memref<72x256xf32, #tpu.memory_space<vmem>>, vector<8x256xf32>
    tpu.vector_store %arg52[%c48_163, %c0_164], %306 {strides = array<i32>} : memref<72x256xf32, #tpu.memory_space<vmem>>, vector<8x256xf32>,
    %c240_i32_165 = arith.constant 240 : i32
    %308 = tpu.dynamic_rotate %272 by %c240_i32_165 dim 1 : vector<8x256xf32>, i32 -> vector<8x256xf32>
    %309 = vector.extract_strided_slice %2 {offsets = [7, 0], sizes = [1, 256], strides = [1, 1]} : vector<9x256xf32> to vector<1x256xf32>
    %310 = vector.broadcast %309 : vector<1x256xf32> to vector<8x256xf32>
    %311 = arith.mulf %308, %310 : vector<8x256xf32>
    %c56_166 = arith.constant 56 : index
    %c0_167 = arith.constant 0 : index
    %312 = vector.load %arg52[%c56_166, %c0_167] : memref<72x256xf32, #tpu.memory_space<vmem>>, vector<8x256xf32>
    tpu.vector_store %arg52[%c56_166, %c0_167], %311 {strides = array<i32>} : memref<72x256xf32, #tpu.memory_space<vmem>>, vector<8x256xf32>,
    %c239_i32_168 = arith.constant 239 : i32
    %313 = tpu.dynamic_rotate %272 by %c239_i32_168 dim 1 : vector<8x256xf32>, i32 -> vector<8x256xf32>
    %314 = vector.extract_strided_slice %2 {offsets = [8, 0], sizes = [1, 256], strides = [1, 1]} : vector<9x256xf32> to vector<1x256xf32>
    %315 = vector.broadcast %314 : vector<1x256xf32> to vector<8x256xf32>
    %316 = arith.mulf %313, %315 : vector<8x256xf32>
    %c64_169 = arith.constant 64 : index
    %c0_170 = arith.constant 0 : index
    %317 = vector.load %arg52[%c64_169, %c0_170] : memref<72x256xf32, #tpu.memory_space<vmem>>, vector<8x256xf32>
    tpu.vector_store %arg52[%c64_169, %c0_170], %316 {strides = array<i32>} : memref<72x256xf32, #tpu.memory_space<vmem>>, vector<8x256xf32>,
    %c0_171 = arith.constant 0 : index
    %c0_172 = arith.constant 0 : index
    %318 = vector.load %arg52[%c0_171, %c0_172] : memref<72x256xf32, #tpu.memory_space<vmem>>, vector<72x256xf32>
    %cst_173 = arith.constant dense<0.000000e+00> : vector<8x256xf32>
    %319 = tpu.matmul %273, %318, %cst_173 {dimension_numbers = #tpu.dot_dimension_numbers<[1], [0], [0], [1], [0, 0, 1, 1], [], []>} : vector<8x72xf32>, vector<72x256xf32>, vector<8x256xf32> -> vector<8x256xf32>
    %c0_174 = arith.constant 0 : index
    %c0_175 = arith.constant 0 : index
    %320 = vector.load %arg30[%c0_174, %c0_175] : memref<8x1xf32, #tpu.memory_space<vmem>>, vector<8x1xf32>
    %321 = vector.broadcast %320 : vector<8x1xf32> to vector<8x256xf32>
    %322 = arith.addf %319, %321 : vector<8x256xf32>
    %c0_176 = arith.constant 0 : index
    %c0_177 = arith.constant 0 : index
    %323 = vector.load %arg31[%c0_176, %c0_177] : memref<8x1xf32, #tpu.memory_space<vmem>>, vector<8x1xf32>
    %c0_178 = arith.constant 0 : index
    %c0_179 = arith.constant 0 : index
    %324 = vector.load %arg32[%c0_178, %c0_179] : memref<8x1xf32, #tpu.memory_space<vmem>>, vector<8x1xf32>
    %cst_180 = arith.constant dense<0.000000e+00> : vector<8xf32>
    %325 = vector.multi_reduction <add>, %322, %cst_180 [1] : vector<8x256xf32> to vector<8xf32>
    %326 = vector.shape_cast %325 : vector<8xf32> to vector<8x1xf32>
    %cst_181 = arith.constant dense<0.000000e+00> : vector<8x1xf32>
    %327 = tpu.matmul %3, %326, %cst_181 {dimension_numbers = #tpu.dot_dimension_numbers<[1], [0], [0], [1], [0, 0, 1, 1], [], []>} : vector<8x8xf32>, vector<8x1xf32>, vector<8x1xf32> -> vector<8x1xf32>
    %cst_182 = arith.constant 0.001953125 : f32
    %328 = vector.broadcast %cst_182 : f32 to vector<8x1xf32>
    %329 = arith.mulf %327, %328 : vector<8x1xf32>
    %330 = vector.broadcast %329 : vector<8x1xf32> to vector<8x256xf32>
    %331 = arith.subf %322, %330 : vector<8x256xf32>
    %332 = arith.mulf %331, %331 : vector<8x256xf32>
    %cst_183 = arith.constant dense<0.000000e+00> : vector<8xf32>
    %333 = vector.multi_reduction <add>, %332, %cst_183 [1] : vector<8x256xf32> to vector<8xf32>
    %334 = vector.shape_cast %333 : vector<8xf32> to vector<8x1xf32>
    %cst_184 = arith.constant dense<0.000000e+00> : vector<8x1xf32>
    %335 = tpu.matmul %3, %334, %cst_184 {dimension_numbers = #tpu.dot_dimension_numbers<[1], [0], [0], [1], [0, 0, 1, 1], [], []>} : vector<8x8xf32>, vector<8x1xf32>, vector<8x1xf32> -> vector<8x1xf32>
    %cst_185 = arith.constant 0.001953125 : f32
    %336 = vector.broadcast %cst_185 : f32 to vector<8x1xf32>
    %337 = arith.mulf %335, %336 : vector<8x1xf32>
    %cst_186 = arith.constant 9.99999974E-6 : f32
    %338 = vector.broadcast %cst_186 : f32 to vector<8x1xf32>
    %339 = arith.addf %337, %338 : vector<8x1xf32>
    %340 = math.rsqrt %339 : vector<8x1xf32>
    %341 = vector.broadcast %340 : vector<8x1xf32> to vector<8x256xf32>
    %342 = arith.mulf %331, %341 : vector<8x256xf32>
    %343 = vector.broadcast %323 : vector<8x1xf32> to vector<8x256xf32>
    %344 = arith.mulf %342, %343 : vector<8x256xf32>
    %345 = vector.broadcast %324 : vector<8x1xf32> to vector<8x256xf32>
    %346 = arith.addf %344, %345 : vector<8x256xf32>
    %347 = arith.negf %346 : vector<8x256xf32>
    %348 = math.exp %347 : vector<8x256xf32>
    %cst_187 = arith.constant 1.000000e+00 : f32
    %349 = vector.broadcast %cst_187 : f32 to vector<8x256xf32>
    %350 = arith.addf %349, %348 : vector<8x256xf32>
    %351 = arith.divf %349, %350 : vector<8x256xf32>
    %352 = arith.mulf %346, %351 : vector<8x256xf32>
    %c0_188 = arith.constant 0 : index
    %c0_189 = arith.constant 0 : index
    %353 = vector.load %arg33[%c0_188, %c0_189] : memref<8x16xf32, #tpu.memory_space<vmem>>, vector<8x16xf32>
    %cst_190 = arith.constant dense<0.000000e+00> : vector<8x1xf32>
    %354 = tpu.matmul %353, %14, %cst_190 {dimension_numbers = #tpu.dot_dimension_numbers<[1], [0], [0], [1], [0, 0, 1, 1], [], []>} : vector<8x16xf32>, vector<16x1xf32>, vector<8x1xf32> -> vector<8x1xf32>
    %c0_191 = arith.constant 0 : index
    %c0_192 = arith.constant 0 : index
    %355 = vector.load %arg34[%c0_191, %c0_192] : memref<8x1xf32, #tpu.memory_space<vmem>>, vector<8x1xf32>
    %356 = arith.addf %354, %355 : vector<8x1xf32>
    %357 = vector.broadcast %356 : vector<8x1xf32> to vector<8x256xf32>
    %358 = arith.addf %352, %357 : vector<8x256xf32>
    %c0_193 = arith.constant 0 : index
    %c0_194 = arith.constant 0 : index
    %359 = vector.load %arg35[%c0_193, %c0_194] : memref<8x72xf32, #tpu.memory_space<vmem>>, vector<8x72xf32>
    %c17_i32_195 = arith.constant 17 : i32
    %360 = tpu.dynamic_rotate %358 by %c17_i32_195 dim 1 : vector<8x256xf32>, i32 -> vector<8x256xf32>
    %361 = vector.extract_strided_slice %2 {offsets = [0, 0], sizes = [1, 256], strides = [1, 1]} : vector<9x256xf32> to vector<1x256xf32>
    %362 = vector.broadcast %361 : vector<1x256xf32> to vector<8x256xf32>
    %363 = arith.mulf %360, %362 : vector<8x256xf32>
    %c0_196 = arith.constant 0 : index
    %c0_197 = arith.constant 0 : index
    %364 = vector.load %arg52[%c0_196, %c0_197] : memref<72x256xf32, #tpu.memory_space<vmem>>, vector<8x256xf32>
    tpu.vector_store %arg52[%c0_196, %c0_197], %363 {strides = array<i32>} : memref<72x256xf32, #tpu.memory_space<vmem>>, vector<8x256xf32>,
    %c16_i32_198 = arith.constant 16 : i32
    %365 = tpu.dynamic_rotate %358 by %c16_i32_198 dim 1 : vector<8x256xf32>, i32 -> vector<8x256xf32>
    %366 = vector.extract_strided_slice %2 {offsets = [1, 0], sizes = [1, 256], strides = [1, 1]} : vector<9x256xf32> to vector<1x256xf32>
    %367 = vector.broadcast %366 : vector<1x256xf32> to vector<8x256xf32>
    %368 = arith.mulf %365, %367 : vector<8x256xf32>
    %c8_199 = arith.constant 8 : index
    %c0_200 = arith.constant 0 : index
    %369 = vector.load %arg52[%c8_199, %c0_200] : memref<72x256xf32, #tpu.memory_space<vmem>>, vector<8x256xf32>
    tpu.vector_store %arg52[%c8_199, %c0_200], %368 {strides = array<i32>} : memref<72x256xf32, #tpu.memory_space<vmem>>, vector<8x256xf32>,
    %c15_i32_201 = arith.constant 15 : i32
    %370 = tpu.dynamic_rotate %358 by %c15_i32_201 dim 1 : vector<8x256xf32>, i32 -> vector<8x256xf32>
    %371 = vector.extract_strided_slice %2 {offsets = [2, 0], sizes = [1, 256], strides = [1, 1]} : vector<9x256xf32> to vector<1x256xf32>
    %372 = vector.broadcast %371 : vector<1x256xf32> to vector<8x256xf32>
    %373 = arith.mulf %370, %372 : vector<8x256xf32>
    %c16_202 = arith.constant 16 : index
    %c0_203 = arith.constant 0 : index
    %374 = vector.load %arg52[%c16_202, %c0_203] : memref<72x256xf32, #tpu.memory_space<vmem>>, vector<8x256xf32>
    tpu.vector_store %arg52[%c16_202, %c0_203], %373 {strides = array<i32>} : memref<72x256xf32, #tpu.memory_space<vmem>>, vector<8x256xf32>,
    %c1_i32_204 = arith.constant 1 : i32
    %375 = tpu.dynamic_rotate %358 by %c1_i32_204 dim 1 : vector<8x256xf32>, i32 -> vector<8x256xf32>
    %376 = vector.extract_strided_slice %2 {offsets = [3, 0], sizes = [1, 256], strides = [1, 1]} : vector<9x256xf32> to vector<1x256xf32>
    %377 = vector.broadcast %376 : vector<1x256xf32> to vector<8x256xf32>
    %378 = arith.mulf %375, %377 : vector<8x256xf32>
    %c24_205 = arith.constant 24 : index
    %c0_206 = arith.constant 0 : index
    %379 = vector.load %arg52[%c24_205, %c0_206] : memref<72x256xf32, #tpu.memory_space<vmem>>, vector<8x256xf32>
    tpu.vector_store %arg52[%c24_205, %c0_206], %378 {strides = array<i32>} : memref<72x256xf32, #tpu.memory_space<vmem>>, vector<8x256xf32>,
    %380 = vector.extract_strided_slice %2 {offsets = [4, 0], sizes = [1, 256], strides = [1, 1]} : vector<9x256xf32> to vector<1x256xf32>
    %381 = vector.broadcast %380 : vector<1x256xf32> to vector<8x256xf32>
    %382 = arith.mulf %358, %381 : vector<8x256xf32>
    %c32_207 = arith.constant 32 : index
    %c0_208 = arith.constant 0 : index
    %383 = vector.load %arg52[%c32_207, %c0_208] : memref<72x256xf32, #tpu.memory_space<vmem>>, vector<8x256xf32>
    tpu.vector_store %arg52[%c32_207, %c0_208], %382 {strides = array<i32>} : memref<72x256xf32, #tpu.memory_space<vmem>>, vector<8x256xf32>,
    %c255_i32_209 = arith.constant 255 : i32
    %384 = tpu.dynamic_rotate %358 by %c255_i32_209 dim 1 : vector<8x256xf32>, i32 -> vector<8x256xf32>
    %385 = vector.extract_strided_slice %2 {offsets = [5, 0], sizes = [1, 256], strides = [1, 1]} : vector<9x256xf32> to vector<1x256xf32>
    %386 = vector.broadcast %385 : vector<1x256xf32> to vector<8x256xf32>
    %387 = arith.mulf %384, %386 : vector<8x256xf32>
    %c40_210 = arith.constant 40 : index
    %c0_211 = arith.constant 0 : index
    %388 = vector.load %arg52[%c40_210, %c0_211] : memref<72x256xf32, #tpu.memory_space<vmem>>, vector<8x256xf32>
    tpu.vector_store %arg52[%c40_210, %c0_211], %387 {strides = array<i32>} : memref<72x256xf32, #tpu.memory_space<vmem>>, vector<8x256xf32>,
    %c241_i32_212 = arith.constant 241 : i32
    %389 = tpu.dynamic_rotate %358 by %c241_i32_212 dim 1 : vector<8x256xf32>, i32 -> vector<8x256xf32>
    %390 = vector.extract_strided_slice %2 {offsets = [6, 0], sizes = [1, 256], strides = [1, 1]} : vector<9x256xf32> to vector<1x256xf32>
    %391 = vector.broadcast %390 : vector<1x256xf32> to vector<8x256xf32>
    %392 = arith.mulf %389, %391 : vector<8x256xf32>
    %c48_213 = arith.constant 48 : index
    %c0_214 = arith.constant 0 : index
    %393 = vector.load %arg52[%c48_213, %c0_214] : memref<72x256xf32, #tpu.memory_space<vmem>>, vector<8x256xf32>
    tpu.vector_store %arg52[%c48_213, %c0_214], %392 {strides = array<i32>} : memref<72x256xf32, #tpu.memory_space<vmem>>, vector<8x256xf32>,
    %c240_i32_215 = arith.constant 240 : i32
    %394 = tpu.dynamic_rotate %358 by %c240_i32_215 dim 1 : vector<8x256xf32>, i32 -> vector<8x256xf32>
    %395 = vector.extract_strided_slice %2 {offsets = [7, 0], sizes = [1, 256], strides = [1, 1]} : vector<9x256xf32> to vector<1x256xf32>
    %396 = vector.broadcast %395 : vector<1x256xf32> to vector<8x256xf32>
    %397 = arith.mulf %394, %396 : vector<8x256xf32>
    %c56_216 = arith.constant 56 : index
    %c0_217 = arith.constant 0 : index
    %398 = vector.load %arg52[%c56_216, %c0_217] : memref<72x256xf32, #tpu.memory_space<vmem>>, vector<8x256xf32>
    tpu.vector_store %arg52[%c56_216, %c0_217], %397 {strides = array<i32>} : memref<72x256xf32, #tpu.memory_space<vmem>>, vector<8x256xf32>,
    %c239_i32_218 = arith.constant 239 : i32
    %399 = tpu.dynamic_rotate %358 by %c239_i32_218 dim 1 : vector<8x256xf32>, i32 -> vector<8x256xf32>
    %400 = vector.extract_strided_slice %2 {offsets = [8, 0], sizes = [1, 256], strides = [1, 1]} : vector<9x256xf32> to vector<1x256xf32>
    %401 = vector.broadcast %400 : vector<1x256xf32> to vector<8x256xf32>
    %402 = arith.mulf %399, %401 : vector<8x256xf32>
    %c64_219 = arith.constant 64 : index
    %c0_220 = arith.constant 0 : index
    %403 = vector.load %arg52[%c64_219, %c0_220] : memref<72x256xf32, #tpu.memory_space<vmem>>, vector<8x256xf32>
    tpu.vector_store %arg52[%c64_219, %c0_220], %402 {strides = array<i32>} : memref<72x256xf32, #tpu.memory_space<vmem>>, vector<8x256xf32>,
    %c0_221 = arith.constant 0 : index
    %c0_222 = arith.constant 0 : index
    %404 = vector.load %arg52[%c0_221, %c0_222] : memref<72x256xf32, #tpu.memory_space<vmem>>, vector<72x256xf32>
    %cst_223 = arith.constant dense<0.000000e+00> : vector<8x256xf32>
    %405 = tpu.matmul %359, %404, %cst_223 {dimension_numbers = #tpu.dot_dimension_numbers<[1], [0], [0], [1], [0, 0, 1, 1], [], []>} : vector<8x72xf32>, vector<72x256xf32>, vector<8x256xf32> -> vector<8x256xf32>
    %c0_224 = arith.constant 0 : index
    %c0_225 = arith.constant 0 : index
    %406 = vector.load %arg36[%c0_224, %c0_225] : memref<8x1xf32, #tpu.memory_space<vmem>>, vector<8x1xf32>
    %407 = vector.broadcast %406 : vector<8x1xf32> to vector<8x256xf32>
    %408 = arith.addf %405, %407 : vector<8x256xf32>
    %c0_226 = arith.constant 0 : index
    %c0_227 = arith.constant 0 : index
    %409 = vector.load %arg37[%c0_226, %c0_227] : memref<8x1xf32, #tpu.memory_space<vmem>>, vector<8x1xf32>
    %c0_228 = arith.constant 0 : index
    %c0_229 = arith.constant 0 : index
    %410 = vector.load %arg38[%c0_228, %c0_229] : memref<8x1xf32, #tpu.memory_space<vmem>>, vector<8x1xf32>
    %cst_230 = arith.constant dense<0.000000e+00> : vector<8xf32>
    %411 = vector.multi_reduction <add>, %408, %cst_230 [1] : vector<8x256xf32> to vector<8xf32>
    %412 = vector.shape_cast %411 : vector<8xf32> to vector<8x1xf32>
    %cst_231 = arith.constant dense<0.000000e+00> : vector<8x1xf32>
    %413 = tpu.matmul %3, %412, %cst_231 {dimension_numbers = #tpu.dot_dimension_numbers<[1], [0], [0], [1], [0, 0, 1, 1], [], []>} : vector<8x8xf32>, vector<8x1xf32>, vector<8x1xf32> -> vector<8x1xf32>
    %cst_232 = arith.constant 0.001953125 : f32
    %414 = vector.broadcast %cst_232 : f32 to vector<8x1xf32>
    %415 = arith.mulf %413, %414 : vector<8x1xf32>
    %416 = vector.broadcast %415 : vector<8x1xf32> to vector<8x256xf32>
    %417 = arith.subf %408, %416 : vector<8x256xf32>
    %418 = arith.mulf %417, %417 : vector<8x256xf32>
    %cst_233 = arith.constant dense<0.000000e+00> : vector<8xf32>
    %419 = vector.multi_reduction <add>, %418, %cst_233 [1] : vector<8x256xf32> to vector<8xf32>
    %420 = vector.shape_cast %419 : vector<8xf32> to vector<8x1xf32>
    %cst_234 = arith.constant dense<0.000000e+00> : vector<8x1xf32>
    %421 = tpu.matmul %3, %420, %cst_234 {dimension_numbers = #tpu.dot_dimension_numbers<[1], [0], [0], [1], [0, 0, 1, 1], [], []>} : vector<8x8xf32>, vector<8x1xf32>, vector<8x1xf32> -> vector<8x1xf32>
    %cst_235 = arith.constant 0.001953125 : f32
    %422 = vector.broadcast %cst_235 : f32 to vector<8x1xf32>
    %423 = arith.mulf %421, %422 : vector<8x1xf32>
    %cst_236 = arith.constant 9.99999974E-6 : f32
    %424 = vector.broadcast %cst_236 : f32 to vector<8x1xf32>
    %425 = arith.addf %423, %424 : vector<8x1xf32>
    %426 = math.rsqrt %425 : vector<8x1xf32>
    %427 = vector.broadcast %426 : vector<8x1xf32> to vector<8x256xf32>
    %428 = arith.mulf %417, %427 : vector<8x256xf32>
    %429 = vector.broadcast %409 : vector<8x1xf32> to vector<8x256xf32>
    %430 = arith.mulf %428, %429 : vector<8x256xf32>
    %431 = vector.broadcast %410 : vector<8x1xf32> to vector<8x256xf32>
    %432 = arith.addf %430, %431 : vector<8x256xf32>
    %433 = arith.negf %432 : vector<8x256xf32>
    %434 = math.exp %433 : vector<8x256xf32>
    %cst_237 = arith.constant 1.000000e+00 : f32
    %435 = vector.broadcast %cst_237 : f32 to vector<8x256xf32>
    %436 = arith.addf %435, %434 : vector<8x256xf32>
    %437 = arith.divf %435, %436 : vector<8x256xf32>
    %438 = arith.mulf %432, %437 : vector<8x256xf32>
    %439 = arith.addf %438, %272 : vector<8x256xf32>
    %c0_238 = arith.constant 0 : index
    %c0_239 = arith.constant 0 : index
    %440 = vector.load %arg39[%c0_238, %c0_239] : memref<8x8xf32, #tpu.memory_space<vmem>>, vector<8x8xf32>
    %c0_240 = arith.constant 0 : index
    %c0_241 = arith.constant 0 : index
    %441 = vector.load %arg40[%c0_240, %c0_241] : memref<8x1xf32, #tpu.memory_space<vmem>>, vector<8x1xf32>
    %c0_242 = arith.constant 0 : index
    %c0_243 = arith.constant 0 : index
    %442 = vector.load %arg41[%c0_242, %c0_243] : memref<8x8xf32, #tpu.memory_space<vmem>>, vector<8x8xf32>
    %c0_244 = arith.constant 0 : index
    %c0_245 = arith.constant 0 : index
    %443 = vector.load %arg42[%c0_244, %c0_245] : memref<8x1xf32, #tpu.memory_space<vmem>>, vector<8x1xf32>
    %c0_246 = arith.constant 0 : index
    %c0_247 = arith.constant 0 : index
    %444 = vector.load %arg43[%c0_246, %c0_247] : memref<8x8xf32, #tpu.memory_space<vmem>>, vector<8x8xf32>
    %c0_248 = arith.constant 0 : index
    %c0_249 = arith.constant 0 : index
    %445 = vector.load %arg44[%c0_248, %c0_249] : memref<8x1xf32, #tpu.memory_space<vmem>>, vector<8x1xf32>
    %c0_250 = arith.constant 0 : index
    %c0_251 = arith.constant 0 : index
    %446 = vector.load %arg45[%c0_250, %c0_251] : memref<8x8xf32, #tpu.memory_space<vmem>>, vector<8x8xf32>
    %c0_252 = arith.constant 0 : index
    %c0_253 = arith.constant 0 : index
    %447 = vector.load %arg46[%c0_252, %c0_253] : memref<8x1xf32, #tpu.memory_space<vmem>>, vector<8x1xf32>
    %c0_254 = arith.constant 0 : index
    %c0_255 = arith.constant 0 : index
    %448 = vector.load %arg47[%c0_254, %c0_255] : memref<8x1xf32, #tpu.memory_space<vmem>>, vector<8x1xf32>
    %c0_256 = arith.constant 0 : index
    %c0_257 = arith.constant 0 : index
    %449 = vector.load %arg48[%c0_256, %c0_257] : memref<8x1xf32, #tpu.memory_space<vmem>>, vector<8x1xf32>
    %cst_258 = arith.constant dense<0.000000e+00> : vector<8x256xf32>
    %450 = tpu.matmul %440, %439, %cst_258 {dimension_numbers = #tpu.dot_dimension_numbers<[1], [0], [0], [1], [0, 0, 1, 1], [], []>} : vector<8x8xf32>, vector<8x256xf32>, vector<8x256xf32> -> vector<8x256xf32>
    %451 = vector.broadcast %441 : vector<8x1xf32> to vector<8x256xf32>
    %452 = arith.addf %450, %451 : vector<8x256xf32>
    %cst_259 = arith.constant dense<0.000000e+00> : vector<8x256xf32>
    %453 = tpu.matmul %442, %439, %cst_259 {dimension_numbers = #tpu.dot_dimension_numbers<[1], [0], [0], [1], [0, 0, 1, 1], [], []>} : vector<8x8xf32>, vector<8x256xf32>, vector<8x256xf32> -> vector<8x256xf32>
    %454 = vector.broadcast %443 : vector<8x1xf32> to vector<8x256xf32>
    %455 = arith.addf %453, %454 : vector<8x256xf32>
    %cst_260 = arith.constant dense<0.000000e+00> : vector<8x256xf32>
    %456 = tpu.matmul %444, %439, %cst_260 {dimension_numbers = #tpu.dot_dimension_numbers<[1], [0], [0], [1], [0, 0, 1, 1], [], []>} : vector<8x8xf32>, vector<8x256xf32>, vector<8x256xf32> -> vector<8x256xf32>
    %457 = vector.broadcast %445 : vector<8x1xf32> to vector<8x256xf32>
    %458 = arith.addf %456, %457 : vector<8x256xf32>
    %cst_261 = arith.constant dense<0.000000e+00> : vector<256x8xf32>
    %459 = tpu.matmul %4, %452, %cst_261 {dimension_numbers = #tpu.dot_dimension_numbers<[1], [1], [0], [0], [0, 0, 1, 0], [], []>} : vector<256x256xf32>, vector<8x256xf32>, vector<256x8xf32> -> vector<256x8xf32>
    %460 = vector.extract_strided_slice %459 {offsets = [0, 0], sizes = [256, 4], strides = [1, 1]} : vector<256x8xf32> to vector<256x4xf32>
    %461 = vector.extract_strided_slice %455 {offsets = [0, 0], sizes = [4, 256], strides = [1, 1]} : vector<8x256xf32> to vector<4x256xf32>
    %cst_262 = arith.constant dense<0.000000e+00> : vector<256x256xf32>
    %462 = tpu.matmul %460, %461, %cst_262 {dimension_numbers = #tpu.dot_dimension_numbers<[1], [0], [0], [1], [0, 0, 1, 1], [], []>} : vector<256x4xf32>, vector<4x256xf32>, vector<256x256xf32> -> vector<256x256xf32>
    %cst_263 = arith.constant 5.000000e-01 : f32
    %463 = vector.broadcast %cst_263 : f32 to vector<256x256xf32>
    %464 = arith.mulf %462, %463 : vector<256x256xf32>
    %cst_264 = arith.constant dense<0xFF800000> : vector<256xf32>
    %465 = vector.multi_reduction <maximumf>, %464, %cst_264 [1] : vector<256x256xf32> to vector<256xf32>
    %466 = vector.shape_cast %465 : vector<256xf32> to vector<256x1xf32>
    %467 = vector.broadcast %466 : vector<256x1xf32> to vector<256x256xf32>
    %468 = arith.subf %464, %467 : vector<256x256xf32>
    %469 = math.exp %468 : vector<256x256xf32>
    %cst_265 = arith.constant dense<0.000000e+00> : vector<256xf32>
    %470 = vector.multi_reduction <add>, %469, %cst_265 [1] : vector<256x256xf32> to vector<256xf32>
    %471 = vector.shape_cast %470 : vector<256xf32> to vector<256x1xf32>
    %cst_266 = arith.constant 1.000000e+00 : f32
    %472 = vector.broadcast %cst_266 : f32 to vector<256x1xf32>
    %473 = arith.divf %472, %471 : vector<256x1xf32>
    %474 = vector.broadcast %473 : vector<256x1xf32> to vector<256x256xf32>
    %475 = arith.mulf %469, %474 : vector<256x256xf32>
    %476 = vector.extract_strided_slice %458 {offsets = [0, 0], sizes = [4, 256], strides = [1, 1]} : vector<8x256xf32> to vector<4x256xf32>
    %cst_267 = arith.constant dense<0.000000e+00> : vector<4x256xf32>
    %477 = tpu.matmul %476, %475, %cst_267 {dimension_numbers = #tpu.dot_dimension_numbers<[1], [1], [0], [0], [0, 0, 1, 0], [], []>} : vector<4x256xf32>, vector<256x256xf32>, vector<4x256xf32> -> vector<4x256xf32>
    %478 = vector.extract_strided_slice %446 {offsets = [0, 0], sizes = [8, 4], strides = [1, 1]} : vector<8x8xf32> to vector<8x4xf32>
    %cst_268 = arith.constant dense<0.000000e+00> : vector<8x256xf32>
    %479 = tpu.matmul %478, %477, %cst_268 {dimension_numbers = #tpu.dot_dimension_numbers<[1], [0], [0], [1], [0, 0, 1, 1], [], []>} : vector<8x4xf32>, vector<4x256xf32>, vector<8x256xf32> -> vector<8x256xf32>
    %480 = vector.extract_strided_slice %459 {offsets = [0, 4], sizes = [256, 4], strides = [1, 1]} : vector<256x8xf32> to vector<256x4xf32>
    %481 = vector.extract_strided_slice %455 {offsets = [4, 0], sizes = [4, 256], strides = [1, 1]} : vector<8x256xf32> to vector<4x256xf32>
    %cst_269 = arith.constant dense<0.000000e+00> : vector<256x256xf32>
    %482 = tpu.matmul %480, %481, %cst_269 {dimension_numbers = #tpu.dot_dimension_numbers<[1], [0], [0], [1], [0, 0, 1, 1], [], []>} : vector<256x4xf32>, vector<4x256xf32>, vector<256x256xf32> -> vector<256x256xf32>
    %cst_270 = arith.constant 5.000000e-01 : f32
    %483 = vector.broadcast %cst_270 : f32 to vector<256x256xf32>
    %484 = arith.mulf %482, %483 : vector<256x256xf32>
    %cst_271 = arith.constant dense<0xFF800000> : vector<256xf32>
    %485 = vector.multi_reduction <maximumf>, %484, %cst_271 [1] : vector<256x256xf32> to vector<256xf32>
    %486 = vector.shape_cast %485 : vector<256xf32> to vector<256x1xf32>
    %487 = vector.broadcast %486 : vector<256x1xf32> to vector<256x256xf32>
    %488 = arith.subf %484, %487 : vector<256x256xf32>
    %489 = math.exp %488 : vector<256x256xf32>
    %cst_272 = arith.constant dense<0.000000e+00> : vector<256xf32>
    %490 = vector.multi_reduction <add>, %489, %cst_272 [1] : vector<256x256xf32> to vector<256xf32>
    %491 = vector.shape_cast %490 : vector<256xf32> to vector<256x1xf32>
    %cst_273 = arith.constant 1.000000e+00 : f32
    %492 = vector.broadcast %cst_273 : f32 to vector<256x1xf32>
    %493 = arith.divf %492, %491 : vector<256x1xf32>
    %494 = vector.broadcast %493 : vector<256x1xf32> to vector<256x256xf32>
    %495 = arith.mulf %489, %494 : vector<256x256xf32>
    %496 = vector.extract_strided_slice %458 {offsets = [4, 0], sizes = [4, 256], strides = [1, 1]} : vector<8x256xf32> to vector<4x256xf32>
    %cst_274 = arith.constant dense<0.000000e+00> : vector<4x256xf32>
    %497 = tpu.matmul %496, %495, %cst_274 {dimension_numbers = #tpu.dot_dimension_numbers<[1], [1], [0], [0], [0, 0, 1, 0], [], []>} : vector<4x256xf32>, vector<256x256xf32>, vector<4x256xf32> -> vector<4x256xf32>
    %498 = vector.extract_strided_slice %446 {offsets = [0, 4], sizes = [8, 4], strides = [1, 1]} : vector<8x8xf32> to vector<8x4xf32>
    %cst_275 = arith.constant dense<0.000000e+00> : vector<8x256xf32>
    %499 = tpu.matmul %498, %497, %cst_275 {dimension_numbers = #tpu.dot_dimension_numbers<[1], [0], [0], [1], [0, 0, 1, 1], [], []>} : vector<8x4xf32>, vector<4x256xf32>, vector<8x256xf32> -> vector<8x256xf32>
    %500 = arith.addf %479, %499 : vector<8x256xf32>
    %501 = vector.broadcast %447 : vector<8x1xf32> to vector<8x256xf32>
    %502 = arith.addf %500, %501 : vector<8x256xf32>
    %503 = arith.addf %502, %439 : vector<8x256xf32>
    %cst_276 = arith.constant dense<0.000000e+00> : vector<8xf32>
    %504 = vector.multi_reduction <add>, %503, %cst_276 [1] : vector<8x256xf32> to vector<8xf32>
    %505 = vector.shape_cast %504 : vector<8xf32> to vector<8x1xf32>
    %cst_277 = arith.constant dense<0.000000e+00> : vector<8x1xf32>
    %506 = tpu.matmul %3, %505, %cst_277 {dimension_numbers = #tpu.dot_dimension_numbers<[1], [0], [0], [1], [0, 0, 1, 1], [], []>} : vector<8x8xf32>, vector<8x1xf32>, vector<8x1xf32> -> vector<8x1xf32>
    %cst_278 = arith.constant 0.001953125 : f32
    %507 = vector.broadcast %cst_278 : f32 to vector<8x1xf32>
    %508 = arith.mulf %506, %507 : vector<8x1xf32>
    %509 = vector.broadcast %508 : vector<8x1xf32> to vector<8x256xf32>
    %510 = arith.subf %503, %509 : vector<8x256xf32>
    %511 = arith.mulf %510, %510 : vector<8x256xf32>
    %cst_279 = arith.constant dense<0.000000e+00> : vector<8xf32>
    %512 = vector.multi_reduction <add>, %511, %cst_279 [1] : vector<8x256xf32> to vector<8xf32>
    %513 = vector.shape_cast %512 : vector<8xf32> to vector<8x1xf32>
    %cst_280 = arith.constant dense<0.000000e+00> : vector<8x1xf32>
    %514 = tpu.matmul %3, %513, %cst_280 {dimension_numbers = #tpu.dot_dimension_numbers<[1], [0], [0], [1], [0, 0, 1, 1], [], []>} : vector<8x8xf32>, vector<8x1xf32>, vector<8x1xf32> -> vector<8x1xf32>
    %cst_281 = arith.constant 0.001953125 : f32
    %515 = vector.broadcast %cst_281 : f32 to vector<8x1xf32>
    %516 = arith.mulf %514, %515 : vector<8x1xf32>
    %cst_282 = arith.constant 9.99999974E-6 : f32
    %517 = vector.broadcast %cst_282 : f32 to vector<8x1xf32>
    %518 = arith.addf %516, %517 : vector<8x1xf32>
    %519 = math.rsqrt %518 : vector<8x1xf32>
    %520 = vector.broadcast %519 : vector<8x1xf32> to vector<8x256xf32>
    %521 = arith.mulf %510, %520 : vector<8x256xf32>
    %522 = vector.broadcast %448 : vector<8x1xf32> to vector<8x256xf32>
    %523 = arith.mulf %521, %522 : vector<8x256xf32>
    %524 = vector.broadcast %449 : vector<8x1xf32> to vector<8x256xf32>
    %525 = arith.addf %523, %524 : vector<8x256xf32>
    %c0_283 = arith.constant 0 : index
    %c0_284 = arith.constant 0 : index
    %526 = vector.load %arg49[%c0_283, %c0_284] : memref<8x72xf32, #tpu.memory_space<vmem>>, vector<8x72xf32>
    %c17_i32_285 = arith.constant 17 : i32
    %527 = tpu.dynamic_rotate %525 by %c17_i32_285 dim 1 : vector<8x256xf32>, i32 -> vector<8x256xf32>
    %528 = vector.extract_strided_slice %2 {offsets = [0, 0], sizes = [1, 256], strides = [1, 1]} : vector<9x256xf32> to vector<1x256xf32>
    %529 = vector.broadcast %528 : vector<1x256xf32> to vector<8x256xf32>
    %530 = arith.mulf %527, %529 : vector<8x256xf32>
    %c0_286 = arith.constant 0 : index
    %c0_287 = arith.constant 0 : index
    %531 = vector.load %arg52[%c0_286, %c0_287] : memref<72x256xf32, #tpu.memory_space<vmem>>, vector<8x256xf32>
    tpu.vector_store %arg52[%c0_286, %c0_287], %530 {strides = array<i32>} : memref<72x256xf32, #tpu.memory_space<vmem>>, vector<8x256xf32>,
    %c16_i32_288 = arith.constant 16 : i32
    %532 = tpu.dynamic_rotate %525 by %c16_i32_288 dim 1 : vector<8x256xf32>, i32 -> vector<8x256xf32>
    %533 = vector.extract_strided_slice %2 {offsets = [1, 0], sizes = [1, 256], strides = [1, 1]} : vector<9x256xf32> to vector<1x256xf32>
    %534 = vector.broadcast %533 : vector<1x256xf32> to vector<8x256xf32>
    %535 = arith.mulf %532, %534 : vector<8x256xf32>
    %c8_289 = arith.constant 8 : index
    %c0_290 = arith.constant 0 : index
    %536 = vector.load %arg52[%c8_289, %c0_290] : memref<72x256xf32, #tpu.memory_space<vmem>>, vector<8x256xf32>
    tpu.vector_store %arg52[%c8_289, %c0_290], %535 {strides = array<i32>} : memref<72x256xf32, #tpu.memory_space<vmem>>, vector<8x256xf32>,
    %c15_i32_291 = arith.constant 15 : i32
    %537 = tpu.dynamic_rotate %525 by %c15_i32_291 dim 1 : vector<8x256xf32>, i32 -> vector<8x256xf32>
    %538 = vector.extract_strided_slice %2 {offsets = [2, 0], sizes = [1, 256], strides = [1, 1]} : vector<9x256xf32> to vector<1x256xf32>
    %539 = vector.broadcast %538 : vector<1x256xf32> to vector<8x256xf32>
    %540 = arith.mulf %537, %539 : vector<8x256xf32>
    %c16_292 = arith.constant 16 : index
    %c0_293 = arith.constant 0 : index
    %541 = vector.load %arg52[%c16_292, %c0_293] : memref<72x256xf32, #tpu.memory_space<vmem>>, vector<8x256xf32>
    tpu.vector_store %arg52[%c16_292, %c0_293], %540 {strides = array<i32>} : memref<72x256xf32, #tpu.memory_space<vmem>>, vector<8x256xf32>,
    %c1_i32_294 = arith.constant 1 : i32
    %542 = tpu.dynamic_rotate %525 by %c1_i32_294 dim 1 : vector<8x256xf32>, i32 -> vector<8x256xf32>
    %543 = vector.extract_strided_slice %2 {offsets = [3, 0], sizes = [1, 256], strides = [1, 1]} : vector<9x256xf32> to vector<1x256xf32>
    %544 = vector.broadcast %543 : vector<1x256xf32> to vector<8x256xf32>
    %545 = arith.mulf %542, %544 : vector<8x256xf32>
    %c24_295 = arith.constant 24 : index
    %c0_296 = arith.constant 0 : index
    %546 = vector.load %arg52[%c24_295, %c0_296] : memref<72x256xf32, #tpu.memory_space<vmem>>, vector<8x256xf32>
    tpu.vector_store %arg52[%c24_295, %c0_296], %545 {strides = array<i32>} : memref<72x256xf32, #tpu.memory_space<vmem>>, vector<8x256xf32>,
    %547 = vector.extract_strided_slice %2 {offsets = [4, 0], sizes = [1, 256], strides = [1, 1]} : vector<9x256xf32> to vector<1x256xf32>
    %548 = vector.broadcast %547 : vector<1x256xf32> to vector<8x256xf32>
    %549 = arith.mulf %525, %548 : vector<8x256xf32>
    %c32_297 = arith.constant 32 : index
    %c0_298 = arith.constant 0 : index
    %550 = vector.load %arg52[%c32_297, %c0_298] : memref<72x256xf32, #tpu.memory_space<vmem>>, vector<8x256xf32>
    tpu.vector_store %arg52[%c32_297, %c0_298], %549 {strides = array<i32>} : memref<72x256xf32, #tpu.memory_space<vmem>>, vector<8x256xf32>,
    %c255_i32_299 = arith.constant 255 : i32
    %551 = tpu.dynamic_rotate %525 by %c255_i32_299 dim 1 : vector<8x256xf32>, i32 -> vector<8x256xf32>
    %552 = vector.extract_strided_slice %2 {offsets = [5, 0], sizes = [1, 256], strides = [1, 1]} : vector<9x256xf32> to vector<1x256xf32>
    %553 = vector.broadcast %552 : vector<1x256xf32> to vector<8x256xf32>
    %554 = arith.mulf %551, %553 : vector<8x256xf32>
    %c40_300 = arith.constant 40 : index
    %c0_301 = arith.constant 0 : index
    %555 = vector.load %arg52[%c40_300, %c0_301] : memref<72x256xf32, #tpu.memory_space<vmem>>, vector<8x256xf32>
    tpu.vector_store %arg52[%c40_300, %c0_301], %554 {strides = array<i32>} : memref<72x256xf32, #tpu.memory_space<vmem>>, vector<8x256xf32>,
    %c241_i32_302 = arith.constant 241 : i32
    %556 = tpu.dynamic_rotate %525 by %c241_i32_302 dim 1 : vector<8x256xf32>, i32 -> vector<8x256xf32>
    %557 = vector.extract_strided_slice %2 {offsets = [6, 0], sizes = [1, 256], strides = [1, 1]} : vector<9x256xf32> to vector<1x256xf32>
    %558 = vector.broadcast %557 : vector<1x256xf32> to vector<8x256xf32>
    %559 = arith.mulf %556, %558 : vector<8x256xf32>
    %c48_303 = arith.constant 48 : index
    %c0_304 = arith.constant 0 : index
    %560 = vector.load %arg52[%c48_303, %c0_304] : memref<72x256xf32, #tpu.memory_space<vmem>>, vector<8x256xf32>
    tpu.vector_store %arg52[%c48_303, %c0_304], %559 {strides = array<i32>} : memref<72x256xf32, #tpu.memory_space<vmem>>, vector<8x256xf32>,
    %c240_i32_305 = arith.constant 240 : i32
    %561 = tpu.dynamic_rotate %525 by %c240_i32_305 dim 1 : vector<8x256xf32>, i32 -> vector<8x256xf32>
    %562 = vector.extract_strided_slice %2 {offsets = [7, 0], sizes = [1, 256], strides = [1, 1]} : vector<9x256xf32> to vector<1x256xf32>
    %563 = vector.broadcast %562 : vector<1x256xf32> to vector<8x256xf32>
    %564 = arith.mulf %561, %563 : vector<8x256xf32>
    %c56_306 = arith.constant 56 : index
    %c0_307 = arith.constant 0 : index
    %565 = vector.load %arg52[%c56_306, %c0_307] : memref<72x256xf32, #tpu.memory_space<vmem>>, vector<8x256xf32>
    tpu.vector_store %arg52[%c56_306, %c0_307], %564 {strides = array<i32>} : memref<72x256xf32, #tpu.memory_space<vmem>>, vector<8x256xf32>,
    %c239_i32_308 = arith.constant 239 : i32
    %566 = tpu.dynamic_rotate %525 by %c239_i32_308 dim 1 : vector<8x256xf32>, i32 -> vector<8x256xf32>
    %567 = vector.extract_strided_slice %2 {offsets = [8, 0], sizes = [1, 256], strides = [1, 1]} : vector<9x256xf32> to vector<1x256xf32>
    %568 = vector.broadcast %567 : vector<1x256xf32> to vector<8x256xf32>
    %569 = arith.mulf %566, %568 : vector<8x256xf32>
    %c64_309 = arith.constant 64 : index
    %c0_310 = arith.constant 0 : index
    %570 = vector.load %arg52[%c64_309, %c0_310] : memref<72x256xf32, #tpu.memory_space<vmem>>, vector<8x256xf32>
    tpu.vector_store %arg52[%c64_309, %c0_310], %569 {strides = array<i32>} : memref<72x256xf32, #tpu.memory_space<vmem>>, vector<8x256xf32>,
    %c0_311 = arith.constant 0 : index
    %c0_312 = arith.constant 0 : index
    %571 = vector.load %arg52[%c0_311, %c0_312] : memref<72x256xf32, #tpu.memory_space<vmem>>, vector<72x256xf32>
    %cst_313 = arith.constant dense<0.000000e+00> : vector<8x256xf32>
    %572 = tpu.matmul %526, %571, %cst_313 {dimension_numbers = #tpu.dot_dimension_numbers<[1], [0], [0], [1], [0, 0, 1, 1], [], []>} : vector<8x72xf32>, vector<72x256xf32>, vector<8x256xf32> -> vector<8x256xf32>
    %c0_314 = arith.constant 0 : index
    %c0_315 = arith.constant 0 : index
    %573 = vector.load %arg6[%c0_314, %c0_315] : memref<256x128xf32, #tpu.memory_space<vmem>>, vector<256x128xf32>
    %cst_316 = arith.constant dense<0.000000e+00> : vector<8x128xf32>
    %574 = tpu.matmul %572, %573, %cst_316 {dimension_numbers = #tpu.dot_dimension_numbers<[1], [0], [0], [1], [0, 0, 1, 1], [], []>} : vector<8x256xf32>, vector<256x128xf32>, vector<8x128xf32> -> vector<8x128xf32>
    %c0_317 = arith.constant 0 : index
    %c0_318 = arith.constant 0 : index
    %575 = vector.load %arg50[%c0_317, %c0_318] : memref<8x1xf32, #tpu.memory_space<vmem>>, vector<8x1xf32>
    %576 = vector.broadcast %575 : vector<8x1xf32> to vector<8x128xf32>
    %577 = arith.addf %574, %576 : vector<8x128xf32>
    %c0_319 = arith.constant 0 : index
    %c0_320 = arith.constant 0 : index
    %c0_321 = arith.constant 0 : index
    %578 = vector.load %arg51[%c0_319, %c0_320, %c0_321] : memref<1x8x128xf32, #tpu.memory_space<vmem>>, vector<1x8x128xf32>
    %579 = vector.shape_cast %578 : vector<1x8x128xf32> to vector<8x128xf32>
    %580 = vector.shape_cast %577 : vector<8x128xf32> to vector<1x8x128xf32>
    tpu.vector_store %arg51[%c0_319, %c0_320, %c0_321], %580 {strides = array<i32>} : memref<1x8x128xf32, #tpu.memory_space<vmem>>, vector<1x8x128xf32>,
    return
  }
  func.func @transform_0(%arg0: i32) -> (i32, i32, i32) {
    %c0_i32 = arith.constant 0 : i32
    %c0_i32_0 = arith.constant 0 : i32
    %c0_i32_1 = arith.constant 0 : i32
    return %arg0, %c0_i32, %c0_i32_0 : i32, i32, i32
  }
  func.func @transform_1(%arg0: i32) -> (i32, i32, i32) {
    %c0_i32 = arith.constant 0 : i32
    %c0_i32_0 = arith.constant 0 : i32
    %c0_i32_1 = arith.constant 0 : i32
    return %arg0, %c0_i32, %c0_i32_0 : i32, i32, i32
  }
  func.func @transform_2(%arg0: i32) -> (i32, i32) {
    %c0_i32 = arith.constant 0 : i32
    %c0_i32_0 = arith.constant 0 : i32
    %c0_i32_1 = arith.constant 0 : i32
    return %c0_i32, %c0_i32_0 : i32, i32
  }
  func.func @transform_3(%arg0: i32) -> (i32, i32) {
    %c0_i32 = arith.constant 0 : i32
    %c0_i32_0 = arith.constant 0 : i32
    %c0_i32_1 = arith.constant 0 : i32
    return %c0_i32, %c0_i32_0 : i32, i32
  }
  func.func @transform_4(%arg0: i32) -> (i32, i32) {
    %c0_i32 = arith.constant 0 : i32
    %c0_i32_0 = arith.constant 0 : i32
    %c0_i32_1 = arith.constant 0 : i32
    return %c0_i32, %c0_i32_0 : i32, i32
  }
  func.func @transform_5(%arg0: i32) -> (i32, i32) {
    %c0_i32 = arith.constant 0 : i32
    %c0_i32_0 = arith.constant 0 : i32
    %c0_i32_1 = arith.constant 0 : i32
    return %c0_i32, %c0_i32_0 : i32, i32
  }
  func.func @transform_6(%arg0: i32) -> (i32, i32) {
    %c0_i32 = arith.constant 0 : i32
    %c0_i32_0 = arith.constant 0 : i32
    %c0_i32_1 = arith.constant 0 : i32
    return %c0_i32, %c0_i32_0 : i32, i32
  }
  func.func @transform_7(%arg0: i32) -> (i32, i32) {
    %c0_i32 = arith.constant 0 : i32
    %c0_i32_0 = arith.constant 0 : i32
    %c0_i32_1 = arith.constant 0 : i32
    return %c0_i32, %c0_i32_0 : i32, i32
  }
  func.func @transform_8(%arg0: i32) -> (i32, i32) {
    %c0_i32 = arith.constant 0 : i32
    %c0_i32_0 = arith.constant 0 : i32
    %c0_i32_1 = arith.constant 0 : i32
    return %c0_i32, %c0_i32_0 : i32, i32
  }
  func.func @transform_9(%arg0: i32) -> (i32, i32) {
    %c0_i32 = arith.constant 0 : i32
    %c0_i32_0 = arith.constant 0 : i32
    %c0_i32_1 = arith.constant 0 : i32
    return %c0_i32, %c0_i32_0 : i32, i32
  }
  func.func @transform_10(%arg0: i32) -> (i32, i32) {
    %c0_i32 = arith.constant 0 : i32
    %c0_i32_0 = arith.constant 0 : i32
    %c0_i32_1 = arith.constant 0 : i32
    return %c0_i32, %c0_i32_0 : i32, i32
  }
  func.func @transform_11(%arg0: i32) -> (i32, i32) {
    %c0_i32 = arith.constant 0 : i32
    %c0_i32_0 = arith.constant 0 : i32
    %c0_i32_1 = arith.constant 0 : i32
    return %c0_i32, %c0_i32_0 : i32, i32
  }
  func.func @transform_12(%arg0: i32) -> (i32, i32) {
    %c0_i32 = arith.constant 0 : i32
    %c0_i32_0 = arith.constant 0 : i32
    %c0_i32_1 = arith.constant 0 : i32
    return %c0_i32, %c0_i32_0 : i32, i32
  }
  func.func @transform_13(%arg0: i32) -> (i32, i32) {
    %c0_i32 = arith.constant 0 : i32
    %c0_i32_0 = arith.constant 0 : i32
    %c0_i32_1 = arith.constant 0 : i32
    return %c0_i32, %c0_i32_0 : i32, i32
  }
  func.func @transform_14(%arg0: i32) -> (i32, i32) {
    %c0_i32 = arith.constant 0 : i32
    %c0_i32_0 = arith.constant 0 : i32
    %c0_i32_1 = arith.constant 0 : i32
    return %c0_i32, %c0_i32_0 : i32, i32
  }
  func.func @transform_15(%arg0: i32) -> (i32, i32) {
    %c0_i32 = arith.constant 0 : i32
    %c0_i32_0 = arith.constant 0 : i32
    %c0_i32_1 = arith.constant 0 : i32
    return %c0_i32, %c0_i32_0 : i32, i32
  }
  func.func @transform_16(%arg0: i32) -> (i32, i32) {
    %c0_i32 = arith.constant 0 : i32
    %c0_i32_0 = arith.constant 0 : i32
    %c0_i32_1 = arith.constant 0 : i32
    return %c0_i32, %c0_i32_0 : i32, i32
  }
  func.func @transform_17(%arg0: i32) -> (i32, i32) {
    %c0_i32 = arith.constant 0 : i32
    %c0_i32_0 = arith.constant 0 : i32
    %c0_i32_1 = arith.constant 0 : i32
    return %c0_i32, %c0_i32_0 : i32, i32
  }
  func.func @transform_18(%arg0: i32) -> (i32, i32) {
    %c0_i32 = arith.constant 0 : i32
    %c0_i32_0 = arith.constant 0 : i32
    %c0_i32_1 = arith.constant 0 : i32
    return %c0_i32, %c0_i32_0 : i32, i32
  }
  func.func @transform_19(%arg0: i32) -> (i32, i32) {
    %c0_i32 = arith.constant 0 : i32
    %c0_i32_0 = arith.constant 0 : i32
    %c0_i32_1 = arith.constant 0 : i32
    return %c0_i32, %c0_i32_0 : i32, i32
  }
  func.func @transform_20(%arg0: i32) -> (i32, i32) {
    %c0_i32 = arith.constant 0 : i32
    %c0_i32_0 = arith.constant 0 : i32
    %c0_i32_1 = arith.constant 0 : i32
    return %c0_i32, %c0_i32_0 : i32, i32
  }
  func.func @transform_21(%arg0: i32) -> (i32, i32) {
    %c0_i32 = arith.constant 0 : i32
    %c0_i32_0 = arith.constant 0 : i32
    %c0_i32_1 = arith.constant 0 : i32
    return %c0_i32, %c0_i32_0 : i32, i32
  }
  func.func @transform_22(%arg0: i32) -> (i32, i32) {
    %c0_i32 = arith.constant 0 : i32
    %c0_i32_0 = arith.constant 0 : i32
    %c0_i32_1 = arith.constant 0 : i32
    return %c0_i32, %c0_i32_0 : i32, i32
  }
  func.func @transform_23(%arg0: i32) -> (i32, i32) {
    %c0_i32 = arith.constant 0 : i32
    %c0_i32_0 = arith.constant 0 : i32
    %c0_i32_1 = arith.constant 0 : i32
    return %c0_i32, %c0_i32_0 : i32, i32
  }
  func.func @transform_24(%arg0: i32) -> (i32, i32) {
    %c0_i32 = arith.constant 0 : i32
    %c0_i32_0 = arith.constant 0 : i32
    %c0_i32_1 = arith.constant 0 : i32
    return %c0_i32, %c0_i32_0 : i32, i32
  }
  func.func @transform_25(%arg0: i32) -> (i32, i32) {
    %c0_i32 = arith.constant 0 : i32
    %c0_i32_0 = arith.constant 0 : i32
    %c0_i32_1 = arith.constant 0 : i32
    return %c0_i32, %c0_i32_0 : i32, i32
  }
  func.func @transform_26(%arg0: i32) -> (i32, i32) {
    %c0_i32 = arith.constant 0 : i32
    %c0_i32_0 = arith.constant 0 : i32
    %c0_i32_1 = arith.constant 0 : i32
    return %c0_i32, %c0_i32_0 : i32, i32
  }
  func.func @transform_27(%arg0: i32) -> (i32, i32) {
    %c0_i32 = arith.constant 0 : i32
    %c0_i32_0 = arith.constant 0 : i32
    %c0_i32_1 = arith.constant 0 : i32
    return %c0_i32, %c0_i32_0 : i32, i32
  }
  func.func @transform_28(%arg0: i32) -> (i32, i32) {
    %c0_i32 = arith.constant 0 : i32
    %c0_i32_0 = arith.constant 0 : i32
    %c0_i32_1 = arith.constant 0 : i32
    return %c0_i32, %c0_i32_0 : i32, i32
  }
  func.func @transform_29(%arg0: i32) -> (i32, i32) {
    %c0_i32 = arith.constant 0 : i32
    %c0_i32_0 = arith.constant 0 : i32
    %c0_i32_1 = arith.constant 0 : i32
    return %c0_i32, %c0_i32_0 : i32, i32
  }
  func.func @transform_30(%arg0: i32) -> (i32, i32) {
    %c0_i32 = arith.constant 0 : i32
    %c0_i32_0 = arith.constant 0 : i32
    %c0_i32_1 = arith.constant 0 : i32
    return %c0_i32, %c0_i32_0 : i32, i32
  }
  func.func @transform_31(%arg0: i32) -> (i32, i32) {
    %c0_i32 = arith.constant 0 : i32
    %c0_i32_0 = arith.constant 0 : i32
    %c0_i32_1 = arith.constant 0 : i32
    return %c0_i32, %c0_i32_0 : i32, i32
  }
  func.func @transform_32(%arg0: i32) -> (i32, i32) {
    %c0_i32 = arith.constant 0 : i32
    %c0_i32_0 = arith.constant 0 : i32
    %c0_i32_1 = arith.constant 0 : i32
    return %c0_i32, %c0_i32_0 : i32, i32
  }
  func.func @transform_33(%arg0: i32) -> (i32, i32) {
    %c0_i32 = arith.constant 0 : i32
    %c0_i32_0 = arith.constant 0 : i32
    %c0_i32_1 = arith.constant 0 : i32
    return %c0_i32, %c0_i32_0 : i32, i32
  }
  func.func @transform_34(%arg0: i32) -> (i32, i32) {
    %c0_i32 = arith.constant 0 : i32
    %c0_i32_0 = arith.constant 0 : i32
    %c0_i32_1 = arith.constant 0 : i32
    return %c0_i32, %c0_i32_0 : i32, i32
  }
  func.func @transform_35(%arg0: i32) -> (i32, i32) {
    %c0_i32 = arith.constant 0 : i32
    %c0_i32_0 = arith.constant 0 : i32
    %c0_i32_1 = arith.constant 0 : i32
    return %c0_i32, %c0_i32_0 : i32, i32
  }
  func.func @transform_36(%arg0: i32) -> (i32, i32) {
    %c0_i32 = arith.constant 0 : i32
    %c0_i32_0 = arith.constant 0 : i32
    %c0_i32_1 = arith.constant 0 : i32
    return %c0_i32, %c0_i32_0 : i32, i32
  }
  func.func @transform_37(%arg0: i32) -> (i32, i32) {
    %c0_i32 = arith.constant 0 : i32
    %c0_i32_0 = arith.constant 0 : i32
    %c0_i32_1 = arith.constant 0 : i32
    return %c0_i32, %c0_i32_0 : i32, i32
  }
  func.func @transform_38(%arg0: i32) -> (i32, i32) {
    %c0_i32 = arith.constant 0 : i32
    %c0_i32_0 = arith.constant 0 : i32
    %c0_i32_1 = arith.constant 0 : i32
    return %c0_i32, %c0_i32_0 : i32, i32
  }
  func.func @transform_39(%arg0: i32) -> (i32, i32) {
    %c0_i32 = arith.constant 0 : i32
    %c0_i32_0 = arith.constant 0 : i32
    %c0_i32_1 = arith.constant 0 : i32
    return %c0_i32, %c0_i32_0 : i32, i32
  }
  func.func @transform_40(%arg0: i32) -> (i32, i32) {
    %c0_i32 = arith.constant 0 : i32
    %c0_i32_0 = arith.constant 0 : i32
    %c0_i32_1 = arith.constant 0 : i32
    return %c0_i32, %c0_i32_0 : i32, i32
  }
  func.func @transform_41(%arg0: i32) -> (i32, i32) {
    %c0_i32 = arith.constant 0 : i32
    %c0_i32_0 = arith.constant 0 : i32
    %c0_i32_1 = arith.constant 0 : i32
    return %c0_i32, %c0_i32_0 : i32, i32
  }
  func.func @transform_42(%arg0: i32) -> (i32, i32) {
    %c0_i32 = arith.constant 0 : i32
    %c0_i32_0 = arith.constant 0 : i32
    %c0_i32_1 = arith.constant 0 : i32
    return %c0_i32, %c0_i32_0 : i32, i32
  }
  func.func @transform_43(%arg0: i32) -> (i32, i32) {
    %c0_i32 = arith.constant 0 : i32
    %c0_i32_0 = arith.constant 0 : i32
    %c0_i32_1 = arith.constant 0 : i32
    return %c0_i32, %c0_i32_0 : i32, i32
  }
  func.func @transform_44(%arg0: i32) -> (i32, i32) {
    %c0_i32 = arith.constant 0 : i32
    %c0_i32_0 = arith.constant 0 : i32
    %c0_i32_1 = arith.constant 0 : i32
    return %c0_i32, %c0_i32_0 : i32, i32
  }
  func.func @transform_45(%arg0: i32) -> (i32, i32) {
    %c0_i32 = arith.constant 0 : i32
    %c0_i32_0 = arith.constant 0 : i32
    %c0_i32_1 = arith.constant 0 : i32
    return %c0_i32, %c0_i32_0 : i32, i32
  }
  func.func @transform_46(%arg0: i32) -> (i32, i32) {
    %c0_i32 = arith.constant 0 : i32
    %c0_i32_0 = arith.constant 0 : i32
    %c0_i32_1 = arith.constant 0 : i32
    return %c0_i32, %c0_i32_0 : i32, i32
  }
  func.func @transform_47(%arg0: i32) -> (i32, i32) {
    %c0_i32 = arith.constant 0 : i32
    %c0_i32_0 = arith.constant 0 : i32
    %c0_i32_1 = arith.constant 0 : i32
    return %c0_i32, %c0_i32_0 : i32, i32
  }
  func.func @transform_48(%arg0: i32) -> (i32, i32) {
    %c0_i32 = arith.constant 0 : i32
    %c0_i32_0 = arith.constant 0 : i32
    %c0_i32_1 = arith.constant 0 : i32
    return %c0_i32, %c0_i32_0 : i32, i32
  }
  func.func @transform_49(%arg0: i32) -> (i32, i32) {
    %c0_i32 = arith.constant 0 : i32
    %c0_i32_0 = arith.constant 0 : i32
    %c0_i32_1 = arith.constant 0 : i32
    return %c0_i32, %c0_i32_0 : i32, i32
  }
  func.func @transform_50(%arg0: i32) -> (i32, i32, i32) {
    %c0_i32 = arith.constant 0 : i32
    %c0_i32_0 = arith.constant 0 : i32
    %c0_i32_1 = arith.constant 0 : i32
    return %arg0, %c0_i32, %c0_i32_0 : i32, i32, i32
  }
}

</mosaic_0001>

<bundles_post_ra>
// kernel: conv_down_block_fwd.1
= control target key start
LH: loop header
LB: loop body
LE: loop exit
PB: predicated region body
PF: predicated region fallthrough
CT: control target
= control target key end

     0   :  { %s11317_s6 = smov 1   ;;  %s11318_s10 = smov 2   ;;  %s15308_s0 = inlined_call_operand.smem [shape: u32[51], index: -1, kind: input, shape index: {}] }
   0x1   :  { %s11388_s5 = sld [smem:[%s15308_s0]]   ;;  %s11319_s14 = smov 3  }
   0x2   :  { %s11393_s9 = sld [smem:[%s15308_s0 + %s11317_s6]]   ;;  %s11320_s18 = smov 4  }
   0x3   :  { %s11398_s13 = sld [smem:[%s15308_s0 + %s11318_s10]]   ;;  %s11321_s22 = smov 5  }
   0x4   :  { %s11403_s17 = sld [smem:[%s15308_s0 + %s11319_s14]]   ;;  %s11322_s26 = smov 6  }
   0x5   :  { %s11408_s21 = sld [smem:[%s15308_s0 + %s11320_s18]]   ;;  %s11323_s30 = smov 7  }
   0x6   :  { %s11413_s25 = sld [smem:[%s15308_s0 + %s11321_s22]]   ;;  %s11324_s4 = smov 8  }
   0x7   :  { %s11418_s29 = sld [smem:[%s15308_s0 + %s11322_s26]]   ;;  %s11325_s10 = smov 9  }
   0x8   :  { %s11423_s3 = sld [smem:[%s15308_s0 + %s11323_s30]]   ;;  %s11326_s15 = smov 10  }
   0x9   :  { %s11428_s8 = sld [smem:[%s15308_s0 + %s11324_s4]]   ;;  %s11327_s20 = smov 11  }
   0xa   :  { %s11433_s14 = sld [smem:[%s15308_s0 + %s11325_s10]]   ;;  %s11328_s26 = smov 12  }
   0xb   :  { %15564 = sst [smem:[#allocation3_spill]] %s11408_s21  ;;  %s11329_s1 = smov 13  }
   0xc   :  { %15565 = sst [smem:[#allocation4_spill]] %s11413_s25  ;;  %s11330_s7 = smov 14  }
   0xd   :  { %s11438_s19 = sld [smem:[%s15308_s0 + %s11326_s15]]   ;;  %s11331_s15 = smov 15  }
   0xe   :  { %s11443_s24 = sld [smem:[%s15308_s0 + %s11327_s20]]   ;;  %s11332_s22 = smov 16  }
   0xf   :  { %s11448_s30 = sld [smem:[%s15308_s0 + %s11328_s26]]   ;;  %s11333_s28 = smov 17  }
  0x10   :  { %s11453_s6 = sld [smem:[%s15308_s0 + %s11329_s1]]  }
  0x11   :  { %s11458_s12 = sld [smem:[%s15308_s0 + %s11330_s7]]   ;;  %s11334_s7 = smov 18  }
  0x12   :  { %s11463_s20 = sld [smem:[%s15308_s0 + %s11331_s15]]   ;;  %s11335_s15 = smov 19  }
  0x13   :  { %s11468_s27 = sld [smem:[%s15308_s0 + %s11332_s22]]   ;;  %s11336_s22 = smov 20  }
  0x14   :  { %s11473_s4 = sld [smem:[%s15308_s0 + %s11333_s28]]   ;;  %s11337_s28 = smov 21  }
  0x15   :  { %s11478_s25 = sld [smem:[%s15308_s0 + %s11334_s7]]   ;;  %s11338_s7 = smov 22  }
  0x16   :  { %s11483_s21 = sld [smem:[%s15308_s0 + %s11335_s15]]   ;;  %s11339_s15 = smov 23  }
  0x18   :  { %15566 = sst [smem:[#allocation5_spill]] %s11463_s20 }
  0x19   :  { %15567 = sst [smem:[#allocation6_spill]] %s11468_s27 }
  0x1a   :  { %15568 = sst [smem:[#allocation7_spill]] %s11473_s4 }
  0x1b   :  { %15569 = sst [smem:[#allocation8_spill]] %s11478_s25 }
  0x1c   :  { %s11488_s20 = sld [smem:[%s15308_s0 + %s11336_s22]]   ;;  %s11340_s22 = smov 24  }
  0x1d   :  { %s11493_s4 = sld [smem:[%s15308_s0 + %s11337_s28]]   ;;  %s11341_s28 = smov 25  }
  0x1e   :  { %s11498_s25 = sld [smem:[%s15308_s0 + %s11338_s7]]   ;;  %s11342_s7 = smov 26  }
  0x1f   :  { %s11503_s27 = sld [smem:[%s15308_s0 + %s11339_s15]]   ;;  %s11343_s15 = smov 27  }
  0x22   :  { %15570 = sst [smem:[#allocation9_spill]] %s11488_s20 }
  0x23   :  { %15571 = sst [smem:[#allocation10_spill]] %s11493_s4 }
  0x24   :  { %15572 = sst [smem:[#allocation11_spill]] %s11498_s25 }
  0x25   :  { %15573 = sst [smem:[#allocation12_spill]] %s11503_s27 }
  0x26   :  { %s11508_s20 = sld [smem:[%s15308_s0 + %s11340_s22]]   ;;  %s11344_s22 = smov 28  }
  0x27   :  { %s11513_s4 = sld [smem:[%s15308_s0 + %s11341_s28]]   ;;  %s11345_s28 = smov 29  }
  0x28   :  { %s11518_s25 = sld [smem:[%s15308_s0 + %s11342_s7]]   ;;  %s11346_s7 = smov 30  }
  0x29   :  { %s11523_s27 = sld [smem:[%s15308_s0 + %s11343_s15]]   ;;  %s11347_s15 = smov 31  }
  0x2c   :  { %15574 = sst [smem:[#allocation13_spill]] %s11508_s20 }
  0x2d   :  { %15575 = sst [smem:[#allocation14_spill]] %s11513_s4 }
  0x2e   :  { %15576 = sst [smem:[#allocation15_spill]] %s11518_s25 }
  0x2f   :  { %15577 = sst [smem:[#allocation16_spill]] %s11523_s27 }
  0x30   :  { %s11528_s20 = sld [smem:[%s15308_s0 + %s11344_s22]]   ;;  %s11348_s22 = smov 32  }
  0x31   :  { %s11533_s4 = sld [smem:[%s15308_s0 + %s11345_s28]]   ;;  %s11349_s28 = smov 33  }
  0x32   :  { %s11538_s25 = sld [smem:[%s15308_s0 + %s11346_s7]]   ;;  %s11350_s7 = smov 34  }
  0x33   :  { %s11543_s27 = sld [smem:[%s15308_s0 + %s11347_s15]]   ;;  %s11351_s15 = smov 35  }
  0x36   :  { %15578 = sst [smem:[#allocation17_spill]] %s11528_s20 }
  0x37   :  { %15579 = sst [smem:[#allocation18_spill]] %s11533_s4 }
  0x38   :  { %15580 = sst [smem:[#allocation19_spill]] %s11538_s25 }
  0x39   :  { %15581 = sst [smem:[#allocation20_spill]] %s11543_s27 }
  0x3a   :  { %s11548_s20 = sld [smem:[%s15308_s0 + %s11348_s22]]   ;;  %s11352_s22 = smov 36  }
  0x3b   :  { %s11553_s4 = sld [smem:[%s15308_s0 + %s11349_s28]]   ;;  %s11353_s28 = smov 37  }
  0x3c   :  { %s11558_s25 = sld [smem:[%s15308_s0 + %s11350_s7]]   ;;  %s11354_s7 = smov 38  }
  0x3d   :  { %s11563_s27 = sld [smem:[%s15308_s0 + %s11351_s15]]   ;;  %s11355_s15 = smov 39  }
  0x40   :  { %15582 = sst [smem:[#allocation21_spill]] %s11548_s20 }
  0x41   :  { %15583 = sst [smem:[#allocation22_spill]] %s11553_s4 }
  0x42   :  { %15584 = sst [smem:[#allocation23_spill]] %s11558_s25 }
  0x43   :  { %15585 = sst [smem:[#allocation24_spill]] %s11563_s27 }
  0x44   :  { %s11568_s20 = sld [smem:[%s15308_s0 + %s11352_s22]]   ;;  %s11356_s22 = smov 40  }
  0x45   :  { %s11573_s4 = sld [smem:[%s15308_s0 + %s11353_s28]]   ;;  %s11357_s28 = smov 41  }
  0x46   :  { %s11578_s25 = sld [smem:[%s15308_s0 + %s11354_s7]]   ;;  %s11358_s7 = smov 42  }
  0x47   :  { %s11583_s27 = sld [smem:[%s15308_s0 + %s11355_s15]]   ;;  %s11359_s15 = smov 43  }
  0x4a   :  { %15586 = sst [smem:[#allocation25_spill]] %s11568_s20 }
  0x4b   :  { %15587 = sst [smem:[#allocation26_spill]] %s11573_s4 }
  0x4c   :  { %15588 = sst [smem:[#allocation27_spill]] %s11578_s25 }
  0x4d   :  { %15589 = sst [smem:[#allocation28_spill]] %s11583_s27 }
  0x4e   :  { %s11588_s20 = sld [smem:[%s15308_s0 + %s11356_s22]]   ;;  %s11360_s22 = smov 44  }
  0x4f   :  { %s11593_s4 = sld [smem:[%s15308_s0 + %s11357_s28]]   ;;  %s11361_s28 = smov 45  }
  0x50   :  { %s11598_s25 = sld [smem:[%s15308_s0 + %s11358_s7]]   ;;  %s11362_s7 = smov 46  }
  0x51   :  { %s11603_s27 = sld [smem:[%s15308_s0 + %s11359_s15]]   ;;  %s11363_s15 = smov 47  }
  0x54   :  { %15590 = sst [smem:[#allocation29_spill]] %s11588_s20 }
  0x55   :  { %15591 = sst [smem:[#allocation30_spill]] %s11593_s4 }
  0x56   :  { %15592 = sst [smem:[#allocation31_spill]] %s11598_s25 }
  0x57   :  { %15593 = sst [smem:[#allocation32_spill]] %s11603_s27 }
  0x58   :  { %s11608_s20 = sld [smem:[%s15308_s0 + %s11360_s22]]   ;;  %s11364_s22 = smov 48  }
  0x59   :  { %s11613_s4 = sld [smem:[%s15308_s0 + %s11361_s28]]   ;;  %s11365_s28 = smov 49  }
  0x5a   :  { %s11618_s25 = sld [smem:[%s15308_s0 + %s11362_s7]]   ;;  %s11366_s7 = smov 50  }
  0x5b   :  { %s11623_s27 = sld [smem:[%s15308_s0 + %s11363_s15]]   ;;  %s11640_s15 = smov 0  }
  0x5e   :  { %15594 = sst [smem:[#allocation33_spill]] %s11608_s20 }
  0x5f   :  { %15595 = sst [smem:[#allocation34_spill]] %s11613_s4 }
  0x60   :  { %15596 = sst [smem:[#allocation35_spill]] %s11618_s25 }
  0x61   :  { %s11628_s20 = sld [smem:[%s15308_s0 + %s11364_s22]]  }
  0x62   :  { %s11633_s4 = sld [smem:[%s15308_s0 + %s11365_s28]]  }
  0x63   :  { %s11638_s25 = sld [smem:[%s15308_s0 + %s11366_s7]]  }
  0x64 LB: > { %s9626_s16 = sadd.s32 4294967295, %s11315_s15   ;;  %p9630_p0 = scmp.ge.s32.totalorder %s11315_s15, 1  ;;  %s11315_s15 = sphi %s11640_s15, %s111_s15  }
  0x65   : > { %p1373_p1 = scmp.lt.s32.totalorder %s11315_s15, 3 }
  0x67   : > { %p1374_p2 = pnand %p9630_p0, %p1373_p1 }
  0x69   : > { %1377 = sbr.rel (%p1374_p2) target bundleno = 12973 (0x32ad), region = 220 }
  0x70   : > { %p11648_p3 = scmp.lt.s32.totalorder %s9626_s16, 1  ;;  %v1621_v0 = vlaneseq  ;;  %v15320_v1 = vmov 0.0   ;;  %v1527_v3 = vld [vmem:[%s11398_s13] sm:$0xff]  ;;  %v1528_v4 = vld [vmem:[%s11398_s13 + $0x8] sm:$0xff]  ;;  %s11368_s23 = smov 16   ;;  %v11376_v35 = vmov 0  }
  0x71   : > { %1511 = vst [vmem:[#allocation2 + $0x10] sm:$0xff] %v15320_v1  ;;  %1512 = vst [vmem:[#allocation2 + $0x18] sm:$0xff] %v15320_v1  ;;  %1881 = vmatprep.mubr.f32.mxu0 %v15320_v1  ;;  %9898 = vmatprep.subr.mxu1 %v15320_v1  ;;  %s11369_s26 = smov 17   ;;  %s11370_s28 = smov 15   ;;  %v1807_v34 = vld [vmem:[%s11423_s3] sm:$0xff]  ;;  %vm1813_vm8 = vcmask 588800  }
  0x72   : > { %1509 = vst [vmem:[#allocation2] sm:$0xff] %v15320_v1  ;;  %1510 = vst [vmem:[#allocation2 + $0x8] sm:$0xff] %v15320_v1  ;;  %s16077_s16 = smov (!%p11648_p3, %s9626_s16), 1  ;;  %v1627_v2 = vshrl.u32 %v1621_v0, 7  ;;  %s15452_s1 = smov 1   ;;  %10416 = vset.pattern.permute.xlu0 %v11376_v35  ;;  %10417 = vset.pattern.permute.xlu1 %v11376_v35  ;;  %v11758_v36 = vand.u32 127, %v1621_v0 }
  0x73   : > { %1513 = vst [vmem:[#allocation2 + $0x20] sm:$0xff] %v15320_v1  ;;  %1514 = vst [vmem:[#allocation2 + $0x28] sm:$0xff] %v15320_v1  ;;  %s15311_s0 = sshll.u32 %s16077_s16, 3  ;;  %s15450_s2 = smov 127   ;;  %vm11377_vm9 = vmmov 0   ;;  %vm1893_vm10 = vcmask 64512  }
  0x74   : > { %1515 = vst [vmem:[#allocation2 + $0x30] sm:$0xff] %v15320_v1  ;;  %1516 = vst [vmem:[#allocation2 + $0x38] sm:$0xff] %v15320_v1  ;;  %v1647_v5 = vsub.s32 1, %v1627_v2  ;;  %v1697_v6 = vsub.s32 4, %v1627_v2  ;;  %s1499_s22 = scalar_lea.vmem %s11388_s5, %s15311_s0  ;;  %v1666_v7 = vsub.s32 2, %v1627_v2  ;;  %v1628_v8 = vsub.s32 0, %v1627_v2  ;;  %9900 = vmatprep.mubr.msk.f32.mxu1 %vm11377_vm9, %v15320_v1 }
  0x75   : > { %1517 = vst [vmem:[#allocation2 + $0x40] sm:$0xff] %v15320_v1  ;;  %1518 = vst [vmem:[#allocation2 + $0x48] sm:$0xff] %v15320_v1  ;;  %v11683_v9 = vld [vmem:[%s1499_s22] sm:$0xff]  ;;  %v1685_v17 = vsub.s32 3, %v1627_v2  ;;  %v1722_v20 = vsub.s32 5, %v1627_v2  ;;  %v1741_v27 = vsub.s32 6, %v1627_v2 }
  0x76   : > { %1519 = vst [vmem:[#allocation2 + $0x50] sm:$0xff] %v15320_v1  ;;  %1520 = vst [vmem:[#allocation2 + $0x58] sm:$0xff] %v15320_v1  ;;  %v11685_v10 = vrot.slane %v1527_v3, %v1647_v5  ;;  %v11687_v11 = vrot.slane %v1528_v4, %v1647_v5  ;;  %v11689_v12 = vrot.slane %v1527_v3, %v1697_v6  ;;  %1638 = vrot.lane.b32.xlu1 %v11683_v9, %s11368_s23  ;;  %s15448_s7 = smov 113   ;;  %s15446_s10 = smov 112   ;;  %vm2090_vm11 = vcmask 130048  }
  0x77   : > { %1521 = vst [vmem:[#allocation2 + $0x60] sm:$0xff] %v15320_v1  ;;  %1522 = vst [vmem:[#allocation2 + $0x68] sm:$0xff] %v15320_v1  ;;  %v11691_v13 = vrot.slane %v1528_v4, %v1697_v6  ;;  %1617 = vrot.lane.b32.xlu0 %v11683_v9, %s11369_s26  ;;  %v11699_v14 = vcombine.high %v11683_v9, %v11683_v9  ;;  %v11701_v15 = vrot.slane %v1527_v3, %v1666_v7  ;;  %s15312_s11 = smov 111   ;;  %s9827_s18 = sshll.u32 %s16077_s16, 4  ;;  %vm2561_vm12 = vcmask 1043456  }
  0x78   : > { %1523 = vst [vmem:[#allocation2 + $0x70] sm:$0xff] %v15320_v1  ;;  %1524 = vst [vmem:[#allocation2 + $0x78] sm:$0xff] %v15320_v1  ;;  %v11703_v16 = vrot.slane %v1528_v4, %v1666_v7  ;;  %v11705_v18 = vrot.slane %v1527_v3, %v1628_v8  ;;  %v11707_v19 = vrot.slane %v1528_v4, %v1628_v8  ;;  %v1760_v31 = vsub.s32 7, %v1627_v2  ;;  %s1504_s22 = scalar_lea.vmem %s11393_s9, %s9827_s18  ;;  %s15616_s18 = sld [smem:[#allocation6_spill]] }
  0x79   : > { %1525 = vst [vmem:[#allocation2 + $0x80] sm:$0xff] %v15320_v1  ;;  %1526 = vst [vmem:[#allocation2 + $0x88] sm:$0xff] %v15320_v1  ;;  %v1705_v21 = vcombine.low %v11689_v12, %v11691_v13  ;;  %v11711_v22 = vrot.slane %v1527_v3, %v1685_v17  ;;  %v11713_v23 = vrot.slane %v1528_v4, %v1685_v17  ;;  %vm1642_vm0 = vcmp.lt.s32.totalorder %v11758_v36, 16  ;;  %s15618_s0 = sld [smem:[#allocation7_spill]] }
  0x7a   : > { %15598 = vst [vmem:[#allocation36_spill] sm:$0xff] %v11685_v10  ;;  %15599 = vst [vmem:[#allocation37_spill] sm:$0xff] %v11687_v11  ;;  %v11715_v24 = vrot.slane %v1527_v3, %v1722_v20  ;;  %v11717_v25 = vrot.slane %v1528_v4, %v1722_v20  ;;  %1640 = vrot.lane.b32.xlu1 %v11699_v14, %s11368_s23  ;;  %v11724_v29 = vrot.slane %v1527_v3, %v1741_v27  ;;  %vm2557_vm13 = vcmask 31744  }
  0x7b   : > { %15600 = vst [vmem:[#allocation38_spill] sm:$0xff] %v11689_v12  ;;  %15601 = vst [vmem:[#allocation39_spill] sm:$0xff] %v11691_v13  ;;  %v1707_v26 = vmul.f32 %v1705_v21, %v11683_v9  ;;  %1657 = vrot.lane.b32.xlu0 %v11683_v9, %s11370_s28  ;;  %v11726_v30 = vrot.slane %v1528_v4, %v1741_v27  ;;  %v11732_v32 = vrot.slane %v1527_v3, %v1760_v31 }
  0x7c   : > { %15602 = vst [vmem:[#allocation40_spill] sm:$0xff] %v11701_v15  ;;  %15603 = vst [vmem:[#allocation41_spill] sm:$0xff] %v11703_v16  ;;  %v11734_v33 = vrot.slane %v1528_v4, %v1760_v31  ;;  %vm1661_vm1 = vcmp.lt.s32.totalorder %v11758_v36, 15  ;;  %vm1623_vm2 = vcmp.lt.s32.totalorder %v11758_v36, 17  ;;  %vm1680_vm3 = vcmp.lt.s32.totalorder %v11758_v36, 1 }
  0x7d   : > { %15604 = vst [vmem:[#allocation42_spill] sm:$0xff] %v11705_v18  ;;  %15605 = vst [vmem:[#allocation43_spill] sm:$0xff] %v11707_v19  ;;  %v1709_v28 = vcombine.high %v1707_v26, %v1707_v26  ;;  %vm1717_vm4 = vcmp.lt.s32.totalorder %v11758_v36, 127  ;;  %vm1736_vm5 = vcmp.lt.s32.totalorder %v11758_v36, 113  ;;  %vm1755_vm6 = vcmp.lt.s32.totalorder %v11758_v36, 112 }
  0x7e   : > { %15606 = vst [vmem:[#allocation44_spill] sm:$0xff] %v11711_v22  ;;  %15607 = vst [vmem:[#allocation45_spill] sm:$0xff] %v11713_v23  ;;  %1659 = vrot.lane.b32.xlu1 %v11699_v14, %s11370_s28  ;;  %vm1774_vm7 = vcmp.lt.s32.totalorder %v11758_v36, 111 }
  0x7f   : > { %15608 = vst [vmem:[#allocation46_spill] sm:$0xff] %v11715_v24  ;;  %15609 = vst [vmem:[#allocation47_spill] sm:$0xff] %v11717_v25  ;;  %1619 = vrot.lane.b32.xlu0 %v11699_v14, %s11369_s26 }
  0x80   : > { %1711 = vst [vmem:[#allocation2 + $0x40] sm:$0xf] %v1707_v26  ;;  %15610 = vst [vmem:[#allocation48_spill] sm:$0xff] %v11724_v29 }
  0x81   : > { %15611 = vst [vmem:[#allocation49_spill] sm:$0xff] %v11726_v30  ;;  %1712 = vst [vmem:[#allocation2 + $0x48] sm:$0xf] %v1709_v28 }
  0x82   : > { %15612 = vst [vmem:[#allocation50_spill] sm:$0xff] %v11732_v32  ;;  %15613 = vst [vmem:[#allocation51_spill] sm:$0xff] %v11734_v33  ;;  %1678 = vrot.lane.b32.xlu1 %v11699_v14, %s15452_s1 }
  0x83   : > { %1676 = vrot.lane.b32.xlu0 %v11683_v9, %s15452_s1  ;;  %15614 = vst [vmem:[#allocation52_spill] sm:$0xff] %v11758_v36 }
  0x86   : > { %1715 = vrot.lane.b32.xlu1 %v11699_v14, %s15450_s2 }
  0x87   : > { %1713 = vrot.lane.b32.xlu0 %v11683_v9, %s15450_s2 }
  0x8a   : > { %1734 = vrot.lane.b32.xlu1 %v11699_v14, %s15448_s7 }
  0x8b   : > { %1732 = vrot.lane.b32.xlu0 %v11683_v9, %s15448_s7 }
  0x8e   : > { %1753 = vrot.lane.b32.xlu1 %v11699_v14, %s15446_s10 }
  0x8f   : > { %1751 = vrot.lane.b32.xlu0 %v11683_v9, %s15446_s10 }
  0x92   : > { %1772 = vrot.lane.b32.xlu1 %v11699_v14, %s15312_s11 }
  0x93   : > { %1770 = vrot.lane.b32.xlu0 %v11683_v9, %s15312_s11 }
  0x97   : > { %1810 = vperm.xlu0 %10416, %v1807_v34  }
  0xe8   : > { %v1639_v37 = vpop.permute.xlu1 %1638 }
  0xe9   : > { %v1618_v38 = vpop.permute.xlu0 %1617 }
  0xec   : > { %v1641_v40 = vpop.permute.xlu1 %1640 }
  0xed   : > { %v1658_v39 = vpop.permute.xlu0 %1657  ;;  %v1643_v41 = vsel %vm1642_vm0, %v1639_v37, %v1641_v40  ;;  %v1644_v42 = vsel %vm1642_vm0, %v1641_v40, %v1639_v37 }
  0xee   : > { %v1653_v43 = vmul.f32 %v11685_v10, %v1644_v42  ;;  %v1654_v44 = vmul.f32 %v11687_v11, %v1643_v41 }
  0xf0   : > { %1655 = vst [vmem:[#allocation2 + $0x10] sm:$0xf] %v1653_v43  ;;  %1656 = vst [vmem:[#allocation2 + $0x18] sm:$0xf] %v1654_v44  ;;  %v1660_v45 = vpop.permute.xlu1 %1659 }
  0xf1   : > { %v1620_v46 = vpop.permute.xlu0 %1619  ;;  %v1662_v47 = vsel %vm1661_vm1, %v1658_v39, %v1660_v45  ;;  %v1663_v48 = vsel %vm1661_vm1, %v1660_v45, %v1658_v39  ;;  %v1798_v45 = vld [vmem:[#allocation2 + $0x48] sm:$0xff] }
  0xf2   : > { %v1624_v49 = vsel %vm1623_vm2, %v1618_v38, %v1620_v46  ;;  %v1625_v50 = vsel %vm1623_vm2, %v1620_v46, %v1618_v38  ;;  %v1672_v51 = vmul.f32 %v11701_v15, %v1663_v48  ;;  %v1673_v52 = vmul.f32 %v11703_v16, %v1662_v47  ;;  %v1797_v46 = vld [vmem:[#allocation2 + $0x40] sm:$0xff] }
  0xf3   : > { %v1634_v53 = vmul.f32 %v11705_v18, %v1625_v50  ;;  %v1635_v54 = vmul.f32 %v11707_v19, %v1624_v49  ;;  %v11810_v49 = vld [vmem:[%s11398_s13 + $0x10] ss:$0 sm:$0xff] }
  0xf4   : > { %1674 = vst [vmem:[#allocation2 + $0x20] sm:$0xf] %v1672_v51  ;;  %1675 = vst [vmem:[#allocation2 + $0x28] sm:$0xf] %v1673_v52  ;;  %v1679_v55 = vpop.permute.xlu1 %1678  ;;  %v11814_v51 = vld [vmem:[%s11398_s13 + $0x18] ss:$0 sm:$0xff] }
  0xf5   : > { %1636 = vst [vmem:[#allocation2] sm:$0xf] %v1634_v53  ;;  %1637 = vst [vmem:[#allocation2 + $0x8] sm:$0xf] %v1635_v54  ;;  %v1677_v56 = vpop.permute.xlu0 %1676 }
  0xf6   : > { %v1681_v57 = vsel %vm1680_vm3, %v1677_v56, %v1679_v55  ;;  %v1682_v58 = vsel %vm1680_vm3, %v1679_v55, %v1677_v56 }
  0xf7   : > { %v1691_v59 = vmul.f32 %v11711_v22, %v1682_v58  ;;  %v1692_v60 = vmul.f32 %v11713_v23, %v1681_v57  ;;  %v1792_v4 = vld [vmem:[#allocation2 + $0x18] sm:$0xff]  ;;  %v1791_v7 = vld [vmem:[#allocation2 + $0x10] sm:$0xff] }
  0xf8   : > { %v1716_v61 = vpop.permute.xlu1 %1715 }
  0xf9   : > { %1693 = vst [vmem:[#allocation2 + $0x30] sm:$0xf] %v1691_v59  ;;  %1694 = vst [vmem:[#allocation2 + $0x38] sm:$0xf] %v1692_v60  ;;  %v1714_v62 = vpop.permute.xlu0 %1713 }
  0xfa   : > { %v1718_v63 = vsel %vm1717_vm4, %v1714_v62, %v1716_v61  ;;  %v1719_v0 = vsel %vm1717_vm4, %v1716_v61, %v1714_v62 }
  0xfb   : > { %v1728_v2 = vmul.f32 %v11715_v24, %v1718_v63  ;;  %v1729_v3 = vmul.f32 %v11717_v25, %v1719_v0  ;;  %v1794_v34 = vld [vmem:[#allocation2 + $0x28] sm:$0xff]  ;;  %v1793_v37 = vld [vmem:[#allocation2 + $0x20] sm:$0xff] }
  0xfc   : > { %v1790_v5 = vld [vmem:[#allocation2 + $0x8] sm:$0xff]  ;;  %v1789_v6 = vld [vmem:[#allocation2] sm:$0xff]  ;;  %v1735_v8 = vpop.permute.xlu1 %1734 }
  0xfd   : > { %1730 = vst [vmem:[#allocation2 + $0x50] sm:$0xf] %v1728_v2  ;;  %1731 = vst [vmem:[#allocation2 + $0x58] sm:$0xf] %v1729_v3  ;;  %v1733_v17 = vpop.permute.xlu0 %1732  ;;  %v9967_v20 = vpack.c.bf16 %v1792_v4, %v1790_v5  ;;  %v9969_v21 = vpack.c.bf16 %v1791_v7, %v1789_v6  ;;  %v1613_v6 = vld [vmem:[%s11418_s29] sm:$0xff] }
  0xfe   : > { %v1737_v26 = vsel %vm1736_vm5, %v1733_v17, %v1735_v8  ;;  %v1738_v27 = vsel %vm1736_vm5, %v1735_v8, %v1733_v17 }
  0xff   : > { %v1747_v28 = vmul.f32 %v11724_v29, %v1737_v26  ;;  %v1748_v31 = vmul.f32 %v11726_v30, %v1738_v27  ;;  %9968 = vmatprep.subr.bf16.mxu0 %v9967_v20  ;;  %v11830_v27 = vld [vmem:[%s11403_s17] sm:$0xff] }
 0x100   : > { %9970 = vmatpush1.bf16.msra.mxu0 %v9969_v21  ;;  %v1796_v35 = vld [vmem:[#allocation2 + $0x38] sm:$0xff]  ;;  %v1795_v38 = vld [vmem:[#allocation2 + $0x30] sm:$0xff]  ;;  %v1754_v39 = vpop.permute.xlu1 %1753 }
 0x101   : > { %1749 = vst [vmem:[#allocation2 + $0x60] sm:$0xf] %v1747_v28  ;;  %1750 = vst [vmem:[#allocation2 + $0x68] sm:$0xf] %v1748_v31  ;;  %v1752_v40 = vpop.permute.xlu0 %1751  ;;  %v9971_v41 = vpack.c.bf16 %v1796_v35, %v1794_v34  ;;  %v9973_v42 = vpack.c.bf16 %v1795_v38, %v1793_v37 }
 0x102   : > { %v1756_v43 = vsel %vm1755_vm6, %v1752_v40, %v1754_v39  ;;  %v1757_v44 = vsel %vm1755_vm6, %v1754_v39, %v1752_v40 }
 0x103   : > { %v1766_v47 = vmul.f32 %v11732_v32, %v1756_v43  ;;  %v1767_v48 = vmul.f32 %v11734_v33, %v1757_v44  ;;  %9972 = vmatprep.subr.bf16.mxu0 %v9971_v41  ;;  %v1597_v43 = vld [vmem:[%s1504_s22] sm:$0xff]  ;;  %v1598_v44 = vld [vmem:[%s1504_s22 + $0x8] sm:$0xff]  ;;  %s15617_s22 = sld [smem:[#allocation5_spill]] }
 0x104   : > { %9974 = vmatpush1.bf16.msra.mxu0 %v9973_v42  ;;  %v1800_v50 = vld [vmem:[#allocation2 + $0x58] sm:$0xff]  ;;  %v1799_v52 = vld [vmem:[#allocation2 + $0x50] sm:$0xff]  ;;  %v1773_v53 = vpop.permute.xlu1 %1772 }
 0x105   : > { %1768 = vst [vmem:[#allocation2 + $0x70] sm:$0xf] %v1766_v47  ;;  %1769 = vst [vmem:[#allocation2 + $0x78] sm:$0xf] %v1767_v48  ;;  %v9975_v54 = vpack.c.bf16 %v1800_v50, %v1798_v45  ;;  %v1771_v55 = vpop.permute.xlu0 %1770  ;;  %v9977_v56 = vpack.c.bf16 %v1799_v52, %v1797_v46  ;;  %v9636_v45 = vmul.f32 -1.442695, %v1597_v43 }
 0x106   : > { %v1775_v57 = vsel %vm1774_vm7, %v1771_v55, %v1773_v53  ;;  %v1776_v58 = vsel %vm1774_vm7, %v1773_v53, %v1771_v55  ;;  %v9637_v46 = vmul.f32 -1.442695, %v1598_v44  ;;  %v1888_v53 = vld [vmem:[%s11428_s8] sm:$0xff] }
 0x107   : > { %9976 = vmatprep.subr.bf16.mxu0 %v9975_v54  ;;  %v1785_v59 = vmul.f32 %v11810_v49, %v1775_v57  ;;  %v1786_v60 = vmul.f32 %v11814_v51, %v1776_v58  ;;  %10419 = vpow2.f32 %v9636_v45  ;;  %v15314_v54 = vmov 0.0|0.0  }
 0x108   : > { %9978 = vmatpush1.bf16.msra.mxu0 %v9977_v56  ;;  %v1802_v61 = vld [vmem:[#allocation2 + $0x68] sm:$0xff]  ;;  %v1801_v63 = vld [vmem:[#allocation2 + $0x60] sm:$0xff]  ;;  %10421 = vpow2.f32 %v9637_v46 }
 0x109   : > { %1787 = vst [vmem:[#allocation2 + $0x80] sm:$0xf] %v1785_v59  ;;  %1788 = vst [vmem:[#allocation2 + $0x88] sm:$0xf] %v1786_v60  ;;  %v2088_v60 = vld [vmem:[%s11438_s19] sm:$0xff] }
 0x10c   : > { %v1804_v62 = vld [vmem:[#allocation2 + $0x78] sm:$0xff]  ;;  %v1803_v0 = vld [vmem:[#allocation2 + $0x70] sm:$0xff] }
 0x10d   : > { %v9979_v2 = vpack.c.bf16 %v1804_v62, %v1802_v61  ;;  %v9981_v3 = vpack.c.bf16 %v1803_v0, %v1801_v63 }
 0x10f   : > { %9980 = vmatprep.subr.bf16.mxu0 %v9979_v2 }
 0x110   : > { %9982 = vmatpush1.bf16.msra.mxu0 %v9981_v3  ;;  %v1806_v4 = vld [vmem:[#allocation2 + $0x88] sm:$0xff]  ;;  %v1805_v5 = vld [vmem:[#allocation2 + $0x80] sm:$0xff] }
 0x111   : > { %1833 = vmatprep.subr.mxu0 %v1806_v4  ;;  %v10420_v47 = vpop.eup %10419 }
 0x112   : > { %v10422_v48 = vpop.eup %10421  ;;  %v1605_v50 = vadd.f32 1.0, %v10420_v47 }
 0x113   : > { %v1606_v52 = vadd.f32 1.0, %v10422_v48 }
 0x114   : > { %1834 = vmatpush1.msra.mxu0 %v1805_v5  ;;  %10423 = vrcp.f32 %v1605_v50 }
 0x115   : > { %9640 = vmatmul.mubr.msk.f32.vlgmr.msra.gmra.mrb[0].mxu0 %vm1813_vm8, %v1613_v6  ;;  %9893 = vmatprep.subr.mxu0 %v15320_v1  ;;  %10425 = vrcp.f32 %v1606_v52  ;;  %v1889_v6 = vld [vmem:[%s11433_s14] sm:$0xff] }
 0x116   : > { %v1811_v7 = vpop.permute.xlu0 %1810  ;;  %9895 = vmatprep.mubr.msk.f32.mxu0 %vm11377_vm9, %v15320_v1 }
 0x11e   : > { %v10424_v55 = vpop.eup %10423 }
 0x11f   : > { %v10426_v56 = vpop.eup %10425  ;;  %v1611_v57 = vmul.f32 %v10424_v55, %v1597_v43 }
 0x120   : > { %v1612_v58 = vmul.f32 %v10426_v56, %v1598_v44 }
 0x122   : > { %v11840_v59 = vpack.c.bf16 %v1612_v58, %v1611_v57 }
 0x124   : > { %15615 = vst [vmem:[#allocation53_spill] sm:$0xff] %v11840_v59 }
 0x1e8   : > { %v1883_v8 = vpop.f32.mrb[0].mxu0 }
 0x1e9   : > { %v1885_v17 = vpop.f32.mrb[1].mxu0  ;;  %v1884_v20 = vadd.f32 %v1883_v8, %v1811_v7 }
 0x1ea   : > { %v1886_v21 = vadd.f32 %v1885_v17, %v1811_v7  ;;  %v2089_v7 = vld [vmem:[%s11443_s24] sm:$0xff] }
 0x1ec   : > { %v1890_v26 = vadd.f32 %v1886_v21, %v1884_v20 }
 0x1ee   : > { %1891 = vadd.xlane.f32.xlu1 %v1890_v26 }
 0x27b   : > { %v1892_v28 = vpop.xlane.xlu1 %1891 }
 0x27c   : > { %9894 = vmatpush3.msra.mxu0 %v1892_v28 }
 0x27d   : > { %9896 = vmatmul.mubr.msk.f32.vlgmr.msra.gmra.mrb[2].mxu0 %vm1893_vm10, %v11830_v27  ;;  %9983 = vmatprep.subr.bf16.mxu0 %v15314_v54 }
 0x27e   : > { %9907 = vmatprep.mubr.msk.f32.mxu0 %vm11377_vm9, %v15320_v1  ;;  %9985 = vmatpush3.bf16.msra.mxu0 %v11840_v59 }
 0x27f   : > { %9910 = vmatprep.subr.mxu0 %v15320_v1 }
 0x281   : > { %9908 = vmatmul.mubr.msk.f32.vlgmr.msra.gmra.mrb[4].mxu0 %vm2090_vm11, %v2088_v60 }
 0x282   : > { %9912 = vmatprep.mubr.msk.f32.mxu0 %vm11377_vm9, %v15320_v1 }
 0x350   : > { %v1963_v31 = vpop.f32.mrb[2].mxu0 }
 0x351   : > { %v1967_v34 = vmul.f32 0.001953125, %v1963_v31  ;;  %v9897_v35 = vpop.f32.mrb[3].mxu0 }
 0x353   : > { %1970 = vperm.xlu0 %10416, %v1967_v34  }
 0x354   : > { %v2160_v62 = vpop.f32.mrb[4].mxu0 }
 0x355   : > { %v9909_v63 = vpop.f32.mrb[5].mxu0  ;;  %v2161_v8 = vadd.f32 %v2160_v62, %v2089_v7 }
 0x3d2   : > { %v1971_v37 = vpop.permute.xlu0 %1970 }
 0x3d3   : > { %v1973_v38 = vsub.f32 %v1884_v20, %v1971_v37  ;;  %v1974_v39 = vsub.f32 %v1886_v21, %v1971_v37 }
 0x3d5   : > { %v1975_v40 = vmul.f32 %v1973_v38, %v1973_v38  ;;  %v1976_v41 = vmul.f32 %v1974_v39, %v1974_v39 }
 0x3d7   : > { %v1977_v42 = vadd.f32 %v1976_v41, %v1975_v40 }
 0x3d9   : > { %1978 = vadd.xlane.f32.xlu0 %v1977_v42 }
 0x3ef   : > { %2062 = vperm.xlu0 %10416, %v1888_v53   ;;  %v2274_v53 = vld [vmem:[%s11453_s6] sm:$0xff] }
 0x466   : > { %v1979_v61 = vpop.xlane.xlu0 %1978 }
 0x467   : > { %9899 = vmatpush3.msra.mxu1 %v1979_v61 }
 0x468   : > { %9901 = vmatmul.mubr.msk.f32.vlgmr.msra.gmra.mrb[0].mxu1 %vm1893_vm10, %v11830_v27 }
 0x469   : > { %2347 = vmatprep.mubr.f32.mxu1 %v15320_v1 }
 0x46e   : > { %v2063_v26 = vpop.permute.xlu0 %2062 }
 0x53b   : > { %v2046_v0 = vpop.f32.mrb[0].mxu1 }
 0x53c   : > { %v2050_v2 = vmul.f32 0.001953125, %v2046_v0  ;;  %v9902_v3 = vpop.f32.mrb[1].mxu1 }
 0x53e   : > { %v2051_v4 = vadd.f32 1e-05, %v2050_v2 }
 0x540   : > { %10427 = vrsqrt.f32 %v2051_v4 }
 0x54a   : > { %v10428_v5 = vpop.eup %10427 }
 0x54b   : > { %2055 = vperm.xlu1 %10417, %v10428_v5  }
 0x54f   : > { %2069 = vperm.xlu1 %10417, %v1889_v6  }
 0x553   : > { %2166 = vperm.xlu1 %10417, %v2161_v8  }
 0x5ca   : > { %v2056_v17 = vpop.permute.xlu1 %2055 }
 0x5cb   : > { %v2058_v20 = vmul.f32 %v2056_v17, %v1973_v38  ;;  %v2059_v21 = vmul.f32 %v2056_v17, %v1974_v39 }
 0x5cd   : > { %v2065_v28 = vmul.f32 %v2063_v26, %v2058_v20  ;;  %v2066_v31 = vmul.f32 %v2063_v26, %v2059_v21 }
 0x5ce   : > { %v2070_v34 = vpop.permute.xlu1 %2069 }
 0x5cf   : > { %v2072_v35 = vadd.f32 %v2070_v34, %v2065_v28  ;;  %v2073_v37 = vadd.f32 %v2070_v34, %v2066_v31 }
 0x5d1   : > { %v9643_v40 = vmul.f32 -1.442695, %v2072_v35  ;;  %v9644_v41 = vmul.f32 -1.442695, %v2073_v37 }
 0x5d2   : > { %v2167_v48 = vpop.permute.xlu1 %2166 }
 0x5d3   : > { %10429 = vpow2.f32 %v9643_v40 }
 0x5d4   : > { %10431 = vpow2.f32 %v9644_v41 }
 0x5dd   : > { %v10430_v42 = vpop.eup %10429 }
 0x5de   : > { %v10432_v43 = vpop.eup %10431  ;;  %v2080_v44 = vadd.f32 1.0, %v10430_v42 }
 0x5df   : > { %v2081_v45 = vadd.f32 1.0, %v10432_v43 }
 0x5e0   : > { %10433 = vrcp.f32 %v2080_v44 }
 0x5e1   : > { %10435 = vrcp.f32 %v2081_v45 }
 0x5ea   : > { %v10434_v46 = vpop.eup %10433 }
 0x5eb   : > { %v10436_v47 = vpop.eup %10435  ;;  %v2086_v38 = vmul.f32 %v10434_v46, %v2072_v35 }
 0x5ec   : > { %v2087_v39 = vmul.f32 %v10436_v47, %v2073_v37 }
 0x5ed   : > { %v2169_v50 = vadd.f32 %v2167_v48, %v2086_v38 }
 0x5ee   : > { %v2170_v52 = vadd.f32 %v2167_v48, %v2087_v39 }
 0x5ef   : > { %2172 = vrot.lane.b32.xlu1 %v2169_v50, %s11369_s26  ;;  %v2212_v47 = vmul.f32 %v2169_v50, %v11689_v12 }
 0x5f0   : > { %2174 = vrot.lane.b32.xlu0 %v2170_v52, %s11369_s26  ;;  %v2213_v38 = vmul.f32 %v2170_v52, %v11691_v13 }
 0x5f3   : > { %2182 = vrot.lane.b32.xlu1 %v2169_v50, %s11368_s23 }
 0x5f4   : > { %2184 = vrot.lane.b32.xlu0 %v2170_v52, %s11368_s23 }
 0x5f7   : > { %2192 = vrot.lane.b32.xlu1 %v2169_v50, %s11370_s28 }
 0x5f8   : > { %2194 = vrot.lane.b32.xlu0 %v2170_v52, %s11370_s28 }
 0x5fb   : > { %2202 = vrot.lane.b32.xlu1 %v2169_v50, %s15452_s1 }
 0x5fc   : > { %2204 = vrot.lane.b32.xlu0 %v2170_v52, %s15452_s1 }
 0x5ff   : > { %2216 = vrot.lane.b32.xlu1 %v2169_v50, %s15450_s2 }
 0x600   : > { %2218 = vrot.lane.b32.xlu0 %v2170_v52, %s15450_s2 }
 0x603   : > { %2226 = vrot.lane.b32.xlu1 %v2169_v50, %s15448_s7 }
 0x604   : > { %2228 = vrot.lane.b32.xlu0 %v2170_v52, %s15448_s7 }
 0x607   : > { %2236 = vrot.lane.b32.xlu1 %v2169_v50, %s15446_s10 }
 0x608   : > { %2238 = vrot.lane.b32.xlu0 %v2170_v52, %s15446_s10 }
 0x60b   : > { %2246 = vrot.lane.b32.xlu1 %v2169_v50, %s15312_s11 }
 0x60c   : > { %2248 = vrot.lane.b32.xlu0 %v2170_v52, %s15312_s11  ;;  %s15619_s11 = sld [smem:[#allocation10_spill]] }
 0x60f   : > { %2277 = vperm.xlu1 %10417, %v2274_v53  }
 0x661   : > { %v2173_v55 = vpop.permute.xlu1 %2172 }
 0x662   : > { %v2175_v56 = vpop.permute.xlu0 %2174 }
 0x663   : > { %v2176_v57 = vsel %vm1623_vm2, %v2173_v55, %v2175_v56  ;;  %v2177_v58 = vsel %vm1623_vm2, %v2175_v56, %v2173_v55 }
 0x664   : > { %v2178_v0 = vmul.f32 %v2177_v58, %v11705_v18  ;;  %v2179_v2 = vmul.f32 %v2176_v57, %v11707_v19 }
 0x665   : > { %v2183_v60 = vpop.permute.xlu1 %2182 }
 0x666   : > { %v2185_v61 = vpop.permute.xlu0 %2184 }
 0x667   : > { %v2186_v62 = vsel %vm1642_vm0, %v2183_v60, %v2185_v61  ;;  %v2187_v63 = vsel %vm1642_vm0, %v2185_v61, %v2183_v60 }
 0x668   : > { %v2188_v3 = vmul.f32 %v2187_v63, %v11685_v10  ;;  %v2189_v4 = vmul.f32 %v2186_v62, %v11687_v11 }
 0x669   : > { %v2193_v5 = vpop.permute.xlu1 %2192 }
 0x66a   : > { %v2195_v6 = vpop.permute.xlu0 %2194  ;;  %v9986_v7 = vpack.c.bf16 %v2189_v4, %v2179_v2  ;;  %v9988_v8 = vpack.c.bf16 %v2188_v3, %v2178_v0 }
 0x66b   : > { %v2196_v17 = vsel %vm1661_vm1, %v2193_v5, %v2195_v6  ;;  %v2197_v20 = vsel %vm1661_vm1, %v2195_v6, %v2193_v5 }
 0x66c   : > { %9987 = vmatprep.subr.bf16.mxu1 %v9986_v7  ;;  %v2198_v34 = vmul.f32 %v2197_v20, %v11701_v15  ;;  %v2199_v35 = vmul.f32 %v2196_v17, %v11703_v16 }
 0x66d   : > { %v2203_v21 = vpop.permute.xlu1 %2202  ;;  %9989 = vmatpush1.bf16.msra.mxu1 %v9988_v8 }
 0x66e   : > { %v2205_v26 = vpop.permute.xlu0 %2204 }
 0x66f   : > { %v2206_v28 = vsel %vm1680_vm3, %v2203_v21, %v2205_v26  ;;  %v2207_v31 = vsel %vm1680_vm3, %v2205_v26, %v2203_v21  ;;  %v2171_v26 = vld [vmem:[%s11448_s30] sm:$0xff] }
 0x670   : > { %v2208_v37 = vmul.f32 %v2207_v31, %v11711_v22  ;;  %v2209_v40 = vmul.f32 %v2206_v28, %v11713_v23 }
 0x671   : > { %v2217_v41 = vpop.permute.xlu1 %2216 }
 0x672   : > { %v2219_v42 = vpop.permute.xlu0 %2218  ;;  %v9990_v43 = vpack.c.bf16 %v2209_v40, %v2199_v35  ;;  %v9992_v44 = vpack.c.bf16 %v2208_v37, %v2198_v34 }
 0x673   : > { %v2220_v45 = vsel %vm1717_vm4, %v2217_v41, %v2219_v42  ;;  %v2221_v46 = vsel %vm1717_vm4, %v2219_v42, %v2217_v41 }
 0x674   : > { %v2222_v39 = vmul.f32 %v2220_v45, %v11715_v24  ;;  %v2223_v48 = vmul.f32 %v2221_v46, %v11717_v25  ;;  %9991 = vmatprep.subr.bf16.mxu1 %v9990_v43 }
 0x675   : > { %v2227_v53 = vpop.permute.xlu1 %2226  ;;  %9993 = vmatpush1.bf16.msra.mxu1 %v9992_v44 }
 0x676   : > { %v2229_v55 = vpop.permute.xlu0 %2228  ;;  %v9994_v56 = vpack.c.bf16 %v2223_v48, %v2213_v38  ;;  %v9996_v57 = vpack.c.bf16 %v2222_v39, %v2212_v47  ;;  %v2354_v39 = vld [vmem:[%s11458_s12] sm:$0xff] }
 0x677   : > { %v2230_v58 = vsel %vm1736_vm5, %v2227_v53, %v2229_v55  ;;  %v2231_v60 = vsel %vm1736_vm5, %v2229_v55, %v2227_v53  ;;  %v2640_v48 = vld [vmem:[%s11483_s21] sm:$0xff] }
 0x678   : > { %9995 = vmatprep.subr.bf16.mxu1 %v9994_v56  ;;  %v2232_v63 = vmul.f32 %v2230_v58, %v11724_v29  ;;  %v2233_v0 = vmul.f32 %v2231_v60, %v11726_v30  ;;  %v2550_v55 = vld [vmem:[%s15616_s18] sm:$0xff]  ;;  %s15620_s18 = sld [smem:[#allocation8_spill]] }
 0x679   : > { %v2237_v50 = vpop.permute.xlu1 %2236  ;;  %9997 = vmatpush1.bf16.msra.mxu1 %v9996_v57 }
 0x67a   : > { %v2239_v52 = vpop.permute.xlu0 %2238 }
 0x67b   : > { %v2240_v61 = vsel %vm1755_vm6, %v2237_v50, %v2239_v52  ;;  %v2241_v62 = vsel %vm1755_vm6, %v2239_v52, %v2237_v50  ;;  %v2551_v50 = vld [vmem:[%s15618_s0] sm:$0xff]  ;;  %s15621_s0 = sld [smem:[#allocation9_spill]] }
 0x67c   : > { %v2242_v2 = vmul.f32 %v2240_v61, %v11732_v32  ;;  %v2243_v3 = vmul.f32 %v2241_v62, %v11734_v33  ;;  %v2642_v61 = vld [vmem:[%s15619_s11] sm:$0xff]  ;;  %s15622_s11 = sld [smem:[#allocation11_spill]] }
 0x67d   : > { %v2247_v4 = vpop.permute.xlu1 %2246 }
 0x67e   : > { %v2249_v5 = vpop.permute.xlu0 %2248  ;;  %v9998_v6 = vpack.c.bf16 %v2243_v3, %v2233_v0  ;;  %v10000_v7 = vpack.c.bf16 %v2242_v2, %v2232_v63 }
 0x67f   : > { %v2251_v8 = vsel %vm1774_vm7, %v2249_v5, %v2247_v4  ;;  %v2250_v17 = vsel %vm1774_vm7, %v2247_v4, %v2249_v5 }
 0x680   : > { %v2253_v20 = vmul.f32 %v11814_v51, %v2251_v8  ;;  %9999 = vmatprep.subr.bf16.mxu1 %v9998_v6  ;;  %v2252_v21 = vmul.f32 %v11810_v49, %v2250_v17 }
 0x681   : > { %10001 = vmatpush1.bf16.msra.mxu1 %v10000_v7 }
 0x682   : > { %2299 = vmatprep.subr.mxu1 %v2253_v20 }
 0x685   : > { %2300 = vmatpush1.msra.mxu1 %v2252_v21 }
 0x686   : > { %9646 = vmatmul.mubr.msk.f32.vlgmr.msra.gmra.mrb[2].mxu1 %vm1813_vm8, %v2171_v26 }
 0x687   : > { %2721 = vmatprep.mubr.f32.mxu1 %v15320_v1 }
 0x68e   : > { %v2278_v28 = vpop.permute.xlu1 %2277 }
 0x759   : > { %v2349_v31 = vpop.f32.mrb[2].mxu1 }
 0x75a   : > { %v2350_v34 = vadd.f32 %v2349_v31, %v2278_v28  ;;  %v2351_v35 = vpop.f32.mrb[3].mxu1 }
 0x75b   : > { %v2352_v37 = vadd.f32 %v2351_v35, %v2278_v28 }
 0x75d   : > { %v2356_v40 = vadd.f32 %v2352_v37, %v2350_v34 }
 0x75f   : > { %2357 = vadd.xlane.f32.xlu0 %v2356_v40 }
 0x7ec   : > { %v2358_v41 = vpop.xlane.xlu0 %2357 }
 0x7ed   : > { %9911 = vmatpush3.msra.mxu0 %v2358_v41 }
 0x7ee   : > { %9913 = vmatmul.mubr.msk.f32.vlgmr.msra.gmra.mrb[6].mxu0 %vm1893_vm10, %v11830_v27  ;;  %9915 = vmatprep.subr.mxu0 %v15320_v1 }
 0x7ef   : > { %9917 = vmatprep.mubr.msk.f32.mxu0 %vm11377_vm9, %v15320_v1 }
 0x8c1   : > { %v2425_v49 = vpop.f32.mrb[6].mxu0 }
 0x8c2   : > { %v2429_v51 = vmul.f32 0.001953125, %v2425_v49  ;;  %v9914_v42 = vpop.f32.mrb[7].mxu0 }
 0x8c4   : > { %2432 = vperm.xlu1 %10417, %v2429_v51  }
 0x943   : > { %v2433_v43 = vpop.permute.xlu1 %2432 }
 0x944   : > { %v2435_v44 = vsub.f32 %v2350_v34, %v2433_v43  ;;  %v2436_v45 = vsub.f32 %v2352_v37, %v2433_v43  ;;  %v2639_v43 = vld [vmem:[%s15620_s18] sm:$0xff]  ;;  %s15702_s18 = sld [smem:[#allocation12_spill]] }
 0x946   : > { %v2437_v46 = vmul.f32 %v2435_v44, %v2435_v44  ;;  %v2438_v47 = vmul.f32 %v2436_v45, %v2436_v45 }
 0x948   : > { %v2439_v38 = vadd.f32 %v2438_v47, %v2437_v46 }
 0x94a   : > { %2440 = vadd.xlane.f32.xlu1 %v2439_v38 }
 0x95b   : > { %2524 = vperm.xlu1 %10417, %v2354_v39  }
 0x95f   : > { %2651 = vperm.xlu1 %10417, %v2640_v48  }
 0x9d7   : > { %v2441_v53 = vpop.xlane.xlu1 %2440 }
 0x9d8   : > { %9916 = vmatpush3.msra.mxu0 %v2441_v53 }
 0x9d9   : > { %9918 = vmatmul.mubr.msk.f32.vlgmr.msra.gmra.mrb[8].mxu0 %vm1893_vm10, %v11830_v27  ;;  %9651 = vmatprep.subr.msk.mxu0 %vm2561_vm12, %v11699_v14  ;;  %v2355_v14 = vld [vmem:[%s15617_s22] sm:$0xff]  ;;  %s15623_s22 = sld [smem:[#allocation3_spill]] }
 0x9da   : > { %9652 = vmatpush1.msk.msra.mxu0 %vm2561_vm12, %v11683_v9  ;;  %2630 = vmatprep.mubr.f32.mxu0 %v15320_v1 }
 0x9db   : > { %v2525_v2 = vpop.permute.xlu1 %2524 }
 0x9dd   : > { %9653 = vmatmul.mubr.msk.f32.vlgmr.msra.gmra.mrb[10].mxu0 %vm2557_vm13, %v2550_v55 }
 0x9de   : > { %2800 = vmatprep.mubr.f32.mxu0 %v15320_v1 }
 0x9df   : > { %v1533_v46 = vld [vmem:[%s15623_s22 + $0x8] sm:$0xff]  ;;  %v2652_v47 = vpop.permute.xlu1 %2651 }
 0xaac   : > { %v2508_v56 = vpop.f32.mrb[8].mxu0 }
 0xaad   : > { %v2512_v57 = vmul.f32 0.001953125, %v2508_v56  ;;  %v9919_v58 = vpop.f32.mrb[9].mxu0 }
 0xaaf   : > { %v2513_v27 = vadd.f32 1e-05, %v2512_v57 }
 0xab0   : > { %v2632_v9 = vpop.f32.mrb[10].mxu0 }
 0xab1   : > { %10437 = vrsqrt.f32 %v2513_v27  ;;  %v2634_v52 = vpop.f32.mrb[11].mxu0 }
 0xabb   : > { %v10438_v60 = vpop.eup %10437 }
 0xabc   : > { %2517 = vperm.xlu0 %10416, %v10438_v60   ;;  %v1532_v60 = vld [vmem:[%s15623_s22] sm:$0xff] }
 0xac0   : > { %2531 = vperm.xlu0 %10416, %v2355_v14   ;;  %v1535_v14 = vld [vmem:[%s15623_s22 + $0x18] sm:$0xff] }
 0xac4   : > { %2554 = vperm.xlu0 %10416, %v2551_v50   ;;  %v1534_v50 = vld [vmem:[%s15623_s22 + $0x10] sm:$0xff] }
 0xac8   : > { %2730 = vperm.xlu0 %10416, %v2642_v61   ;;  %v1539_v61 = vld [vmem:[%s15623_s22 + $0x38] sm:$0xff] }
 0xb3b   : > { %v2518_v62 = vpop.permute.xlu0 %2517 }
 0xb3c   : > { %v2520_v63 = vmul.f32 %v2518_v62, %v2435_v44  ;;  %v2521_v0 = vmul.f32 %v2518_v62, %v2436_v45  ;;  %v2641_v44 = vld [vmem:[%s15621_s0] sm:$0xff]  ;;  %v1538_v62 = vld [vmem:[%s15623_s22 + $0x30] sm:$0xff]  ;;  %s15444_s0 = smov 124  }
 0xb3d   : > { %v2643_v45 = vld [vmem:[%s15622_s11] sm:$0xff]  ;;  %s15797_s11 = sld [smem:[#allocation14_spill]] }
 0xb3e   : > { %v2527_v3 = vmul.f32 %v2525_v2, %v2520_v63  ;;  %v2528_v4 = vmul.f32 %v2525_v2, %v2521_v0  ;;  %v1541_v63 = vld [vmem:[%s15623_s22 + $0x48] sm:$0xff]  ;;  %v1540_v0 = vld [vmem:[%s15623_s22 + $0x40] sm:$0xff]  ;;  %v1543_v2 = vld [vmem:[%s15623_s22 + $0x58] sm:$0xff] }
 0xb3f   : > { %v2532_v5 = vpop.permute.xlu0 %2531 }
 0xb40   : > { %v2534_v6 = vadd.f32 %v2532_v5, %v2527_v3  ;;  %v2535_v7 = vadd.f32 %v2532_v5, %v2528_v4  ;;  %v1542_v3 = vld [vmem:[%s15623_s22 + $0x50] sm:$0xff]  ;;  %v1545_v4 = vld [vmem:[%s15623_s22 + $0x68] sm:$0xff]  ;;  %v1544_v5 = vld [vmem:[%s15623_s22 + $0x60] sm:$0xff] }
 0xb42   : > { %v9649_v8 = vmul.f32 -1.442695, %v2534_v6  ;;  %v9650_v17 = vmul.f32 -1.442695, %v2535_v7 }
 0xb43   : > { %v2555_v31 = vpop.permute.xlu0 %2554 }
 0xb44   : > { %10439 = vpow2.f32 %v9649_v8  ;;  %v2633_v40 = vadd.f32 %v2632_v9, %v2555_v31  ;;  %v2635_v49 = vadd.f32 %v2634_v52, %v2555_v31  ;;  %v1537_v9 = vld [vmem:[%s15623_s22 + $0x28] sm:$0xff]  ;;  %v1536_v52 = vld [vmem:[%s15623_s22 + $0x20] sm:$0xff]  ;;  %v1555_v31 = vld [vmem:[%s15623_s22 + $0xb8] sm:$0xff] }
 0xb45   : > { %10441 = vpow2.f32 %v9650_v17  ;;  %v1549_v8 = vld [vmem:[%s15623_s22 + $0x88] sm:$0xff]  ;;  %v1548_v17 = vld [vmem:[%s15623_s22 + $0x80] sm:$0xff] }
 0xb47   : > { %v2731_v38 = vpop.permute.xlu0 %2730 }
 0xb4e   : > { %v10440_v20 = vpop.eup %10439 }
 0xb4f   : > { %v10442_v21 = vpop.eup %10441  ;;  %v2542_v26 = vadd.f32 1.0, %v10440_v20  ;;  %v1551_v20 = vld [vmem:[%s15623_s22 + $0x98] sm:$0xff] }
 0xb50   : > { %v2543_v28 = vadd.f32 1.0, %v10442_v21  ;;  %v1550_v21 = vld [vmem:[%s15623_s22 + $0x90] sm:$0xff] }
 0xb51   : > { %10443 = vrcp.f32 %v2542_v26  ;;  %v1553_v26 = vld [vmem:[%s15623_s22 + $0xa8] sm:$0xff] }
 0xb52   : > { %10445 = vrcp.f32 %v2543_v28  ;;  %v1552_v28 = vld [vmem:[%s15623_s22 + $0xa0] sm:$0xff] }
 0xb5b   : > { %v10444_v34 = vpop.eup %10443 }
 0xb5c   : > { %v10446_v35 = vpop.eup %10445  ;;  %v2548_v37 = vmul.f32 %v10444_v34, %v2534_v6  ;;  %v1547_v6 = vld [vmem:[%s15623_s22 + $0x78] sm:$0xff]  ;;  %v1554_v34 = vld [vmem:[%s15623_s22 + $0xb0] sm:$0xff] }
 0xb5d   : > { %v2549_v41 = vmul.f32 %v10446_v35, %v2535_v7  ;;  %v1546_v7 = vld [vmem:[%s15623_s22 + $0x70] sm:$0xff]  ;;  %v1557_v35 = vld [vmem:[%s15623_s22 + $0xc8] sm:$0xff] }
 0xb5e   : > { %v11943_v51 = vadd.f32 %v2633_v40, %v2548_v37  ;;  %v1556_v37 = vld [vmem:[%s15623_s22 + $0xc0] sm:$0xff]  ;;  %v1559_v40 = vld [vmem:[%s15623_s22 + $0xd8] sm:$0xff] }
 0xb5f   : > { %v11945_v42 = vadd.f32 %v2635_v49, %v2549_v41  ;;  %v1558_v41 = vld [vmem:[%s15623_s22 + $0xd0] sm:$0xff]  ;;  %v1561_v49 = vld [vmem:[%s15623_s22 + $0xe8] sm:$0xff] }
 0xb60   : > { %15624 = vst [vmem:[#allocation54_spill] sm:$0xff] %v11943_v51 }
 0xb61   : > { %15625 = vst [vmem:[#allocation55_spill] sm:$0xff] %v11945_v42  ;;  %2657 = vmatprep.subr.mxu1 %v11945_v42  ;;  %2736 = vmatprep.subr.mxu0 %v11945_v42 }
 0xb62   : > { %2658 = vmatpush1.msra.mxu1 %v11943_v51  ;;  %2737 = vmatpush1.msra.mxu0 %v11943_v51 }
 0xb63   : > { %9654 = vmatmul.mubr.msk.f32.vlgmr.msra.gmra.mrb[4].mxu1 %vm1893_vm10, %v2639_v43  ;;  %9655 = vmatmul.mubr.msk.f32.vlgmr.msra.gmra.mrb[12].mxu0 %vm1893_vm10, %v2641_v44  ;;  %v1560_v43 = vld [vmem:[%s15623_s22 + $0xe0] sm:$0xff]  ;;  %v1563_v44 = vld [vmem:[%s15623_s22 + $0xf8] sm:$0xff] }
 0xb64   : > { %2815 = vmatprep.subr.mxu1 %v11945_v42  ;;  %2879 = vmatprep.mubr.f32.mxu1 %v15320_v1 }
 0xb65   : > { %2816 = vmatpush1.msra.mxu1 %v11943_v51  ;;  %2950 = vmatprep.mubr.f32.mxu0 %v1533_v46  ;;  %v1565_v46 = vld [vmem:[%s15623_s22 + $0x108] sm:$0xff] }
 0xb67   : > { %9656 = vmatmul.mubr.msk.f32.vlgmr.msra.gmra.mrb[6].mxu1 %vm1893_vm10, %v2643_v45  ;;  %v1562_v45 = vld [vmem:[%s15623_s22 + $0xf0] sm:$0xff] }
 0xb68   : > { %3277 = vmatprep.mubr.f32.mxu1 %v15320_v1 }
 0xc36   : > { %v2723_v39 = vpop.f32.mrb[4].mxu1  ;;  %v2802_v48 = vpop.f32.mrb[12].mxu0 }
 0xc37   : > { %v2725_v53 = vpop.f32.mrb[5].mxu1  ;;  %v2804_v55 = vpop.f32.mrb[13].mxu0  ;;  %v2724_v58 = vadd.f32 %v2723_v39, %v2652_v47  ;;  %v11964_v27 = vadd.f32 %v2802_v48, %v2731_v38  ;;  %v1566_v39 = vld [vmem:[%s15623_s22 + $0x110] sm:$0xff]  ;;  %v1569_v48 = vld [vmem:[%s15623_s22 + $0x128] sm:$0xff] }
 0xc38   : > { %v2726_v56 = vadd.f32 %v2725_v53, %v2652_v47  ;;  %v11962_v57 = vadd.f32 %v2804_v55, %v2731_v38  ;;  %v1564_v47 = vld [vmem:[%s15623_s22 + $0x100] sm:$0xff]  ;;  %v1567_v38 = vld [vmem:[%s15623_s22 + $0x118] sm:$0xff] }
 0xc39   : > { %15627 = vst [vmem:[#allocation57_spill] sm:$0xff] %v11964_v27  ;;  %v1568_v53 = vld [vmem:[%s15623_s22 + $0x120] sm:$0xff]  ;;  %v1571_v55 = vld [vmem:[%s15623_s22 + $0x138] sm:$0xff] }
 0xc3a   : > { %15626 = vst [vmem:[#allocation56_spill] sm:$0xff] %v11962_v57  ;;  %2886 = vmatprep.subr.mxu0 %v2726_v56  ;;  %9657 = vmatprep.subr.msk.mxu1 %vm2561_vm12, %v11962_v57  ;;  %v1570_v56 = vld [vmem:[%s15623_s22 + $0x130] sm:$0xff] }
 0xc3b   : > { %2887 = vmatpush1.xpose.msra.mxu0 %v2724_v58  ;;  %9658 = vmatpush1.msk.msra.mxu1 %vm2561_vm12, %v11964_v27  ;;  %v1573_v58 = vld [vmem:[%s15623_s22 + $0x148] sm:$0xff] }
 0xc3e   : > { %2951 = vmatmul.mubr.f32.vlgmr.msra.gmra.mrb[14].mxu0 %v1532_v60  ;;  %v1572_v60 = vld [vmem:[%s15623_s22 + $0x140] sm:$0xff] }
 0xc3f   : > { %2955 = vmatprep.mubr.f32.mxu0 %v1535_v14  ;;  %v1575_v14 = vld [vmem:[%s15623_s22 + $0x158] sm:$0xff] }
 0xc42   : > { %2956 = vmatmul.mubr.f32.gmra.mrb[16].mxu0 %v1534_v50  ;;  %v1574_v50 = vld [vmem:[%s15623_s22 + $0x150] sm:$0xff] }
 0xc43   : > { %2960 = vmatprep.mubr.f32.mxu0 %v1537_v9  ;;  %v1577_v9 = vld [vmem:[%s15623_s22 + $0x168] sm:$0xff] }
 0xc46   : > { %2961 = vmatmul.mubr.f32.gmra.mrb[18].mxu0 %v1536_v52  ;;  %v1576_v52 = vld [vmem:[%s15623_s22 + $0x160] sm:$0xff] }
 0xc47   : > { %2965 = vmatprep.mubr.f32.mxu0 %v1539_v61  ;;  %v1579_v61 = vld [vmem:[%s15623_s22 + $0x178] sm:$0xff] }
 0xc4a   : > { %2966 = vmatmul.mubr.f32.gmra.mrb[20].mxu0 %v1538_v62  ;;  %v1578_v62 = vld [vmem:[%s15623_s22 + $0x170] sm:$0xff] }
 0xc4b   : > { %2970 = vmatprep.mubr.f32.mxu0 %v1541_v63  ;;  %v1581_v63 = vld [vmem:[%s15623_s22 + $0x188] sm:$0xff] }
 0xc4e   : > { %2971 = vmatmul.mubr.f32.gmra.mrb[22].mxu0 %v1540_v0  ;;  %v1580_v0 = vld [vmem:[%s15623_s22 + $0x180] sm:$0xff] }
 0xc4f   : > { %2975 = vmatprep.mubr.f32.mxu0 %v1543_v2  ;;  %v1583_v2 = vld [vmem:[%s15623_s22 + $0x198] sm:$0xff] }
 0xc52   : > { %2976 = vmatmul.mubr.f32.gmra.mrb[24].mxu0 %v1542_v3  ;;  %v1582_v3 = vld [vmem:[%s15623_s22 + $0x190] sm:$0xff] }
 0xc53   : > { %2980 = vmatprep.mubr.f32.mxu0 %v1545_v4  ;;  %v1585_v4 = vld [vmem:[%s15623_s22 + $0x1a8] sm:$0xff] }
 0xc56   : > { %2981 = vmatmul.mubr.f32.gmra.mrb[26].mxu0 %v1544_v5  ;;  %v1584_v5 = vld [vmem:[%s15623_s22 + $0x1a0] sm:$0xff] }
 0xc57   : > { %2985 = vmatprep.mubr.f32.mxu0 %v1547_v6  ;;  %v1587_v6 = vld [vmem:[%s15623_s22 + $0x1b8] sm:$0xff] }
 0xc5a   : > { %2986 = vmatmul.mubr.f32.gmra.mrb[28].mxu0 %v1546_v7  ;;  %v1586_v7 = vld [vmem:[%s15623_s22 + $0x1b0] sm:$0xff] }
 0xc5b   : > { %2990 = vmatprep.mubr.f32.mxu0 %v1549_v8  ;;  %v1589_v8 = vld [vmem:[%s15623_s22 + $0x1c8] sm:$0xff] }
 0xc5e   : > { %2991 = vmatmul.mubr.f32.gmra.mrb[30].mxu0 %v1548_v17  ;;  %v1588_v17 = vld [vmem:[%s15623_s22 + $0x1c0] sm:$0xff] }
 0xc5f   : > { %2995 = vmatprep.mubr.f32.mxu0 %v1551_v20  ;;  %v1591_v20 = vld [vmem:[%s15623_s22 + $0x1d8] sm:$0xff] }
 0xc62   : > { %2996 = vmatmul.mubr.f32.gmra.mrb[32].mxu0 %v1550_v21  ;;  %v1590_v21 = vld [vmem:[%s15623_s22 + $0x1d0] sm:$0xff] }
 0xc63   : > { %3000 = vmatprep.mubr.f32.mxu0 %v1553_v26  ;;  %v1593_v26 = vld [vmem:[%s15623_s22 + $0x1e8] sm:$0xff] }
 0xc66   : > { %3001 = vmatmul.mubr.f32.gmra.mrb[34].mxu0 %v1552_v28  ;;  %v1592_v28 = vld [vmem:[%s15623_s22 + $0x1e0] sm:$0xff] }
 0xc67   : > { %3005 = vmatprep.mubr.f32.mxu0 %v1555_v31  ;;  %v1595_v31 = vld [vmem:[%s15623_s22 + $0x1f8] sm:$0xff] }
 0xc6a   : > { %3006 = vmatmul.mubr.f32.gmra.mrb[36].mxu0 %v1554_v34  ;;  %v1594_v34 = vld [vmem:[%s15623_s22 + $0x1f0] sm:$0xff] }
 0xc6b   : > { %3010 = vmatprep.mubr.f32.mxu0 %v1557_v35  ;;  %v12033_v35 = vpop.f32.mrb[6].mxu1 }
 0xc6c   : > { %15628 = vst [vmem:[#allocation58_spill] sm:$0xff] %v12033_v35 }
 0xc6e   : > { %3011 = vmatmul.mubr.f32.gmra.mrb[38].mxu0 %v1556_v37  ;;  %v12035_v37 = vpop.f32.mrb[7].mxu1 }
 0xc6f   : > { %3015 = vmatprep.mubr.f32.mxu0 %v1559_v40  ;;  %15629 = vst [vmem:[#allocation59_spill] sm:$0xff] %v12035_v37 }
 0xc72   : > { %3016 = vmatmul.mubr.f32.gmra.mrb[40].mxu0 %v1558_v41 }
 0xc73   : > { %3020 = vmatprep.mubr.f32.mxu0 %v1561_v49 }
 0xc76   : > { %3021 = vmatmul.mubr.f32.gmra.mrb[42].mxu0 %v1560_v43 }
 0xc77   : > { %3025 = vmatprep.mubr.f32.mxu0 %v1563_v44 }
 0xc7a   : > { %3026 = vmatmul.mubr.f32.gmra.mrb[44].mxu0 %v1562_v45 }
 0xc7b   : > { %3030 = vmatprep.mubr.f32.mxu0 %v1565_v46 }
 0xc7e   : > { %3031 = vmatmul.mubr.f32.gmra.mrb[46].mxu0 %v1564_v47 }
 0xc7f   : > { %3035 = vmatprep.mubr.f32.mxu0 %v1567_v38 }
 0xc82   : > { %3036 = vmatmul.mubr.f32.gmra.mrb[48].mxu0 %v1566_v39 }
 0xc83   : > { %3040 = vmatprep.mubr.f32.mxu0 %v1569_v48 }
 0xc86   : > { %3041 = vmatmul.mubr.f32.gmra.mrb[50].mxu0 %v1568_v53 }
 0xc87   : > { %3045 = vmatprep.mubr.f32.mxu0 %v1571_v55 }
 0xc8a   : > { %3046 = vmatmul.mubr.f32.gmra.mrb[52].mxu0 %v1570_v56 }
 0xc8b   : > { %3050 = vmatprep.mubr.f32.mxu0 %v1573_v58 }
 0xc8e   : > { %3051 = vmatmul.mubr.f32.gmra.mrb[54].mxu0 %v1572_v60 }
 0xc8f   : > { %3055 = vmatprep.mubr.f32.mxu0 %v1575_v14 }
 0xc92   : > { %3056 = vmatmul.mubr.f32.gmra.mrb[56].mxu0 %v1574_v50 }
 0xc93   : > { %3060 = vmatprep.mubr.f32.mxu0 %v1577_v9 }
 0xc96   : > { %3061 = vmatmul.mubr.f32.gmra.mrb[58].mxu0 %v1576_v52 }
 0xc97   : > { %3065 = vmatprep.mubr.f32.mxu0 %v1579_v61 }
 0xc9a   : > { %3066 = vmatmul.mubr.f32.gmra.mrb[60].mxu0 %v1578_v62 }
 0xc9b   : > { %3070 = vmatprep.mubr.f32.mxu0 %v1581_v63 }
 0xc9e   : > { %3071 = vmatmul.mubr.f32.gmra.mrb[62].mxu0 %v1580_v0 }
 0xc9f   : > { %3075 = vmatprep.mubr.f32.mxu0 %v1583_v2 }
 0xca2   : > { %3076 = vmatmul.mubr.f32.gmra.mrb[64].mxu0 %v1582_v3 }
 0xca3   : > { %3080 = vmatprep.mubr.f32.mxu0 %v1585_v4 }
 0xca6   : > { %3081 = vmatmul.mubr.f32.gmra.mrb[66].mxu0 %v1584_v5 }
 0xca7   : > { %3085 = vmatprep.mubr.f32.mxu0 %v1587_v6 }
 0xcaa   : > { %3086 = vmatmul.mubr.f32.gmra.mrb[68].mxu0 %v1586_v7 }
 0xcab   : > { %3090 = vmatprep.mubr.f32.mxu0 %v1589_v8 }
 0xcae   : > { %3091 = vmatmul.mubr.f32.gmra.mrb[70].mxu0 %v1588_v17 }
 0xcaf   : > { %3095 = vmatprep.mubr.f32.mxu0 %v1591_v20 }
 0xcb2   : > { %3096 = vmatmul.mubr.f32.gmra.mrb[72].mxu0 %v1590_v21 }
 0xcb3   : > { %3100 = vmatprep.mubr.f32.mxu0 %v1593_v26 }
 0xcb6   : > { %3101 = vmatmul.mubr.f32.gmra.mrb[74].mxu0 %v1592_v28 }
 0xcb7   : > { %3105 = vmatprep.mubr.f32.mxu0 %v1595_v31 }
 0xcba   : > { %3106 = vmatmul.mubr.f32.gmra.mrb[76].mxu0 %v1594_v34 }
 0xd11   : > { %v12037_v40 = vpop.f32.mrb[14].mxu0 }
 0xd12   : > { %15630 = vst [vmem:[#allocation60_spill] sm:$0xff] %v12037_v40  ;;  %v2954_v41 = vpop.f32.mrb[15].mxu0  ;;  %9659 = vmatmul.mubr.msk.f32.vlgmr.msra.gmra.mrb[8].mxu1 %vm2557_vm13, %v12037_v40 }
 0xd13   : > { %3283 = vmatprep.mubr.f32.mxu1 %v15320_v1 }
 0xd15   : > { %v12042_v49 = vpop.f32.mrb[16].mxu0 }
 0xd16   : > { %15631 = vst [vmem:[#allocation61_spill] sm:$0xff] %v12042_v49  ;;  %v2959_v43 = vpop.f32.mrb[17].mxu0  ;;  %9660 = vmatmul.mubr.msk.f32.gmra.mrb[10].mxu1 %vm2557_vm13, %v12042_v49 }
 0xd17   : > { %3289 = vmatprep.mubr.f32.mxu1 %v15320_v1 }
 0xd19   : > { %v12047_v44 = vpop.f32.mrb[18].mxu0 }
 0xd1a   : > { %15632 = vst [vmem:[#allocation62_spill] sm:$0xff] %v12047_v44  ;;  %v2964_v45 = vpop.f32.mrb[19].mxu0  ;;  %9661 = vmatmul.mubr.msk.f32.gmra.mrb[12].mxu1 %vm2557_vm13, %v12047_v44 }
 0xd1b   : > { %3295 = vmatprep.mubr.f32.mxu1 %v15320_v1 }
 0xd1d   : > { %v12052_v46 = vpop.f32.mrb[20].mxu0 }
 0xd1e   : > { %15633 = vst [vmem:[#allocation63_spill] sm:$0xff] %v12052_v46  ;;  %v2969_v47 = vpop.f32.mrb[21].mxu0  ;;  %9662 = vmatmul.mubr.msk.f32.gmra.mrb[14].mxu1 %vm2557_vm13, %v12052_v46 }
 0xd1f   : > { %3301 = vmatprep.mubr.f32.mxu1 %v15320_v1 }
 0xd21   : > { %v12057_v38 = vpop.f32.mrb[22].mxu0 }
 0xd22   : > { %15634 = vst [vmem:[#allocation64_spill] sm:$0xff] %v12057_v38  ;;  %v2974_v39 = vpop.f32.mrb[23].mxu0  ;;  %9663 = vmatmul.mubr.msk.f32.gmra.mrb[16].mxu1 %vm2557_vm13, %v12057_v38 }
 0xd23   : > { %3307 = vmatprep.mubr.f32.mxu1 %v15320_v1 }
 0xd25   : > { %v12062_v48 = vpop.f32.mrb[24].mxu0 }
 0xd26   : > { %15635 = vst [vmem:[#allocation65_spill] sm:$0xff] %v12062_v48  ;;  %v2979_v53 = vpop.f32.mrb[25].mxu0  ;;  %9664 = vmatmul.mubr.msk.f32.gmra.mrb[18].mxu1 %vm2557_vm13, %v12062_v48 }
 0xd27   : > { %3313 = vmatprep.mubr.f32.mxu1 %v15320_v1 }
 0xd29   : > { %v12067_v55 = vpop.f32.mrb[26].mxu0 }
 0xd2a   : > { %15636 = vst [vmem:[#allocation66_spill] sm:$0xff] %v12067_v55  ;;  %v2984_v56 = vpop.f32.mrb[27].mxu0  ;;  %9665 = vmatmul.mubr.msk.f32.gmra.mrb[20].mxu1 %vm2557_vm13, %v12067_v55 }
 0xd2b   : > { %3319 = vmatprep.mubr.f32.mxu1 %v15320_v1 }
 0xd2d   : > { %v12072_v58 = vpop.f32.mrb[28].mxu0 }
 0xd2e   : > { %15637 = vst [vmem:[#allocation67_spill] sm:$0xff] %v12072_v58  ;;  %v2989_v60 = vpop.f32.mrb[29].mxu0  ;;  %9666 = vmatmul.mubr.msk.f32.gmra.mrb[22].mxu1 %vm2557_vm13, %v12072_v58 }
 0xd2f   : > { %3325 = vmatprep.mubr.f32.mxu1 %v15320_v1 }
 0xd31   : > { %v12077_v14 = vpop.f32.mrb[30].mxu0 }
 0xd32   : > { %15638 = vst [vmem:[#allocation68_spill] sm:$0xff] %v12077_v14  ;;  %9667 = vmatmul.mubr.msk.f32.gmra.mrb[24].mxu1 %vm2557_vm13, %v12077_v14  ;;  %v2994_v50 = vpop.f32.mrb[31].mxu0 }
 0xd33   : > { %3331 = vmatprep.mubr.f32.mxu1 %v15320_v1 }
 0xd35   : > { %v12082_v9 = vpop.f32.mrb[32].mxu0 }
 0xd36   : > { %15639 = vst [vmem:[#allocation69_spill] sm:$0xff] %v12082_v9  ;;  %9668 = vmatmul.mubr.msk.f32.gmra.mrb[26].mxu1 %vm2557_vm13, %v12082_v9  ;;  %v2999_v52 = vpop.f32.mrb[33].mxu0 }
 0xd37   : > { %3337 = vmatprep.mubr.f32.mxu1 %v15320_v1 }
 0xd39   : > { %v12087_v61 = vpop.f32.mrb[34].mxu0 }
 0xd3a   : > { %15640 = vst [vmem:[#allocation70_spill] sm:$0xff] %v12087_v61  ;;  %9669 = vmatmul.mubr.msk.f32.gmra.mrb[28].mxu1 %vm2557_vm13, %v12087_v61  ;;  %v3004_v62 = vpop.f32.mrb[35].mxu0 }
 0xd3b   : > { %3343 = vmatprep.mubr.f32.mxu1 %v15320_v1 }
 0xd3d   : > { %v12092_v63 = vpop.f32.mrb[36].mxu0 }
 0xd3e   : > { %15641 = vst [vmem:[#allocation71_spill] sm:$0xff] %v12092_v63  ;;  %9670 = vmatmul.mubr.msk.f32.gmra.mrb[30].mxu1 %vm2557_vm13, %v12092_v63  ;;  %v3009_v0 = vpop.f32.mrb[37].mxu0 }
 0xd3f   : > { %3349 = vmatprep.mubr.f32.mxu1 %v15320_v1 }
 0xd41   : > { %v12097_v2 = vpop.f32.mrb[38].mxu0 }
 0xd42   : > { %15642 = vst [vmem:[#allocation72_spill] sm:$0xff] %v12097_v2  ;;  %9671 = vmatmul.mubr.msk.f32.gmra.mrb[32].mxu1 %vm2557_vm13, %v12097_v2  ;;  %v3014_v3 = vpop.f32.mrb[39].mxu0 }
 0xd43   : > { %3355 = vmatprep.mubr.f32.mxu1 %v15320_v1 }
 0xd45   : > { %v12102_v4 = vpop.f32.mrb[40].mxu0 }
 0xd46   : > { %15643 = vst [vmem:[#allocation73_spill] sm:$0xff] %v12102_v4  ;;  %9672 = vmatmul.mubr.msk.f32.gmra.mrb[34].mxu1 %vm2557_vm13, %v12102_v4  ;;  %v3019_v5 = vpop.f32.mrb[41].mxu0 }
 0xd47   : > { %3361 = vmatprep.mubr.f32.mxu1 %v15320_v1 }
 0xd49   : > { %v12107_v6 = vpop.f32.mrb[42].mxu0 }
 0xd4a   : > { %15644 = vst [vmem:[#allocation74_spill] sm:$0xff] %v12107_v6  ;;  %9673 = vmatmul.mubr.msk.f32.gmra.mrb[36].mxu1 %vm2557_vm13, %v12107_v6  ;;  %v3024_v7 = vpop.f32.mrb[43].mxu0 }
 0xd4b   : > { %3367 = vmatprep.mubr.f32.mxu1 %v15320_v1 }
 0xd4d   : > { %v12112_v8 = vpop.f32.mrb[44].mxu0 }
 0xd4e   : > { %15645 = vst [vmem:[#allocation75_spill] sm:$0xff] %v12112_v8  ;;  %9674 = vmatmul.mubr.msk.f32.gmra.mrb[38].mxu1 %vm2557_vm13, %v12112_v8  ;;  %v3029_v17 = vpop.f32.mrb[45].mxu0 }
 0xd4f   : > { %3373 = vmatprep.mubr.f32.mxu1 %v15320_v1 }
 0xd51   : > { %v12117_v20 = vpop.f32.mrb[46].mxu0 }
 0xd52   : > { %15646 = vst [vmem:[#allocation76_spill] sm:$0xff] %v12117_v20  ;;  %9675 = vmatmul.mubr.msk.f32.gmra.mrb[40].mxu1 %vm2557_vm13, %v12117_v20  ;;  %v3034_v21 = vpop.f32.mrb[47].mxu0 }
 0xd53   : > { %3379 = vmatprep.mubr.f32.mxu1 %v15320_v1 }
 0xd55   : > { %v12122_v26 = vpop.f32.mrb[48].mxu0 }
 0xd56   : > { %15647 = vst [vmem:[#allocation77_spill] sm:$0xff] %v12122_v26  ;;  %9676 = vmatmul.mubr.msk.f32.gmra.mrb[42].mxu1 %vm2557_vm13, %v12122_v26  ;;  %v3039_v28 = vpop.f32.mrb[49].mxu0 }
 0xd57   : > { %3385 = vmatprep.mubr.f32.mxu1 %v15320_v1 }
 0xd59   : > { %v12127_v31 = vpop.f32.mrb[50].mxu0 }
 0xd5a   : > { %15648 = vst [vmem:[#allocation78_spill] sm:$0xff] %v12127_v31  ;;  %9677 = vmatmul.mubr.msk.f32.gmra.mrb[44].mxu1 %vm2557_vm13, %v12127_v31  ;;  %v3044_v34 = vpop.f32.mrb[51].mxu0 }
 0xd5b   : > { %3391 = vmatprep.mubr.f32.mxu1 %v15320_v1 }
 0xd5d   : > { %v12132_v41 = vpop.f32.mrb[52].mxu0 }
 0xd5e   : > { %15649 = vst [vmem:[#allocation79_spill] sm:$0xff] %v12132_v41  ;;  %9678 = vmatmul.mubr.msk.f32.gmra.mrb[46].mxu1 %vm2557_vm13, %v12132_v41  ;;  %v3049_v43 = vpop.f32.mrb[53].mxu0 }
 0xd5f   : > { %3397 = vmatprep.mubr.f32.mxu1 %v15320_v1 }
 0xd61   : > { %v12137_v45 = vpop.f32.mrb[54].mxu0 }
 0xd62   : > { %15650 = vst [vmem:[#allocation80_spill] sm:$0xff] %v12137_v45  ;;  %9679 = vmatmul.mubr.msk.f32.gmra.mrb[48].mxu1 %vm2557_vm13, %v12137_v45  ;;  %v3054_v47 = vpop.f32.mrb[55].mxu0 }
 0xd63   : > { %3403 = vmatprep.mubr.f32.mxu1 %v15320_v1 }
 0xd65   : > { %v12142_v39 = vpop.f32.mrb[56].mxu0 }
 0xd66   : > { %15651 = vst [vmem:[#allocation81_spill] sm:$0xff] %v12142_v39  ;;  %9680 = vmatmul.mubr.msk.f32.gmra.mrb[50].mxu1 %vm2557_vm13, %v12142_v39  ;;  %v3059_v53 = vpop.f32.mrb[57].mxu0 }
 0xd67   : > { %3409 = vmatprep.mubr.f32.mxu1 %v15320_v1 }
 0xd69   : > { %v12147_v56 = vpop.f32.mrb[58].mxu0 }
 0xd6a   : > { %15652 = vst [vmem:[#allocation82_spill] sm:$0xff] %v12147_v56  ;;  %9681 = vmatmul.mubr.msk.f32.gmra.mrb[52].mxu1 %vm2557_vm13, %v12147_v56  ;;  %v3064_v60 = vpop.f32.mrb[59].mxu0 }
 0xd6b   : > { %3415 = vmatprep.mubr.f32.mxu1 %v15320_v1 }
 0xd6d   : > { %v12152_v50 = vpop.f32.mrb[60].mxu0 }
 0xd6e   : > { %15653 = vst [vmem:[#allocation83_spill] sm:$0xff] %v12152_v50  ;;  %9682 = vmatmul.mubr.msk.f32.gmra.mrb[54].mxu1 %vm2557_vm13, %v12152_v50  ;;  %v3069_v52 = vpop.f32.mrb[61].mxu0 }
 0xd6f   : > { %3421 = vmatprep.mubr.f32.mxu1 %v15320_v1 }
 0xd71   : > { %v12157_v62 = vpop.f32.mrb[62].mxu0 }
 0xd72   : > { %15654 = vst [vmem:[#allocation84_spill] sm:$0xff] %v12157_v62  ;;  %v3074_v0 = vpop.f32.mrb[63].mxu0  ;;  %9683 = vmatmul.mubr.msk.f32.gmra.mrb[56].mxu1 %vm2557_vm13, %v12157_v62 }
 0xd73   : > { %3427 = vmatprep.mubr.f32.mxu1 %v15320_v1 }
 0xd75   : > { %v12162_v3 = vpop.f32.mrb[64].mxu0 }
 0xd76   : > { %15655 = vst [vmem:[#allocation85_spill] sm:$0xff] %v12162_v3  ;;  %v3079_v5 = vpop.f32.mrb[65].mxu0  ;;  %9684 = vmatmul.mubr.msk.f32.gmra.mrb[58].mxu1 %vm2557_vm13, %v12162_v3 }
 0xd77   : > { %3433 = vmatprep.mubr.f32.mxu1 %v15320_v1 }
 0xd79   : > { %v12167_v7 = vpop.f32.mrb[66].mxu0 }
 0xd7a   : > { %15656 = vst [vmem:[#allocation86_spill] sm:$0xff] %v12167_v7  ;;  %v3084_v17 = vpop.f32.mrb[67].mxu0  ;;  %9685 = vmatmul.mubr.msk.f32.gmra.mrb[60].mxu1 %vm2557_vm13, %v12167_v7 }
 0xd7b   : > { %3439 = vmatprep.mubr.f32.mxu1 %v15320_v1 }
 0xd7d   : > { %v12172_v21 = vpop.f32.mrb[68].mxu0 }
 0xd7e   : > { %15657 = vst [vmem:[#allocation87_spill] sm:$0xff] %v12172_v21  ;;  %v3089_v28 = vpop.f32.mrb[69].mxu0  ;;  %9686 = vmatmul.mubr.msk.f32.gmra.mrb[62].mxu1 %vm2557_vm13, %v12172_v21 }
 0xd7f   : > { %3445 = vmatprep.mubr.f32.mxu1 %v15320_v1 }
 0xd81   : > { %v12177_v34 = vpop.f32.mrb[70].mxu0 }
 0xd82   : > { %15658 = vst [vmem:[#allocation88_spill] sm:$0xff] %v12177_v34  ;;  %v3094_v43 = vpop.f32.mrb[71].mxu0  ;;  %9687 = vmatmul.mubr.msk.f32.gmra.mrb[64].mxu1 %vm2557_vm13, %v12177_v34 }
 0xd83   : > { %3451 = vmatprep.mubr.f32.mxu1 %v15320_v1 }
 0xd85   : > { %v12182_v47 = vpop.f32.mrb[72].mxu0 }
 0xd86   : > { %15659 = vst [vmem:[#allocation89_spill] sm:$0xff] %v12182_v47  ;;  %v3099_v53 = vpop.f32.mrb[73].mxu0  ;;  %9688 = vmatmul.mubr.msk.f32.gmra.mrb[66].mxu1 %vm2557_vm13, %v12182_v47 }
 0xd87   : > { %3457 = vmatprep.mubr.f32.mxu1 %v15320_v1 }
 0xd89   : > { %v12187_v60 = vpop.f32.mrb[74].mxu0 }
 0xd8a   : > { %15660 = vst [vmem:[#allocation90_spill] sm:$0xff] %v12187_v60  ;;  %v3104_v52 = vpop.f32.mrb[75].mxu0  ;;  %9689 = vmatmul.mubr.msk.f32.gmra.mrb[68].mxu1 %vm2557_vm13, %v12187_v60 }
 0xd8b   : > { %3463 = vmatprep.mubr.f32.mxu1 %v15320_v1 }
 0xd8d   : > { %v12192_v0 = vpop.f32.mrb[76].mxu0 }
 0xd8e   : > { %15661 = vst [vmem:[#allocation91_spill] sm:$0xff] %v12192_v0  ;;  %v3109_v5 = vpop.f32.mrb[77].mxu0  ;;  %9690 = vmatmul.mubr.msk.f32.gmra.mrb[70].mxu1 %vm2557_vm13, %v12192_v0 }
 0xd8f   : > { %5236 = vmatprep.mubr.f32.mxu1 %v15320_v1 }
 0xde5   : > { %v3279_v17 = vpop.f32.mrb[8].mxu1 }
 0xde6   : > { %v12197_v28 = vmul.f32 0.5, %v3279_v17  ;;  %v3281_v43 = vpop.f32.mrb[9].mxu1 }
 0xde7   : > { %v12199_v53 = vmul.f32 0.5, %v3281_v43 }
 0xde9   : > { %v3285_v52 = vpop.f32.mrb[10].mxu1  ;;  %v3534_v54 = vmax.f32 %v12197_v28, %v12199_v53 }
 0xdea   : > { %v12203_v59 = vmul.f32 0.5, %v3285_v52  ;;  %v3287_v33 = vpop.f32.mrb[11].mxu1 }
 0xdeb   : > { %v12205_v32 = vmul.f32 0.5, %v3287_v33  ;;  %3535 = vmax.xlane.f32.xlu1 %v3534_v54 }
 0xded   : > { %v3291_v5 = vpop.f32.mrb[12].mxu1  ;;  %v3537_v1 = vmax.f32 %v12203_v59, %v12205_v32 }
 0xdee   : > { %v12209_v30 = vmul.f32 0.5, %v3291_v5  ;;  %v3293_v17 = vpop.f32.mrb[13].mxu1 }
 0xdef   : > { %v12211_v29 = vmul.f32 0.5, %v3293_v17  ;;  %3538 = vmax.xlane.f32.xlu0 %v3537_v1 }
 0xdf1   : > { %v3297_v43 = vpop.f32.mrb[14].mxu1  ;;  %v3540_v12 = vmax.f32 %v12209_v30, %v12211_v29 }
 0xdf2   : > { %v12215_v52 = vmul.f32 0.5, %v3297_v43  ;;  %v3299_v13 = vpop.f32.mrb[15].mxu1 }
 0xdf3   : > { %v12217_v33 = vmul.f32 0.5, %v3299_v13  ;;  %3541 = vmax.xlane.f32.xlu0 %v3540_v12 }
 0xdf5   : > { %v3303_v54 = vpop.f32.mrb[16].mxu1  ;;  %v3543_v25 = vmax.f32 %v12215_v52, %v12217_v33 }
 0xdf6   : > { %v12221_v5 = vmul.f32 0.5, %v3303_v54  ;;  %v3305_v24 = vpop.f32.mrb[17].mxu1 }
 0xdf7   : > { %v12223_v17 = vmul.f32 0.5, %v3305_v24  ;;  %3544 = vmax.xlane.f32.xlu1 %v3543_v25 }
 0xdf9   : > { %v3309_v1 = vpop.f32.mrb[18].mxu1  ;;  %v3546_v23 = vmax.f32 %v12221_v5, %v12223_v17 }
 0xdfa   : > { %v12227_v43 = vmul.f32 0.5, %v3309_v1  ;;  %v3311_v22 = vpop.f32.mrb[19].mxu1 }
 0xdfb   : > { %v12229_v13 = vmul.f32 0.5, %v3311_v22  ;;  %3547 = vmax.xlane.f32.xlu0 %v3546_v23 }
 0xdfd   : > { %v3315_v12 = vpop.f32.mrb[20].mxu1  ;;  %v3549_v16 = vmax.f32 %v12227_v43, %v12229_v13 }
 0xdfe   : > { %v12233_v54 = vmul.f32 0.5, %v3315_v12  ;;  %v3317_v15 = vpop.f32.mrb[21].mxu1 }
 0xdff   : > { %v12235_v24 = vmul.f32 0.5, %v3317_v15  ;;  %3550 = vmax.xlane.f32.xlu1 %v3549_v16 }
 0xe01   : > { %v3321_v25 = vpop.f32.mrb[22].mxu1  ;;  %v3552_v11 = vmax.f32 %v12233_v54, %v12235_v24 }
 0xe02   : > { %v12239_v1 = vmul.f32 0.5, %v3321_v25  ;;  %v3323_v10 = vpop.f32.mrb[23].mxu1 }
 0xe03   : > { %v12241_v22 = vmul.f32 0.5, %v3323_v10  ;;  %3553 = vmax.xlane.f32.xlu0 %v3552_v11 }
 0xe05   : > { %v3327_v23 = vpop.f32.mrb[24].mxu1  ;;  %v3555_v19 = vmax.f32 %v12239_v1, %v12241_v22 }
 0xe06   : > { %v12245_v12 = vmul.f32 0.5, %v3327_v23  ;;  %v3329_v18 = vpop.f32.mrb[25].mxu1 }
 0xe07   : > { %v12247_v15 = vmul.f32 0.5, %v3329_v18  ;;  %3556 = vmax.xlane.f32.xlu1 %v3555_v19 }
 0xe09   : > { %v3333_v16 = vpop.f32.mrb[26].mxu1  ;;  %v3558_v36 = vmax.f32 %v12245_v12, %v12247_v15 }
 0xe0a   : > { %v12251_v25 = vmul.f32 0.5, %v3333_v16  ;;  %v3335_v42 = vpop.f32.mrb[27].mxu1 }
 0xe0b   : > { %v12253_v10 = vmul.f32 0.5, %v3335_v42  ;;  %3559 = vmax.xlane.f32.xlu0 %v3558_v36 }
 0xe0d   : > { %v3339_v11 = vpop.f32.mrb[28].mxu1  ;;  %v3561_v51 = vmax.f32 %v12251_v25, %v12253_v10 }
 0xe0e   : > { %v12257_v23 = vmul.f32 0.5, %v3339_v11  ;;  %v3341_v27 = vpop.f32.mrb[29].mxu1 }
 0xe0f   : > { %v12259_v18 = vmul.f32 0.5, %v3341_v27  ;;  %3562 = vmax.xlane.f32.xlu1 %v3561_v51 }
 0xe11   : > { %v3345_v19 = vpop.f32.mrb[30].mxu1  ;;  %v3564_v35 = vmax.f32 %v12257_v23, %v12259_v18 }
 0xe12   : > { %v12263_v16 = vmul.f32 0.5, %v3345_v19  ;;  %v3347_v57 = vpop.f32.mrb[31].mxu1 }
 0xe13   : > { %v12265_v42 = vmul.f32 0.5, %v3347_v57  ;;  %3565 = vmax.xlane.f32.xlu0 %v3564_v35 }
 0xe15   : > { %v3351_v36 = vpop.f32.mrb[32].mxu1  ;;  %v3567_v37 = vmax.f32 %v12263_v16, %v12265_v42 }
 0xe16   : > { %v12269_v11 = vmul.f32 0.5, %v3351_v36  ;;  %v3353_v0 = vpop.f32.mrb[33].mxu1 }
 0xe17   : > { %v12271_v27 = vmul.f32 0.5, %v3353_v0  ;;  %3568 = vmax.xlane.f32.xlu1 %v3567_v37 }
 0xe19   : > { %v3357_v51 = vpop.f32.mrb[34].mxu1  ;;  %v3570_v60 = vmax.f32 %v12269_v11, %v12271_v27 }
 0xe1a   : > { %v12275_v19 = vmul.f32 0.5, %v3357_v51  ;;  %v3359_v47 = vpop.f32.mrb[35].mxu1 }
 0xe1b   : > { %v12277_v57 = vmul.f32 0.5, %v3359_v47  ;;  %3571 = vmax.xlane.f32.xlu0 %v3570_v60 }
 0xe1d   : > { %v3363_v35 = vpop.f32.mrb[36].mxu1  ;;  %v3573_v34 = vmax.f32 %v12275_v19, %v12277_v57 }
 0xe1e   : > { %v12281_v36 = vmul.f32 0.5, %v3363_v35  ;;  %v3365_v21 = vpop.f32.mrb[37].mxu1 }
 0xe1f   : > { %v12283_v0 = vmul.f32 0.5, %v3365_v21  ;;  %3574 = vmax.xlane.f32.xlu1 %v3573_v34 }
 0xe21   : > { %v3369_v37 = vpop.f32.mrb[38].mxu1  ;;  %v3576_v7 = vmax.f32 %v12281_v36, %v12283_v0 }
 0xe22   : > { %v12287_v51 = vmul.f32 0.5, %v3369_v37  ;;  %v3371_v3 = vpop.f32.mrb[39].mxu1 }
 0xe23   : > { %v12289_v47 = vmul.f32 0.5, %v3371_v3  ;;  %3577 = vmax.xlane.f32.xlu0 %v3576_v7 }
 0xe25   : > { %v3375_v60 = vpop.f32.mrb[40].mxu1  ;;  %v3579_v62 = vmax.f32 %v12287_v51, %v12289_v47 }
 0xe26   : > { %v12293_v35 = vmul.f32 0.5, %v3375_v60  ;;  %v3377_v50 = vpop.f32.mrb[41].mxu1 }
 0xe27   : > { %v12295_v21 = vmul.f32 0.5, %v3377_v50  ;;  %3580 = vmax.xlane.f32.xlu1 %v3579_v62 }
 0xe29   : > { %v3381_v34 = vpop.f32.mrb[42].mxu1  ;;  %v3582_v56 = vmax.f32 %v12293_v35, %v12295_v21 }
 0xe2a   : > { %v12299_v37 = vmul.f32 0.5, %v3381_v34  ;;  %v3383_v39 = vpop.f32.mrb[43].mxu1 }
 0xe2b   : > { %v12301_v3 = vmul.f32 0.5, %v3383_v39  ;;  %3583 = vmax.xlane.f32.xlu0 %v3582_v56 }
 0xe2d   : > { %15662 = vst [vmem:[#allocation92_spill] sm:$0xff] %v12301_v3  ;;  %v3387_v7 = vpop.f32.mrb[44].mxu1  ;;  %v3585_v45 = vmax.f32 %v12299_v37, %v12301_v3 }
 0xe2e   : > { %v12305_v60 = vmul.f32 0.5, %v3387_v7  ;;  %v3389_v41 = vpop.f32.mrb[45].mxu1 }
 0xe2f   : > { %v12307_v50 = vmul.f32 0.5, %v3389_v41  ;;  %3586 = vmax.xlane.f32.xlu1 %v3585_v45 }
 0xe30   : > { %15663 = vst [vmem:[#allocation93_spill] sm:$0xff] %v12305_v60 }
 0xe31   : > { %15664 = vst [vmem:[#allocation94_spill] sm:$0xff] %v12307_v50  ;;  %v3393_v62 = vpop.f32.mrb[46].mxu1  ;;  %v3588_v31 = vmax.f32 %v12305_v60, %v12307_v50 }
 0xe32   : > { %v12311_v34 = vmul.f32 0.5, %v3393_v62  ;;  %v3395_v26 = vpop.f32.mrb[47].mxu1 }
 0xe33   : > { %v12313_v39 = vmul.f32 0.5, %v3395_v26  ;;  %3589 = vmax.xlane.f32.xlu0 %v3588_v31 }
 0xe34   : > { %15665 = vst [vmem:[#allocation95_spill] sm:$0xff] %v12311_v34 }
 0xe35   : > { %15666 = vst [vmem:[#allocation96_spill] sm:$0xff] %v12313_v39  ;;  %v3399_v56 = vpop.f32.mrb[48].mxu1  ;;  %v3591_v20 = vmax.f32 %v12311_v34, %v12313_v39 }
 0xe36   : > { %v12317_v7 = vmul.f32 0.5, %v3399_v56  ;;  %v3401_v8 = vpop.f32.mrb[49].mxu1 }
 0xe37   : > { %v12319_v41 = vmul.f32 0.5, %v3401_v8  ;;  %3592 = vmax.xlane.f32.xlu1 %v3591_v20 }
 0xe38   : > { %15667 = vst [vmem:[#allocation97_spill] sm:$0xff] %v12317_v7 }
 0xe39   : > { %15668 = vst [vmem:[#allocation98_spill] sm:$0xff] %v12319_v41  ;;  %v3405_v45 = vpop.f32.mrb[50].mxu1  ;;  %v3594_v6 = vmax.f32 %v12317_v7, %v12319_v41 }
 0xe3a   : > { %v12323_v62 = vmul.f32 0.5, %v3405_v45  ;;  %v3407_v4 = vpop.f32.mrb[51].mxu1 }
 0xe3b   : > { %v12325_v26 = vmul.f32 0.5, %v3407_v4  ;;  %3595 = vmax.xlane.f32.xlu0 %v3594_v6 }
 0xe3c   : > { %15669 = vst [vmem:[#allocation99_spill] sm:$0xff] %v12323_v62 }
 0xe3d   : > { %15670 = vst [vmem:[#allocation100_spill] sm:$0xff] %v12325_v26  ;;  %v3411_v31 = vpop.f32.mrb[52].mxu1  ;;  %v3597_v2 = vmax.f32 %v12323_v62, %v12325_v26 }
 0xe3e   : > { %v12329_v56 = vmul.f32 0.5, %v3411_v31  ;;  %v3413_v63 = vpop.f32.mrb[53].mxu1 }
 0xe3f   : > { %v12331_v8 = vmul.f32 0.5, %v3413_v63  ;;  %3598 = vmax.xlane.f32.xlu1 %v3597_v2 }
 0xe40   : > { %15671 = vst [vmem:[#allocation101_spill] sm:$0xff] %v12329_v56 }
 0xe41   : > { %15672 = vst [vmem:[#allocation102_spill] sm:$0xff] %v12331_v8  ;;  %v3417_v20 = vpop.f32.mrb[54].mxu1  ;;  %v3600_v61 = vmax.f32 %v12329_v56, %v12331_v8 }
 0xe42   : > { %v12335_v45 = vmul.f32 0.5, %v3417_v20  ;;  %v3419_v9 = vpop.f32.mrb[55].mxu1 }
 0xe43   : > { %v12337_v4 = vmul.f32 0.5, %v3419_v9  ;;  %3601 = vmax.xlane.f32.xlu0 %v3600_v61 }
 0xe44   : > { %15673 = vst [vmem:[#allocation103_spill] sm:$0xff] %v12335_v45 }
 0xe45   : > { %15674 = vst [vmem:[#allocation104_spill] sm:$0xff] %v12337_v4  ;;  %v3603_v6 = vmax.f32 %v12335_v45, %v12337_v4  ;;  %v3423_v14 = vpop.f32.mrb[56].mxu1 }
 0xe46   : > { %v3425_v31 = vpop.f32.mrb[57].mxu1 }
 0xe47   : > { %3604 = vmax.xlane.f32.xlu1 %v3603_v6 }
 0xe49   : > { %v3429_v58 = vpop.f32.mrb[58].mxu1 }
 0xe4a   : > { %v3431_v63 = vpop.f32.mrb[59].mxu1 }
 0xe4d   : > { %v3435_v55 = vpop.f32.mrb[60].mxu1 }
 0xe4e   : > { %v3437_v2 = vpop.f32.mrb[61].mxu1 }
 0xe51   : > { %v12341_v48 = vpop.f32.mrb[62].mxu1 }
 0xe52   : > { %v12343_v38 = vpop.f32.mrb[63].mxu1 }
 0xe55   : > { %v12345_v20 = vpop.f32.mrb[64].mxu1 }
 0xe56   : > { %v12347_v46 = vpop.f32.mrb[65].mxu1 }
 0xe59   : > { %v12349_v9 = vpop.f32.mrb[66].mxu1 }
 0xe5a   : > { %v12351_v61 = vpop.f32.mrb[67].mxu1 }
 0xe5d   : > { %v12353_v44 = vpop.f32.mrb[68].mxu1 }
 0xe5e   : > { %v12355_v49 = vpop.f32.mrb[69].mxu1 }
 0xe61   : > { %v12357_v6 = vpop.f32.mrb[70].mxu1 }
 0xe62   : > { %v12359_v40 = vpop.f32.mrb[71].mxu1 }
 0xe78   : > { %v3536_v4 = vpop.xlane.xlu1 %3535 }
 0xe79   : > { %v3630_v45 = vsub.f32 %v12197_v28, %v3536_v4  ;;  %v3631_v8 = vsub.f32 %v12199_v53, %v3536_v4 }
 0xe7b   : > { %v3694_v56 = vmul.f32 1.442695, %v3630_v45  ;;  %v3696_v26 = vmul.f32 1.442695, %v3631_v8  ;;  %v12387_v8 = vmul.f32 0.5, %v3431_v63 }
 0xe7c   : > { %v3539_v62 = vpop.xlane.xlu0 %3538 }
 0xe7d   : > { %10447 = vpow2.f32 %v3694_v56  ;;  %v3632_v41 = vsub.f32 %v12203_v59, %v3539_v62  ;;  %v3633_v7 = vsub.f32 %v12205_v32, %v3539_v62  ;;  %v12369_v32 = vmul.f32 0.5, %v3423_v14 }
 0xe7e   : > { %10449 = vpow2.f32 %v3696_v26  ;;  %v12385_v26 = vmul.f32 0.5, %v3429_v58 }
 0xe7f   : > { %v3698_v39 = vmul.f32 1.442695, %v3632_v41  ;;  %v3700_v34 = vmul.f32 1.442695, %v3633_v7  ;;  %v12371_v41 = vmul.f32 0.5, %v3425_v31 }
 0xe80   : > { %v3542_v50 = vpop.xlane.xlu0 %3541 }
 0xe81   : > { %10451 = vpow2.f32 %v3698_v39  ;;  %v3634_v60 = vsub.f32 %v12209_v30, %v3542_v50  ;;  %v3635_v3 = vsub.f32 %v12211_v29, %v3542_v50  ;;  %v3606_v14 = vmax.f32 %v12369_v32, %v12371_v41 }
 0xe82   : > { %10453 = vpow2.f32 %v3700_v34 }
 0xe83   : > { %v3702_v28 = vmul.f32 1.442695, %v3634_v60  ;;  %v3704_v53 = vmul.f32 1.442695, %v3635_v3 }
 0xe84   : > { %v3545_v45 = vpop.xlane.xlu1 %3544 }
 0xe85   : > { %10455 = vpow2.f32 %v3702_v28  ;;  %v3636_v56 = vsub.f32 %v12215_v52, %v3545_v45  ;;  %v3637_v59 = vsub.f32 %v12217_v33, %v3545_v45  ;;  %v12397_v45 = vmul.f32 0.5, %v3437_v2 }
 0xe86   : > { %10457 = vpow2.f32 %v3704_v53  ;;  %v12395_v53 = vmul.f32 0.5, %v3435_v55 }
 0xe87   : > { %v12373_v7 = vpop.eup %10447  ;;  %v3706_v39 = vmul.f32 1.442695, %v3636_v56  ;;  %v3708_v30 = vmul.f32 1.442695, %v3637_v59  ;;  %v3609_v59 = vmax.f32 %v12385_v26, %v12387_v8 }
 0xe88   : > { %v12375_v62 = vpop.eup %10449  ;;  %v3548_v29 = vpop.xlane.xlu0 %3547 }
 0xe89   : > { %10459 = vpow2.f32 %v3706_v39  ;;  %v3638_v3 = vsub.f32 %v12221_v5, %v3548_v29  ;;  %v3639_v60 = vsub.f32 %v12223_v17, %v3548_v29  ;;  %v3822_v52 = vadd.f32 %v12375_v62, %v12373_v7 }
 0xe8a   : > { %10461 = vpow2.f32 %v3708_v30  ;;  %v3612_v30 = vmax.f32 %v12395_v53, %v12397_v45 }
 0xe8b   : > { %v12383_v33 = vpop.eup %10451  ;;  %v3710_v50 = vmul.f32 1.442695, %v3638_v3  ;;  %v3712_v34 = vmul.f32 1.442695, %v3639_v60  ;;  %3823 = vadd.xlane.f32.xlu0 %v3822_v52  ;;  %v12414_v52 = vmul.f32 0.5, %v12341_v48  ;;  %v12429_v48 = vmul.f32 0.5, %v12347_v46 }
 0xe8c   : > { %v12389_v4 = vpop.eup %10453  ;;  %v3551_v5 = vpop.xlane.xlu1 %3550 }
 0xe8d   : > { %10463 = vpow2.f32 %v3710_v50  ;;  %v3640_v17 = vsub.f32 %v12227_v43, %v3551_v5  ;;  %v3641_v31 = vsub.f32 %v12229_v13, %v3551_v5  ;;  %v3825_v28 = vadd.f32 %v12389_v4, %v12383_v33 }
 0xe8e   : > { %10465 = vpow2.f32 %v3712_v34 }
 0xe8f   : > { %v12399_v58 = vpop.eup %10455  ;;  %v3714_v63 = vmul.f32 1.442695, %v3640_v17  ;;  %v3716_v56 = vmul.f32 1.442695, %v3641_v31  ;;  %3826 = vadd.xlane.f32.xlu1 %v3825_v28  ;;  %3607 = vmax.xlane.f32.xlu0 %v3606_v14  ;;  %v12426_v17 = vmul.f32 0.5, %v12345_v20 }
 0xe90   : > { %v12403_v43 = vpop.eup %10457  ;;  %v3554_v13 = vpop.xlane.xlu0 %3553 }
 0xe91   : > { %10467 = vpow2.f32 %v3714_v63  ;;  %v3642_v39 = vsub.f32 %v12233_v54, %v3554_v13  ;;  %v3643_v55 = vsub.f32 %v12235_v24, %v3554_v13  ;;  %v3828_v2 = vadd.f32 %v12403_v43, %v12399_v58 }
 0xe92   : > { %10469 = vpow2.f32 %v3716_v56  ;;  %v12417_v54 = vmul.f32 0.5, %v12343_v38 }
 0xe93   : > { %v12411_v29 = vpop.eup %10459  ;;  %v3718_v3 = vmul.f32 1.442695, %v3642_v39  ;;  %v3720_v60 = vmul.f32 1.442695, %v3643_v55  ;;  %3829 = vadd.xlane.f32.xlu0 %v3828_v2  ;;  %3610 = vmax.xlane.f32.xlu1 %v3609_v59  ;;  %v3618_v59 = vmax.f32 %v12426_v17, %v12429_v48  ;;  %v12446_v2 = vmul.f32 0.5, %v12349_v9 }
 0xe94   : > { %v12419_v24 = vpop.eup %10461  ;;  %v3557_v14 = vpop.xlane.xlu1 %3556  ;;  %v12461_v9 = vmul.f32 0.5, %v12355_v49 }
 0xe95   : > { %10471 = vpow2.f32 %v3718_v3  ;;  %v3644_v50 = vsub.f32 %v12239_v1, %v3557_v14  ;;  %v3645_v34 = vsub.f32 %v12241_v22, %v3557_v14  ;;  %v3831_v5 = vadd.f32 %v12419_v24, %v12411_v29 }
 0xe96   : > { %10473 = vpow2.f32 %v3720_v60  ;;  %v3615_v1 = vmax.f32 %v12414_v52, %v12417_v54 }
 0xe97   : > { %v12431_v38 = vpop.eup %10463  ;;  %v3722_v31 = vmul.f32 1.442695, %v3644_v50  ;;  %v3724_v28 = vmul.f32 1.442695, %v3645_v34  ;;  %3832 = vadd.xlane.f32.xlu1 %v3831_v5  ;;  %3613 = vmax.xlane.f32.xlu0 %v3612_v30  ;;  %v12458_v50 = vmul.f32 0.5, %v12353_v44 }
 0xe98   : > { %v12435_v22 = vpop.eup %10465  ;;  %v3560_v63 = vpop.xlane.xlu0 %3559 }
 0xe99   : > { %10475 = vpow2.f32 %v3722_v31  ;;  %v3646_v56 = vsub.f32 %v12245_v12, %v3560_v63  ;;  %v3647_v20 = vsub.f32 %v12247_v15, %v3560_v63  ;;  %v3834_v46 = vadd.f32 %v12435_v22, %v12431_v38 }
 0xe9a   : > { %10477 = vpow2.f32 %v3724_v28  ;;  %v12449_v12 = vmul.f32 0.5, %v12351_v61 }
 0xe9b   : > { %v12443_v13 = vpop.eup %10467  ;;  %v3726_v39 = vmul.f32 1.442695, %v3646_v56  ;;  %v3728_v55 = vmul.f32 1.442695, %v3647_v20  ;;  %3835 = vadd.xlane.f32.xlu0 %v3834_v46  ;;  %3616 = vmax.xlane.f32.xlu1 %v3615_v1  ;;  %v3624_v1 = vmax.f32 %v12458_v50, %v12461_v9  ;;  %v12478_v46 = vmul.f32 0.5, %v12357_v6 }
 0xe9c   : > { %v12451_v15 = vpop.eup %10469  ;;  %v3563_v30 = vpop.xlane.xlu1 %3562 }
 0xe9d   : > { %10479 = vpow2.f32 %v3726_v39  ;;  %v3648_v3 = vsub.f32 %v12251_v25, %v3563_v30  ;;  %v3649_v60 = vsub.f32 %v12253_v10, %v3563_v30  ;;  %v3837_v14 = vadd.f32 %v12451_v15, %v12443_v13 }
 0xe9e   : > { %10481 = vpow2.f32 %v3728_v55  ;;  %v3621_v25 = vmax.f32 %v12446_v2, %v12449_v12 }
 0xe9f   : > { %v12463_v61 = vpop.eup %10471  ;;  %v3730_v34 = vmul.f32 1.442695, %v3648_v3  ;;  %v3732_v5 = vmul.f32 1.442695, %v3649_v60  ;;  %3838 = vadd.xlane.f32.xlu1 %v3837_v14  ;;  %3619 = vmax.xlane.f32.xlu0 %v3618_v59 }
 0xea0   : > { %v12467_v10 = vpop.eup %10473  ;;  %v3566_v31 = vpop.xlane.xlu0 %3565 }
 0xea1   : > { %10483 = vpow2.f32 %v3730_v34  ;;  %v3650_v28 = vsub.f32 %v12257_v23, %v3566_v31  ;;  %v3651_v44 = vsub.f32 %v12259_v18, %v3566_v31  ;;  %v3840_v49 = vadd.f32 %v12467_v10, %v12463_v61 }
 0xea2   : > { %10485 = vpow2.f32 %v3732_v5  ;;  %v12481_v23 = vmul.f32 0.5, %v12359_v40 }
 0xea3   : > { %v12475_v63 = vpop.eup %10475  ;;  %v3734_v56 = vmul.f32 1.442695, %v3650_v28  ;;  %v3736_v20 = vmul.f32 1.442695, %v3651_v44  ;;  %3841 = vadd.xlane.f32.xlu0 %v3840_v49  ;;  %3622 = vmax.xlane.f32.xlu1 %v3621_v25 }
 0xea4   : > { %v12483_v18 = vpop.eup %10477  ;;  %v3569_v59 = vpop.xlane.xlu1 %3568  ;;  %v3627_v40 = vmax.f32 %v12478_v46, %v12481_v23 }
 0xea5   : > { %10487 = vpow2.f32 %v3734_v56  ;;  %v3652_v39 = vsub.f32 %v12263_v16, %v3569_v59  ;;  %v3653_v55 = vsub.f32 %v12265_v42, %v3569_v59  ;;  %v3843_v30 = vadd.f32 %v12483_v18, %v12475_v63 }
 0xea6   : > { %10489 = vpow2.f32 %v3736_v20 }
 0xea7   : > { %v12489_v3 = vpop.eup %10479  ;;  %v3738_v60 = vmul.f32 1.442695, %v3652_v39  ;;  %v3740_v6 = vmul.f32 1.442695, %v3653_v55  ;;  %3844 = vadd.xlane.f32.xlu1 %v3843_v30  ;;  %3625 = vmax.xlane.f32.xlu0 %v3624_v1 }
 0xea8   : > { %v12493_v14 = vpop.eup %10481  ;;  %v3572_v34 = vpop.xlane.xlu0 %3571 }
 0xea9   : > { %10491 = vpow2.f32 %v3738_v60  ;;  %v3654_v16 = vsub.f32 %v12269_v11, %v3572_v34  ;;  %v3655_v42 = vsub.f32 %v12271_v27, %v3572_v34  ;;  %v3846_v5 = vadd.f32 %v12493_v14, %v12489_v3 }
 0xeaa   : > { %10493 = vpow2.f32 %v3740_v6 }
 0xeab   : > { %v12499_v25 = vpop.eup %10483  ;;  %v3742_v31 = vmul.f32 1.442695, %v3654_v16  ;;  %v3744_v28 = vmul.f32 1.442695, %v3655_v42  ;;  %3847 = vadd.xlane.f32.xlu0 %v3846_v5  ;;  %3628 = vmax.xlane.f32.xlu1 %v3627_v40 }
 0xeac   : > { %v12501_v44 = vpop.eup %10485  ;;  %v3575_v49 = vpop.xlane.xlu1 %3574 }
 0xead   : > { %10495 = vpow2.f32 %v3742_v31  ;;  %v3656_v1 = vsub.f32 %v12275_v19, %v3575_v49  ;;  %v3657_v11 = vsub.f32 %v12277_v57, %v3575_v49  ;;  %v3849_v27 = vadd.f32 %v12501_v44, %v12499_v25 }
 0xeae   : > { %10497 = vpow2.f32 %v3744_v28 }
 0xeaf   : > { %v12507_v56 = vpop.eup %10487  ;;  %v3746_v20 = vmul.f32 1.442695, %v3656_v1  ;;  %v3748_v59 = vmul.f32 1.442695, %v3657_v11  ;;  %3850 = vadd.xlane.f32.xlu1 %v3849_v27 }
 0xeb0   : > { %v12509_v39 = vpop.eup %10489  ;;  %v3578_v55 = vpop.xlane.xlu0 %3577 }
 0xeb1   : > { %10499 = vpow2.f32 %v3746_v20  ;;  %v3658_v30 = vsub.f32 %v12281_v36, %v3578_v55  ;;  %v3659_v60 = vsub.f32 %v12283_v0, %v3578_v55  ;;  %v3852_v19 = vadd.f32 %v12509_v39, %v12507_v56 }
 0xeb2   : > { %10501 = vpow2.f32 %v3748_v59 }
 0xeb3   : > { %v12515_v57 = vpop.eup %10491  ;;  %v3750_v6 = vmul.f32 1.442695, %v3658_v30  ;;  %v3752_v40 = vmul.f32 1.442695, %v3659_v60  ;;  %3853 = vadd.xlane.f32.xlu0 %v3852_v19  ;;  %v15675_v19 = vld [vmem:[#allocation92_spill] sm:$0xff] }
 0xeb4   : > { %v12517_v34 = vpop.eup %10493  ;;  %v3581_v16 = vpop.xlane.xlu1 %3580 }
 0xeb5   : > { %10503 = vpow2.f32 %v3750_v6  ;;  %v3660_v42 = vsub.f32 %v12287_v51, %v3581_v16  ;;  %v3661_v5 = vsub.f32 %v12289_v47, %v3581_v16  ;;  %v3855_v36 = vadd.f32 %v12517_v34, %v12515_v57 }
 0xeb6   : > { %10505 = vpow2.f32 %v3752_v40 }
 0xeb7   : > { %v12523_v0 = vpop.eup %10495  ;;  %v3754_v31 = vmul.f32 1.442695, %v3660_v42  ;;  %v3756_v28 = vmul.f32 1.442695, %v3661_v5  ;;  %3856 = vadd.xlane.f32.xlu1 %v3855_v36  ;;  %v15677_v36 = vld [vmem:[#allocation93_spill] sm:$0xff] }
 0xeb8   : > { %v12525_v49 = vpop.eup %10497  ;;  %v3584_v1 = vpop.xlane.xlu0 %3583 }
 0xeb9   : > { %10507 = vpow2.f32 %v3754_v31  ;;  %v3662_v11 = vsub.f32 %v12293_v35, %v3584_v1  ;;  %v3663_v27 = vsub.f32 %v12295_v21, %v3584_v1  ;;  %v3858_v51 = vadd.f32 %v12525_v49, %v12523_v0 }
 0xeba   : > { %10509 = vpow2.f32 %v3756_v28  ;;  %v15678_v28 = vld [vmem:[#allocation94_spill] sm:$0xff] }
 0xebb   : > { %v12531_v47 = vpop.eup %10499  ;;  %v3758_v20 = vmul.f32 1.442695, %v3662_v11  ;;  %v3760_v59 = vmul.f32 1.442695, %v3663_v27  ;;  %3859 = vadd.xlane.f32.xlu0 %v3858_v51 }
 0xebc   : > { %v12533_v55 = vpop.eup %10501  ;;  %v3587_v30 = vpop.xlane.xlu1 %3586 }
 0xebd   : > { %10511 = vpow2.f32 %v3758_v20  ;;  %v3664_v60 = vsub.f32 %v12299_v37, %v3587_v30  ;;  %v3665_v6 = vsub.f32 %v15675_v19, %v3587_v30  ;;  %v3861_v35 = vadd.f32 %v12533_v55, %v12531_v47  ;;  %v15680_v30 = vld [vmem:[#allocation95_spill] sm:$0xff]  ;;  %v15681_v19 = vld [vmem:[#allocation96_spill] sm:$0xff] }
 0xebe   : > { %10513 = vpow2.f32 %v3760_v59 }
 0xebf   : > { %v12539_v21 = vpop.eup %10503  ;;  %v3762_v40 = vmul.f32 1.442695, %v3664_v60  ;;  %v3764_v16 = vmul.f32 1.442695, %v3665_v6  ;;  %3862 = vadd.xlane.f32.xlu1 %v3861_v35 }
 0xec0   : > { %15676 = vst [vmem:[#allocation92_spill] sm:$0xff] %v12539_v21  ;;  %v12541_v42 = vpop.eup %10505  ;;  %v3590_v5 = vpop.xlane.xlu0 %3589 }
 0xec1   : > { %10515 = vpow2.f32 %v3762_v40  ;;  %v3666_v31 = vsub.f32 %v15677_v36, %v3590_v5  ;;  %v3667_v1 = vsub.f32 %v15678_v28, %v3590_v5  ;;  %v3864_v37 = vadd.f32 %v12541_v42, %v12539_v21  ;;  %v15684_v28 = vld [vmem:[#allocation97_spill] sm:$0xff] }
 0xec2   : > { %10517 = vpow2.f32 %v3764_v16 }
 0xec3   : > { %v12547_v11 = vpop.eup %10507  ;;  %v3766_v27 = vmul.f32 1.442695, %v3666_v31  ;;  %v3768_v51 = vmul.f32 1.442695, %v3667_v1  ;;  %3865 = vadd.xlane.f32.xlu0 %v3864_v37  ;;  %v15685_v37 = vld [vmem:[#allocation98_spill] sm:$0xff] }
 0xec4   : > { %15679 = vst [vmem:[#allocation93_spill] sm:$0xff] %v12547_v11  ;;  %v12549_v20 = vpop.eup %10509  ;;  %v3593_v59 = vpop.xlane.xlu1 %3592 }
 0xec5   : > { %10519 = vpow2.f32 %v3766_v27  ;;  %v3668_v60 = vsub.f32 %v15680_v30, %v3593_v59  ;;  %v3669_v6 = vsub.f32 %v15681_v19, %v3593_v59  ;;  %v3867_v35 = vadd.f32 %v12549_v20, %v12547_v11 }
 0xec6   : > { %10521 = vpow2.f32 %v3768_v51 }
 0xec7   : > { %v12555_v40 = vpop.eup %10511  ;;  %v3770_v16 = vmul.f32 1.442695, %v3668_v60  ;;  %v3772_v5 = vmul.f32 1.442695, %v3669_v6  ;;  %3868 = vadd.xlane.f32.xlu1 %v3867_v35  ;;  %v15688_v35 = vld [vmem:[#allocation99_spill] sm:$0xff] }
 0xec8   : > { %15682 = vst [vmem:[#allocation94_spill] sm:$0xff] %v12555_v40  ;;  %v12557_v36 = vpop.eup %10513  ;;  %v3596_v31 = vpop.xlane.xlu0 %3595 }
 0xec9   : > { %15683 = vst [vmem:[#allocation95_spill] sm:$0xff] %v12557_v36  ;;  %10523 = vpow2.f32 %v3770_v16  ;;  %v3670_v1 = vsub.f32 %v15684_v28, %v3596_v31  ;;  %v3671_v27 = vsub.f32 %v15685_v37, %v3596_v31  ;;  %v3870_v59 = vadd.f32 %v12557_v36, %v12555_v40  ;;  %v15689_v16 = vld [vmem:[#allocation100_spill] sm:$0xff] }
 0xeca   : > { %10525 = vpow2.f32 %v3772_v5 }
 0xecb   : > { %v12563_v30 = vpop.eup %10515  ;;  %v3774_v51 = vmul.f32 1.442695, %v3670_v1  ;;  %v3776_v19 = vmul.f32 1.442695, %v3671_v27  ;;  %3871 = vadd.xlane.f32.xlu0 %v3870_v59  ;;  %v15690_v59 = vld [vmem:[#allocation101_spill] sm:$0xff] }
 0xecc   : > { %15686 = vst [vmem:[#allocation96_spill] sm:$0xff] %v12563_v30  ;;  %v12565_v60 = vpop.eup %10517  ;;  %v3599_v6 = vpop.xlane.xlu1 %3598 }
 0xecd   : > { %15687 = vst [vmem:[#allocation97_spill] sm:$0xff] %v12565_v60  ;;  %10527 = vpow2.f32 %v3774_v51  ;;  %v3672_v21 = vsub.f32 %v15688_v35, %v3599_v6  ;;  %v3673_v11 = vsub.f32 %v15689_v16, %v3599_v6  ;;  %v3873_v31 = vadd.f32 %v12565_v60, %v12563_v30  ;;  %v15691_v51 = vld [vmem:[#allocation102_spill] sm:$0xff] }
 0xece   : > { %10529 = vpow2.f32 %v3776_v19 }
 0xecf   : > { %v12571_v28 = vpop.eup %10519  ;;  %v3778_v5 = vmul.f32 1.442695, %v3672_v21  ;;  %v3780_v37 = vmul.f32 1.442695, %v3673_v11  ;;  %3874 = vadd.xlane.f32.xlu1 %v3873_v31  ;;  %v15692_v31 = vld [vmem:[#allocation103_spill] sm:$0xff] }
 0xed0   : > { %v12573_v1 = vpop.eup %10521  ;;  %v3602_v27 = vpop.xlane.xlu0 %3601 }
 0xed1   : > { %10531 = vpow2.f32 %v3778_v5  ;;  %v3674_v40 = vsub.f32 %v15690_v59, %v3602_v27  ;;  %v3675_v36 = vsub.f32 %v15691_v51, %v3602_v27  ;;  %v3876_v6 = vadd.f32 %v12573_v1, %v12571_v28  ;;  %v15693_v5 = vld [vmem:[#allocation104_spill] sm:$0xff] }
 0xed2   : > { %10533 = vpow2.f32 %v3780_v37 }
 0xed3   : > { %v12579_v35 = vpop.eup %10523  ;;  %v3782_v19 = vmul.f32 1.442695, %v3674_v40  ;;  %v3784_v16 = vmul.f32 1.442695, %v3675_v36  ;;  %3877 = vadd.xlane.f32.xlu0 %v3876_v6 }
 0xed4   : > { %v12581_v21 = vpop.eup %10525  ;;  %v3605_v11 = vpop.xlane.xlu1 %3604 }
 0xed5   : > { %10535 = vpow2.f32 %v3782_v19  ;;  %v3676_v30 = vsub.f32 %v15692_v31, %v3605_v11  ;;  %v3677_v60 = vsub.f32 %v15693_v5, %v3605_v11  ;;  %v3879_v27 = vadd.f32 %v12581_v21, %v12579_v35 }
 0xed6   : > { %10537 = vpow2.f32 %v3784_v16 }
 0xed7   : > { %v12587_v59 = vpop.eup %10527  ;;  %v3786_v37 = vmul.f32 1.442695, %v3676_v30  ;;  %v3788_v51 = vmul.f32 1.442695, %v3677_v60  ;;  %3880 = vadd.xlane.f32.xlu1 %v3879_v27 }
 0xed8   : > { %15694 = vst [vmem:[#allocation98_spill] sm:$0xff] %v12587_v59  ;;  %v12589_v40 = vpop.eup %10529 }
 0xed9   : > { %15695 = vst [vmem:[#allocation99_spill] sm:$0xff] %v12589_v40  ;;  %10539 = vpow2.f32 %v3786_v37  ;;  %v3882_v36 = vadd.f32 %v12589_v40, %v12587_v59 }
 0xeda   : > { %10541 = vpow2.f32 %v3788_v51 }
 0xedb   : > { %v12593_v6 = vpop.eup %10531  ;;  %3883 = vadd.xlane.f32.xlu0 %v3882_v36 }
 0xedc   : > { %15696 = vst [vmem:[#allocation100_spill] sm:$0xff] %v12593_v6  ;;  %v12595_v19 = vpop.eup %10533 }
 0xedd   : > { %15697 = vst [vmem:[#allocation101_spill] sm:$0xff] %v12595_v19  ;;  %v3885_v16 = vadd.f32 %v12595_v19, %v12593_v6 }
 0xedf   : > { %v12599_v11 = vpop.eup %10535  ;;  %3886 = vadd.xlane.f32.xlu1 %v3885_v16 }
 0xee0   : > { %15698 = vst [vmem:[#allocation102_spill] sm:$0xff] %v12599_v11  ;;  %v12601_v30 = vpop.eup %10537 }
 0xee1   : > { %15699 = vst [vmem:[#allocation103_spill] sm:$0xff] %v12601_v30  ;;  %v3888_v60 = vadd.f32 %v12601_v30, %v12599_v11 }
 0xee3   : > { %v12605_v31 = vpop.eup %10539  ;;  %3889 = vadd.xlane.f32.xlu0 %v3888_v60 }
 0xee4   : > { %15700 = vst [vmem:[#allocation104_spill] sm:$0xff] %v12605_v31  ;;  %v12607_v5 = vpop.eup %10541 }
 0xee5   : > { %15701 = vst [vmem:[#allocation105_spill] sm:$0xff] %v12607_v5  ;;  %v3891_v27 = vadd.f32 %v12607_v5, %v12605_v31 }
 0xee7   : > { %3892 = vadd.xlane.f32.xlu1 %v3891_v27 }
 0xf18   : > { %v3824_v37 = vpop.xlane.xlu0 %3823 }
 0xf19   : > { %10543 = vrcp.f32 %v3824_v37 }
 0xf1c   : > { %v3827_v51 = vpop.xlane.xlu1 %3826  ;;  %v3608_v36 = vpop.xlane.xlu0 %3607 }
 0xf1d   : > { %10545 = vrcp.f32 %v3827_v51  ;;  %v3678_v16 = vsub.f32 %v12369_v32, %v3608_v36  ;;  %v3679_v59 = vsub.f32 %v12371_v41, %v3608_v36 }
 0xf1f   : > { %v3790_v6 = vmul.f32 1.442695, %v3678_v16  ;;  %v3792_v11 = vmul.f32 1.442695, %v3679_v59 }
 0xf20   : > { %v3830_v30 = vpop.xlane.xlu0 %3829  ;;  %v3611_v19 = vpop.xlane.xlu1 %3610 }
 0xf21   : > { %10547 = vpow2.f32 %v3790_v6  ;;  %v3680_v60 = vsub.f32 %v12385_v26, %v3611_v19  ;;  %v3681_v40 = vsub.f32 %v12387_v8, %v3611_v19 }
 0xf22   : > { %10549 = vpow2.f32 %v3792_v11 }
 0xf23   : > { %10551 = vrcp.f32 %v3830_v30  ;;  %v3794_v27 = vmul.f32 1.442695, %v3680_v60  ;;  %v3796_v37 = vmul.f32 1.442695, %v3681_v40  ;;  %v10544_v51 = vpop.eup %10543 }
 0xf24   : > { %v3833_v31 = vpop.xlane.xlu1 %3832  ;;  %v3614_v5 = vpop.xlane.xlu0 %3613  ;;  %v3983_v8 = vmul.f32 %v10544_v51, %v12375_v62  ;;  %v3982_v40 = vmul.f32 %v10544_v51, %v12373_v7 }
 0xf25   : > { %10553 = vpow2.f32 %v3794_v27  ;;  %v3682_v32 = vsub.f32 %v12395_v53, %v3614_v5  ;;  %v3683_v41 = vsub.f32 %v12397_v45, %v3614_v5 }
 0xf26   : > { %10555 = vpow2.f32 %v3796_v37 }
 0xf27   : > { %v10546_v59 = vpop.eup %10545  ;;  %10557 = vrcp.f32 %v3833_v31  ;;  %v3798_v6 = vmul.f32 1.442695, %v3682_v32  ;;  %v3800_v36 = vmul.f32 1.442695, %v3683_v41 }
 0xf28   : > { %v3836_v26 = vpop.xlane.xlu0 %3835  ;;  %v3617_v16 = vpop.xlane.xlu1 %3616  ;;  %v3985_v19 = vmul.f32 %v10546_v59, %v12389_v4  ;;  %v3984_v11 = vmul.f32 %v10546_v59, %v12383_v33 }
 0xf29   : > { %10559 = vpow2.f32 %v3798_v6  ;;  %v3684_v53 = vsub.f32 %v12414_v52, %v3617_v16  ;;  %v3685_v45 = vsub.f32 %v12417_v54, %v3617_v16 }
 0xf2a   : > { %10561 = vpow2.f32 %v3800_v36  ;;  %v10002_v30 = vpack.c.bf16 %v3985_v19, %v3983_v8  ;;  %v10004_v31 = vpack.c.bf16 %v3984_v11, %v3982_v40 }
 0xf2b   : > { %v12623_v5 = vpop.eup %10547  ;;  %10563 = vrcp.f32 %v3836_v26  ;;  %v3802_v60 = vmul.f32 1.442695, %v3684_v53  ;;  %v3804_v27 = vmul.f32 1.442695, %v3685_v45 }
 0xf2c   : > { %v12625_v62 = vpop.eup %10549  ;;  %10003 = vmatprep.subr.bf16.mxu0 %v10002_v30  ;;  %v3839_v4 = vpop.xlane.xlu1 %3838 }
 0xf2d   : > { %v3620_v7 = vpop.xlane.xlu0 %3619  ;;  %v10552_v37 = vpop.eup %10551  ;;  %10565 = vpow2.f32 %v3802_v60  ;;  %10005 = vmatpush1.bf16.xpose.msra.mxu0 %v10004_v31  ;;  %v3894_v54 = vadd.f32 %v12625_v62, %v12623_v5 }
 0xf2e   : > { %v3686_v33 = vsub.f32 %v12426_v17, %v3620_v7  ;;  %v3687_v52 = vsub.f32 %v12429_v48, %v3620_v7  ;;  %10567 = vpow2.f32 %v3804_v27  ;;  %v3987_v26 = vmul.f32 %v10552_v37, %v12403_v43 }
 0xf2f   : > { %v12631_v51 = vpop.eup %10553  ;;  %10569 = vrcp.f32 %v3839_v4  ;;  %3895 = vadd.xlane.f32.xlu0 %v3894_v54  ;;  %v3986_v40 = vmul.f32 %v10552_v37, %v12399_v58 }
 0xf30   : > { %v3806_v32 = vmul.f32 1.442695, %v3686_v33  ;;  %v3808_v41 = vmul.f32 1.442695, %v3687_v52  ;;  %v12633_v59 = vpop.eup %10555  ;;  %v3623_v36 = vpop.xlane.xlu1 %3622 }
 0xf31   : > { %v3842_v6 = vpop.xlane.xlu0 %3841  ;;  %v10558_v17 = vpop.eup %10557  ;;  %v3688_v48 = vsub.f32 %v12446_v2, %v3623_v36  ;;  %v3689_v16 = vsub.f32 %v12449_v12, %v3623_v36  ;;  %v3897_v8 = vadd.f32 %v12633_v59, %v12631_v51 }
 0xf32   : > { %10571 = vpow2.f32 %v3806_v32  ;;  %v3989_v19 = vmul.f32 %v10558_v17, %v12419_v24  ;;  %v3988_v11 = vmul.f32 %v10558_v17, %v12411_v29 }
 0xf33   : > { %10573 = vpow2.f32 %v3808_v41  ;;  %v12643_v53 = vpop.eup %10559  ;;  %v3810_v45 = vmul.f32 1.442695, %v3688_v48  ;;  %v3812_v43 = vmul.f32 1.442695, %v3689_v16  ;;  %3898 = vadd.xlane.f32.xlu1 %v3897_v8 }
 0xf34   : > { %v12645_v30 = vpop.eup %10561  ;;  %10575 = vrcp.f32 %v3842_v6  ;;  %v10006_v2 = vpack.c.bf16 %v3989_v19, %v3987_v26  ;;  %v3845_v12 = vpop.xlane.xlu1 %3844  ;;  %v10008_v60 = vpack.c.bf16 %v3988_v11, %v3986_v40 }
 0xf35   : > { %v3626_v31 = vpop.xlane.xlu0 %3625  ;;  %v10564_v27 = vpop.eup %10563  ;;  %10577 = vpow2.f32 %v3810_v45  ;;  %v3900_v29 = vadd.f32 %v12645_v30, %v12643_v53 }
 0xf36   : > { %v3690_v24 = vsub.f32 %v12458_v50, %v3626_v31  ;;  %v3691_v58 = vsub.f32 %v12461_v9, %v3626_v31  ;;  %10579 = vpow2.f32 %v3812_v43  ;;  %10007 = vmatprep.subr.bf16.mxu0 %v10006_v2  ;;  %v3991_v54 = vmul.f32 %v10564_v27, %v12435_v22 }
 0xf37   : > { %v12651_v4 = vpop.eup %10565  ;;  %10581 = vrcp.f32 %v3845_v12  ;;  %10009 = vmatpush1.bf16.xpose.msra.mxu0 %v10008_v60  ;;  %3901 = vadd.xlane.f32.xlu0 %v3900_v29  ;;  %v3990_v26 = vmul.f32 %v10564_v27, %v12431_v38 }
 0xf38   : > { %v3814_v7 = vmul.f32 1.442695, %v3690_v24  ;;  %v3816_v37 = vmul.f32 1.442695, %v3691_v58  ;;  %v12653_v33 = vpop.eup %10567  ;;  %v3629_v52 = vpop.xlane.xlu1 %3628 }
 0xf39   : > { %v10570_v50 = vpop.eup %10569  ;;  %v3848_v9 = vpop.xlane.xlu0 %3847  ;;  %v3692_v32 = vsub.f32 %v12478_v46, %v3629_v52  ;;  %v3693_v41 = vsub.f32 %v12481_v23, %v3629_v52  ;;  %v3903_v6 = vadd.f32 %v12653_v33, %v12651_v4 }
 0xf3a   : > { %10583 = vpow2.f32 %v3814_v7  ;;  %v3993_v36 = vmul.f32 %v10570_v50, %v12451_v15  ;;  %v3992_v17 = vmul.f32 %v10570_v50, %v12443_v13 }
 0xf3b   : > { %10585 = vpow2.f32 %v3816_v37  ;;  %v3818_v22 = vmul.f32 1.442695, %v3692_v32  ;;  %v3820_v16 = vmul.f32 1.442695, %v3693_v41  ;;  %3904 = vadd.xlane.f32.xlu1 %v3903_v6 }
 0xf3c   : > { %v12663_v48 = vpop.eup %10571  ;;  %10587 = vrcp.f32 %v3848_v9  ;;  %v10010_v46 = vpack.c.bf16 %v3993_v36, %v3991_v54  ;;  %v3851_v23 = vpop.xlane.xlu1 %3850  ;;  %v10012_v19 = vpack.c.bf16 %v3992_v17, %v3990_v26 }
 0xf3d   : > { %v12665_v8 = vpop.eup %10573  ;;  %10589 = vpow2.f32 %v3818_v22 }
 0xf3e   : > { %v3906_v40 = vadd.f32 %v12665_v8, %v12663_v48  ;;  %v10576_v15 = vpop.eup %10575  ;;  %10591 = vpow2.f32 %v3820_v16  ;;  %10011 = vmatprep.subr.bf16.mxu0 %v10010_v46 }
 0xf3f   : > { %v12669_v38 = vpop.eup %10577  ;;  %10593 = vrcp.f32 %v3851_v23  ;;  %10013 = vmatpush1.bf16.xpose.msra.mxu0 %v10012_v19  ;;  %v3995_v2 = vmul.f32 %v10576_v15, %v12467_v10  ;;  %v3994_v31 = vmul.f32 %v10576_v15, %v12463_v61 }
 0xf40   : > { %3907 = vadd.xlane.f32.xlu0 %v3906_v40  ;;  %v12671_v13 = vpop.eup %10579  ;;  %v3854_v11 = vpop.xlane.xlu0 %3853 }
 0xf41   : > { %v10582_v45 = vpop.eup %10581  ;;  %v3909_v43 = vadd.f32 %v12671_v13, %v12669_v38  ;;  %10595 = vrcp.f32 %v3854_v11 }
 0xf42   : > { %v3997_v12 = vmul.f32 %v10582_v45, %v12483_v18  ;;  %v3996_v60 = vmul.f32 %v10582_v45, %v12475_v63 }
 0xf43   : > { %3910 = vadd.xlane.f32.xlu1 %v3909_v43  ;;  %v2644_v43 = vld [vmem:[%s15702_s18] sm:$0xff]  ;;  %s15803_s18 = sld [smem:[#allocation13_spill]] }
 0xf44   : > { %v12679_v27 = vpop.eup %10583  ;;  %v10014_v58 = vpack.c.bf16 %v3997_v12, %v3995_v2  ;;  %v3857_v29 = vpop.xlane.xlu1 %3856  ;;  %v10016_v7 = vpack.c.bf16 %v3996_v60, %v3994_v31  ;;  %v15703_v12 = vld [vmem:[#allocation60_spill] sm:$0xff] }
 0xf45   : > { %v12681_v24 = vpop.eup %10585  ;;  %10597 = vrcp.f32 %v3857_v29  ;;  %v15705_v29 = vld [vmem:[#allocation93_spill] sm:$0xff] }
 0xf46   : > { %v3912_v37 = vadd.f32 %v12681_v24, %v12679_v27  ;;  %v10588_v10 = vpop.eup %10587  ;;  %10015 = vmatprep.subr.bf16.mxu0 %v10014_v58 }
 0xf47   : > { %v12685_v18 = vpop.eup %10589  ;;  %10017 = vmatpush1.bf16.xpose.msra.mxu0 %v10016_v7  ;;  %v3999_v50 = vmul.f32 %v10588_v10, %v12493_v14  ;;  %v3998_v32 = vmul.f32 %v10588_v10, %v12489_v3  ;;  %v15707_v10 = vld [vmem:[#allocation92_spill] sm:$0xff] }
 0xf48   : > { %3913 = vadd.xlane.f32.xlu0 %v3912_v37  ;;  %v12687_v61 = vpop.eup %10591  ;;  %v3860_v63 = vpop.xlane.xlu0 %3859  ;;  %v15706_v37 = vld [vmem:[#allocation62_spill] sm:$0xff] }
 0xf49   : > { %v10594_v52 = vpop.eup %10593  ;;  %v3915_v54 = vadd.f32 %v12687_v61, %v12685_v18  ;;  %10599 = vrcp.f32 %v3860_v63 }
 0xf4a   : > { %v4001_v9 = vmul.f32 %v10594_v52, %v12501_v44  ;;  %v4000_v41 = vmul.f32 %v10594_v52, %v12499_v25 }
 0xf4b   : > { %3916 = vadd.xlane.f32.xlu1 %v3915_v54  ;;  %v10596_v17 = vpop.eup %10595 }
 0xf4c   : > { %v10018_v6 = vpack.c.bf16 %v4001_v9, %v3999_v50  ;;  %v3863_v36 = vpop.xlane.xlu1 %3862  ;;  %v10020_v26 = vpack.c.bf16 %v4000_v41, %v3998_v32  ;;  %v4003_v46 = vmul.f32 %v10596_v17, %v12509_v39  ;;  %v4002_v3 = vmul.f32 %v10596_v17, %v12507_v56  ;;  %v15708_v50 = vld [vmem:[#allocation63_spill] sm:$0xff]  ;;  %v15710_v41 = vld [vmem:[#allocation65_spill] sm:$0xff] }
 0xf4d   : > { %10601 = vrcp.f32 %v3863_v36  ;;  %v15711_v36 = vld [vmem:[#allocation95_spill] sm:$0xff]  ;;  %v15712_v17 = vld [vmem:[#allocation97_spill] sm:$0xff] }
 0xf4e   : > { %10019 = vmatprep.subr.bf16.mxu0 %v10018_v6 }
 0xf4f   : > { %v10598_v22 = vpop.eup %10597  ;;  %10021 = vmatpush1.bf16.xpose.msra.mxu0 %v10020_v26 }
 0xf50   : > { %v3866_v16 = vpop.xlane.xlu0 %3865  ;;  %v4005_v14 = vmul.f32 %v10598_v22, %v12517_v34  ;;  %v4004_v44 = vmul.f32 %v10598_v22, %v12515_v57 }
 0xf51   : > { %10603 = vrcp.f32 %v3866_v16  ;;  %v15713_v16 = vld [vmem:[#allocation96_spill] sm:$0xff] }
 0xf52   : > { %v10022_v25 = vpack.c.bf16 %v4005_v14, %v4003_v46  ;;  %v10024_v23 = vpack.c.bf16 %v4004_v44, %v4002_v3  ;;  %v15714_v14 = vld [vmem:[#allocation66_spill] sm:$0xff] }
 0xf53   : > { %v10600_v40 = vpop.eup %10599  ;;  %v15715_v44 = vld [vmem:[#allocation94_spill] sm:$0xff] }
 0xf54   : > { %10023 = vmatprep.subr.bf16.mxu0 %v10022_v25  ;;  %v3869_v19 = vpop.xlane.xlu1 %3868  ;;  %v4007_v45 = vmul.f32 %v10600_v40, %v12525_v49  ;;  %v4006_v57 = vmul.f32 %v10600_v40, %v12523_v0 }
 0xf55   : > { %10605 = vrcp.f32 %v3869_v19  ;;  %v15716_v19 = vld [vmem:[#allocation67_spill] sm:$0xff] }
 0xf57   : > { %v10602_v15 = vpop.eup %10601  ;;  %10025 = vmatpush1.bf16.xpose.msra.mxu0 %v10024_v23 }
 0xf58   : > { %v3872_v11 = vpop.xlane.xlu0 %3871  ;;  %v4009_v39 = vmul.f32 %v10602_v15, %v12533_v55  ;;  %v4008_v34 = vmul.f32 %v10602_v15, %v12531_v47  ;;  %v15704_v55 = vld [vmem:[#allocation61_spill] sm:$0xff] }
 0xf59   : > { %10607 = vrcp.f32 %v3872_v11  ;;  %v15717_v11 = vld [vmem:[#allocation68_spill] sm:$0xff] }
 0xf5a   : > { %v10026_v56 = vpack.c.bf16 %v4009_v39, %v4007_v45  ;;  %v10028_v2 = vpack.c.bf16 %v4008_v34, %v4006_v57  ;;  %v15718_v39 = vld [vmem:[#allocation69_spill] sm:$0xff] }
 0xf5b   : > { %v10604_v60 = vpop.eup %10603 }
 0xf5c   : > { %4117 = vrot.lane.b32.xlu1 %v15703_v12, %s15444_s0  ;;  %10027 = vmatprep.subr.bf16.mxu0 %v10026_v56  ;;  %v3875_v31 = vpop.xlane.xlu1 %3874  ;;  %v4011_v0 = vmul.f32 %v10604_v60, %v12541_v42  ;;  %v4010_v63 = vmul.f32 %v10604_v60, %v15707_v10  ;;  %v15709_v42 = vld [vmem:[#allocation64_spill] sm:$0xff]  ;;  %v15726_v10 = vld [vmem:[#allocation74_spill] sm:$0xff] }
 0xf5d   : > { %10609 = vrcp.f32 %v3875_v31 }
 0xf5e   : > { %2809 = vperm.xlu0 %10416, %v2644_v43  }
 0xf5f   : > { %v10606_v49 = vpop.eup %10605  ;;  %10029 = vmatpush1.bf16.xpose.msra.mxu0 %v10028_v2  ;;  %v15719_v2 = vld [vmem:[#allocation70_spill] sm:$0xff] }
 0xf60   : > { %4119 = vrot.lane.b32.xlu1 %v15704_v55, %s15444_s0  ;;  %v3878_v47 = vpop.xlane.xlu0 %3877  ;;  %v4013_v58 = vmul.f32 %v10606_v49, %v12549_v20  ;;  %v4012_v7 = vmul.f32 %v10606_v49, %v15705_v29  ;;  %v15720_v49 = vld [vmem:[#allocation71_spill] sm:$0xff] }
 0xf61   : > { %10611 = vrcp.f32 %v3878_v47 }
 0xf62   : > { %4121 = vrot.lane.b32.xlu0 %v15706_v37, %s15444_s0  ;;  %v10030_v52 = vpack.c.bf16 %v4013_v58, %v4011_v0  ;;  %v10032_v54 = vpack.c.bf16 %v4012_v7, %v4010_v63  ;;  %v15723_v0 = vld [vmem:[#allocation99_spill] sm:$0xff]  ;;  %v15724_v58 = vld [vmem:[#allocation101_spill] sm:$0xff]  ;;  %v15725_v7 = vld [vmem:[#allocation100_spill] sm:$0xff] }
 0xf63   : > { %v10608_v32 = vpop.eup %10607  ;;  %v15727_v63 = vld [vmem:[#allocation98_spill] sm:$0xff] }
 0xf64   : > { %4123 = vrot.lane.b32.xlu1 %v15708_v50, %s15444_s0  ;;  %10031 = vmatprep.subr.bf16.mxu0 %v10030_v52  ;;  %v3881_v9 = vpop.xlane.xlu1 %3880  ;;  %v4015_v26 = vmul.f32 %v10608_v32, %v15711_v36  ;;  %v4014_v3 = vmul.f32 %v10608_v32, %v15715_v44 }
 0xf65   : > { %10613 = vrcp.f32 %v3881_v9  ;;  %v15728_v9 = vld [vmem:[#allocation75_spill] sm:$0xff] }
 0xf66   : > { %4125 = vrot.lane.b32.xlu0 %v15709_v42, %s15444_s0  ;;  %v15729_v42 = vld [vmem:[#allocation76_spill] sm:$0xff] }
 0xf67   : > { %v10610_v20 = vpop.eup %10609  ;;  %10033 = vmatpush1.bf16.xpose.msra.mxu0 %v10032_v54 }
 0xf68   : > { %4127 = vrot.lane.b32.xlu1 %v15710_v41, %s15444_s0  ;;  %v3884_v6 = vpop.xlane.xlu0 %3883  ;;  %v4017_v22 = vmul.f32 %v10610_v20, %v15712_v17  ;;  %v4016_v46 = vmul.f32 %v10610_v20, %v15713_v16  ;;  %v15730_v41 = vld [vmem:[#allocation77_spill] sm:$0xff] }
 0xf69   : > { %10615 = vrcp.f32 %v3884_v6  ;;  %v15731_v6 = vld [vmem:[#allocation103_spill] sm:$0xff] }
 0xf6a   : > { %4129 = vrot.lane.b32.xlu0 %v15714_v14, %s15444_s0  ;;  %v10034_v25 = vpack.c.bf16 %v4017_v22, %v4015_v26  ;;  %v10036_v23 = vpack.c.bf16 %v4016_v46, %v4014_v3  ;;  %v15732_v26 = vld [vmem:[#allocation105_spill] sm:$0xff]  ;;  %v15733_v22 = vld [vmem:[#allocation104_spill] sm:$0xff]  ;;  %v15734_v46 = vld [vmem:[#allocation78_spill] sm:$0xff] }
 0xf6b   : > { %v10612_v15 = vpop.eup %10611  ;;  %v15735_v14 = vld [vmem:[#allocation102_spill] sm:$0xff] }
 0xf6c   : > { %4131 = vrot.lane.b32.xlu1 %v15716_v19, %s15444_s0  ;;  %10035 = vmatprep.subr.bf16.mxu0 %v10034_v25  ;;  %v3887_v40 = vpop.xlane.xlu1 %3886  ;;  %v4019_v57 = vmul.f32 %v10612_v15, %v12573_v1  ;;  %v4018_v12 = vmul.f32 %v10612_v15, %v12571_v28  ;;  %v15721_v1 = vld [vmem:[#allocation72_spill] sm:$0xff]  ;;  %v15739_v15 = vld [vmem:[#allocation82_spill] sm:$0xff] }
 0xf6d   : > { %10617 = vrcp.f32 %v3887_v40  ;;  %v15737_v19 = vld [vmem:[#allocation80_spill] sm:$0xff]  ;;  %v15738_v40 = vld [vmem:[#allocation81_spill] sm:$0xff] }
 0xf6e   : > { %4133 = vrot.lane.b32.xlu0 %v15717_v11, %s15444_s0  ;;  %v15740_v11 = vld [vmem:[#allocation83_spill] sm:$0xff] }
 0xf6f   : > { %v10614_v45 = vpop.eup %10613  ;;  %10037 = vmatpush1.bf16.xpose.msra.mxu0 %v10036_v23  ;;  %v15736_v23 = vld [vmem:[#allocation79_spill] sm:$0xff] }
 0xf70   : > { %4135 = vrot.lane.b32.xlu1 %v15718_v39, %s15444_s0  ;;  %v3890_v34 = vpop.xlane.xlu0 %3889  ;;  %v4021_v43 = vmul.f32 %v10614_v45, %v12581_v21  ;;  %v4020_v56 = vmul.f32 %v10614_v45, %v12579_v35  ;;  %v15722_v35 = vld [vmem:[#allocation73_spill] sm:$0xff]  ;;  %v15741_v45 = vld [vmem:[#allocation84_spill] sm:$0xff] }
 0xf71   : > { %10619 = vrcp.f32 %v3890_v34  ;;  %v15742_v39 = vld [vmem:[#allocation85_spill] sm:$0xff]  ;;  %v15743_v34 = vld [vmem:[#allocation86_spill] sm:$0xff] }
 0xf72   : > { %4137 = vrot.lane.b32.xlu0 %v15719_v2, %s15444_s0  ;;  %v10038_v31 = vpack.c.bf16 %v4021_v43, %v4019_v57  ;;  %v10040_v60 = vpack.c.bf16 %v4020_v56, %v4018_v12  ;;  %v15744_v57 = vld [vmem:[#allocation87_spill] sm:$0xff]  ;;  %v15745_v43 = vld [vmem:[#allocation88_spill] sm:$0xff]  ;;  %v15746_v56 = vld [vmem:[#allocation89_spill] sm:$0xff] }
 0xf73   : > { %v10616_v47 = vpop.eup %10615  ;;  %v15747_v2 = vld [vmem:[#allocation90_spill] sm:$0xff]  ;;  %v15748_v12 = vld [vmem:[#allocation91_spill] sm:$0xff] }
 0xf74   : > { %4139 = vrot.lane.b32.xlu1 %v15720_v49, %s15444_s0  ;;  %10039 = vmatprep.subr.bf16.mxu0 %v10038_v31  ;;  %v3893_v55 = vpop.xlane.xlu1 %3892  ;;  %v4023_v28 = vmul.f32 %v10616_v47, %v15723_v0  ;;  %v4022_v52 = vmul.f32 %v10616_v47, %v15727_v63 }
 0xf75   : > { %10621 = vrcp.f32 %v3893_v55 }
 0xf76   : > { %4141 = vrot.lane.b32.xlu0 %v15721_v1, %s15444_s0 }
 0xf77   : > { %v10618_v21 = vpop.eup %10617  ;;  %10041 = vmatpush1.bf16.xpose.msra.mxu0 %v10040_v60 }
 0xf78   : > { %4143 = vrot.lane.b32.xlu1 %v15722_v35, %s15444_s0  ;;  %v4025_v29 = vmul.f32 %v10618_v21, %v15724_v58  ;;  %v4024_v37 = vmul.f32 %v10618_v21, %v15725_v7 }
 0xf7a   : > { %4145 = vrot.lane.b32.xlu0 %v15726_v10, %s15444_s0  ;;  %v10042_v54 = vpack.c.bf16 %v4025_v29, %v4023_v28  ;;  %v10044_v50 = vpack.c.bf16 %v4024_v37, %v4022_v52 }
 0xf7b   : > { %v10620_v32 = vpop.eup %10619 }
 0xf7c   : > { %4147 = vrot.lane.b32.xlu1 %v15728_v9, %s15444_s0  ;;  %10043 = vmatprep.subr.bf16.mxu0 %v10042_v54  ;;  %v4027_v36 = vmul.f32 %v10620_v32, %v15731_v6  ;;  %v4026_v44 = vmul.f32 %v10620_v32, %v15735_v14  ;;  %v15749_v6 = vld [vmem:[#allocation59_spill] sm:$0xff]  ;;  %v15750_v14 = vld [vmem:[#allocation56_spill] sm:$0xff] }
 0xf7e   : > { %4149 = vrot.lane.b32.xlu0 %v15729_v42, %s15444_s0 }
 0xf7f   : > { %v10622_v20 = vpop.eup %10621  ;;  %10045 = vmatpush1.bf16.xpose.msra.mxu0 %v10044_v50 }
 0xf80   : > { %4151 = vrot.lane.b32.xlu1 %v15730_v41, %s15444_s0  ;;  %v4029_v17 = vmul.f32 %v10622_v20, %v15732_v26  ;;  %v4028_v16 = vmul.f32 %v10622_v20, %v15733_v22 }
 0xf82   : > { %4153 = vrot.lane.b32.xlu0 %v15734_v46, %s15444_s0  ;;  %v10046_v3 = vpack.c.bf16 %v4029_v17, %v4027_v36  ;;  %v10048_v25 = vpack.c.bf16 %v4028_v16, %v4026_v44  ;;  %v4182_v44 = vrot.slane %v15750_v14, 4 }
 0xf84   : > { %4155 = vrot.lane.b32.xlu1 %v15736_v23, %s15444_s0  ;;  %10047 = vmatprep.subr.bf16.mxu0 %v10046_v3  ;;  %v15751_v3 = vld [vmem:[#allocation58_spill] sm:$0xff]  ;;  %v15753_v23 = vld [vmem:[#allocation57_spill] sm:$0xff] }
 0xf86   : > { %4157 = vrot.lane.b32.xlu0 %v15737_v19, %s15444_s0  ;;  %v4181_v19 = vrot.slane %v15753_v23, 4 }
 0xf87   : > { %10049 = vmatpush1.bf16.xpose.msra.mxu0 %v10048_v25 }
 0xf88   : > { %4159 = vrot.lane.b32.xlu1 %v15738_v40, %s15444_s0 }
 0xf8a   : > { %4161 = vrot.lane.b32.xlu0 %v15739_v15, %s15444_s0 }
 0xf8c   : > { %4163 = vrot.lane.b32.xlu1 %v15740_v11, %s15444_s0 }
 0xf8e   : > { %4165 = vrot.lane.b32.xlu0 %v15741_v45, %s15444_s0 }
 0xf90   : > { %4167 = vrot.lane.b32.xlu1 %v15742_v39, %s15444_s0 }
 0xf92   : > { %4169 = vrot.lane.b32.xlu0 %v15743_v34, %s15444_s0 }
 0xf94   : > { %4171 = vrot.lane.b32.xlu1 %v15744_v57, %s15444_s0 }
 0xf96   : > { %4173 = vrot.lane.b32.xlu0 %v15745_v43, %s15444_s0 }
 0xf98   : > { %4175 = vrot.lane.b32.xlu1 %v15746_v56, %s15444_s0 }
 0xf9a   : > { %4177 = vrot.lane.b32.xlu0 %v15747_v2, %s15444_s0 }
 0xf9c   : > { %4179 = vrot.lane.b32.xlu1 %v15748_v12, %s15444_s0 }
 0xfbc   : > { %v3896_v31 = vpop.xlane.xlu0 %3895 }
 0xfbd   : > { %10623 = vrcp.f32 %v3896_v31 }
 0xfc0   : > { %v3899_v60 = vpop.xlane.xlu1 %3898 }
 0xfc1   : > { %10625 = vrcp.f32 %v3899_v60 }
 0xfc4   : > { %v3902_v49 = vpop.xlane.xlu0 %3901 }
 0xfc5   : > { %10627 = vrcp.f32 %v3902_v49 }
 0xfc7   : > { %v10624_v47 = vpop.eup %10623 }
 0xfc8   : > { %v3905_v55 = vpop.xlane.xlu1 %3904  ;;  %v4031_v35 = vmul.f32 %v10624_v47, %v12625_v62  ;;  %v4030_v28 = vmul.f32 %v10624_v47, %v12623_v5 }
 0xfc9   : > { %10629 = vrcp.f32 %v3905_v55 }
 0xfcb   : > { %v10626_v1 = vpop.eup %10625 }
 0xfcc   : > { %v4033_v0 = vmul.f32 %v10626_v1, %v12633_v59  ;;  %v4032_v58 = vmul.f32 %v10626_v1, %v12631_v51 }
 0xfcd   : > { %v3908_v21 = vpop.xlane.xlu0 %3907 }
 0xfce   : > { %v10050_v29 = vpack.c.bf16 %v4033_v0, %v4031_v35  ;;  %v10052_v7 = vpack.c.bf16 %v4032_v58, %v4030_v28  ;;  %10631 = vrcp.f32 %v3908_v21 }
 0xfcf   : > { %v10628_v10 = vpop.eup %10627 }
 0xfd0   : > { %10051 = vmatprep.subr.bf16.mxu0 %v10050_v29  ;;  %v3911_v37 = vpop.xlane.xlu1 %3910  ;;  %v4035_v54 = vmul.f32 %v10628_v10, %v12645_v30  ;;  %v4034_v59 = vmul.f32 %v10628_v10, %v12643_v53 }
 0xfd1   : > { %10633 = vrcp.f32 %v3911_v37  ;;  %10053 = vmatpush1.bf16.xpose.msra.mxu0 %v10052_v7 }
 0xfd3   : > { %v10630_v63 = vpop.eup %10629 }
 0xfd4   : > { %v4037_v62 = vmul.f32 %v10630_v63, %v12653_v33  ;;  %v4036_v5 = vmul.f32 %v10630_v63, %v12651_v4 }
 0xfd5   : > { %v3914_v52 = vpop.xlane.xlu0 %3913 }
 0xfd6   : > { %v10054_v50 = vpack.c.bf16 %v4037_v62, %v4035_v54  ;;  %v10056_v51 = vpack.c.bf16 %v4036_v5, %v4034_v59  ;;  %10635 = vrcp.f32 %v3914_v52 }
 0xfd8   : > { %10055 = vmatprep.subr.bf16.mxu0 %v10054_v50  ;;  %v3917_v9 = vpop.xlane.xlu1 %3916  ;;  %v10632_v32 = vpop.eup %10631 }
 0xfd9   : > { %10637 = vrcp.f32 %v3917_v9  ;;  %10057 = vmatpush1.bf16.xpose.msra.mxu0 %v10056_v51  ;;  %v4039_v41 = vmul.f32 %v10632_v32, %v12665_v8  ;;  %v4038_v33 = vmul.f32 %v10632_v32, %v12663_v48 }
 0xfdb   : > { %v10634_v42 = vpop.eup %10633 }
 0xfdc   : > { %v4041_v30 = vmul.f32 %v10634_v42, %v12671_v13  ;;  %v4040_v53 = vmul.f32 %v10634_v42, %v12669_v38 }
 0xfdd   : > { %v2810_v20 = vpop.permute.xlu0 %2809 }
 0xfde   : > { %v12801_v4 = vadd.f32 %v15749_v6, %v2810_v20  ;;  %v10058_v36 = vpack.c.bf16 %v4041_v30, %v4039_v41  ;;  %v10060_v26 = vpack.c.bf16 %v4040_v53, %v4038_v33  ;;  %v12811_v25 = vadd.f32 %v15751_v3, %v2810_v20 }
 0xfe0   : > { %4110 = vmatprep.mubr.f32.mxu0 %v12801_v4  ;;  %10059 = vmatprep.subr.bf16.mxu0 %v10058_v36  ;;  %v10636_v17 = vpop.eup %10635  ;;  %15752 = vst [vmem:[#allocation60_spill] sm:$0xff] %v12811_v25  ;;  %v5087_v62 = vrot.slane %v12801_v4, 4 }
 0xfe1   : > { %10061 = vmatpush1.bf16.xpose.msra.mxu0 %v10060_v26  ;;  %v4043_v16 = vmul.f32 %v10636_v17, %v12681_v24  ;;  %v4042_v13 = vmul.f32 %v10636_v17, %v12679_v27  ;;  %v4118_v24 = vpop.permute.xlu1 %4117  ;;  %v15754_v27 = vmov 0.0  }
 0xfe3   : > { %v10638_v22 = vpop.eup %10637 }
 0xfe4   : > { %v4045_v8 = vmul.f32 %v10638_v22, %v12687_v61  ;;  %v4044_v48 = vmul.f32 %v10638_v22, %v12685_v18  ;;  %v4122_v61 = vpop.permute.xlu0 %4121 }
 0xfe5   : > { %v4120_v18 = vpop.permute.xlu1 %4119 }
 0xfe6   : > { %v10062_v38 = vpack.c.bf16 %v4045_v8, %v4043_v16  ;;  %v10064_v46 = vpack.c.bf16 %v4044_v48, %v4042_v13 }
 0xfe8   : > { %10063 = vmatprep.subr.bf16.mxu0 %v10062_v38  ;;  %v4126_v15 = vpop.permute.xlu0 %4125 }
 0xfe9   : > { %10065 = vmatpush1.bf16.xpose.msra.mxu0 %v10064_v46  ;;  %v4124_v40 = vpop.permute.xlu1 %4123 }
 0xfea   : > { %9691 = vmatprep.subr.msk.mxu0 %vm2561_vm12, %v4182_v44 }
 0xfec   : > { %v4130_v45 = vpop.permute.xlu0 %4129 }
 0xfed   : > { %v4128_v11 = vpop.permute.xlu1 %4127 }
 0xff0   : > { %4111 = vmatmul.mubr.f32.vlgmr.msra.gmra.mrb[78].mxu0 %v12811_v25  ;;  %v4134_v34 = vpop.permute.xlu0 %4133 }
 0xff1   : > { %9692 = vmatpush1.msk.msra.mxu0 %vm2561_vm12, %v4181_v19  ;;  %4315 = vmatprep.mubr.f32.mxu0 %v15754_v27  ;;  %v4132_v39 = vpop.permute.xlu1 %4131 }
 0xff4   : > { %9693 = vmatmul.mubr.msk.f32.vlgmr.msra.gmra.mrb[80].mxu0 %vm2557_vm13, %v4118_v24  ;;  %v4138_v43 = vpop.permute.xlu0 %4137 }
 0xff5   : > { %4321 = vmatprep.mubr.f32.mxu0 %v15754_v27  ;;  %v4136_v57 = vpop.permute.xlu1 %4135 }
 0xff8   : > { %9694 = vmatmul.mubr.msk.f32.gmra.mrb[82].mxu0 %vm2557_vm13, %v4120_v18  ;;  %v4142_v2 = vpop.permute.xlu0 %4141 }
 0xff9   : > { %4327 = vmatprep.mubr.f32.mxu0 %v15754_v27  ;;  %v4140_v56 = vpop.permute.xlu1 %4139 }
 0xffc   : > { %9695 = vmatmul.mubr.msk.f32.gmra.mrb[84].mxu0 %vm2557_vm13, %v4122_v61  ;;  %v4146_v31 = vpop.permute.xlu0 %4145 }
 0xffd   : > { %4333 = vmatprep.mubr.f32.mxu0 %v15754_v27  ;;  %v4144_v12 = vpop.permute.xlu1 %4143 }
0x1000   : > { %9696 = vmatmul.mubr.msk.f32.gmra.mrb[86].mxu0 %vm2557_vm13, %v4124_v40  ;;  %v4150_v49 = vpop.permute.xlu0 %4149 }
0x1001   : > { %4339 = vmatprep.mubr.f32.mxu0 %v15754_v27  ;;  %v4148_v60 = vpop.permute.xlu1 %4147 }
0x1004   : > { %9697 = vmatmul.mubr.msk.f32.gmra.mrb[88].mxu0 %vm2557_vm13, %v4126_v15  ;;  %v4154_v47 = vpop.permute.xlu0 %4153 }
0x1005   : > { %4345 = vmatprep.mubr.f32.mxu0 %v15754_v27  ;;  %v4152_v55 = vpop.permute.xlu1 %4151 }
0x1008   : > { %9698 = vmatmul.mubr.msk.f32.gmra.mrb[90].mxu0 %vm2557_vm13, %v4128_v11  ;;  %v4158_v21 = vpop.permute.xlu0 %4157 }
0x1009   : > { %4351 = vmatprep.mubr.f32.mxu0 %v15754_v27  ;;  %v4156_v1 = vpop.permute.xlu1 %4155 }
0x100c   : > { %9699 = vmatmul.mubr.msk.f32.gmra.mrb[92].mxu0 %vm2557_vm13, %v4130_v45  ;;  %v4162_v0 = vpop.permute.xlu0 %4161 }
0x100d   : > { %4357 = vmatprep.mubr.f32.mxu0 %v15754_v27  ;;  %v4160_v35 = vpop.permute.xlu1 %4159 }
0x1010   : > { %9700 = vmatmul.mubr.msk.f32.gmra.mrb[94].mxu0 %vm2557_vm13, %v4132_v39  ;;  %v4166_v58 = vpop.permute.xlu0 %4165 }
0x1011   : > { %4363 = vmatprep.mubr.f32.mxu0 %v15754_v27  ;;  %v4164_v28 = vpop.permute.xlu1 %4163 }
0x1014   : > { %9701 = vmatmul.mubr.msk.f32.gmra.mrb[96].mxu0 %vm2557_vm13, %v4134_v34  ;;  %v4170_v7 = vpop.permute.xlu0 %4169 }
0x1015   : > { %4369 = vmatprep.mubr.f32.mxu0 %v15754_v27  ;;  %v4168_v29 = vpop.permute.xlu1 %4167 }
0x1018   : > { %9702 = vmatmul.mubr.msk.f32.gmra.mrb[98].mxu0 %vm2557_vm13, %v4136_v57  ;;  %v4174_v10 = vpop.permute.xlu0 %4173 }
0x1019   : > { %4375 = vmatprep.mubr.f32.mxu0 %v15754_v27  ;;  %v4172_v37 = vpop.permute.xlu1 %4171 }
0x101c   : > { %9703 = vmatmul.mubr.msk.f32.gmra.mrb[100].mxu0 %vm2557_vm13, %v4138_v43  ;;  %v4178_v52 = vpop.permute.xlu0 %4177 }
0x101d   : > { %4381 = vmatprep.mubr.f32.mxu0 %v15754_v27  ;;  %v4176_v63 = vpop.permute.xlu1 %4175 }
0x1020   : > { %9704 = vmatmul.mubr.msk.f32.gmra.mrb[102].mxu0 %vm2557_vm13, %v4140_v56 }
0x1021   : > { %4387 = vmatprep.mubr.f32.mxu0 %v15754_v27  ;;  %v4180_v54 = vpop.permute.xlu1 %4179 }
0x1024   : > { %9705 = vmatmul.mubr.msk.f32.gmra.mrb[104].mxu0 %vm2557_vm13, %v4142_v2 }
0x1025   : > { %4393 = vmatprep.mubr.f32.mxu0 %v15754_v27 }
0x1028   : > { %9706 = vmatmul.mubr.msk.f32.gmra.mrb[106].mxu0 %vm2557_vm13, %v4144_v12 }
0x1029   : > { %4399 = vmatprep.mubr.f32.mxu0 %v15754_v27 }
0x102c   : > { %9707 = vmatmul.mubr.msk.f32.gmra.mrb[108].mxu0 %vm2557_vm13, %v4146_v31 }
0x102d   : > { %4405 = vmatprep.mubr.f32.mxu0 %v15754_v27 }
0x1030   : > { %9708 = vmatmul.mubr.msk.f32.gmra.mrb[110].mxu0 %vm2557_vm13, %v4148_v60 }
0x1031   : > { %4411 = vmatprep.mubr.f32.mxu0 %v15754_v27 }
0x1034   : > { %9709 = vmatmul.mubr.msk.f32.gmra.mrb[112].mxu0 %vm2557_vm13, %v4150_v49 }
0x1035   : > { %4417 = vmatprep.mubr.f32.mxu0 %v15754_v27 }
0x1038   : > { %9710 = vmatmul.mubr.msk.f32.gmra.mrb[114].mxu0 %vm2557_vm13, %v4152_v55 }
0x1039   : > { %4423 = vmatprep.mubr.f32.mxu0 %v15754_v27 }
0x103c   : > { %9711 = vmatmul.mubr.msk.f32.gmra.mrb[116].mxu0 %vm2557_vm13, %v4154_v47 }
0x103d   : > { %4429 = vmatprep.mubr.f32.mxu0 %v15754_v27 }
0x1040   : > { %9712 = vmatmul.mubr.msk.f32.gmra.mrb[118].mxu0 %vm2557_vm13, %v4156_v1 }
0x1041   : > { %4435 = vmatprep.mubr.f32.mxu0 %v15754_v27 }
0x1044   : > { %9713 = vmatmul.mubr.msk.f32.gmra.mrb[120].mxu0 %vm2557_vm13, %v4158_v21 }
0x1045   : > { %4441 = vmatprep.mubr.f32.mxu0 %v15754_v27 }
0x1048   : > { %9714 = vmatmul.mubr.msk.f32.gmra.mrb[122].mxu0 %vm2557_vm13, %v4160_v35 }
0x1049   : > { %4447 = vmatprep.mubr.f32.mxu0 %v15754_v27 }
0x104c   : > { %9715 = vmatmul.mubr.msk.f32.gmra.mrb[124].mxu0 %vm2557_vm13, %v4162_v0 }
0x104d   : > { %4453 = vmatprep.mubr.f32.mxu0 %v15754_v27 }
0x1050   : > { %9716 = vmatmul.mubr.msk.f32.gmra.mrb[126].mxu0 %vm2557_vm13, %v4164_v28 }
0x1051   : > { %4459 = vmatprep.mubr.f32.mxu0 %v15754_v27 }
0x1054   : > { %9717 = vmatmul.mubr.msk.f32.gmra.mrb[128].mxu0 %vm2557_vm13, %v4166_v58 }
0x1055   : > { %4465 = vmatprep.mubr.f32.mxu0 %v15754_v27 }
0x1058   : > { %9718 = vmatmul.mubr.msk.f32.gmra.mrb[130].mxu0 %vm2557_vm13, %v4168_v29 }
0x1059   : > { %4471 = vmatprep.mubr.f32.mxu0 %v15754_v27 }
0x105c   : > { %9719 = vmatmul.mubr.msk.f32.gmra.mrb[132].mxu0 %vm2557_vm13, %v4170_v7 }
0x105d   : > { %4477 = vmatprep.mubr.f32.mxu0 %v15754_v27 }
0x1060   : > { %9720 = vmatmul.mubr.msk.f32.gmra.mrb[134].mxu0 %vm2557_vm13, %v4172_v37 }
0x1061   : > { %4483 = vmatprep.mubr.f32.mxu0 %v15754_v27 }
0x1064   : > { %9721 = vmatmul.mubr.msk.f32.gmra.mrb[136].mxu0 %vm2557_vm13, %v4174_v10 }
0x1065   : > { %4489 = vmatprep.mubr.f32.mxu0 %v15754_v27 }
0x1068   : > { %9722 = vmatmul.mubr.msk.f32.gmra.mrb[138].mxu0 %vm2557_vm13, %v4176_v63 }
0x1069   : > { %4495 = vmatprep.mubr.f32.mxu0 %v15754_v27 }
0x106c   : > { %9723 = vmatmul.mubr.msk.f32.gmra.mrb[140].mxu0 %vm2557_vm13, %v4178_v52 }
0x106d   : > { %4501 = vmatprep.mubr.f32.mxu0 %v15754_v27 }
0x1070   : > { %9724 = vmatmul.mubr.msk.f32.gmra.mrb[142].mxu0 %vm2557_vm13, %v4180_v54 }
0x1071   : > { %5154 = vmatprep.mubr.f32.mxu0 %v5087_v62 }
0x10c3   : > { %v12881_v59 = vpop.f32.mrb[78].mxu0 }
0x10c4   : > { %15755 = vst [vmem:[#allocation61_spill] sm:$0xff] %v12881_v59  ;;  %v12883_v5 = vpop.f32.mrb[79].mxu0 }
0x10c5   : > { %15756 = vst [vmem:[#allocation93_spill] sm:$0xff] %v12883_v5 }
0x10c7   : > { %v4317_v50 = vpop.f32.mrb[80].mxu0 }
0x10c8   : > { %v12885_v51 = vmul.f32 0.5, %v4317_v50  ;;  %v4319_v9 = vpop.f32.mrb[81].mxu0 }
0x10c9   : > { %v12887_v32 = vmul.f32 0.5, %v4319_v9 }
0x10cb   : > { %v4572_v42 = vmax.f32 %v12885_v51, %v12887_v32  ;;  %v4323_v20 = vpop.f32.mrb[82].mxu0 }
0x10cc   : > { %v12891_v41 = vmul.f32 0.5, %v4323_v20  ;;  %v4325_v30 = vpop.f32.mrb[83].mxu0 }
0x10cd   : > { %v12893_v33 = vmul.f32 0.5, %v4325_v30  ;;  %4573 = vmax.xlane.f32.xlu0 %v4572_v42 }
0x10cf   : > { %v4575_v53 = vmax.f32 %v12891_v41, %v12893_v33  ;;  %v4329_v6 = vpop.f32.mrb[84].mxu0 }
0x10d0   : > { %v12897_v4 = vmul.f32 0.5, %v4329_v6  ;;  %v4331_v36 = vpop.f32.mrb[85].mxu0 }
0x10d1   : > { %v12899_v26 = vmul.f32 0.5, %v4331_v36  ;;  %4576 = vmax.xlane.f32.xlu1 %v4575_v53 }
0x10d3   : > { %v4578_v17 = vmax.f32 %v12897_v4, %v12899_v26  ;;  %v4335_v22 = vpop.f32.mrb[86].mxu0 }
0x10d4   : > { %v12903_v16 = vmul.f32 0.5, %v4335_v22  ;;  %v4337_v8 = vpop.f32.mrb[87].mxu0 }
0x10d5   : > { %v12905_v13 = vmul.f32 0.5, %v4337_v8  ;;  %4579 = vmax.xlane.f32.xlu0 %v4578_v17 }
0x10d7   : > { %v4581_v48 = vmax.f32 %v12903_v16, %v12905_v13  ;;  %v4341_v38 = vpop.f32.mrb[88].mxu0 }
0x10d8   : > { %v12909_v46 = vmul.f32 0.5, %v4341_v38  ;;  %v4343_v14 = vpop.f32.mrb[89].mxu0 }
0x10d9   : > { %v12911_v44 = vmul.f32 0.5, %v4343_v14  ;;  %4582 = vmax.xlane.f32.xlu0 %v4581_v48 }
0x10db   : > { %v4584_v3 = vmax.f32 %v12909_v46, %v12911_v44  ;;  %v4347_v23 = vpop.f32.mrb[90].mxu0 }
0x10dc   : > { %v12915_v19 = vmul.f32 0.5, %v4347_v23  ;;  %v4349_v24 = vpop.f32.mrb[91].mxu0 }
0x10dd   : > { %v12917_v18 = vmul.f32 0.5, %v4349_v24  ;;  %4585 = vmax.xlane.f32.xlu1 %v4584_v3 }
0x10df   : > { %v4587_v61 = vmax.f32 %v12915_v19, %v12917_v18  ;;  %v4353_v40 = vpop.f32.mrb[92].mxu0 }
0x10e0   : > { %v12921_v15 = vmul.f32 0.5, %v4353_v40  ;;  %v4355_v11 = vpop.f32.mrb[93].mxu0 }
0x10e1   : > { %v12923_v45 = vmul.f32 0.5, %v4355_v11  ;;  %4588 = vmax.xlane.f32.xlu0 %v4587_v61 }
0x10e3   : > { %v4590_v39 = vmax.f32 %v12921_v15, %v12923_v45  ;;  %v4359_v34 = vpop.f32.mrb[94].mxu0 }
0x10e4   : > { %v12927_v57 = vmul.f32 0.5, %v4359_v34  ;;  %v4361_v43 = vpop.f32.mrb[95].mxu0 }
0x10e5   : > { %v12929_v56 = vmul.f32 0.5, %v4361_v43  ;;  %4591 = vmax.xlane.f32.xlu1 %v4590_v39 }
0x10e7   : > { %v4593_v2 = vmax.f32 %v12927_v57, %v12929_v56  ;;  %v4365_v12 = vpop.f32.mrb[96].mxu0 }
0x10e8   : > { %v12933_v31 = vmul.f32 0.5, %v4365_v12  ;;  %v4367_v60 = vpop.f32.mrb[97].mxu0 }
0x10e9   : > { %v12935_v49 = vmul.f32 0.5, %v4367_v60  ;;  %4594 = vmax.xlane.f32.xlu0 %v4593_v2 }
0x10eb   : > { %v4596_v55 = vmax.f32 %v12933_v31, %v12935_v49  ;;  %v4371_v47 = vpop.f32.mrb[98].mxu0 }
0x10ec   : > { %v12939_v1 = vmul.f32 0.5, %v4371_v47  ;;  %v4373_v21 = vpop.f32.mrb[99].mxu0 }
0x10ed   : > { %v12941_v35 = vmul.f32 0.5, %v4373_v21  ;;  %4597 = vmax.xlane.f32.xlu1 %v4596_v55 }
0x10ef   : > { %v4599_v0 = vmax.f32 %v12939_v1, %v12941_v35  ;;  %v4377_v28 = vpop.f32.mrb[100].mxu0 }
0x10f0   : > { %v12945_v58 = vmul.f32 0.5, %v4377_v28  ;;  %v4379_v29 = vpop.f32.mrb[101].mxu0 }
0x10f1   : > { %v12947_v7 = vmul.f32 0.5, %v4379_v29  ;;  %4600 = vmax.xlane.f32.xlu0 %v4599_v0 }
0x10f3   : > { %v4602_v37 = vmax.f32 %v12945_v58, %v12947_v7  ;;  %v4383_v10 = vpop.f32.mrb[102].mxu0 }
0x10f4   : > { %v12951_v63 = vmul.f32 0.5, %v4383_v10  ;;  %v4385_v52 = vpop.f32.mrb[103].mxu0 }
0x10f5   : > { %v12953_v54 = vmul.f32 0.5, %v4385_v52  ;;  %4603 = vmax.xlane.f32.xlu1 %v4602_v37 }
0x10f7   : > { %v4605_v62 = vmax.f32 %v12951_v63, %v12953_v54  ;;  %v4389_v50 = vpop.f32.mrb[104].mxu0 }
0x10f8   : > { %v12957_v9 = vmul.f32 0.5, %v4389_v50  ;;  %v4391_v42 = vpop.f32.mrb[105].mxu0 }
0x10f9   : > { %v12959_v20 = vmul.f32 0.5, %v4391_v42  ;;  %4606 = vmax.xlane.f32.xlu0 %v4605_v62 }
0x10fb   : > { %v4608_v30 = vmax.f32 %v12957_v9, %v12959_v20  ;;  %v4395_v53 = vpop.f32.mrb[106].mxu0 }
0x10fc   : > { %v12963_v6 = vmul.f32 0.5, %v4395_v53  ;;  %v4397_v36 = vpop.f32.mrb[107].mxu0 }
0x10fd   : > { %v12965_v17 = vmul.f32 0.5, %v4397_v36  ;;  %4609 = vmax.xlane.f32.xlu1 %v4608_v30 }
0x10ff   : > { %v4611_v22 = vmax.f32 %v12963_v6, %v12965_v17  ;;  %v4401_v8 = vpop.f32.mrb[108].mxu0 }
0x1100   : > { %v12969_v48 = vmul.f32 0.5, %v4401_v8  ;;  %v4403_v38 = vpop.f32.mrb[109].mxu0 }
0x1101   : > { %v12971_v14 = vmul.f32 0.5, %v4403_v38  ;;  %4612 = vmax.xlane.f32.xlu0 %v4611_v22 }
0x1103   : > { %v4614_v3 = vmax.f32 %v12969_v48, %v12971_v14  ;;  %v4407_v23 = vpop.f32.mrb[110].mxu0 }
0x1104   : > { %v12975_v24 = vmul.f32 0.5, %v4407_v23  ;;  %v4409_v61 = vpop.f32.mrb[111].mxu0 }
0x1105   : > { %v12977_v40 = vmul.f32 0.5, %v4409_v61  ;;  %4615 = vmax.xlane.f32.xlu1 %v4614_v3 }
0x1107   : > { %v4617_v11 = vmax.f32 %v12975_v24, %v12977_v40  ;;  %v4413_v39 = vpop.f32.mrb[112].mxu0 }
0x1108   : > { %v12981_v34 = vmul.f32 0.5, %v4413_v39  ;;  %v4415_v43 = vpop.f32.mrb[113].mxu0 }
0x1109   : > { %v12983_v2 = vmul.f32 0.5, %v4415_v43  ;;  %4618 = vmax.xlane.f32.xlu0 %v4617_v11 }
0x110b   : > { %v4620_v12 = vmax.f32 %v12981_v34, %v12983_v2  ;;  %v4419_v60 = vpop.f32.mrb[114].mxu0 }
0x110c   : > { %v12987_v55 = vmul.f32 0.5, %v4419_v60  ;;  %v4421_v47 = vpop.f32.mrb[115].mxu0 }
0x110d   : > { %v12989_v21 = vmul.f32 0.5, %v4421_v47  ;;  %4621 = vmax.xlane.f32.xlu1 %v4620_v12 }
0x110f   : > { %15757 = vst [vmem:[#allocation62_spill] sm:$0xff] %v12989_v21  ;;  %v4623_v0 = vmax.f32 %v12987_v55, %v12989_v21  ;;  %v4425_v28 = vpop.f32.mrb[116].mxu0 }
0x1110   : > { %v12993_v29 = vmul.f32 0.5, %v4425_v28  ;;  %v4427_v37 = vpop.f32.mrb[117].mxu0 }
0x1111   : > { %v12995_v10 = vmul.f32 0.5, %v4427_v37  ;;  %4624 = vmax.xlane.f32.xlu0 %v4623_v0 }
0x1112   : > { %15758 = vst [vmem:[#allocation92_spill] sm:$0xff] %v12993_v29 }
0x1113   : > { %15759 = vst [vmem:[#allocation63_spill] sm:$0xff] %v12995_v10  ;;  %v4626_v52 = vmax.f32 %v12993_v29, %v12995_v10  ;;  %v4431_v62 = vpop.f32.mrb[118].mxu0 }
0x1114   : > { %v12999_v50 = vmul.f32 0.5, %v4431_v62  ;;  %v4433_v42 = vpop.f32.mrb[119].mxu0 }
0x1115   : > { %v13001_v30 = vmul.f32 0.5, %v4433_v42  ;;  %4627 = vmax.xlane.f32.xlu1 %v4626_v52 }
0x1116   : > { %15760 = vst [vmem:[#allocation64_spill] sm:$0xff] %v12999_v50 }
0x1117   : > { %15761 = vst [vmem:[#allocation65_spill] sm:$0xff] %v13001_v30  ;;  %v4629_v53 = vmax.f32 %v12999_v50, %v13001_v30  ;;  %v4437_v36 = vpop.f32.mrb[120].mxu0 }
0x1118   : > { %v13005_v22 = vmul.f32 0.5, %v4437_v36  ;;  %v4439_v8 = vpop.f32.mrb[121].mxu0 }
0x1119   : > { %v13007_v38 = vmul.f32 0.5, %v4439_v8  ;;  %4630 = vmax.xlane.f32.xlu0 %v4629_v53 }
0x111a   : > { %15762 = vst [vmem:[#allocation95_spill] sm:$0xff] %v13005_v22 }
0x111b   : > { %15763 = vst [vmem:[#allocation97_spill] sm:$0xff] %v13007_v38  ;;  %v4632_v3 = vmax.f32 %v13005_v22, %v13007_v38  ;;  %v4443_v23 = vpop.f32.mrb[122].mxu0 }
0x111c   : > { %v13011_v61 = vmul.f32 0.5, %v4443_v23  ;;  %v4445_v11 = vpop.f32.mrb[123].mxu0 }
0x111d   : > { %v13013_v39 = vmul.f32 0.5, %v4445_v11  ;;  %4633 = vmax.xlane.f32.xlu1 %v4632_v3 }
0x111e   : > { %15764 = vst [vmem:[#allocation96_spill] sm:$0xff] %v13011_v61 }
0x111f   : > { %15765 = vst [vmem:[#allocation66_spill] sm:$0xff] %v13013_v39  ;;  %v4635_v43 = vmax.f32 %v13011_v61, %v13013_v39  ;;  %v4449_v12 = vpop.f32.mrb[124].mxu0 }
0x1120   : > { %v13017_v60 = vmul.f32 0.5, %v4449_v12  ;;  %v4451_v47 = vpop.f32.mrb[125].mxu0 }
0x1121   : > { %v13019_v0 = vmul.f32 0.5, %v4451_v47  ;;  %4636 = vmax.xlane.f32.xlu0 %v4635_v43 }
0x1122   : > { %15766 = vst [vmem:[#allocation94_spill] sm:$0xff] %v13017_v60 }
0x1123   : > { %15767 = vst [vmem:[#allocation67_spill] sm:$0xff] %v13019_v0  ;;  %v4638_v28 = vmax.f32 %v13017_v60, %v13019_v0  ;;  %v4455_v37 = vpop.f32.mrb[126].mxu0 }
0x1124   : > { %v13023_v52 = vmul.f32 0.5, %v4455_v37  ;;  %v4457_v62 = vpop.f32.mrb[127].mxu0 }
0x1125   : > { %v13025_v42 = vmul.f32 0.5, %v4457_v62  ;;  %4639 = vmax.xlane.f32.xlu1 %v4638_v28 }
0x1126   : > { %15768 = vst [vmem:[#allocation68_spill] sm:$0xff] %v13023_v52 }
0x1127   : > { %15769 = vst [vmem:[#allocation69_spill] sm:$0xff] %v13025_v42  ;;  %v4641_v53 = vmax.f32 %v13023_v52, %v13025_v42  ;;  %v4461_v36 = vpop.f32.mrb[128].mxu0 }
0x1128   : > { %v4463_v8 = vpop.f32.mrb[129].mxu0 }
0x1129   : > { %4642 = vmax.xlane.f32.xlu0 %v4641_v53 }
0x112b   : > { %v4467_v3 = vpop.f32.mrb[130].mxu0 }
0x112c   : > { %v4469_v23 = vpop.f32.mrb[131].mxu0 }
0x112f   : > { %v13029_v11 = vpop.f32.mrb[132].mxu0 }
0x1130   : > { %v13031_v43 = vpop.f32.mrb[133].mxu0 }
0x1133   : > { %v13033_v12 = vpop.f32.mrb[134].mxu0 }
0x1134   : > { %v13035_v47 = vpop.f32.mrb[135].mxu0 }
0x1137   : > { %v13037_v37 = vpop.f32.mrb[136].mxu0 }
0x1138   : > { %v13039_v62 = vpop.f32.mrb[137].mxu0 }
0x113b   : > { %v13041_v28 = vpop.f32.mrb[138].mxu0 }
0x113c   : > { %v13043_v59 = vpop.f32.mrb[139].mxu0 }
0x113f   : > { %v13045_v5 = vpop.f32.mrb[140].mxu0 }
0x1140   : > { %v13047_v53 = vpop.f32.mrb[141].mxu0 }
0x1143   : > { %v13049_v25 = vpop.f32.mrb[142].mxu0 }
0x1144   : > { %v13051_v27 = vpop.f32.mrb[143].mxu0 }
0x115a   : > { %v4574_v42 = vpop.xlane.xlu0 %4573 }
0x115b   : > { %v4668_v52 = vsub.f32 %v12885_v51, %v4574_v42  ;;  %v4669_v0 = vsub.f32 %v12887_v32, %v4574_v42  ;;  %v13079_v42 = vmul.f32 0.5, %v4467_v3 }
0x115d   : > { %v4732_v60 = vmul.f32 1.442695, %v4668_v52  ;;  %v4734_v39 = vmul.f32 1.442695, %v4669_v0 }
0x115e   : > { %v4577_v61 = vpop.xlane.xlu1 %4576 }
0x115f   : > { %10639 = vpow2.f32 %v4732_v60  ;;  %v4670_v38 = vsub.f32 %v12891_v41, %v4577_v61  ;;  %v4671_v22 = vsub.f32 %v12893_v33, %v4577_v61 }
0x1160   : > { %10641 = vpow2.f32 %v4734_v39 }
0x1161   : > { %v4736_v30 = vmul.f32 1.442695, %v4670_v38  ;;  %v4738_v50 = vmul.f32 1.442695, %v4671_v22 }
0x1162   : > { %v4580_v10 = vpop.xlane.xlu0 %4579 }
0x1163   : > { %10643 = vpow2.f32 %v4736_v30  ;;  %v4672_v29 = vsub.f32 %v12897_v4, %v4580_v10  ;;  %v4673_v21 = vsub.f32 %v12899_v26, %v4580_v10  ;;  %v13065_v30 = vmul.f32 0.5, %v4461_v36 }
0x1164   : > { %10645 = vpow2.f32 %v4738_v50  ;;  %v13067_v4 = vmul.f32 0.5, %v4463_v8  ;;  %v13081_v36 = vmul.f32 0.5, %v4469_v23 }
0x1165   : > { %v4740_v51 = vmul.f32 1.442695, %v4672_v29  ;;  %v4742_v32 = vmul.f32 1.442695, %v4673_v21 }
0x1166   : > { %v4583_v52 = vpop.xlane.xlu0 %4582  ;;  %v4644_v0 = vmax.f32 %v13065_v30, %v13067_v4  ;;  %v4647_v23 = vmax.f32 %v13079_v42, %v13081_v36 }
0x1167   : > { %10647 = vpow2.f32 %v4740_v51  ;;  %v4674_v60 = vsub.f32 %v12903_v16, %v4583_v52  ;;  %v4675_v41 = vsub.f32 %v12905_v13, %v4583_v52 }
0x1168   : > { %10649 = vpow2.f32 %v4742_v32 }
0x1169   : > { %v13061_v33 = vpop.eup %10639  ;;  %v4744_v38 = vmul.f32 1.442695, %v4674_v60  ;;  %v4746_v22 = vmul.f32 1.442695, %v4675_v41  ;;  %v13094_v41 = vmul.f32 0.5, %v13029_v11 }
0x116a   : > { %v13063_v61 = vpop.eup %10641  ;;  %v4586_v26 = vpop.xlane.xlu1 %4585 }
0x116b   : > { %10651 = vpow2.f32 %v4744_v38  ;;  %v4676_v21 = vsub.f32 %v12909_v46, %v4586_v26  ;;  %v4677_v29 = vsub.f32 %v12911_v44, %v4586_v26  ;;  %v4860_v16 = vadd.f32 %v13063_v61, %v13061_v33 }
0x116c   : > { %10653 = vpow2.f32 %v4746_v22 }
0x116d   : > { %v13073_v13 = vpop.eup %10643  ;;  %v4748_v10 = vmul.f32 1.442695, %v4676_v21  ;;  %v4750_v50 = vmul.f32 1.442695, %v4677_v29  ;;  %4861 = vadd.xlane.f32.xlu1 %v4860_v16 }
0x116e   : > { %v13075_v39 = vpop.eup %10645  ;;  %v4589_v46 = vpop.xlane.xlu0 %4588 }
0x116f   : > { %10655 = vpow2.f32 %v4748_v10  ;;  %v4678_v44 = vsub.f32 %v12915_v19, %v4589_v46  ;;  %v4679_v8 = vsub.f32 %v12917_v18, %v4589_v46  ;;  %v4863_v51 = vadd.f32 %v13075_v39, %v13073_v13 }
0x1170   : > { %10657 = vpow2.f32 %v4750_v50  ;;  %v13097_v19 = vmul.f32 0.5, %v13031_v43  ;;  %v13110_v10 = vmul.f32 0.5, %v13033_v12 }
0x1171   : > { %v13087_v32 = vpop.eup %10647  ;;  %v4752_v52 = vmul.f32 1.442695, %v4678_v44  ;;  %v4754_v60 = vmul.f32 1.442695, %v4679_v8  ;;  %4864 = vadd.xlane.f32.xlu0 %v4863_v51  ;;  %4645 = vmax.xlane.f32.xlu1 %v4644_v0 }
0x1172   : > { %v13089_v3 = vpop.eup %10649  ;;  %v4592_v18 = vpop.xlane.xlu1 %4591  ;;  %v4650_v43 = vmax.f32 %v13094_v41, %v13097_v19 }
0x1173   : > { %10659 = vpow2.f32 %v4752_v52  ;;  %v4680_v38 = vsub.f32 %v12921_v15, %v4592_v18  ;;  %v4681_v22 = vsub.f32 %v12923_v45, %v4592_v18  ;;  %v4866_v26 = vadd.f32 %v13089_v3, %v13087_v32 }
0x1174   : > { %10661 = vpow2.f32 %v4754_v60  ;;  %v13113_v15 = vmul.f32 0.5, %v13035_v47  ;;  %v13126_v52 = vmul.f32 0.5, %v13037_v37 }
0x1175   : > { %v13103_v21 = vpop.eup %10651  ;;  %v4756_v29 = vmul.f32 1.442695, %v4680_v38  ;;  %v4758_v16 = vmul.f32 1.442695, %v4681_v22  ;;  %4867 = vadd.xlane.f32.xlu1 %v4866_v26  ;;  %4648 = vmax.xlane.f32.xlu0 %v4647_v23 }
0x1176   : > { %v13105_v11 = vpop.eup %10653  ;;  %v4595_v45 = vpop.xlane.xlu0 %4594  ;;  %v4653_v47 = vmax.f32 %v13110_v10, %v13113_v15 }
0x1177   : > { %10663 = vpow2.f32 %v4756_v29  ;;  %v4682_v50 = vsub.f32 %v12927_v57, %v4595_v45  ;;  %v4683_v0 = vsub.f32 %v12929_v56, %v4595_v45  ;;  %v4869_v46 = vadd.f32 %v13105_v11, %v13103_v21 }
0x1178   : > { %10665 = vpow2.f32 %v4758_v16  ;;  %v13129_v57 = vmul.f32 0.5, %v13039_v62  ;;  %v13142_v29 = vmul.f32 0.5, %v13041_v28 }
0x1179   : > { %v13119_v44 = vpop.eup %10655  ;;  %v4760_v8 = vmul.f32 1.442695, %v4682_v50  ;;  %v4762_v51 = vmul.f32 1.442695, %v4683_v0  ;;  %4870 = vadd.xlane.f32.xlu0 %v4869_v46  ;;  %4651 = vmax.xlane.f32.xlu1 %v4650_v43 }
0x117a   : > { %v13121_v12 = vpop.eup %10657  ;;  %v4598_v56 = vpop.xlane.xlu1 %4597  ;;  %v4656_v62 = vmax.f32 %v13126_v52, %v13129_v57 }
0x117b   : > { %10667 = vpow2.f32 %v4760_v8  ;;  %v4684_v60 = vsub.f32 %v12933_v31, %v4598_v56  ;;  %v4685_v23 = vsub.f32 %v12935_v49, %v4598_v56  ;;  %v4872_v18 = vadd.f32 %v13121_v12, %v13119_v44 }
0x117c   : > { %10669 = vpow2.f32 %v4762_v51  ;;  %v13145_v31 = vmul.f32 0.5, %v13043_v59  ;;  %v13158_v8 = vmul.f32 0.5, %v13045_v5 }
0x117d   : > { %v13135_v38 = vpop.eup %10659  ;;  %v4764_v22 = vmul.f32 1.442695, %v4684_v60  ;;  %v4766_v26 = vmul.f32 1.442695, %v4685_v23  ;;  %4873 = vadd.xlane.f32.xlu1 %v4872_v18  ;;  %4654 = vmax.xlane.f32.xlu0 %v4653_v47 }
0x117e   : > { %v13137_v37 = vpop.eup %10661  ;;  %v4601_v49 = vpop.xlane.xlu0 %4600  ;;  %v4659_v59 = vmax.f32 %v13142_v29, %v13145_v31 }
0x117f   : > { %10671 = vpow2.f32 %v4764_v22  ;;  %v4686_v16 = vsub.f32 %v12939_v1, %v4601_v49  ;;  %v4687_v43 = vsub.f32 %v12941_v35, %v4601_v49  ;;  %v4875_v45 = vadd.f32 %v13137_v37, %v13135_v38 }
0x1180   : > { %10673 = vpow2.f32 %v4766_v26  ;;  %v13161_v1 = vmul.f32 0.5, %v13047_v53  ;;  %v13174_v22 = vmul.f32 0.5, %v13049_v25 }
0x1181   : > { %v13151_v50 = vpop.eup %10663  ;;  %v4768_v0 = vmul.f32 1.442695, %v4686_v16  ;;  %v4770_v46 = vmul.f32 1.442695, %v4687_v43  ;;  %4876 = vadd.xlane.f32.xlu0 %v4875_v45  ;;  %4657 = vmax.xlane.f32.xlu1 %v4656_v62 }
0x1182   : > { %v13153_v28 = vpop.eup %10665  ;;  %v4604_v35 = vpop.xlane.xlu1 %4603  ;;  %v4662_v53 = vmax.f32 %v13158_v8, %v13161_v1 }
0x1183   : > { %10675 = vpow2.f32 %v4768_v0  ;;  %v4688_v51 = vsub.f32 %v12945_v58, %v4604_v35  ;;  %v4689_v47 = vsub.f32 %v12947_v7, %v4604_v35  ;;  %v4878_v56 = vadd.f32 %v13153_v28, %v13151_v50 }
0x1184   : > { %10677 = vpow2.f32 %v4770_v46  ;;  %v13177_v58 = vmul.f32 0.5, %v13051_v27 }
0x1185   : > { %v13167_v60 = vpop.eup %10667  ;;  %v4772_v23 = vmul.f32 1.442695, %v4688_v51  ;;  %v4774_v18 = vmul.f32 1.442695, %v4689_v47  ;;  %4879 = vadd.xlane.f32.xlu1 %v4878_v56  ;;  %4660 = vmax.xlane.f32.xlu0 %v4659_v59 }
0x1186   : > { %v13169_v5 = vpop.eup %10669  ;;  %v4607_v7 = vpop.xlane.xlu0 %4606  ;;  %v4665_v27 = vmax.f32 %v13174_v22, %v13177_v58 }
0x1187   : > { %10679 = vpow2.f32 %v4772_v23  ;;  %v4690_v26 = vsub.f32 %v12951_v63, %v4607_v7  ;;  %v4691_v62 = vsub.f32 %v12953_v54, %v4607_v7  ;;  %v4881_v49 = vadd.f32 %v13169_v5, %v13167_v60 }
0x1188   : > { %10681 = vpow2.f32 %v4774_v18 }
0x1189   : > { %v13183_v16 = vpop.eup %10671  ;;  %v4776_v43 = vmul.f32 1.442695, %v4690_v26  ;;  %v4778_v45 = vmul.f32 1.442695, %v4691_v62  ;;  %4882 = vadd.xlane.f32.xlu0 %v4881_v49  ;;  %4663 = vmax.xlane.f32.xlu1 %v4662_v53 }
0x118a   : > { %v13185_v25 = vpop.eup %10673  ;;  %v4610_v0 = vpop.xlane.xlu1 %4609 }
0x118b   : > { %10683 = vpow2.f32 %v4776_v43  ;;  %v4692_v63 = vsub.f32 %v12957_v9, %v4610_v0  ;;  %v4693_v54 = vsub.f32 %v12959_v20, %v4610_v0  ;;  %v4884_v46 = vadd.f32 %v13185_v25, %v13183_v16 }
0x118c   : > { %10685 = vpow2.f32 %v4778_v45 }
0x118d   : > { %v13193_v59 = vpop.eup %10675  ;;  %v4780_v35 = vmul.f32 1.442695, %v4692_v63  ;;  %v4782_v51 = vmul.f32 1.442695, %v4693_v54  ;;  %4885 = vadd.xlane.f32.xlu1 %v4884_v46  ;;  %4666 = vmax.xlane.f32.xlu0 %v4665_v27 }
0x118e   : > { %v13195_v47 = vpop.eup %10677  ;;  %v4613_v56 = vpop.xlane.xlu0 %4612 }
0x118f   : > { %10687 = vpow2.f32 %v4780_v35  ;;  %v4694_v23 = vsub.f32 %v12963_v6, %v4613_v56  ;;  %v4695_v9 = vsub.f32 %v12965_v17, %v4613_v56  ;;  %v4887_v20 = vadd.f32 %v13195_v47, %v13193_v59 }
0x1190   : > { %10689 = vpow2.f32 %v4782_v51 }
0x1191   : > { %v13201_v18 = vpop.eup %10679  ;;  %v4784_v53 = vmul.f32 1.442695, %v4694_v23  ;;  %v4786_v7 = vmul.f32 1.442695, %v4695_v9  ;;  %4888 = vadd.xlane.f32.xlu0 %v4887_v20 }
0x1192   : > { %v13203_v26 = vpop.eup %10681  ;;  %v4616_v62 = vpop.xlane.xlu1 %4615 }
0x1193   : > { %10691 = vpow2.f32 %v4784_v53  ;;  %v4696_v49 = vsub.f32 %v12969_v48, %v4616_v62  ;;  %v4697_v43 = vsub.f32 %v12971_v14, %v4616_v62  ;;  %v4890_v6 = vadd.f32 %v13203_v26, %v13201_v18 }
0x1194   : > { %10693 = vpow2.f32 %v4786_v7 }
0x1195   : > { %v13209_v17 = vpop.eup %10683  ;;  %v4788_v45 = vmul.f32 1.442695, %v4696_v49  ;;  %v4790_v27 = vmul.f32 1.442695, %v4697_v43  ;;  %4891 = vadd.xlane.f32.xlu1 %v4890_v6  ;;  %v15770_v6 = vld [vmem:[#allocation62_spill] sm:$0xff] }
0x1196   : > { %v13211_v0 = vpop.eup %10685  ;;  %v4619_v63 = vpop.xlane.xlu0 %4618 }
0x1197   : > { %10695 = vpow2.f32 %v4788_v45  ;;  %v4698_v54 = vsub.f32 %v12975_v24, %v4619_v63  ;;  %v4699_v46 = vsub.f32 %v12977_v40, %v4619_v63  ;;  %v4893_v48 = vadd.f32 %v13211_v0, %v13209_v17 }
0x1198   : > { %10697 = vpow2.f32 %v4790_v27 }
0x1199   : > { %v13217_v14 = vpop.eup %10687  ;;  %v4792_v35 = vmul.f32 1.442695, %v4698_v54  ;;  %v4794_v51 = vmul.f32 1.442695, %v4699_v46  ;;  %4894 = vadd.xlane.f32.xlu0 %v4893_v48  ;;  %v15772_v48 = vld [vmem:[#allocation92_spill] sm:$0xff] }
0x119a   : > { %v13219_v56 = vpop.eup %10689  ;;  %v4622_v23 = vpop.xlane.xlu1 %4621 }
0x119b   : > { %10699 = vpow2.f32 %v4792_v35  ;;  %v4700_v9 = vsub.f32 %v12981_v34, %v4622_v23  ;;  %v4701_v20 = vsub.f32 %v12983_v2, %v4622_v23  ;;  %v4896_v24 = vadd.f32 %v13219_v56, %v13217_v14 }
0x119c   : > { %10701 = vpow2.f32 %v4794_v51  ;;  %v15773_v51 = vld [vmem:[#allocation63_spill] sm:$0xff] }
0x119d   : > { %v13225_v40 = vpop.eup %10691  ;;  %v4796_v53 = vmul.f32 1.442695, %v4700_v9  ;;  %v4798_v7 = vmul.f32 1.442695, %v4701_v20  ;;  %4897 = vadd.xlane.f32.xlu1 %v4896_v24 }
0x119e   : > { %v13227_v62 = vpop.eup %10693  ;;  %v4625_v49 = vpop.xlane.xlu0 %4624 }
0x119f   : > { %10703 = vpow2.f32 %v4796_v53  ;;  %v4702_v43 = vsub.f32 %v12987_v55, %v4625_v49  ;;  %v4703_v45 = vsub.f32 %v15770_v6, %v4625_v49  ;;  %v4899_v34 = vadd.f32 %v13227_v62, %v13225_v40  ;;  %v15775_v49 = vld [vmem:[#allocation64_spill] sm:$0xff]  ;;  %v15776_v6 = vld [vmem:[#allocation65_spill] sm:$0xff] }
0x11a0   : > { %10705 = vpow2.f32 %v4798_v7 }
0x11a1   : > { %v13233_v2 = vpop.eup %10695  ;;  %v4800_v27 = vmul.f32 1.442695, %v4702_v43  ;;  %v4802_v63 = vmul.f32 1.442695, %v4703_v45  ;;  %4900 = vadd.xlane.f32.xlu0 %v4899_v34 }
0x11a2   : > { %15771 = vst [vmem:[#allocation70_spill] sm:$0xff] %v13233_v2  ;;  %v13235_v54 = vpop.eup %10697  ;;  %v4628_v46 = vpop.xlane.xlu1 %4627 }
0x11a3   : > { %10707 = vpow2.f32 %v4800_v27  ;;  %v4704_v35 = vsub.f32 %v15772_v48, %v4628_v46  ;;  %v4705_v23 = vsub.f32 %v15773_v51, %v4628_v46  ;;  %v4902_v55 = vadd.f32 %v13235_v54, %v13233_v2  ;;  %v15779_v51 = vld [vmem:[#allocation95_spill] sm:$0xff] }
0x11a4   : > { %10709 = vpow2.f32 %v4802_v63 }
0x11a5   : > { %v13241_v9 = vpop.eup %10699  ;;  %v4804_v20 = vmul.f32 1.442695, %v4704_v35  ;;  %v4806_v24 = vmul.f32 1.442695, %v4705_v23  ;;  %4903 = vadd.xlane.f32.xlu1 %v4902_v55  ;;  %v15780_v55 = vld [vmem:[#allocation97_spill] sm:$0xff] }
0x11a6   : > { %15774 = vst [vmem:[#allocation71_spill] sm:$0xff] %v13241_v9  ;;  %v13243_v53 = vpop.eup %10701  ;;  %v4631_v7 = vpop.xlane.xlu0 %4630 }
0x11a7   : > { %10711 = vpow2.f32 %v4804_v20  ;;  %v4706_v43 = vsub.f32 %v15775_v49, %v4631_v7  ;;  %v4707_v45 = vsub.f32 %v15776_v6, %v4631_v7  ;;  %v4905_v34 = vadd.f32 %v13243_v53, %v13241_v9 }
0x11a8   : > { %10713 = vpow2.f32 %v4806_v24 }
0x11a9   : > { %v13249_v27 = vpop.eup %10703  ;;  %v4808_v63 = vmul.f32 1.442695, %v4706_v43  ;;  %v4810_v46 = vmul.f32 1.442695, %v4707_v45  ;;  %4906 = vadd.xlane.f32.xlu0 %v4905_v34  ;;  %v15783_v34 = vld [vmem:[#allocation96_spill] sm:$0xff] }
0x11aa   : > { %15777 = vst [vmem:[#allocation72_spill] sm:$0xff] %v13249_v27  ;;  %v13251_v48 = vpop.eup %10705  ;;  %v4634_v35 = vpop.xlane.xlu1 %4633 }
0x11ab   : > { %15778 = vst [vmem:[#allocation73_spill] sm:$0xff] %v13251_v48  ;;  %10715 = vpow2.f32 %v4808_v63  ;;  %v4708_v23 = vsub.f32 %v15779_v51, %v4634_v35  ;;  %v4709_v20 = vsub.f32 %v15780_v55, %v4634_v35  ;;  %v4908_v7 = vadd.f32 %v13251_v48, %v13249_v27  ;;  %v15784_v63 = vld [vmem:[#allocation66_spill] sm:$0xff] }
0x11ac   : > { %10717 = vpow2.f32 %v4810_v46 }
0x11ad   : > { %v13257_v49 = vpop.eup %10707  ;;  %v4812_v24 = vmul.f32 1.442695, %v4708_v23  ;;  %v4814_v6 = vmul.f32 1.442695, %v4709_v20  ;;  %4909 = vadd.xlane.f32.xlu1 %v4908_v7  ;;  %v15785_v7 = vld [vmem:[#allocation94_spill] sm:$0xff] }
0x11ae   : > { %15781 = vst [vmem:[#allocation99_spill] sm:$0xff] %v13257_v49  ;;  %v13259_v43 = vpop.eup %10709  ;;  %v4637_v45 = vpop.xlane.xlu0 %4636 }
0x11af   : > { %15782 = vst [vmem:[#allocation101_spill] sm:$0xff] %v13259_v43  ;;  %10719 = vpow2.f32 %v4812_v24  ;;  %v4710_v2 = vsub.f32 %v15783_v34, %v4637_v45  ;;  %v4711_v9 = vsub.f32 %v15784_v63, %v4637_v45  ;;  %v4911_v35 = vadd.f32 %v13259_v43, %v13257_v49  ;;  %v15786_v24 = vld [vmem:[#allocation67_spill] sm:$0xff] }
0x11b0   : > { %10721 = vpow2.f32 %v4814_v6 }
0x11b1   : > { %v13265_v51 = vpop.eup %10711  ;;  %v4816_v46 = vmul.f32 1.442695, %v4710_v2  ;;  %v4818_v55 = vmul.f32 1.442695, %v4711_v9  ;;  %4912 = vadd.xlane.f32.xlu0 %v4911_v35  ;;  %v15787_v35 = vld [vmem:[#allocation68_spill] sm:$0xff] }
0x11b2   : > { %v13267_v23 = vpop.eup %10713  ;;  %v4640_v20 = vpop.xlane.xlu1 %4639 }
0x11b3   : > { %10723 = vpow2.f32 %v4816_v46  ;;  %v4712_v27 = vsub.f32 %v15785_v7, %v4640_v20  ;;  %v4713_v48 = vsub.f32 %v15786_v24, %v4640_v20  ;;  %v4914_v45 = vadd.f32 %v13267_v23, %v13265_v51  ;;  %v15788_v46 = vld [vmem:[#allocation69_spill] sm:$0xff] }
0x11b4   : > { %10725 = vpow2.f32 %v4818_v55 }
0x11b5   : > { %v13273_v34 = vpop.eup %10715  ;;  %v4820_v6 = vmul.f32 1.442695, %v4712_v27  ;;  %v4822_v63 = vmul.f32 1.442695, %v4713_v48  ;;  %4915 = vadd.xlane.f32.xlu1 %v4914_v45 }
0x11b6   : > { %v13275_v2 = vpop.eup %10717  ;;  %v4643_v9 = vpop.xlane.xlu0 %4642 }
0x11b7   : > { %10727 = vpow2.f32 %v4820_v6  ;;  %v4714_v49 = vsub.f32 %v15787_v35, %v4643_v9  ;;  %v4715_v43 = vsub.f32 %v15788_v46, %v4643_v9  ;;  %v4917_v20 = vadd.f32 %v13275_v2, %v13273_v34 }
0x11b8   : > { %10729 = vpow2.f32 %v4822_v63 }
0x11b9   : > { %v13281_v7 = vpop.eup %10719  ;;  %v4824_v55 = vmul.f32 1.442695, %v4714_v49  ;;  %v4826_v24 = vmul.f32 1.442695, %v4715_v43  ;;  %4918 = vadd.xlane.f32.xlu0 %v4917_v20 }
0x11ba   : > { %15789 = vst [vmem:[#allocation100_spill] sm:$0xff] %v13281_v7  ;;  %v13283_v27 = vpop.eup %10721 }
0x11bb   : > { %15790 = vst [vmem:[#allocation74_spill] sm:$0xff] %v13283_v27  ;;  %10731 = vpow2.f32 %v4824_v55  ;;  %v4920_v48 = vadd.f32 %v13283_v27, %v13281_v7 }
0x11bc   : > { %10733 = vpow2.f32 %v4826_v24 }
0x11bd   : > { %v13287_v45 = vpop.eup %10723  ;;  %4921 = vadd.xlane.f32.xlu1 %v4920_v48 }
0x11be   : > { %15791 = vst [vmem:[#allocation98_spill] sm:$0xff] %v13287_v45  ;;  %v13289_v6 = vpop.eup %10725 }
0x11bf   : > { %15792 = vst [vmem:[#allocation75_spill] sm:$0xff] %v13289_v6  ;;  %v4923_v63 = vadd.f32 %v13289_v6, %v13287_v45 }
0x11c1   : > { %v13293_v9 = vpop.eup %10727  ;;  %4924 = vadd.xlane.f32.xlu0 %v4923_v63 }
0x11c2   : > { %15793 = vst [vmem:[#allocation76_spill] sm:$0xff] %v13293_v9  ;;  %v13295_v49 = vpop.eup %10729 }
0x11c3   : > { %15794 = vst [vmem:[#allocation77_spill] sm:$0xff] %v13295_v49  ;;  %v4926_v43 = vadd.f32 %v13295_v49, %v13293_v9 }
0x11c5   : > { %v13299_v35 = vpop.eup %10731  ;;  %4927 = vadd.xlane.f32.xlu1 %v4926_v43 }
0x11c6   : > { %15795 = vst [vmem:[#allocation103_spill] sm:$0xff] %v13299_v35  ;;  %v13301_v46 = vpop.eup %10733 }
0x11c7   : > { %15796 = vst [vmem:[#allocation105_spill] sm:$0xff] %v13301_v46  ;;  %v4929_v20 = vadd.f32 %v13301_v46, %v13299_v35 }
0x11c9   : > { %4930 = vadd.xlane.f32.xlu0 %v4929_v20 }
0x11fa   : > { %v4862_v55 = vpop.xlane.xlu1 %4861 }
0x11fb   : > { %10735 = vrcp.f32 %v4862_v55 }
0x11fe   : > { %v4865_v24 = vpop.xlane.xlu0 %4864  ;;  %v4646_v48 = vpop.xlane.xlu1 %4645 }
0x11ff   : > { %10737 = vrcp.f32 %v4865_v24  ;;  %v4716_v63 = vsub.f32 %v13065_v30, %v4646_v48  ;;  %v4717_v7 = vsub.f32 %v13067_v4, %v4646_v48 }
0x1201   : > { %v4828_v45 = vmul.f32 1.442695, %v4716_v63  ;;  %v4830_v9 = vmul.f32 1.442695, %v4717_v7 }
0x1202   : > { %v4868_v49 = vpop.xlane.xlu1 %4867  ;;  %v4649_v6 = vpop.xlane.xlu0 %4648 }
0x1203   : > { %10739 = vpow2.f32 %v4828_v45  ;;  %v4718_v43 = vsub.f32 %v13079_v42, %v4649_v6  ;;  %v4719_v27 = vsub.f32 %v13081_v36, %v4649_v6 }
0x1204   : > { %10741 = vpow2.f32 %v4830_v9 }
0x1205   : > { %10743 = vrcp.f32 %v4868_v49  ;;  %v4832_v20 = vmul.f32 1.442695, %v4718_v43  ;;  %v4834_v55 = vmul.f32 1.442695, %v4719_v27  ;;  %v10736_v24 = vpop.eup %10735 }
0x1206   : > { %v4871_v35 = vpop.xlane.xlu0 %4870  ;;  %v4652_v46 = vpop.xlane.xlu1 %4651  ;;  %v5021_v36 = vmul.f32 %v10736_v24, %v13063_v61  ;;  %v5020_v27 = vmul.f32 %v10736_v24, %v13061_v33 }
0x1207   : > { %10745 = vpow2.f32 %v4832_v20  ;;  %v4720_v30 = vsub.f32 %v13094_v41, %v4652_v46  ;;  %v4721_v4 = vsub.f32 %v13097_v19, %v4652_v46 }
0x1208   : > { %10747 = vpow2.f32 %v4834_v55 }
0x1209   : > { %v10738_v7 = vpop.eup %10737  ;;  %10749 = vrcp.f32 %v4871_v35  ;;  %v4836_v45 = vmul.f32 1.442695, %v4720_v30  ;;  %v4838_v48 = vmul.f32 1.442695, %v4721_v4 }
0x120a   : > { %v4874_v42 = vpop.xlane.xlu1 %4873  ;;  %v4655_v63 = vpop.xlane.xlu0 %4654  ;;  %v5023_v6 = vmul.f32 %v10738_v7, %v13075_v39  ;;  %v5022_v9 = vmul.f32 %v10738_v7, %v13073_v13 }
0x120b   : > { %10751 = vpow2.f32 %v4836_v45  ;;  %v4722_v41 = vsub.f32 %v13110_v10, %v4655_v63  ;;  %v4723_v19 = vsub.f32 %v13113_v15, %v4655_v63 }
0x120c   : > { %10753 = vpow2.f32 %v4838_v48  ;;  %v10066_v49 = vpack.c.bf16 %v5023_v6, %v5021_v36  ;;  %v10068_v35 = vpack.c.bf16 %v5022_v9, %v5020_v27 }
0x120d   : > { %v13317_v46 = vpop.eup %10739  ;;  %10755 = vrcp.f32 %v4874_v42  ;;  %v4840_v43 = vmul.f32 1.442695, %v4722_v41  ;;  %v4842_v20 = vmul.f32 1.442695, %v4723_v19 }
0x120e   : > { %v13319_v61 = vpop.eup %10741  ;;  %10067 = vmatprep.subr.bf16.mxu0 %v10066_v49  ;;  %v4877_v39 = vpop.xlane.xlu0 %4876 }
0x120f   : > { %v4658_v33 = vpop.xlane.xlu1 %4657  ;;  %v10744_v55 = vpop.eup %10743  ;;  %10757 = vpow2.f32 %v4840_v43  ;;  %10069 = vmatpush1.bf16.xpose.msra.mxu0 %v10068_v35  ;;  %v4932_v15 = vadd.f32 %v13319_v61, %v13317_v46 }
0x1210   : > { %v4724_v13 = vsub.f32 %v13126_v52, %v4658_v33  ;;  %v4725_v10 = vsub.f32 %v13129_v57, %v4658_v33  ;;  %10759 = vpow2.f32 %v4842_v20  ;;  %v5025_v42 = vmul.f32 %v10744_v55, %v13089_v3 }
0x1211   : > { %v13325_v24 = vpop.eup %10745  ;;  %10761 = vrcp.f32 %v4877_v39  ;;  %4933 = vadd.xlane.f32.xlu1 %v4932_v15  ;;  %v5024_v27 = vmul.f32 %v10744_v55, %v13087_v32 }
0x1212   : > { %v4844_v30 = vmul.f32 1.442695, %v4724_v13  ;;  %v4846_v4 = vmul.f32 1.442695, %v4725_v10  ;;  %v13327_v7 = vpop.eup %10747  ;;  %v4661_v48 = vpop.xlane.xlu0 %4660 }
0x1213   : > { %v4880_v45 = vpop.xlane.xlu1 %4879  ;;  %v10750_v52 = vpop.eup %10749  ;;  %v4726_v57 = vsub.f32 %v13142_v29, %v4661_v48  ;;  %v4727_v63 = vsub.f32 %v13145_v31, %v4661_v48  ;;  %v4935_v36 = vadd.f32 %v13327_v7, %v13325_v24 }
0x1214   : > { %10763 = vpow2.f32 %v4844_v30  ;;  %v5027_v6 = vmul.f32 %v10750_v52, %v13105_v11  ;;  %v5026_v9 = vmul.f32 %v10750_v52, %v13103_v21 }
0x1215   : > { %10765 = vpow2.f32 %v4846_v4  ;;  %v13337_v41 = vpop.eup %10751  ;;  %v4848_v19 = vmul.f32 1.442695, %v4726_v57  ;;  %v4850_v3 = vmul.f32 1.442695, %v4727_v63  ;;  %4936 = vadd.xlane.f32.xlu0 %v4935_v36 }
0x1216   : > { %v13339_v49 = vpop.eup %10753  ;;  %10767 = vrcp.f32 %v4880_v45  ;;  %v10070_v29 = vpack.c.bf16 %v5027_v6, %v5025_v42  ;;  %v4883_v31 = vpop.xlane.xlu0 %4882  ;;  %v10072_v43 = vpack.c.bf16 %v5026_v9, %v5024_v27 }
0x1217   : > { %v4664_v35 = vpop.xlane.xlu1 %4663  ;;  %v10756_v20 = vpop.eup %10755  ;;  %10769 = vpow2.f32 %v4848_v19  ;;  %v4938_v21 = vadd.f32 %v13339_v49, %v13337_v41 }
0x1218   : > { %v4728_v11 = vsub.f32 %v13158_v8, %v4664_v35  ;;  %v4729_v32 = vsub.f32 %v13161_v1, %v4664_v35  ;;  %10771 = vpow2.f32 %v4850_v3  ;;  %10071 = vmatprep.subr.bf16.mxu0 %v10070_v29  ;;  %v5029_v15 = vmul.f32 %v10756_v20, %v13121_v12 }
0x1219   : > { %v13345_v39 = vpop.eup %10757  ;;  %10773 = vrcp.f32 %v4883_v31  ;;  %10073 = vmatpush1.bf16.xpose.msra.mxu0 %v10072_v43  ;;  %4939 = vadd.xlane.f32.xlu1 %v4938_v21  ;;  %v5028_v42 = vmul.f32 %v10756_v20, %v13119_v44 }
0x121a   : > { %v4852_v33 = vmul.f32 1.442695, %v4728_v11  ;;  %v4854_v55 = vmul.f32 1.442695, %v4729_v32  ;;  %v13347_v13 = vpop.eup %10759  ;;  %v4667_v10 = vpop.xlane.xlu0 %4666 }
0x121b   : > { %v10762_v8 = vpop.eup %10761  ;;  %v4886_v1 = vpop.xlane.xlu1 %4885  ;;  %v4730_v30 = vsub.f32 %v13174_v22, %v4667_v10  ;;  %v4731_v4 = vsub.f32 %v13177_v58, %v4667_v10  ;;  %v4941_v45 = vadd.f32 %v13347_v13, %v13345_v39 }
0x121c   : > { %10775 = vpow2.f32 %v4852_v33  ;;  %v5031_v48 = vmul.f32 %v10762_v8, %v13137_v37  ;;  %v5030_v52 = vmul.f32 %v10762_v8, %v13135_v38 }
0x121d   : > { %10777 = vpow2.f32 %v4854_v55  ;;  %v4856_v12 = vmul.f32 1.442695, %v4730_v30  ;;  %v4858_v63 = vmul.f32 1.442695, %v4731_v4  ;;  %4942 = vadd.xlane.f32.xlu0 %v4941_v45 }
0x121e   : > { %v13357_v57 = vpop.eup %10763  ;;  %10779 = vrcp.f32 %v4886_v1  ;;  %v10074_v22 = vpack.c.bf16 %v5031_v48, %v5029_v15  ;;  %v4889_v58 = vpop.xlane.xlu0 %4888  ;;  %v10076_v6 = vpack.c.bf16 %v5030_v52, %v5028_v42 }
0x121f   : > { %v13359_v36 = vpop.eup %10765  ;;  %10781 = vpow2.f32 %v4856_v12 }
0x1220   : > { %v4944_v27 = vadd.f32 %v13359_v36, %v13357_v57  ;;  %v10768_v37 = vpop.eup %10767  ;;  %10783 = vpow2.f32 %v4858_v63  ;;  %10075 = vmatprep.subr.bf16.mxu0 %v10074_v22 }
0x1221   : > { %v13363_v44 = vpop.eup %10769  ;;  %10785 = vrcp.f32 %v4889_v58  ;;  %10077 = vmatpush1.bf16.xpose.msra.mxu0 %v10076_v6  ;;  %v5033_v29 = vmul.f32 %v10768_v37, %v13153_v28  ;;  %v5032_v35 = vmul.f32 %v10768_v37, %v13151_v50 }
0x1222   : > { %4945 = vadd.xlane.f32.xlu1 %v4944_v27  ;;  %v13365_v38 = vpop.eup %10771  ;;  %v4892_v9 = vpop.xlane.xlu1 %4891 }
0x1223   : > { %v10774_v19 = vpop.eup %10773  ;;  %v4947_v3 = vadd.f32 %v13365_v38, %v13363_v44  ;;  %10787 = vrcp.f32 %v4892_v9 }
0x1224   : > { %v5035_v31 = vmul.f32 %v10774_v19, %v13169_v5  ;;  %v5034_v43 = vmul.f32 %v10774_v19, %v13167_v60 }
0x1225   : > { %4948 = vadd.xlane.f32.xlu0 %v4947_v3 }
0x1226   : > { %v13373_v20 = vpop.eup %10775  ;;  %v10078_v32 = vpack.c.bf16 %v5035_v31, %v5033_v29  ;;  %v4895_v21 = vpop.xlane.xlu0 %4894  ;;  %v10080_v33 = vpack.c.bf16 %v5034_v43, %v5032_v35  ;;  %v2646_v35 = vld [vmem:[%s15797_s11] sm:$0xff]  ;;  %s15819_s11 = sld [smem:[#allocation15_spill]] }
0x1227   : > { %v13375_v11 = vpop.eup %10777  ;;  %10789 = vrcp.f32 %v4895_v21 }
0x1228   : > { %v4950_v55 = vadd.f32 %v13375_v11, %v13373_v20  ;;  %v10780_v28 = vpop.eup %10779  ;;  %10079 = vmatprep.subr.bf16.mxu0 %v10078_v32 }
0x1229   : > { %v13379_v5 = vpop.eup %10781  ;;  %10081 = vmatpush1.bf16.xpose.msra.mxu0 %v10080_v33  ;;  %v5037_v8 = vmul.f32 %v10780_v28, %v13185_v25  ;;  %v5036_v30 = vmul.f32 %v10780_v28, %v13183_v16 }
0x122a   : > { %4951 = vadd.xlane.f32.xlu1 %v4950_v55  ;;  %v13381_v50 = vpop.eup %10783  ;;  %v4898_v60 = vpop.xlane.xlu1 %4897 }
0x122b   : > { %v10786_v10 = vpop.eup %10785  ;;  %v4953_v15 = vadd.f32 %v13381_v50, %v13379_v5  ;;  %10791 = vrcp.f32 %v4898_v60 }
0x122c   : > { %v5039_v1 = vmul.f32 %v10786_v10, %v13195_v47  ;;  %v5038_v4 = vmul.f32 %v10786_v10, %v13193_v59 }
0x122d   : > { %4954 = vadd.xlane.f32.xlu0 %v4953_v15  ;;  %v10788_v52 = vpop.eup %10787 }
0x122e   : > { %v10082_v45 = vpack.c.bf16 %v5039_v1, %v5037_v8  ;;  %v4901_v48 = vpop.xlane.xlu0 %4900  ;;  %v10084_v42 = vpack.c.bf16 %v5038_v4, %v5036_v30  ;;  %v5041_v22 = vmul.f32 %v10788_v52, %v13203_v26  ;;  %v5040_v16 = vmul.f32 %v10788_v52, %v13201_v18  ;;  %v15800_v1 = vld [vmem:[#allocation73_spill] sm:$0xff] }
0x122f   : > { %10793 = vrcp.f32 %v4901_v48  ;;  %v15804_v48 = vld [vmem:[#allocation72_spill] sm:$0xff] }
0x1230   : > { %10083 = vmatprep.subr.bf16.mxu0 %v10082_v45 }
0x1231   : > { %v10790_v12 = vpop.eup %10789  ;;  %10085 = vmatpush1.bf16.xpose.msra.mxu0 %v10084_v42 }
0x1232   : > { %v4904_v63 = vpop.xlane.xlu1 %4903  ;;  %v5043_v25 = vmul.f32 %v10790_v12, %v13211_v0  ;;  %v5042_v47 = vmul.f32 %v10790_v12, %v13209_v17 }
0x1233   : > { %10795 = vrcp.f32 %v4904_v63 }
0x1234   : > { %v10086_v59 = vpack.c.bf16 %v5043_v25, %v5041_v22  ;;  %v10088_v58 = vpack.c.bf16 %v5042_v47, %v5040_v16 }
0x1235   : > { %v10792_v27 = vpop.eup %10791 }
0x1236   : > { %10087 = vmatprep.subr.bf16.mxu0 %v10086_v59  ;;  %v4907_v6 = vpop.xlane.xlu0 %4906  ;;  %v5045_v19 = vmul.f32 %v10792_v27, %v13219_v56  ;;  %v5044_v17 = vmul.f32 %v10792_v27, %v13217_v14 }
0x1237   : > { %10797 = vrcp.f32 %v4907_v6  ;;  %v13410_v6 = vld [vmem:[%s15803_s18] sm:$0xff]  ;;  %s15820_s18 = sld [smem:[#allocation16_spill]] }
0x1239   : > { %v10794_v37 = vpop.eup %10793  ;;  %10089 = vmatpush1.bf16.xpose.msra.mxu0 %v10088_v58 }
0x123a   : > { %v4910_v9 = vpop.xlane.xlu1 %4909  ;;  %v5047_v26 = vmul.f32 %v10794_v37, %v13227_v62  ;;  %v5046_v0 = vmul.f32 %v10794_v37, %v13225_v40  ;;  %v15798_v62 = vld [vmem:[#allocation71_spill] sm:$0xff]  ;;  %v15799_v40 = vld [vmem:[#allocation70_spill] sm:$0xff] }
0x123b   : > { %10799 = vrcp.f32 %v4910_v9  ;;  %5162 = vrot.lane.b32.xlu1 %v13410_v6, %s15444_s0  ;;  %s15841_s0 = sld [smem:[#allocation19_spill]] }
0x123c   : > { %v10090_v18 = vpack.c.bf16 %v5047_v26, %v5045_v19  ;;  %v10092_v3 = vpack.c.bf16 %v5046_v0, %v5044_v17  ;;  %v15806_v17 = vld [vmem:[#allocation75_spill] sm:$0xff] }
0x123d   : > { %v10796_v31 = vpop.eup %10795 }
0x123e   : > { %10091 = vmatprep.subr.bf16.mxu0 %v10090_v18  ;;  %v4913_v29 = vpop.xlane.xlu0 %4912  ;;  %v5049_v21 = vmul.f32 %v10796_v31, %v13235_v54  ;;  %v5048_v14 = vmul.f32 %v10796_v31, %v15799_v40  ;;  %v15801_v54 = vld [vmem:[#allocation101_spill] sm:$0xff]  ;;  %v15807_v18 = vld [vmem:[#allocation98_spill] sm:$0xff]  ;;  %v15811_v40 = vld [vmem:[#allocation103_spill] sm:$0xff] }
0x123f   : > { %10801 = vrcp.f32 %v4913_v29  ;;  %v15808_v29 = vld [vmem:[#allocation100_spill] sm:$0xff] }
0x1241   : > { %v10798_v43 = vpop.eup %10797  ;;  %10093 = vmatpush1.bf16.xpose.msra.mxu0 %v10092_v3 }
0x1242   : > { %v4916_v32 = vpop.xlane.xlu1 %4915  ;;  %v5051_v56 = vmul.f32 %v10798_v43, %v13243_v53  ;;  %v5050_v33 = vmul.f32 %v10798_v43, %v15798_v62  ;;  %v15802_v53 = vld [vmem:[#allocation99_spill] sm:$0xff]  ;;  %v15810_v62 = vld [vmem:[#allocation105_spill] sm:$0xff] }
0x1243   : > { %5324 = vperm.xlu0 %10416, %v2646_v35   ;;  %10803 = vrcp.f32 %v4916_v32 }
0x1244   : > { %v10094_v55 = vpack.c.bf16 %v5051_v56, %v5049_v21  ;;  %v10096_v28 = vpack.c.bf16 %v5050_v33, %v5048_v14  ;;  %v15809_v21 = vld [vmem:[#allocation77_spill] sm:$0xff] }
0x1245   : > { %v10800_v10 = vpop.eup %10799 }
0x1246   : > { %10095 = vmatprep.subr.bf16.mxu0 %v10094_v55  ;;  %v4919_v60 = vpop.xlane.xlu0 %4918  ;;  %v5053_v30 = vmul.f32 %v10800_v10, %v15800_v1  ;;  %v5052_v42 = vmul.f32 %v10800_v10, %v15804_v48  ;;  %v15812_v55 = vld [vmem:[#allocation76_spill] sm:$0xff] }
0x1247   : > { %10805 = vrcp.f32 %v4919_v60 }
0x1249   : > { %v10802_v15 = vpop.eup %10801  ;;  %10097 = vmatpush1.bf16.xpose.msra.mxu0 %v10096_v28 }
0x124a   : > { %v4922_v8 = vpop.xlane.xlu1 %4921  ;;  %v5055_v4 = vmul.f32 %v10802_v15, %v15801_v54  ;;  %v5054_v45 = vmul.f32 %v10802_v15, %v15802_v53 }
0x124b   : > { %10807 = vrcp.f32 %v4922_v8 }
0x124c   : > { %v10098_v52 = vpack.c.bf16 %v5055_v4, %v5053_v30  ;;  %v10100_v12 = vpack.c.bf16 %v5054_v45, %v5052_v42 }
0x124d   : > { %v10804_v22 = vpop.eup %10803 }
0x124e   : > { %10099 = vmatprep.subr.bf16.mxu0 %v10098_v52  ;;  %v4925_v63 = vpop.xlane.xlu0 %4924  ;;  %v5057_v16 = vmul.f32 %v10804_v22, %v13267_v23  ;;  %v5056_v27 = vmul.f32 %v10804_v22, %v13265_v51  ;;  %v15805_v23 = vld [vmem:[#allocation74_spill] sm:$0xff] }
0x124f   : > { %10809 = vrcp.f32 %v4925_v63 }
0x1251   : > { %v10806_v25 = vpop.eup %10805  ;;  %10101 = vmatpush1.bf16.xpose.msra.mxu0 %v10100_v12 }
0x1252   : > { %v4928_v47 = vpop.xlane.xlu1 %4927  ;;  %v5059_v59 = vmul.f32 %v10806_v25, %v13275_v2  ;;  %v5058_v58 = vmul.f32 %v10806_v25, %v13273_v34 }
0x1253   : > { %10811 = vrcp.f32 %v4928_v47 }
0x1254   : > { %v10102_v37 = vpack.c.bf16 %v5059_v59, %v5057_v16  ;;  %v10104_v9 = vpack.c.bf16 %v5058_v58, %v5056_v27 }
0x1255   : > { %v10808_v26 = vpop.eup %10807 }
0x1256   : > { %10103 = vmatprep.subr.bf16.mxu0 %v10102_v37  ;;  %v4931_v19 = vpop.xlane.xlu0 %4930  ;;  %v5061_v2 = vmul.f32 %v10808_v26, %v15805_v23  ;;  %v5060_v51 = vmul.f32 %v10808_v26, %v15808_v29 }
0x1257   : > { %10813 = vrcp.f32 %v4931_v19 }
0x1259   : > { %v10810_v0 = vpop.eup %10809  ;;  %10105 = vmatpush1.bf16.xpose.msra.mxu0 %v10104_v9 }
0x125a   : > { %v5063_v34 = vmul.f32 %v10810_v0, %v15806_v17  ;;  %v5062_v3 = vmul.f32 %v10810_v0, %v15807_v18 }
0x125c   : > { %v10106_v31 = vpack.c.bf16 %v5063_v34, %v5061_v2  ;;  %v10108_v35 = vpack.c.bf16 %v5062_v3, %v5060_v51 }
0x125d   : > { %v10812_v43 = vpop.eup %10811 }
0x125e   : > { %10107 = vmatprep.subr.bf16.mxu0 %v10106_v31  ;;  %v5065_v56 = vmul.f32 %v10812_v43, %v15809_v21  ;;  %v5064_v28 = vmul.f32 %v10812_v43, %v15812_v55  ;;  %v15817_v21 = vld [vmem:[#allocation54_spill] sm:$0xff] }
0x125f   : > { %v13457_v55 = vld [vmem:[%s11403_s17] sm:$0xff] }
0x1261   : > { %v10814_v32 = vpop.eup %10813  ;;  %10109 = vmatpush1.bf16.xpose.msra.mxu0 %v10108_v35 }
0x1262   : > { %v5067_v33 = vmul.f32 %v10814_v32, %v15810_v62  ;;  %v5066_v14 = vmul.f32 %v10814_v32, %v15811_v40  ;;  %v15818_v62 = vld [vmem:[#allocation55_spill] sm:$0xff] }
0x1264   : > { %v10110_v60 = vpack.c.bf16 %v5067_v33, %v5065_v56  ;;  %v10112_v10 = vpack.c.bf16 %v5066_v14, %v5064_v28 }
0x1266   : > { %10111 = vmatprep.subr.bf16.mxu0 %v10110_v60 }
0x1269   : > { %10113 = vmatpush1.bf16.xpose.msra.mxu0 %v10112_v10 }
0x129e   : > { %v4934_v15 = vpop.xlane.xlu1 %4933 }
0x129f   : > { %10815 = vrcp.f32 %v4934_v15 }
0x12a2   : > { %v4937_v8 = vpop.xlane.xlu0 %4936 }
0x12a3   : > { %10817 = vrcp.f32 %v4937_v8 }
0x12a6   : > { %v4940_v1 = vpop.xlane.xlu1 %4939 }
0x12a7   : > { %10819 = vrcp.f32 %v4940_v1 }
0x12a9   : > { %v10816_v54 = vpop.eup %10815 }
0x12aa   : > { %v4943_v30 = vpop.xlane.xlu0 %4942  ;;  %v5069_v45 = vmul.f32 %v10816_v54, %v13319_v61  ;;  %v5068_v42 = vmul.f32 %v10816_v54, %v13317_v46 }
0x12ab   : > { %10821 = vrcp.f32 %v4943_v30 }
0x12ad   : > { %v10818_v4 = vpop.eup %10817 }
0x12ae   : > { %v5071_v48 = vmul.f32 %v10818_v4, %v13327_v7  ;;  %v5070_v52 = vmul.f32 %v10818_v4, %v13325_v24  ;;  %v2647_v4 = vld [vmem:[%s15819_s11] sm:$0xff]  ;;  %s15821_s11 = sld [smem:[#allocation18_spill]] }
0x12af   : > { %v4946_v53 = vpop.xlane.xlu1 %4945 }
0x12b0   : > { %v10114_v12 = vpack.c.bf16 %v5071_v48, %v5069_v45  ;;  %v10116_v63 = vpack.c.bf16 %v5070_v52, %v5068_v42  ;;  %10823 = vrcp.f32 %v4946_v53 }
0x12b1   : > { %v10820_v25 = vpop.eup %10819 }
0x12b2   : > { %10115 = vmatprep.subr.bf16.mxu0 %v10114_v12  ;;  %v4949_v22 = vpop.xlane.xlu0 %4948  ;;  %v5073_v59 = vmul.f32 %v10820_v25, %v13339_v49  ;;  %v5072_v7 = vmul.f32 %v10820_v25, %v13337_v41 }
0x12b3   : > { %10825 = vrcp.f32 %v4949_v22  ;;  %10117 = vmatpush1.bf16.xpose.msra.mxu0 %v10116_v63  ;;  %v2648_v63 = vld [vmem:[%s15820_s18] sm:$0xff]  ;;  %s15822_s18 = smov 111  }
0x12b5   : > { %v10822_v47 = vpop.eup %10821 }
0x12b6   : > { %v5075_v61 = vmul.f32 %v10822_v47, %v13347_v13  ;;  %v5074_v46 = vmul.f32 %v10822_v47, %v13345_v39 }
0x12b7   : > { %v4952_v16 = vpop.xlane.xlu1 %4951 }
0x12b8   : > { %v10118_v58 = vpack.c.bf16 %v5075_v61, %v5073_v59  ;;  %v10120_v24 = vpack.c.bf16 %v5074_v46, %v5072_v7  ;;  %10827 = vrcp.f32 %v4952_v16 }
0x12ba   : > { %10119 = vmatprep.subr.bf16.mxu0 %v10118_v58  ;;  %v4955_v27 = vpop.xlane.xlu0 %4954  ;;  %v10824_v37 = vpop.eup %10823 }
0x12bb   : > { %10829 = vrcp.f32 %v4955_v27  ;;  %10121 = vmatpush1.bf16.xpose.msra.mxu0 %v10120_v24  ;;  %v5077_v19 = vmul.f32 %v10824_v37, %v13359_v36  ;;  %v5076_v49 = vmul.f32 %v10824_v37, %v13357_v57  ;;  %v15813_v57 = vmov 0.0   ;;  %v5163_v51 = vpop.permute.xlu1 %5162  ;;  %v5614_v24 = vld [vmem:[%s15821_s11] sm:$0xff]  ;;  %s15839_s11 = sld [smem:[#allocation17_spill]] }
0x12bd   : > { %v10826_v9 = vpop.eup %10825 }
0x12be   : > { %v5079_v26 = vmul.f32 %v10826_v9, %v13365_v38  ;;  %v5078_v13 = vmul.f32 %v10826_v9, %v13363_v44  ;;  %v15814_v44 = vld [vmem:[#allocation60_spill] sm:$0xff] }
0x12bf   : > { %v5086_v3 = vrot.slane %v15814_v44, 4  ;;  %v15827_v44 = vld [vmem:[#allocation37_spill] sm:$0xff] }
0x12c0   : > { %v10122_v41 = vpack.c.bf16 %v5079_v26, %v5077_v19  ;;  %v10124_v0 = vpack.c.bf16 %v5078_v13, %v5076_v49 }
0x12c2   : > { %10123 = vmatprep.subr.bf16.mxu0 %v10122_v41  ;;  %v10828_v39 = vpop.eup %10827 }
0x12c3   : > { %10125 = vmatpush1.bf16.xpose.msra.mxu0 %v10124_v0  ;;  %v5081_v2 = vmul.f32 %v10828_v39, %v13375_v11  ;;  %v5080_v34 = vmul.f32 %v10828_v39, %v13373_v20  ;;  %v15815_v20 = vld [vmem:[#allocation93_spill] sm:$0xff] }
0x12c5   : > { %v10830_v23 = vpop.eup %10829 }
0x12c6   : > { %v5083_v17 = vmul.f32 %v10830_v23, %v13381_v50  ;;  %v5082_v36 = vmul.f32 %v10830_v23, %v13379_v5  ;;  %v15816_v5 = vld [vmem:[#allocation61_spill] sm:$0xff]  ;;  %v5325_v50 = vpop.permute.xlu0 %5324 }
0x12c8   : > { %v10126_v18 = vpack.c.bf16 %v5083_v17, %v5081_v2  ;;  %v10128_v38 = vpack.c.bf16 %v5082_v36, %v5080_v34  ;;  %v15824_v2 = vld [vmem:[#allocation42_spill] sm:$0xff]  ;;  %v15825_v34 = vld [vmem:[#allocation43_spill] sm:$0xff] }
0x12ca   : > { %10127 = vmatprep.subr.bf16.mxu0 %v10126_v18  ;;  %v15826_v18 = vld [vmem:[#allocation36_spill] sm:$0xff] }
0x12cb   : > { %10129 = vmatpush1.bf16.xpose.msra.mxu0 %v10128_v38 }
0x12cc   : > { %9920 = vmatprep.subr.mxu0 %v15813_v57 }
0x12d2   : > { %5155 = vmatmul.mubr.f32.vlgmr.msra.gmra.mrb[144].mxu0 %v5086_v3 }
0x12d3   : > { %9922 = vmatprep.mubr.msk.f32.mxu0 %vm11377_vm9, %v15813_v57 }
0x13a5   : > { %v5156_v29 = vpop.f32.mrb[144].mxu0 }
0x13a6   : > { %v5158_v11 = vpop.f32.mrb[145].mxu0 }
0x13a7   : > { %9725 = vmatprep.subr.msk.mxu1 %vm2561_vm12, %v5158_v11 }
0x13a8   : > { %9726 = vmatpush1.msk.msra.mxu1 %vm2561_vm12, %v5156_v29 }
0x13a9   : > { %9727 = vmatmul.mubr.msk.f32.vlgmr.msra.gmra.mrb[72].mxu1 %vm2557_vm13, %v5163_v51  ;;  %9728 = vmatprep.subr.msk.mxu1 %vm2561_vm12, %v15815_v20 }
0x13aa   : > { %9729 = vmatpush1.msk.msra.mxu1 %vm2561_vm12, %v15816_v5  ;;  %5315 = vmatprep.mubr.f32.mxu1 %v15813_v57 }
0x13b1   : > { %9730 = vmatmul.mubr.msk.f32.vlgmr.msra.gmra.mrb[72].mxu1 %vm2557_vm13, %v13410_v6 }
0x13b2   : > { %5687 = vmatprep.mubr.f32.mxu1 %v15813_v57 }
0x1484   : > { %v5317_v31 = vpop.f32.mrb[72].mxu1 }
0x1485   : > { %v5327_v35 = vadd.f32 %v5325_v50, %v5317_v31  ;;  %v5319_v43 = vpop.f32.mrb[73].mxu1 }
0x1486   : > { %v5328_v32 = vadd.f32 %v5325_v50, %v5319_v43 }
0x1487   : > { %v5329_v56 = vadd.f32 %v5327_v35, %v15817_v21 }
0x1488   : > { %v5330_v33 = vadd.f32 %v5328_v32, %v15818_v62  ;;  %v15828_v32 = vld [vmem:[#allocation40_spill] sm:$0xff] }
0x148a   : > { %v5331_v40 = vadd.f32 %v5330_v33, %v5329_v56 }
0x148c   : > { %5332 = vadd.xlane.f32.xlu1 %v5331_v40 }
0x1519   : > { %v5333_v14 = vpop.xlane.xlu1 %5332 }
0x151a   : > { %9921 = vmatpush3.msra.mxu0 %v5333_v14  ;;  %v15831_v14 = vld [vmem:[#allocation45_spill] sm:$0xff] }
0x151b   : > { %9923 = vmatmul.mubr.msk.f32.vlgmr.msra.gmra.mrb[146].mxu0 %vm1893_vm10, %v13457_v55  ;;  %9925 = vmatprep.subr.mxu0 %v15813_v57 }
0x151c   : > { %9927 = vmatprep.mubr.msk.f32.mxu0 %vm11377_vm9, %v15813_v57 }
0x15ee   : > { %v5400_v6 = vpop.f32.mrb[146].mxu0 }
0x15ef   : > { %v5404_v28 = vmul.f32 0.001953125, %v5400_v6  ;;  %v9924_v60 = vpop.f32.mrb[147].mxu0 }
0x15f1   : > { %5407 = vperm.xlu0 %10416, %v5404_v28  }
0x1670   : > { %v5408_v10 = vpop.permute.xlu0 %5407 }
0x1671   : > { %v5410_v15 = vsub.f32 %v5329_v56, %v5408_v10  ;;  %v5411_v8 = vsub.f32 %v5330_v33, %v5408_v10  ;;  %v15829_v56 = vld [vmem:[#allocation41_spill] sm:$0xff]  ;;  %v15830_v33 = vld [vmem:[#allocation44_spill] sm:$0xff] }
0x1673   : > { %v5412_v1 = vmul.f32 %v5410_v15, %v5410_v15  ;;  %v5413_v30 = vmul.f32 %v5411_v8, %v5411_v8 }
0x1675   : > { %v5414_v54 = vadd.f32 %v5413_v30, %v5412_v1  ;;  %v15832_v30 = vld [vmem:[#allocation46_spill] sm:$0xff] }
0x1677   : > { %5415 = vadd.xlane.f32.xlu0 %v5414_v54 }
0x168d   : > { %5499 = vperm.xlu0 %10416, %v2647_v4   ;;  %v15833_v4 = vld [vmem:[#allocation47_spill] sm:$0xff] }
0x1704   : > { %v5416_v53 = vpop.xlane.xlu0 %5415 }
0x1705   : > { %9926 = vmatpush3.msra.mxu0 %v5416_v53 }
0x1706   : > { %9928 = vmatmul.mubr.msk.f32.vlgmr.msra.gmra.mrb[148].mxu0 %vm1893_vm10, %v13457_v55  ;;  %9930 = vmatprep.subr.mxu0 %v15813_v57 }
0x1707   : > { %9932 = vmatprep.mubr.msk.f32.mxu0 %vm11377_vm9, %v15813_v57 }
0x170c   : > { %v5500_v16 = vpop.permute.xlu0 %5499 }
0x17d9   : > { %v5483_v45 = vpop.f32.mrb[148].mxu0 }
0x17da   : > { %v5487_v48 = vmul.f32 0.001953125, %v5483_v45  ;;  %v9929_v42 = vpop.f32.mrb[149].mxu0  ;;  %v15834_v45 = vld [vmem:[#allocation39_spill] sm:$0xff] }
0x17db   : > { %v15835_v42 = vld [vmem:[#allocation38_spill] sm:$0xff] }
0x17dc   : > { %v5488_v52 = vadd.f32 1e-05, %v5487_v48 }
0x17de   : > { %10831 = vrsqrt.f32 %v5488_v52 }
0x17e8   : > { %v10832_v12 = vpop.eup %10831 }
0x17e9   : > { %5492 = vperm.xlu1 %10417, %v10832_v12  }
0x17ed   : > { %5506 = vperm.xlu1 %10417, %v2648_v63  }
0x1868   : > { %v5493_v22 = vpop.permute.xlu1 %5492 }
0x1869   : > { %v5495_v25 = vmul.f32 %v5493_v22, %v5410_v15  ;;  %v5496_v47 = vmul.f32 %v5493_v22, %v5411_v8 }
0x186b   : > { %v5502_v59 = vmul.f32 %v5500_v16, %v5495_v25  ;;  %v5503_v7 = vmul.f32 %v5500_v16, %v5496_v47 }
0x186c   : > { %v5507_v61 = vpop.permute.xlu1 %5506 }
0x186d   : > { %v13471_v46 = vadd.f32 %v5507_v61, %v5502_v59  ;;  %v13477_v58 = vadd.f32 %v5507_v61, %v5503_v7 }
0x186f   : > { %5522 = vrot.lane.b32.xlu0 %v13471_v46, %s11368_s23  ;;  %5512 = vrot.lane.b32.xlu1 %v13471_v46, %s11369_s26  ;;  %v5553_v48 = vmul.f32 %v13477_v58, %v15834_v45  ;;  %v5552_v52 = vmul.f32 %v13471_v46, %v15835_v42 }
0x1873   : > { %5532 = vrot.lane.b32.xlu0 %v13471_v46, %s11370_s28  ;;  %5514 = vrot.lane.b32.xlu1 %v13477_v58, %s11369_s26 }
0x1877   : > { %5542 = vrot.lane.b32.xlu0 %v13471_v46, %s15452_s1  ;;  %5524 = vrot.lane.b32.xlu1 %v13477_v58, %s11368_s23 }
0x187b   : > { %5556 = vrot.lane.b32.xlu0 %v13471_v46, %s15450_s2  ;;  %5534 = vrot.lane.b32.xlu1 %v13477_v58, %s11370_s28 }
0x187f   : > { %5566 = vrot.lane.b32.xlu0 %v13471_v46, %s15448_s7  ;;  %5544 = vrot.lane.b32.xlu1 %v13477_v58, %s15452_s1 }
0x1883   : > { %5576 = vrot.lane.b32.xlu0 %v13471_v46, %s15446_s10  ;;  %5558 = vrot.lane.b32.xlu1 %v13477_v58, %s15450_s2 }
0x1887   : > { %5586 = vrot.lane.b32.xlu0 %v13471_v46, %s15822_s18  ;;  %5568 = vrot.lane.b32.xlu1 %v13477_v58, %s15448_s7  ;;  %s15846_s7 = sld [smem:[#allocation22_spill]] }
0x188b   : > { %5617 = vperm.xlu0 %10416, %v5614_v24   ;;  %5578 = vrot.lane.b32.xlu1 %v13477_v58, %s15446_s10  ;;  %v15836_v24 = vld [vmem:[#allocation48_spill] sm:$0xff]  ;;  %s15844_s10 = sld [smem:[#allocation20_spill]] }
0x188f   : > { %5588 = vrot.lane.b32.xlu1 %v13477_v58, %s15822_s18 }
0x18e1   : > { %v5523_v27 = vpop.permute.xlu0 %5522  ;;  %v5513_v37 = vpop.permute.xlu1 %5512 }
0x18e5   : > { %v5533_v9 = vpop.permute.xlu0 %5532  ;;  %v5515_v19 = vpop.permute.xlu1 %5514 }
0x18e6   : > { %v5516_v49 = vsel %vm1623_vm2, %v5513_v37, %v5515_v19  ;;  %v5517_v13 = vsel %vm1623_vm2, %v5515_v19, %v5513_v37  ;;  %v15837_v37 = vld [vmem:[#allocation49_spill] sm:$0xff]  ;;  %v15838_v19 = vld [vmem:[#allocation50_spill] sm:$0xff] }
0x18e7   : > { %v5518_v17 = vmul.f32 %v5517_v13, %v15824_v2  ;;  %v5519_v36 = vmul.f32 %v5516_v49, %v15825_v34  ;;  %v15840_v13 = vld [vmem:[#allocation51_spill] sm:$0xff] }
0x18e9   : > { %v5543_v41 = vpop.permute.xlu0 %5542  ;;  %v5525_v0 = vpop.permute.xlu1 %5524 }
0x18ea   : > { %v5526_v39 = vsel %vm1642_vm0, %v5523_v27, %v5525_v0  ;;  %v5527_v23 = vsel %vm1642_vm0, %v5525_v0, %v5523_v27 }
0x18eb   : > { %v5528_v38 = vmul.f32 %v5527_v23, %v15826_v18  ;;  %v5529_v3 = vmul.f32 %v5526_v39, %v15827_v44 }
0x18ed   : > { %v5535_v29 = vpop.permute.xlu1 %5534  ;;  %v10130_v11 = vpack.c.bf16 %v5529_v3, %v5519_v36  ;;  %v10132_v51 = vpack.c.bf16 %v5528_v38, %v5518_v17  ;;  %v5557_v20 = vpop.permute.xlu0 %5556  ;;  %v13559_v3 = vld [vmem:[%s11398_s13 + $0x18] ss:$0 sm:$0xff] }
0x18ee   : > { %v5536_v5 = vsel %vm1661_vm1, %v5533_v9, %v5535_v29  ;;  %v5537_v50 = vsel %vm1661_vm1, %v5535_v29, %v5533_v9 }
0x18ef   : > { %10131 = vmatprep.subr.bf16.mxu1 %v10130_v11  ;;  %v5538_v21 = vmul.f32 %v5537_v50, %v15828_v32  ;;  %v5539_v62 = vmul.f32 %v5536_v5, %v15829_v56  ;;  %v13563_v11 = vld [vmem:[%s11398_s13 + $0x10] ss:$0 sm:$0xff] }
0x18f0   : > { %10133 = vmatpush1.bf16.msra.mxu1 %v10132_v51 }
0x18f1   : > { %v5545_v31 = vpop.permute.xlu1 %5544  ;;  %v5567_v28 = vpop.permute.xlu0 %5566 }
0x18f2   : > { %v5546_v35 = vsel %vm1680_vm3, %v5543_v41, %v5545_v31  ;;  %v5547_v43 = vsel %vm1680_vm3, %v5545_v31, %v5543_v41 }
0x18f3   : > { %v5548_v40 = vmul.f32 %v5547_v43, %v15830_v33  ;;  %v5549_v6 = vmul.f32 %v5546_v35, %v15831_v14 }
0x18f5   : > { %v5559_v60 = vpop.permute.xlu1 %5558  ;;  %v10134_v10 = vpack.c.bf16 %v5549_v6, %v5539_v62  ;;  %v10136_v15 = vpack.c.bf16 %v5548_v40, %v5538_v21  ;;  %v5577_v25 = vpop.permute.xlu0 %5576 }
0x18f6   : > { %v5560_v8 = vsel %vm1717_vm4, %v5557_v20, %v5559_v60  ;;  %v5561_v1 = vsel %vm1717_vm4, %v5559_v60, %v5557_v20  ;;  %v5511_v20 = vld [vmem:[%s15839_s11] sm:$0xff]  ;;  %s15842_s11 = sld [smem:[#allocation21_spill]] }
0x18f7   : > { %v5562_v54 = vmul.f32 %v5560_v8, %v15832_v30  ;;  %v5563_v53 = vmul.f32 %v5561_v1, %v15833_v4  ;;  %10135 = vmatprep.subr.bf16.mxu1 %v10134_v10 }
0x18f8   : > { %10137 = vmatpush1.bf16.msra.mxu1 %v10136_v15 }
0x18f9   : > { %v5569_v12 = vpop.permute.xlu1 %5568  ;;  %v10138_v63 = vpack.c.bf16 %v5563_v53, %v5553_v48  ;;  %v10140_v22 = vpack.c.bf16 %v5562_v54, %v5552_v52  ;;  %v5587_v0 = vpop.permute.xlu0 %5586  ;;  %v5694_v53 = vld [vmem:[%s15841_s0] sm:$0xff]  ;;  %v15843_v52 = vmov 0.0|0.0   ;;  %s15849_s0 = smov 112  }
0x18fa   : > { %v5570_v47 = vsel %vm1736_vm5, %v5567_v28, %v5569_v12  ;;  %v5571_v16 = vsel %vm1736_vm5, %v5569_v12, %v5567_v28  ;;  %v15845_v12 = vld [vmem:[#allocation53_spill] sm:$0xff] }
0x18fb   : > { %10139 = vmatprep.subr.bf16.mxu1 %v10138_v63  ;;  %v5572_v27 = vmul.f32 %v5570_v47, %v15836_v24  ;;  %v5573_v9 = vmul.f32 %v5571_v16, %v15837_v37 }
0x18fc   : > { %10141 = vmatpush1.bf16.msra.mxu1 %v10140_v22  ;;  %v5890_v63 = vld [vmem:[%s15842_s11] sm:$0xff]  ;;  %s15850_s11 = sld [smem:[#allocation23_spill]] }
0x18fd   : > { %v5579_v59 = vpop.permute.xlu1 %5578 }
0x18fe   : > { %v5580_v61 = vsel %vm1755_vm6, %v5577_v25, %v5579_v59  ;;  %v5581_v7 = vsel %vm1755_vm6, %v5579_v59, %v5577_v25 }
0x18ff   : > { %v5582_v49 = vmul.f32 %v5580_v61, %v15838_v19  ;;  %v5583_v41 = vmul.f32 %v5581_v7, %v15840_v13 }
0x1901   : > { %v5589_v39 = vpop.permute.xlu1 %5588  ;;  %v10142_v23 = vpack.c.bf16 %v5583_v41, %v5573_v9  ;;  %v10144_v17 = vpack.c.bf16 %v5582_v49, %v5572_v27  ;;  %v5695_v27 = vld [vmem:[%s15844_s10] sm:$0xff]  ;;  %s15848_s10 = smov 113  }
0x1902   : > { %v5591_v36 = vsel %vm1774_vm7, %v5589_v39, %v5587_v0  ;;  %v5590_v38 = vsel %vm1774_vm7, %v5587_v0, %v5589_v39  ;;  %v5891_v9 = vld [vmem:[%s15846_s7] sm:$0xff]  ;;  %s15847_s7 = sld [smem:[#allocation24_spill]] }
0x1903   : > { %v5593_v29 = vmul.f32 %v13559_v3, %v5591_v36  ;;  %10143 = vmatprep.subr.bf16.mxu1 %v10142_v23  ;;  %v5592_v51 = vmul.f32 %v13563_v11, %v5590_v38 }
0x1904   : > { %10145 = vmatpush1.bf16.msra.mxu1 %v10144_v17 }
0x1905   : > { %5639 = vmatprep.subr.mxu1 %v5593_v29 }
0x1908   : > { %5640 = vmatpush1.msra.mxu1 %v5592_v51 }
0x1909   : > { %9733 = vmatmul.mubr.msk.f32.vlgmr.msra.gmra.mrb[74].mxu1 %vm1813_vm8, %v5511_v20  ;;  %9947 = vmatprep.subr.mxu1 %v15813_v57 }
0x190a   : > { %9949 = vmatprep.mubr.msk.f32.mxu1 %vm11377_vm9, %v15813_v57  ;;  %v5618_v5 = vpop.permute.xlu0 %5617 }
0x19dc   : > { %v5689_v50 = vpop.f32.mrb[74].mxu1 }
0x19dd   : > { %v5690_v31 = vadd.f32 %v5689_v50, %v5618_v5  ;;  %v5691_v35 = vpop.f32.mrb[75].mxu1 }
0x19de   : > { %v5692_v43 = vadd.f32 %v5691_v35, %v5618_v5 }
0x19e0   : > { %v5696_v21 = vadd.f32 %v5692_v43, %v5690_v31 }
0x19e2   : > { %5697 = vadd.xlane.f32.xlu1 %v5696_v21 }
0x1a6f   : > { %v5698_v62 = vpop.xlane.xlu1 %5697 }
0x1a70   : > { %9931 = vmatpush3.msra.mxu0 %v5698_v62 }
0x1a71   : > { %9933 = vmatmul.mubr.msk.f32.vlgmr.msra.gmra.mrb[150].mxu0 %vm1893_vm10, %v13457_v55  ;;  %9935 = vmatprep.subr.mxu0 %v15813_v57 }
0x1a72   : > { %9937 = vmatprep.mubr.msk.f32.mxu0 %vm11377_vm9, %v15813_v57 }
0x1b44   : > { %v5765_v40 = vpop.f32.mrb[150].mxu0 }
0x1b45   : > { %v5769_v6 = vmul.f32 0.001953125, %v5765_v40  ;;  %v9934_v28 = vpop.f32.mrb[151].mxu0 }
0x1b47   : > { %5772 = vperm.xlu0 %10416, %v5769_v6  }
0x1bc6   : > { %v5773_v60 = vpop.permute.xlu0 %5772 }
0x1bc7   : > { %v5775_v10 = vsub.f32 %v5690_v31, %v5773_v60  ;;  %v5776_v15 = vsub.f32 %v5692_v43, %v5773_v60 }
0x1bc9   : > { %v5777_v8 = vmul.f32 %v5775_v10, %v5775_v10  ;;  %v5778_v1 = vmul.f32 %v5776_v15, %v5776_v15 }
0x1bcb   : > { %v5779_v54 = vadd.f32 %v5778_v1, %v5777_v8 }
0x1bcd   : > { %5780 = vadd.xlane.f32.xlu0 %v5779_v54 }
0x1be3   : > { %5864 = vperm.xlu0 %10416, %v5694_v53  }
0x1c5a   : > { %v5781_v48 = vpop.xlane.xlu0 %5780 }
0x1c5b   : > { %9936 = vmatpush3.msra.mxu0 %v5781_v48 }
0x1c5c   : > { %9938 = vmatmul.mubr.msk.f32.vlgmr.msra.gmra.mrb[152].mxu0 %vm1893_vm10, %v13457_v55  ;;  %10146 = vmatprep.subr.bf16.mxu0 %v15843_v52 }
0x1c5d   : > { %10148 = vmatpush3.bf16.msra.mxu0 %v15845_v12  ;;  %9944 = vmatprep.mubr.msk.f32.mxu0 %vm11377_vm9, %v15813_v57 }
0x1c60   : > { %9945 = vmatmul.mubr.msk.f32.vlgmr.msra.gmra.mrb[154].mxu0 %vm2090_vm11, %v5890_v63 }
0x1c61   : > { %6148 = vmatprep.mubr.f32.mxu0 %v15813_v57 }
0x1c62   : > { %v5865_v23 = vpop.permute.xlu0 %5864 }
0x1d2f   : > { %v5848_v22 = vpop.f32.mrb[152].mxu0 }
0x1d30   : > { %v5852_v25 = vmul.f32 0.001953125, %v5848_v22  ;;  %v9939_v47 = vpop.f32.mrb[153].mxu0 }
0x1d32   : > { %v5853_v16 = vadd.f32 1e-05, %v5852_v25 }
0x1d33   : > { %v5961_v59 = vpop.f32.mrb[154].mxu0 }
0x1d34   : > { %10833 = vrsqrt.f32 %v5853_v16  ;;  %v9946_v61 = vpop.f32.mrb[155].mxu0  ;;  %v5962_v49 = vadd.f32 %v5961_v59, %v5891_v9 }
0x1d3e   : > { %v10834_v7 = vpop.eup %10833 }
0x1d3f   : > { %5857 = vperm.xlu1 %10417, %v10834_v7  }
0x1d43   : > { %5871 = vperm.xlu1 %10417, %v5695_v27  }
0x1d47   : > { %5967 = vperm.xlu1 %10417, %v5962_v49  }
0x1dbe   : > { %v5858_v41 = vpop.permute.xlu1 %5857 }
0x1dbf   : > { %v5860_v0 = vmul.f32 %v5858_v41, %v5775_v10  ;;  %v5861_v39 = vmul.f32 %v5858_v41, %v5776_v15  ;;  %v6075_v15 = vld [vmem:[%s15847_s7] sm:$0xff]  ;;  %s15851_s7 = sld [smem:[#allocation25_spill]] }
0x1dc1   : > { %v5867_v17 = vmul.f32 %v5865_v23, %v5860_v0  ;;  %v5868_v36 = vmul.f32 %v5865_v23, %v5861_v39 }
0x1dc2   : > { %v5872_v38 = vpop.permute.xlu1 %5871 }
0x1dc3   : > { %v5874_v29 = vadd.f32 %v5872_v38, %v5867_v17  ;;  %v5875_v51 = vadd.f32 %v5872_v38, %v5868_v36 }
0x1dc5   : > { %v9736_v20 = vmul.f32 -1.442695, %v5874_v29  ;;  %v9737_v5 = vmul.f32 -1.442695, %v5875_v51 }
0x1dc6   : > { %v5968_v28 = vpop.permute.xlu1 %5967 }
0x1dc7   : > { %10835 = vpow2.f32 %v9736_v20 }
0x1dc8   : > { %10837 = vpow2.f32 %v9737_v5 }
0x1dd1   : > { %v10836_v50 = vpop.eup %10835 }
0x1dd2   : > { %v10838_v31 = vpop.eup %10837  ;;  %v5882_v35 = vadd.f32 1.0, %v10836_v50 }
0x1dd3   : > { %v5883_v43 = vadd.f32 1.0, %v10838_v31 }
0x1dd4   : > { %10839 = vrcp.f32 %v5882_v35 }
0x1dd5   : > { %10841 = vrcp.f32 %v5883_v43 }
0x1dde   : > { %v10840_v21 = vpop.eup %10839 }
0x1ddf   : > { %v10842_v62 = vpop.eup %10841  ;;  %v5888_v40 = vmul.f32 %v10840_v21, %v5874_v29 }
0x1de0   : > { %v5889_v6 = vmul.f32 %v10842_v62, %v5875_v51 }
0x1de1   : > { %v5970_v60 = vadd.f32 %v5968_v28, %v5888_v40 }
0x1de2   : > { %v5971_v10 = vadd.f32 %v5968_v28, %v5889_v6 }
0x1de3   : > { %5973 = vrot.lane.b32.xlu0 %v5970_v60, %s11369_s26  ;;  %v6013_v43 = vmul.f32 %v5970_v60, %v15835_v42 }
0x1de4   : > { %5975 = vrot.lane.b32.xlu1 %v5971_v10, %s11369_s26  ;;  %v6014_v40 = vmul.f32 %v5971_v10, %v15834_v45 }
0x1de7   : > { %5983 = vrot.lane.b32.xlu0 %v5970_v60, %s11368_s23 }
0x1de8   : > { %5985 = vrot.lane.b32.xlu1 %v5971_v10, %s11368_s23 }
0x1deb   : > { %5993 = vrot.lane.b32.xlu0 %v5970_v60, %s11370_s28 }
0x1dec   : > { %5995 = vrot.lane.b32.xlu1 %v5971_v10, %s11370_s28 }
0x1def   : > { %6003 = vrot.lane.b32.xlu0 %v5970_v60, %s15452_s1 }
0x1df0   : > { %6005 = vrot.lane.b32.xlu1 %v5971_v10, %s15452_s1  ;;  %s15854_s1 = sld [smem:[#allocation28_spill]] }
0x1df3   : > { %6017 = vrot.lane.b32.xlu0 %v5970_v60, %s15450_s2 }
0x1df4   : > { %6019 = vrot.lane.b32.xlu1 %v5971_v10, %s15450_s2  ;;  %s15853_s2 = sld [smem:[#allocation26_spill]] }
0x1df7   : > { %6027 = vrot.lane.b32.xlu0 %v5970_v60, %s15848_s10 }
0x1df8   : > { %6029 = vrot.lane.b32.xlu1 %v5971_v10, %s15848_s10 }
0x1dfb   : > { %6037 = vrot.lane.b32.xlu0 %v5970_v60, %s15849_s0 }
0x1dfc   : > { %6039 = vrot.lane.b32.xlu1 %v5971_v10, %s15849_s0 }
0x1dff   : > { %6047 = vrot.lane.b32.xlu0 %v5970_v60, %s15822_s18 }
0x1e00   : > { %6049 = vrot.lane.b32.xlu1 %v5971_v10, %s15822_s18 }
0x1e03   : > { %6078 = vperm.xlu0 %10416, %v6075_v15  }
0x1e55   : > { %v5974_v8 = vpop.permute.xlu0 %5973 }
0x1e56   : > { %v5976_v1 = vpop.permute.xlu1 %5975 }
0x1e57   : > { %v5977_v54 = vsel %vm1623_vm2, %v5974_v8, %v5976_v1  ;;  %v5978_v53 = vsel %vm1623_vm2, %v5976_v1, %v5974_v8 }
0x1e58   : > { %v5979_v22 = vmul.f32 %v5978_v53, %v15824_v2  ;;  %v5980_v25 = vmul.f32 %v5977_v54, %v15825_v34 }
0x1e59   : > { %v5984_v48 = vpop.permute.xlu0 %5983 }
0x1e5a   : > { %v5986_v52 = vpop.permute.xlu1 %5985 }
0x1e5b   : > { %v5987_v12 = vsel %vm1642_vm0, %v5984_v48, %v5986_v52  ;;  %v5988_v63 = vsel %vm1642_vm0, %v5986_v52, %v5984_v48 }
0x1e5c   : > { %v5989_v47 = vmul.f32 %v5988_v63, %v15826_v18  ;;  %v5990_v16 = vmul.f32 %v5987_v12, %v15827_v44 }
0x1e5d   : > { %v5994_v59 = vpop.permute.xlu0 %5993 }
0x1e5e   : > { %v5996_v61 = vpop.permute.xlu1 %5995  ;;  %v10149_v7 = vpack.c.bf16 %v5990_v16, %v5980_v25  ;;  %v10151_v27 = vpack.c.bf16 %v5989_v47, %v5979_v22 }
0x1e5f   : > { %v5997_v9 = vsel %vm1661_vm1, %v5994_v59, %v5996_v61  ;;  %v5998_v49 = vsel %vm1661_vm1, %v5996_v61, %v5994_v59 }
0x1e60   : > { %10150 = vmatprep.subr.bf16.mxu0 %v10149_v7  ;;  %v5999_v17 = vmul.f32 %v5998_v49, %v15828_v32  ;;  %v6000_v36 = vmul.f32 %v5997_v9, %v15829_v56  ;;  %v5972_v49 = vld [vmem:[%s15850_s11] sm:$0xff]  ;;  %s15852_s11 = sld [smem:[#allocation30_spill]] }
0x1e61   : > { %v6004_v41 = vpop.permute.xlu0 %6003  ;;  %10152 = vmatpush1.bf16.msra.mxu0 %v10151_v27 }
0x1e62   : > { %v6006_v0 = vpop.permute.xlu1 %6005 }
0x1e63   : > { %v6007_v39 = vsel %vm1680_vm3, %v6004_v41, %v6006_v0  ;;  %v6008_v23 = vsel %vm1680_vm3, %v6006_v0, %v6004_v41 }
0x1e64   : > { %v6009_v38 = vmul.f32 %v6008_v23, %v15830_v33  ;;  %v6010_v29 = vmul.f32 %v6007_v39, %v15831_v14 }
0x1e65   : > { %v6018_v51 = vpop.permute.xlu0 %6017 }
0x1e66   : > { %v6020_v20 = vpop.permute.xlu1 %6019  ;;  %v10153_v5 = vpack.c.bf16 %v6010_v29, %v6000_v36  ;;  %v10155_v50 = vpack.c.bf16 %v6009_v38, %v5999_v17 }
0x1e67   : > { %v6021_v31 = vsel %vm1717_vm4, %v6018_v51, %v6020_v20  ;;  %v6022_v35 = vsel %vm1717_vm4, %v6020_v20, %v6018_v51 }
0x1e68   : > { %v6023_v21 = vmul.f32 %v6021_v31, %v15832_v30  ;;  %v6024_v62 = vmul.f32 %v6022_v35, %v15833_v4  ;;  %10154 = vmatprep.subr.bf16.mxu0 %v10153_v5 }
0x1e69   : > { %v6028_v6 = vpop.permute.xlu0 %6027  ;;  %10156 = vmatpush1.bf16.msra.mxu0 %v10155_v50 }
0x1e6a   : > { %v6030_v28 = vpop.permute.xlu1 %6029  ;;  %v10157_v15 = vpack.c.bf16 %v6024_v62, %v6014_v40  ;;  %v10159_v8 = vpack.c.bf16 %v6023_v21, %v6013_v43  ;;  %v6155_v43 = vld [vmem:[%s15851_s7] sm:$0xff]  ;;  %s15855_s7 = sld [smem:[#allocation27_spill]] }
0x1e6b   : > { %v6031_v1 = vsel %vm1736_vm5, %v6028_v6, %v6030_v28  ;;  %v6032_v54 = vsel %vm1736_vm5, %v6030_v28, %v6028_v6  ;;  %v6356_v21 = vld [vmem:[%s15852_s11] sm:$0xff]  ;;  %s15936_s11 = sld [smem:[#allocation32_spill]] }
0x1e6c   : > { %10158 = vmatprep.subr.bf16.mxu0 %v10157_v15  ;;  %v6033_v52 = vmul.f32 %v6031_v1, %v15836_v24  ;;  %v6034_v12 = vmul.f32 %v6032_v54, %v15837_v37  ;;  %v6156_v1 = vld [vmem:[%s15853_s2] sm:$0xff]  ;;  %s15857_s2 = sld [smem:[#allocation31_spill]] }
0x1e6d   : > { %v6038_v60 = vpop.permute.xlu0 %6037  ;;  %10160 = vmatpush1.bf16.msra.mxu0 %v10159_v8  ;;  %v6354_v54 = vld [vmem:[%s15854_s1] sm:$0xff]  ;;  %s15856_s1 = sld [smem:[#allocation29_spill]] }
0x1e6e   : > { %v6040_v53 = vpop.permute.xlu1 %6039 }
0x1e6f   : > { %v6041_v48 = vsel %vm1755_vm6, %v6038_v60, %v6040_v53  ;;  %v6042_v10 = vsel %vm1755_vm6, %v6040_v53, %v6038_v60 }
0x1e70   : > { %v6043_v63 = vmul.f32 %v6041_v48, %v15838_v19  ;;  %v6044_v22 = vmul.f32 %v6042_v10, %v15840_v13 }
0x1e71   : > { %v6048_v25 = vpop.permute.xlu0 %6047 }
0x1e72   : > { %v6050_v47 = vpop.permute.xlu1 %6049  ;;  %v10161_v16 = vpack.c.bf16 %v6044_v22, %v6034_v12  ;;  %v10163_v59 = vpack.c.bf16 %v6043_v63, %v6033_v52 }
0x1e73   : > { %v6052_v61 = vsel %vm1774_vm7, %v6050_v47, %v6048_v25  ;;  %v6051_v7 = vsel %vm1774_vm7, %v6048_v25, %v6050_v47 }
0x1e74   : > { %v6054_v27 = vmul.f32 %v13559_v3, %v6052_v61  ;;  %10162 = vmatprep.subr.bf16.mxu0 %v10161_v16  ;;  %v6053_v9 = vmul.f32 %v13563_v11, %v6051_v7 }
0x1e75   : > { %10164 = vmatpush1.bf16.msra.mxu0 %v10163_v59 }
0x1e76   : > { %6100 = vmatprep.subr.mxu0 %v6054_v27 }
0x1e79   : > { %6101 = vmatpush1.msra.mxu0 %v6053_v9 }
0x1e7a   : > { %9739 = vmatmul.mubr.msk.f32.vlgmr.msra.gmra.mrb[156].mxu0 %vm1813_vm8, %v5972_v49 }
0x1e7b   : > { %6593 = vmatprep.mubr.f32.mxu0 %v15813_v57 }
0x1e82   : > { %v6079_v41 = vpop.permute.xlu0 %6078 }
0x1f4d   : > { %v6150_v0 = vpop.f32.mrb[156].mxu0 }
0x1f4e   : > { %v6151_v39 = vadd.f32 %v6150_v0, %v6079_v41  ;;  %v6152_v23 = vpop.f32.mrb[157].mxu0 }
0x1f4f   : > { %v6153_v17 = vadd.f32 %v6152_v23, %v6079_v41  ;;  %v6353_v23 = vld [vmem:[%s15855_s7] sm:$0xff]  ;;  %s15937_s7 = smov 124  }
0x1f51   : > { %v6157_v36 = vadd.f32 %v6153_v17, %v6151_v39 }
0x1f53   : > { %6158 = vadd.xlane.f32.xlu1 %v6157_v36 }
0x1fe0   : > { %v6159_v38 = vpop.xlane.xlu1 %6158 }
0x1fe1   : > { %9948 = vmatpush3.msra.mxu1 %v6159_v38 }
0x1fe2   : > { %9950 = vmatmul.mubr.msk.f32.vlgmr.msra.gmra.mrb[76].mxu1 %vm1893_vm10, %v13457_v55  ;;  %9952 = vmatprep.subr.mxu1 %v15813_v57 }
0x1fe3   : > { %9954 = vmatprep.mubr.msk.f32.mxu1 %vm11377_vm9, %v15813_v57 }
0x20b5   : > { %v6226_v3 = vpop.f32.mrb[76].mxu1 }
0x20b6   : > { %v6230_v11 = vmul.f32 0.001953125, %v6226_v3  ;;  %v9951_v29 = vpop.f32.mrb[77].mxu1 }
0x20b8   : > { %6233 = vperm.xlu0 %10416, %v6230_v11  }
0x2137   : > { %v6234_v51 = vpop.permute.xlu0 %6233 }
0x2138   : > { %v6236_v20 = vsub.f32 %v6151_v39, %v6234_v51  ;;  %v6237_v5 = vsub.f32 %v6153_v17, %v6234_v51  ;;  %v6357_v17 = vld [vmem:[%s15857_s2] sm:$0xff]  ;;  %s16038_s2 = sld [smem:[#allocation33_spill]] }
0x213a   : > { %v6238_v50 = vmul.f32 %v6236_v20, %v6236_v20  ;;  %v6239_v31 = vmul.f32 %v6237_v5, %v6237_v5 }
0x213c   : > { %v6240_v35 = vadd.f32 %v6239_v31, %v6238_v50 }
0x213e   : > { %6241 = vadd.xlane.f32.xlu0 %v6240_v35  ;;  %v11243_v35 = vld [vmem:[%s15623_s22] sm:$0xff] }
0x2154   : > { %6325 = vperm.xlu0 %10416, %v6155_v43   ;;  %v11244_v43 = vld [vmem:[%s15623_s22 + $0x18] sm:$0xff] }
0x2158   : > { %6444 = vperm.xlu0 %10416, %v6356_v21   ;;  %v11245_v21 = vld [vmem:[%s15623_s22 + $0x10] sm:$0xff] }
0x21cb   : > { %v6242_v62 = vpop.xlane.xlu0 %6241 }
0x21cc   : > { %9953 = vmatpush3.msra.mxu1 %v6242_v62  ;;  %v11246_v62 = vld [vmem:[%s15623_s22 + $0x28] sm:$0xff] }
0x21cd   : > { %9955 = vmatmul.mubr.msk.f32.vlgmr.msra.gmra.mrb[78].mxu1 %vm1893_vm10, %v13457_v55 }
0x21ce   : > { %6435 = vmatprep.mubr.f32.mxu1 %v15813_v57 }
0x21d3   : > { %v6326_v10 = vpop.permute.xlu0 %6325 }
0x22a0   : > { %v6309_v40 = vpop.f32.mrb[78].mxu1 }
0x22a1   : > { %v6313_v6 = vmul.f32 0.001953125, %v6309_v40  ;;  %v9956_v28 = vpop.f32.mrb[79].mxu1  ;;  %v11247_v40 = vld [vmem:[%s15623_s22 + $0x20] sm:$0xff] }
0x22a2   : > { %v11249_v28 = vld [vmem:[%s15623_s22 + $0x30] sm:$0xff] }
0x22a3   : > { %v6314_v15 = vadd.f32 1e-05, %v6313_v6  ;;  %v11248_v6 = vld [vmem:[%s15623_s22 + $0x38] sm:$0xff] }
0x22a5   : > { %10843 = vrsqrt.f32 %v6314_v15  ;;  %v11250_v15 = vld [vmem:[%s15623_s22 + $0x48] sm:$0xff] }
0x22af   : > { %v10844_v8 = vpop.eup %10843 }
0x22b0   : > { %6318 = vperm.xlu1 %10417, %v10844_v8   ;;  %v11251_v8 = vld [vmem:[%s15623_s22 + $0x40] sm:$0xff] }
0x22b4   : > { %6332 = vperm.xlu1 %10417, %v6156_v1   ;;  %v11252_v1 = vld [vmem:[%s15623_s22 + $0x58] sm:$0xff] }
0x22b8   : > { %6365 = vperm.xlu1 %10417, %v6354_v54   ;;  %v11253_v54 = vld [vmem:[%s15623_s22 + $0x50] sm:$0xff] }
0x232f   : > { %v6319_v60 = vpop.permute.xlu1 %6318 }
0x2330   : > { %v6321_v53 = vmul.f32 %v6319_v60, %v6236_v20  ;;  %v6322_v48 = vmul.f32 %v6319_v60, %v6237_v5  ;;  %v6445_v20 = vpop.permute.xlu0 %6444  ;;  %v11254_v60 = vld [vmem:[%s15623_s22 + $0x68] sm:$0xff] }
0x2332   : > { %v6328_v52 = vmul.f32 %v6326_v10, %v6321_v53  ;;  %v6329_v12 = vmul.f32 %v6326_v10, %v6322_v48  ;;  %v11255_v53 = vld [vmem:[%s15623_s22 + $0x60] sm:$0xff]  ;;  %v11256_v48 = vld [vmem:[%s15623_s22 + $0x78] sm:$0xff]  ;;  %v11257_v10 = vld [vmem:[%s15623_s22 + $0x70] sm:$0xff] }
0x2333   : > { %v6333_v55 = vpop.permute.xlu1 %6332 }
0x2334   : > { %v6335_v63 = vadd.f32 %v6333_v55, %v6328_v52  ;;  %v6336_v22 = vadd.f32 %v6333_v55, %v6329_v12  ;;  %v11258_v52 = vld [vmem:[%s15623_s22 + $0x88] sm:$0xff]  ;;  %v11259_v12 = vld [vmem:[%s15623_s22 + $0x80] sm:$0xff]  ;;  %v11260_v55 = vld [vmem:[%s15623_s22 + $0x98] sm:$0xff] }
0x2336   : > { %v9742_v25 = vmul.f32 -1.442695, %v6335_v63  ;;  %v9743_v47 = vmul.f32 -1.442695, %v6336_v22 }
0x2337   : > { %v6366_v38 = vpop.permute.xlu1 %6365 }
0x2338   : > { %10845 = vpow2.f32 %v9742_v25  ;;  %v11263_v25 = vld [vmem:[%s15623_s22 + $0xa0] sm:$0xff] }
0x2339   : > { %10847 = vpow2.f32 %v9743_v47  ;;  %v11264_v47 = vld [vmem:[%s15623_s22 + $0xb8] sm:$0xff] }
0x2342   : > { %v10846_v16 = vpop.eup %10845 }
0x2343   : > { %v10848_v59 = vpop.eup %10847  ;;  %v6343_v61 = vadd.f32 1.0, %v10846_v16  ;;  %v11265_v16 = vld [vmem:[%s15623_s22 + $0xb0] sm:$0xff] }
0x2344   : > { %v6344_v7 = vadd.f32 1.0, %v10848_v59  ;;  %v11266_v59 = vld [vmem:[%s15623_s22 + $0xc8] sm:$0xff] }
0x2345   : > { %10849 = vrcp.f32 %v6343_v61  ;;  %v11267_v61 = vld [vmem:[%s15623_s22 + $0xc0] sm:$0xff] }
0x2346   : > { %10851 = vrcp.f32 %v6344_v7  ;;  %v11268_v7 = vld [vmem:[%s15623_s22 + $0xd8] sm:$0xff] }
0x234f   : > { %v10850_v27 = vpop.eup %10849 }
0x2350   : > { %v10852_v9 = vpop.eup %10851  ;;  %v6349_v49 = vmul.f32 %v10850_v27, %v6335_v63  ;;  %v11261_v63 = vld [vmem:[%s15623_s22 + $0x90] sm:$0xff] }
0x2351   : > { %v6350_v41 = vmul.f32 %v10852_v9, %v6336_v22  ;;  %v11262_v22 = vld [vmem:[%s15623_s22 + $0xa8] sm:$0xff]  ;;  %v11269_v27 = vld [vmem:[%s15623_s22 + $0xd0] sm:$0xff] }
0x2352   : > { %v13671_v0 = vadd.f32 %v6349_v49, %v13471_v46  ;;  %v6355_v46 = vld [vmem:[%s15856_s1] sm:$0xff]  ;;  %v11270_v9 = vld [vmem:[%s15623_s22 + $0xe8] sm:$0xff]  ;;  %s16032_s1 = sld [smem:[#allocation34_spill]] }
0x2353   : > { %v13674_v39 = vadd.f32 %v6350_v41, %v13477_v58  ;;  %v11242_v58 = vld [vmem:[%s15623_s22 + $0x8] sm:$0xff]  ;;  %v11271_v49 = vld [vmem:[%s15623_s22 + $0xe0] sm:$0xff]  ;;  %v11272_v41 = vld [vmem:[%s15623_s22 + $0xf8] sm:$0xff] }
0x2354   : > { %15858 = vst [vmem:[#allocation104_spill] sm:$0xff] %v13671_v0 }
0x2355   : > { %15859 = vst [vmem:[#allocation78_spill] sm:$0xff] %v13674_v39  ;;  %6371 = vmatprep.subr.mxu1 %v13674_v39  ;;  %6529 = vmatprep.subr.mxu0 %v13674_v39 }
0x2356   : > { %6372 = vmatpush1.msra.mxu1 %v13671_v0  ;;  %6530 = vmatpush1.msra.mxu0 %v13671_v0 }
0x2357   : > { %9744 = vmatmul.mubr.msk.f32.vlgmr.msra.gmra.mrb[80].mxu1 %vm1893_vm10, %v6353_v23  ;;  %6450 = vmatprep.subr.mxu1 %v13674_v39  ;;  %v11273_v23 = vld [vmem:[%s15623_s22 + $0xf0] sm:$0xff] }
0x2358   : > { %6451 = vmatpush1.msra.mxu1 %v13671_v0  ;;  %6514 = vmatprep.mubr.f32.mxu1 %v15813_v57 }
0x2359   : > { %9746 = vmatmul.mubr.msk.f32.vlgmr.msra.gmra.mrb[158].mxu0 %vm1893_vm10, %v6357_v17  ;;  %v11276_v17 = vld [vmem:[%s15623_s22 + $0x118] sm:$0xff] }
0x235a   : > { %6991 = vmatprep.mubr.f32.mxu0 %v15813_v57 }
0x235b   : > { %9745 = vmatmul.mubr.msk.f32.vlgmr.msra.gmra.mrb[82].mxu1 %vm1893_vm10, %v6355_v46  ;;  %v11274_v46 = vld [vmem:[%s15623_s22 + $0x108] sm:$0xff] }
0x235c   : > { %6664 = vmatprep.mubr.f32.mxu1 %v11242_v58  ;;  %v11275_v58 = vld [vmem:[%s15623_s22 + $0x100] sm:$0xff] }
0x242a   : > { %v6437_v36 = vpop.f32.mrb[80].mxu1 }
0x242b   : > { %v6439_v3 = vpop.f32.mrb[81].mxu1  ;;  %v6438_v29 = vadd.f32 %v6437_v36, %v6366_v38  ;;  %v11277_v36 = vld [vmem:[%s15623_s22 + $0x110] sm:$0xff] }
0x242c   : > { %v6440_v11 = vadd.f32 %v6439_v3, %v6366_v38  ;;  %v11278_v38 = vld [vmem:[%s15623_s22 + $0x128] sm:$0xff]  ;;  %v11279_v3 = vld [vmem:[%s15623_s22 + $0x120] sm:$0xff] }
0x242e   : > { %v6516_v51 = vpop.f32.mrb[82].mxu1  ;;  %6600 = vmatprep.subr.mxu1 %v6440_v11  ;;  %v11280_v11 = vld [vmem:[%s15623_s22 + $0x138] sm:$0xff] }
0x242f   : > { %v6518_v5 = vpop.f32.mrb[83].mxu1  ;;  %6601 = vmatpush1.xpose.msra.mxu1 %v6438_v29  ;;  %v13693_v31 = vadd.f32 %v6516_v51, %v6445_v20  ;;  %v11281_v29 = vld [vmem:[%s15623_s22 + $0x130] sm:$0xff]  ;;  %v11282_v51 = vld [vmem:[%s15623_s22 + $0x148] sm:$0xff] }
0x2430   : > { %v13691_v50 = vadd.f32 %v6518_v5, %v6445_v20  ;;  %v11283_v20 = vld [vmem:[%s15623_s22 + $0x140] sm:$0xff]  ;;  %v11284_v5 = vld [vmem:[%s15623_s22 + $0x158] sm:$0xff] }
0x2431   : > { %15861 = vst [vmem:[#allocation79_spill] sm:$0xff] %v13693_v31 }
0x2432   : > { %15860 = vst [vmem:[#allocation102_spill] sm:$0xff] %v13691_v50  ;;  %6665 = vmatmul.mubr.f32.vlgmr.msra.gmra.mrb[84].mxu1 %v11243_v35  ;;  %9747 = vmatprep.subr.msk.mxu0 %vm2561_vm12, %v13691_v50  ;;  %v11285_v35 = vld [vmem:[%s15623_s22 + $0x150] sm:$0xff] }
0x2433   : > { %9748 = vmatpush1.msk.msra.mxu0 %vm2561_vm12, %v13693_v31  ;;  %6669 = vmatprep.mubr.f32.mxu1 %v11244_v43  ;;  %v11286_v43 = vld [vmem:[%s15623_s22 + $0x168] sm:$0xff] }
0x2436   : > { %6670 = vmatmul.mubr.f32.gmra.mrb[86].mxu1 %v11245_v21  ;;  %v11287_v21 = vld [vmem:[%s15623_s22 + $0x160] sm:$0xff] }
0x2437   : > { %6674 = vmatprep.mubr.f32.mxu1 %v11246_v62  ;;  %v11288_v62 = vld [vmem:[%s15623_s22 + $0x178] sm:$0xff] }
0x243a   : > { %6675 = vmatmul.mubr.f32.gmra.mrb[88].mxu1 %v11247_v40  ;;  %v11289_v40 = vld [vmem:[%s15623_s22 + $0x170] sm:$0xff] }
0x243b   : > { %6679 = vmatprep.mubr.f32.mxu1 %v11248_v6  ;;  %v11290_v6 = vld [vmem:[%s15623_s22 + $0x188] sm:$0xff] }
0x243e   : > { %6680 = vmatmul.mubr.f32.gmra.mrb[90].mxu1 %v11249_v28  ;;  %v11291_v28 = vld [vmem:[%s15623_s22 + $0x180] sm:$0xff] }
0x243f   : > { %6684 = vmatprep.mubr.f32.mxu1 %v11250_v15  ;;  %v11292_v15 = vld [vmem:[%s15623_s22 + $0x198] sm:$0xff] }
0x2442   : > { %6685 = vmatmul.mubr.f32.gmra.mrb[92].mxu1 %v11251_v8  ;;  %v11293_v8 = vld [vmem:[%s15623_s22 + $0x190] sm:$0xff] }
0x2443   : > { %6689 = vmatprep.mubr.f32.mxu1 %v11252_v1  ;;  %v11294_v1 = vld [vmem:[%s15623_s22 + $0x1a8] sm:$0xff] }
0x2446   : > { %6690 = vmatmul.mubr.f32.gmra.mrb[94].mxu1 %v11253_v54  ;;  %v11295_v54 = vld [vmem:[%s15623_s22 + $0x1a0] sm:$0xff] }
0x2447   : > { %6694 = vmatprep.mubr.f32.mxu1 %v11254_v60  ;;  %v11296_v60 = vld [vmem:[%s15623_s22 + $0x1b8] sm:$0xff] }
0x244a   : > { %6695 = vmatmul.mubr.f32.gmra.mrb[96].mxu1 %v11255_v53  ;;  %v11297_v53 = vld [vmem:[%s15623_s22 + $0x1b0] sm:$0xff] }
0x244b   : > { %6699 = vmatprep.mubr.f32.mxu1 %v11256_v48  ;;  %v11298_v48 = vld [vmem:[%s15623_s22 + $0x1c8] sm:$0xff] }
0x244e   : > { %6700 = vmatmul.mubr.f32.gmra.mrb[98].mxu1 %v11257_v10  ;;  %v11299_v10 = vld [vmem:[%s15623_s22 + $0x1c0] sm:$0xff] }
0x244f   : > { %6704 = vmatprep.mubr.f32.mxu1 %v11258_v52  ;;  %v11300_v52 = vld [vmem:[%s15623_s22 + $0x1d8] sm:$0xff] }
0x2452   : > { %6705 = vmatmul.mubr.f32.gmra.mrb[100].mxu1 %v11259_v12  ;;  %v11301_v12 = vld [vmem:[%s15623_s22 + $0x1d0] sm:$0xff] }
0x2453   : > { %6709 = vmatprep.mubr.f32.mxu1 %v11260_v55  ;;  %v11302_v55 = vld [vmem:[%s15623_s22 + $0x1e8] sm:$0xff] }
0x2456   : > { %6710 = vmatmul.mubr.f32.gmra.mrb[102].mxu1 %v11261_v63  ;;  %v11303_v63 = vld [vmem:[%s15623_s22 + $0x1e0] sm:$0xff] }
0x2457   : > { %6714 = vmatprep.mubr.f32.mxu1 %v11262_v22  ;;  %v11304_v22 = vld [vmem:[%s15623_s22 + $0x1f8] sm:$0xff] }
0x245a   : > { %6715 = vmatmul.mubr.f32.gmra.mrb[104].mxu1 %v11263_v25  ;;  %v11305_v25 = vld [vmem:[%s15623_s22 + $0x1f0] sm:$0xff] }
0x245b   : > { %6719 = vmatprep.mubr.f32.mxu1 %v11264_v47  ;;  %v13762_v47 = vpop.f32.mrb[158].mxu0 }
0x245c   : > { %15862 = vst [vmem:[#allocation80_spill] sm:$0xff] %v13762_v47 }
0x245e   : > { %6720 = vmatmul.mubr.f32.gmra.mrb[106].mxu1 %v11265_v16  ;;  %v13764_v16 = vpop.f32.mrb[159].mxu0 }
0x245f   : > { %6724 = vmatprep.mubr.f32.mxu1 %v11266_v59  ;;  %15863 = vst [vmem:[#allocation81_spill] sm:$0xff] %v13764_v16 }
0x2462   : > { %6725 = vmatmul.mubr.f32.gmra.mrb[108].mxu1 %v11267_v61 }
0x2463   : > { %6729 = vmatprep.mubr.f32.mxu1 %v11268_v7 }
0x2466   : > { %6730 = vmatmul.mubr.f32.gmra.mrb[110].mxu1 %v11269_v27 }
0x2467   : > { %6734 = vmatprep.mubr.f32.mxu1 %v11270_v9 }
0x246a   : > { %6735 = vmatmul.mubr.f32.gmra.mrb[112].mxu1 %v11271_v49 }
0x246b   : > { %6739 = vmatprep.mubr.f32.mxu1 %v11272_v41 }
0x246e   : > { %6740 = vmatmul.mubr.f32.gmra.mrb[114].mxu1 %v11273_v23 }
0x246f   : > { %6744 = vmatprep.mubr.f32.mxu1 %v11274_v46 }
0x2472   : > { %6745 = vmatmul.mubr.f32.gmra.mrb[116].mxu1 %v11275_v58 }
0x2473   : > { %6749 = vmatprep.mubr.f32.mxu1 %v11276_v17 }
0x2476   : > { %6750 = vmatmul.mubr.f32.gmra.mrb[118].mxu1 %v11277_v36 }
0x2477   : > { %6754 = vmatprep.mubr.f32.mxu1 %v11278_v38 }
0x247a   : > { %6755 = vmatmul.mubr.f32.gmra.mrb[120].mxu1 %v11279_v3 }
0x247b   : > { %6759 = vmatprep.mubr.f32.mxu1 %v11280_v11 }
0x247e   : > { %6760 = vmatmul.mubr.f32.gmra.mrb[122].mxu1 %v11281_v29 }
0x247f   : > { %6764 = vmatprep.mubr.f32.mxu1 %v11282_v51 }
0x2482   : > { %6765 = vmatmul.mubr.f32.gmra.mrb[124].mxu1 %v11283_v20 }
0x2483   : > { %6769 = vmatprep.mubr.f32.mxu1 %v11284_v5 }
0x2486   : > { %6770 = vmatmul.mubr.f32.gmra.mrb[126].mxu1 %v11285_v35 }
0x2487   : > { %6774 = vmatprep.mubr.f32.mxu1 %v11286_v43 }
0x248a   : > { %6775 = vmatmul.mubr.f32.gmra.mrb[128].mxu1 %v11287_v21 }
0x248b   : > { %6779 = vmatprep.mubr.f32.mxu1 %v11288_v62 }
0x248e   : > { %6780 = vmatmul.mubr.f32.gmra.mrb[130].mxu1 %v11289_v40 }
0x248f   : > { %6784 = vmatprep.mubr.f32.mxu1 %v11290_v6 }
0x2492   : > { %6785 = vmatmul.mubr.f32.gmra.mrb[132].mxu1 %v11291_v28 }
0x2493   : > { %6789 = vmatprep.mubr.f32.mxu1 %v11292_v15 }
0x2496   : > { %6790 = vmatmul.mubr.f32.gmra.mrb[134].mxu1 %v11293_v8 }
0x2497   : > { %6794 = vmatprep.mubr.f32.mxu1 %v11294_v1 }
0x249a   : > { %6795 = vmatmul.mubr.f32.gmra.mrb[136].mxu1 %v11295_v54 }
0x249b   : > { %6799 = vmatprep.mubr.f32.mxu1 %v11296_v60 }
0x249e   : > { %6800 = vmatmul.mubr.f32.gmra.mrb[138].mxu1 %v11297_v53 }
0x249f   : > { %6804 = vmatprep.mubr.f32.mxu1 %v11298_v48 }
0x24a2   : > { %6805 = vmatmul.mubr.f32.gmra.mrb[140].mxu1 %v11299_v10 }
0x24a3   : > { %6809 = vmatprep.mubr.f32.mxu1 %v11300_v52 }
0x24a6   : > { %6810 = vmatmul.mubr.f32.gmra.mrb[142].mxu1 %v11301_v12 }
0x24a7   : > { %6814 = vmatprep.mubr.f32.mxu1 %v11302_v55 }
0x24aa   : > { %6815 = vmatmul.mubr.f32.gmra.mrb[144].mxu1 %v11303_v63 }
0x24ab   : > { %6819 = vmatprep.mubr.f32.mxu1 %v11304_v22 }
0x24ae   : > { %6820 = vmatmul.mubr.f32.gmra.mrb[146].mxu1 %v11305_v25 }
0x2505   : > { %v13766_v59 = vpop.f32.mrb[84].mxu1 }
0x2506   : > { %15864 = vst [vmem:[#allocation82_spill] sm:$0xff] %v13766_v59  ;;  %v6668_v61 = vpop.f32.mrb[85].mxu1  ;;  %9749 = vmatmul.mubr.msk.f32.vlgmr.msra.gmra.mrb[160].mxu0 %vm2557_vm13, %v13766_v59 }
0x2507   : > { %6997 = vmatprep.mubr.f32.mxu0 %v15813_v57 }
0x2509   : > { %v13771_v7 = vpop.f32.mrb[86].mxu1 }
0x250a   : > { %15865 = vst [vmem:[#allocation83_spill] sm:$0xff] %v13771_v7  ;;  %v6673_v27 = vpop.f32.mrb[87].mxu1  ;;  %9750 = vmatmul.mubr.msk.f32.gmra.mrb[162].mxu0 %vm2557_vm13, %v13771_v7 }
0x250b   : > { %7003 = vmatprep.mubr.f32.mxu0 %v15813_v57 }
0x250d   : > { %v13776_v9 = vpop.f32.mrb[88].mxu1 }
0x250e   : > { %15866 = vst [vmem:[#allocation84_spill] sm:$0xff] %v13776_v9  ;;  %v6678_v49 = vpop.f32.mrb[89].mxu1  ;;  %9751 = vmatmul.mubr.msk.f32.gmra.mrb[164].mxu0 %vm2557_vm13, %v13776_v9 }
0x250f   : > { %7009 = vmatprep.mubr.f32.mxu0 %v15813_v57 }
0x2511   : > { %v13781_v41 = vpop.f32.mrb[90].mxu1 }
0x2512   : > { %15867 = vst [vmem:[#allocation85_spill] sm:$0xff] %v13781_v41  ;;  %v6683_v23 = vpop.f32.mrb[91].mxu1  ;;  %9752 = vmatmul.mubr.msk.f32.gmra.mrb[166].mxu0 %vm2557_vm13, %v13781_v41 }
0x2513   : > { %7015 = vmatprep.mubr.f32.mxu0 %v15813_v57 }
0x2515   : > { %v13786_v46 = vpop.f32.mrb[92].mxu1 }
0x2516   : > { %15868 = vst [vmem:[#allocation86_spill] sm:$0xff] %v13786_v46  ;;  %v6688_v58 = vpop.f32.mrb[93].mxu1  ;;  %9753 = vmatmul.mubr.msk.f32.gmra.mrb[168].mxu0 %vm2557_vm13, %v13786_v46 }
0x2517   : > { %7021 = vmatprep.mubr.f32.mxu0 %v15813_v57 }
0x2519   : > { %v13791_v17 = vpop.f32.mrb[94].mxu1 }
0x251a   : > { %15869 = vst [vmem:[#allocation87_spill] sm:$0xff] %v13791_v17  ;;  %v6693_v36 = vpop.f32.mrb[95].mxu1  ;;  %9754 = vmatmul.mubr.msk.f32.gmra.mrb[170].mxu0 %vm2557_vm13, %v13791_v17 }
0x251b   : > { %7027 = vmatprep.mubr.f32.mxu0 %v15813_v57 }
0x251d   : > { %v13796_v38 = vpop.f32.mrb[96].mxu1 }
0x251e   : > { %15870 = vst [vmem:[#allocation88_spill] sm:$0xff] %v13796_v38  ;;  %v6698_v3 = vpop.f32.mrb[97].mxu1  ;;  %9755 = vmatmul.mubr.msk.f32.gmra.mrb[172].mxu0 %vm2557_vm13, %v13796_v38 }
0x251f   : > { %7033 = vmatprep.mubr.f32.mxu0 %v15813_v57 }
0x2521   : > { %v13801_v11 = vpop.f32.mrb[98].mxu1 }
0x2522   : > { %15871 = vst [vmem:[#allocation89_spill] sm:$0xff] %v13801_v11  ;;  %v6703_v29 = vpop.f32.mrb[99].mxu1  ;;  %9756 = vmatmul.mubr.msk.f32.gmra.mrb[174].mxu0 %vm2557_vm13, %v13801_v11 }
0x2523   : > { %7039 = vmatprep.mubr.f32.mxu0 %v15813_v57 }
0x2525   : > { %v13806_v51 = vpop.f32.mrb[100].mxu1 }
0x2526   : > { %15872 = vst [vmem:[#allocation90_spill] sm:$0xff] %v13806_v51  ;;  %9757 = vmatmul.mubr.msk.f32.gmra.mrb[176].mxu0 %vm2557_vm13, %v13806_v51  ;;  %v6708_v20 = vpop.f32.mrb[101].mxu1 }
0x2527   : > { %7045 = vmatprep.mubr.f32.mxu0 %v15813_v57 }
0x2529   : > { %v13811_v5 = vpop.f32.mrb[102].mxu1 }
0x252a   : > { %15873 = vst [vmem:[#allocation91_spill] sm:$0xff] %v13811_v5  ;;  %9758 = vmatmul.mubr.msk.f32.gmra.mrb[178].mxu0 %vm2557_vm13, %v13811_v5  ;;  %v6713_v35 = vpop.f32.mrb[103].mxu1 }
0x252b   : > { %7051 = vmatprep.mubr.f32.mxu0 %v15813_v57 }
0x252d   : > { %v13816_v43 = vpop.f32.mrb[104].mxu1 }
0x252e   : > { %15874 = vst [vmem:[#allocation59_spill] sm:$0xff] %v13816_v43  ;;  %9759 = vmatmul.mubr.msk.f32.gmra.mrb[180].mxu0 %vm2557_vm13, %v13816_v43  ;;  %v6718_v21 = vpop.f32.mrb[105].mxu1 }
0x252f   : > { %7057 = vmatprep.mubr.f32.mxu0 %v15813_v57 }
0x2531   : > { %v13821_v62 = vpop.f32.mrb[106].mxu1 }
0x2532   : > { %15875 = vst [vmem:[#allocation56_spill] sm:$0xff] %v13821_v62  ;;  %9760 = vmatmul.mubr.msk.f32.gmra.mrb[182].mxu0 %vm2557_vm13, %v13821_v62  ;;  %v6723_v40 = vpop.f32.mrb[107].mxu1 }
0x2533   : > { %7063 = vmatprep.mubr.f32.mxu0 %v15813_v57 }
0x2535   : > { %v13826_v6 = vpop.f32.mrb[108].mxu1 }
0x2536   : > { %15876 = vst [vmem:[#allocation58_spill] sm:$0xff] %v13826_v6  ;;  %9761 = vmatmul.mubr.msk.f32.gmra.mrb[184].mxu0 %vm2557_vm13, %v13826_v6  ;;  %v6728_v28 = vpop.f32.mrb[109].mxu1 }
0x2537   : > { %7069 = vmatprep.mubr.f32.mxu0 %v15813_v57 }
0x2539   : > { %v13831_v15 = vpop.f32.mrb[110].mxu1 }
0x253a   : > { %15877 = vst [vmem:[#allocation57_spill] sm:$0xff] %v13831_v15  ;;  %9762 = vmatmul.mubr.msk.f32.gmra.mrb[186].mxu0 %vm2557_vm13, %v13831_v15  ;;  %v6733_v8 = vpop.f32.mrb[111].mxu1 }
0x253b   : > { %7075 = vmatprep.mubr.f32.mxu0 %v15813_v57 }
0x253d   : > { %v13836_v1 = vpop.f32.mrb[112].mxu1 }
0x253e   : > { %15878 = vst [vmem:[#allocation62_spill] sm:$0xff] %v13836_v1  ;;  %9763 = vmatmul.mubr.msk.f32.gmra.mrb[188].mxu0 %vm2557_vm13, %v13836_v1  ;;  %v6738_v54 = vpop.f32.mrb[113].mxu1 }
0x253f   : > { %7081 = vmatprep.mubr.f32.mxu0 %v15813_v57 }
0x2541   : > { %v13841_v60 = vpop.f32.mrb[114].mxu1 }
0x2542   : > { %15879 = vst [vmem:[#allocation92_spill] sm:$0xff] %v13841_v60  ;;  %9764 = vmatmul.mubr.msk.f32.gmra.mrb[190].mxu0 %vm2557_vm13, %v13841_v60  ;;  %v6743_v53 = vpop.f32.mrb[115].mxu1 }
0x2543   : > { %7087 = vmatprep.mubr.f32.mxu0 %v15813_v57 }
0x2545   : > { %v13846_v48 = vpop.f32.mrb[116].mxu1 }
0x2546   : > { %15880 = vst [vmem:[#allocation63_spill] sm:$0xff] %v13846_v48  ;;  %9765 = vmatmul.mubr.msk.f32.gmra.mrb[192].mxu0 %vm2557_vm13, %v13846_v48  ;;  %v6748_v10 = vpop.f32.mrb[117].mxu1 }
0x2547   : > { %7093 = vmatprep.mubr.f32.mxu0 %v15813_v57 }
0x2549   : > { %v13851_v52 = vpop.f32.mrb[118].mxu1 }
0x254a   : > { %15881 = vst [vmem:[#allocation64_spill] sm:$0xff] %v13851_v52  ;;  %9766 = vmatmul.mubr.msk.f32.gmra.mrb[194].mxu0 %vm2557_vm13, %v13851_v52  ;;  %v6753_v12 = vpop.f32.mrb[119].mxu1 }
0x254b   : > { %7099 = vmatprep.mubr.f32.mxu0 %v15813_v57 }
0x254d   : > { %v13856_v55 = vpop.f32.mrb[120].mxu1 }
0x254e   : > { %15882 = vst [vmem:[#allocation65_spill] sm:$0xff] %v13856_v55  ;;  %9767 = vmatmul.mubr.msk.f32.gmra.mrb[196].mxu0 %vm2557_vm13, %v13856_v55  ;;  %v6758_v63 = vpop.f32.mrb[121].mxu1 }
0x254f   : > { %7105 = vmatprep.mubr.f32.mxu0 %v15813_v57 }
0x2551   : > { %v13861_v22 = vpop.f32.mrb[122].mxu1 }
0x2552   : > { %15883 = vst [vmem:[#allocation95_spill] sm:$0xff] %v13861_v22  ;;  %9768 = vmatmul.mubr.msk.f32.gmra.mrb[198].mxu0 %vm2557_vm13, %v13861_v22  ;;  %v6763_v25 = vpop.f32.mrb[123].mxu1 }
0x2553   : > { %7111 = vmatprep.mubr.f32.mxu0 %v15813_v57 }
0x2555   : > { %v13866_v61 = vpop.f32.mrb[124].mxu1 }
0x2556   : > { %15884 = vst [vmem:[#allocation97_spill] sm:$0xff] %v13866_v61  ;;  %9769 = vmatmul.mubr.msk.f32.gmra.mrb[200].mxu0 %vm2557_vm13, %v13866_v61  ;;  %v6768_v27 = vpop.f32.mrb[125].mxu1 }
0x2557   : > { %7117 = vmatprep.mubr.f32.mxu0 %v15813_v57 }
0x2559   : > { %v13871_v49 = vpop.f32.mrb[126].mxu1 }
0x255a   : > { %15885 = vst [vmem:[#allocation96_spill] sm:$0xff] %v13871_v49  ;;  %9770 = vmatmul.mubr.msk.f32.gmra.mrb[202].mxu0 %vm2557_vm13, %v13871_v49  ;;  %v6773_v23 = vpop.f32.mrb[127].mxu1 }
0x255b   : > { %7123 = vmatprep.mubr.f32.mxu0 %v15813_v57 }
0x255d   : > { %v13876_v58 = vpop.f32.mrb[128].mxu1 }
0x255e   : > { %15886 = vst [vmem:[#allocation66_spill] sm:$0xff] %v13876_v58  ;;  %9771 = vmatmul.mubr.msk.f32.gmra.mrb[204].mxu0 %vm2557_vm13, %v13876_v58  ;;  %v6778_v36 = vpop.f32.mrb[129].mxu1 }
0x255f   : > { %7129 = vmatprep.mubr.f32.mxu0 %v15813_v57 }
0x2561   : > { %v13881_v3 = vpop.f32.mrb[130].mxu1 }
0x2562   : > { %15887 = vst [vmem:[#allocation94_spill] sm:$0xff] %v13881_v3  ;;  %9772 = vmatmul.mubr.msk.f32.gmra.mrb[206].mxu0 %vm2557_vm13, %v13881_v3  ;;  %v6783_v29 = vpop.f32.mrb[131].mxu1 }
0x2563   : > { %7135 = vmatprep.mubr.f32.mxu0 %v15813_v57 }
0x2565   : > { %v13886_v20 = vpop.f32.mrb[132].mxu1 }
0x2566   : > { %15888 = vst [vmem:[#allocation67_spill] sm:$0xff] %v13886_v20  ;;  %v6788_v35 = vpop.f32.mrb[133].mxu1  ;;  %9773 = vmatmul.mubr.msk.f32.gmra.mrb[208].mxu0 %vm2557_vm13, %v13886_v20 }
0x2567   : > { %7141 = vmatprep.mubr.f32.mxu0 %v15813_v57 }
0x2569   : > { %v13891_v21 = vpop.f32.mrb[134].mxu1 }
0x256a   : > { %15889 = vst [vmem:[#allocation68_spill] sm:$0xff] %v13891_v21  ;;  %v6793_v40 = vpop.f32.mrb[135].mxu1  ;;  %9774 = vmatmul.mubr.msk.f32.gmra.mrb[210].mxu0 %vm2557_vm13, %v13891_v21 }
0x256b   : > { %7147 = vmatprep.mubr.f32.mxu0 %v15813_v57 }
0x256d   : > { %v13896_v28 = vpop.f32.mrb[136].mxu1 }
0x256e   : > { %15890 = vst [vmem:[#allocation69_spill] sm:$0xff] %v13896_v28  ;;  %v6798_v8 = vpop.f32.mrb[137].mxu1  ;;  %9775 = vmatmul.mubr.msk.f32.gmra.mrb[212].mxu0 %vm2557_vm13, %v13896_v28 }
0x256f   : > { %7153 = vmatprep.mubr.f32.mxu0 %v15813_v57 }
0x2571   : > { %v13901_v54 = vpop.f32.mrb[138].mxu1 }
0x2572   : > { %15891 = vst [vmem:[#allocation71_spill] sm:$0xff] %v13901_v54  ;;  %v6803_v53 = vpop.f32.mrb[139].mxu1  ;;  %9776 = vmatmul.mubr.msk.f32.gmra.mrb[214].mxu0 %vm2557_vm13, %v13901_v54 }
0x2573   : > { %7159 = vmatprep.mubr.f32.mxu0 %v15813_v57 }
0x2575   : > { %v13906_v10 = vpop.f32.mrb[140].mxu1 }
0x2576   : > { %15892 = vst [vmem:[#allocation70_spill] sm:$0xff] %v13906_v10  ;;  %v6808_v12 = vpop.f32.mrb[141].mxu1  ;;  %9777 = vmatmul.mubr.msk.f32.gmra.mrb[216].mxu0 %vm2557_vm13, %v13906_v10 }
0x2577   : > { %7165 = vmatprep.mubr.f32.mxu0 %v15813_v57 }
0x2579   : > { %v13911_v63 = vpop.f32.mrb[142].mxu1 }
0x257a   : > { %15893 = vst [vmem:[#allocation73_spill] sm:$0xff] %v13911_v63  ;;  %v6813_v25 = vpop.f32.mrb[143].mxu1  ;;  %9778 = vmatmul.mubr.msk.f32.gmra.mrb[218].mxu0 %vm2557_vm13, %v13911_v63 }
0x257b   : > { %7171 = vmatprep.mubr.f32.mxu0 %v15813_v57 }
0x257d   : > { %v13916_v27 = vpop.f32.mrb[144].mxu1 }
0x257e   : > { %15894 = vst [vmem:[#allocation101_spill] sm:$0xff] %v13916_v27  ;;  %v6818_v23 = vpop.f32.mrb[145].mxu1  ;;  %9779 = vmatmul.mubr.msk.f32.gmra.mrb[220].mxu0 %vm2557_vm13, %v13916_v27 }
0x257f   : > { %7177 = vmatprep.mubr.f32.mxu0 %v15813_v57 }
0x2581   : > { %v13921_v36 = vpop.f32.mrb[146].mxu1 }
0x2582   : > { %15895 = vst [vmem:[#allocation99_spill] sm:$0xff] %v13921_v36  ;;  %v6823_v29 = vpop.f32.mrb[147].mxu1  ;;  %9780 = vmatmul.mubr.msk.f32.gmra.mrb[222].mxu0 %vm2557_vm13, %v13921_v36 }
0x2583   : > { %8950 = vmatprep.mubr.f32.mxu0 %v15813_v57 }
0x25d9   : > { %v6993_v35 = vpop.f32.mrb[160].mxu0 }
0x25da   : > { %v13926_v40 = vmul.f32 0.5, %v6993_v35  ;;  %v6995_v8 = vpop.f32.mrb[161].mxu0 }
0x25db   : > { %v13928_v53 = vmul.f32 0.5, %v6995_v8 }
0x25dd   : > { %v7248_v12 = vmax.f32 %v13926_v40, %v13928_v53  ;;  %v6999_v25 = vpop.f32.mrb[162].mxu0 }
0x25de   : > { %v13932_v23 = vmul.f32 0.5, %v6999_v25  ;;  %v7001_v13 = vpop.f32.mrb[163].mxu0 }
0x25df   : > { %v13934_v19 = vmul.f32 0.5, %v7001_v13  ;;  %7249 = vmax.xlane.f32.xlu1 %v7248_v12 }
0x25e1   : > { %v7251_v29 = vmax.f32 %v13932_v23, %v13934_v19  ;;  %v7005_v37 = vpop.f32.mrb[164].mxu0 }
0x25e2   : > { %v13938_v24 = vmul.f32 0.5, %v7005_v37  ;;  %v7007_v35 = vpop.f32.mrb[165].mxu0 }
0x25e3   : > { %v13940_v4 = vmul.f32 0.5, %v7007_v35  ;;  %7252 = vmax.xlane.f32.xlu0 %v7251_v29 }
0x25e5   : > { %v7254_v8 = vmax.f32 %v13938_v24, %v13940_v4  ;;  %v7011_v30 = vpop.f32.mrb[166].mxu0 }
0x25e6   : > { %v13944_v25 = vmul.f32 0.5, %v7011_v30  ;;  %v7013_v14 = vpop.f32.mrb[167].mxu0 }
0x25e7   : > { %v13946_v13 = vmul.f32 0.5, %v7013_v14  ;;  %7255 = vmax.xlane.f32.xlu0 %v7254_v8 }
0x25e9   : > { %v7257_v12 = vmax.f32 %v13944_v25, %v13946_v13  ;;  %v7017_v33 = vpop.f32.mrb[168].mxu0 }
0x25ea   : > { %v13950_v37 = vmul.f32 0.5, %v7017_v33  ;;  %v7019_v56 = vpop.f32.mrb[169].mxu0 }
0x25eb   : > { %v13952_v35 = vmul.f32 0.5, %v7019_v56  ;;  %7258 = vmax.xlane.f32.xlu1 %v7257_v12 }
0x25ed   : > { %v7260_v29 = vmax.f32 %v13950_v37, %v13952_v35  ;;  %v7023_v32 = vpop.f32.mrb[170].mxu0 }
0x25ee   : > { %v13956_v30 = vmul.f32 0.5, %v7023_v32  ;;  %v7025_v44 = vpop.f32.mrb[171].mxu0 }
0x25ef   : > { %v13958_v14 = vmul.f32 0.5, %v7025_v44  ;;  %7261 = vmax.xlane.f32.xlu0 %v7260_v29 }
0x25f1   : > { %v7263_v8 = vmax.f32 %v13956_v30, %v13958_v14  ;;  %v7029_v18 = vpop.f32.mrb[172].mxu0 }
0x25f2   : > { %v13962_v33 = vmul.f32 0.5, %v7029_v18  ;;  %v7031_v34 = vpop.f32.mrb[173].mxu0 }
0x25f3   : > { %v13964_v56 = vmul.f32 0.5, %v7031_v34  ;;  %7264 = vmax.xlane.f32.xlu1 %v7263_v8 }
0x25f5   : > { %v7266_v12 = vmax.f32 %v13962_v33, %v13964_v56  ;;  %v7035_v2 = vpop.f32.mrb[174].mxu0 }
0x25f6   : > { %v13968_v32 = vmul.f32 0.5, %v7035_v2  ;;  %v7037_v26 = vpop.f32.mrb[175].mxu0 }
0x25f7   : > { %v13970_v44 = vmul.f32 0.5, %v7037_v26  ;;  %7267 = vmax.xlane.f32.xlu0 %v7266_v12 }
0x25f9   : > { %v7269_v29 = vmax.f32 %v13968_v32, %v13970_v44  ;;  %v7041_v45 = vpop.f32.mrb[176].mxu0 }
0x25fa   : > { %v13974_v18 = vmul.f32 0.5, %v7041_v45  ;;  %v7043_v42 = vpop.f32.mrb[177].mxu0 }
0x25fb   : > { %v13976_v34 = vmul.f32 0.5, %v7043_v42  ;;  %7270 = vmax.xlane.f32.xlu1 %v7269_v29 }
0x25fd   : > { %v7272_v8 = vmax.f32 %v13974_v18, %v13976_v34  ;;  %v7047_v39 = vpop.f32.mrb[178].mxu0 }
0x25fe   : > { %v13980_v2 = vmul.f32 0.5, %v7047_v39  ;;  %v7049_v0 = vpop.f32.mrb[179].mxu0 }
0x25ff   : > { %v13982_v26 = vmul.f32 0.5, %v7049_v0  ;;  %7273 = vmax.xlane.f32.xlu0 %v7272_v8 }
0x2601   : > { %v7275_v12 = vmax.f32 %v13980_v2, %v13982_v26  ;;  %v7053_v57 = vpop.f32.mrb[180].mxu0 }
0x2602   : > { %v13986_v45 = vmul.f32 0.5, %v7053_v57  ;;  %v7055_v31 = vpop.f32.mrb[181].mxu0 }
0x2603   : > { %v13988_v42 = vmul.f32 0.5, %v7055_v31  ;;  %7276 = vmax.xlane.f32.xlu1 %v7275_v12 }
0x2605   : > { %v7278_v29 = vmax.f32 %v13986_v45, %v13988_v42  ;;  %v7059_v47 = vpop.f32.mrb[182].mxu0 }
0x2606   : > { %v13992_v39 = vmul.f32 0.5, %v7059_v47  ;;  %v7061_v50 = vpop.f32.mrb[183].mxu0 }
0x2607   : > { %v13994_v0 = vmul.f32 0.5, %v7061_v50  ;;  %7279 = vmax.xlane.f32.xlu0 %v7278_v29 }
0x2609   : > { %v7281_v8 = vmax.f32 %v13992_v39, %v13994_v0  ;;  %v7065_v16 = vpop.f32.mrb[184].mxu0 }
0x260a   : > { %v13998_v57 = vmul.f32 0.5, %v7065_v16  ;;  %v7067_v36 = vpop.f32.mrb[185].mxu0 }
0x260b   : > { %v14000_v31 = vmul.f32 0.5, %v7067_v36  ;;  %7282 = vmax.xlane.f32.xlu1 %v7281_v8 }
0x260d   : > { %v7284_v12 = vmax.f32 %v13998_v57, %v14000_v31  ;;  %v7071_v27 = vpop.f32.mrb[186].mxu0 }
0x260e   : > { %v14004_v47 = vmul.f32 0.5, %v7071_v27  ;;  %v7073_v63 = vpop.f32.mrb[187].mxu0 }
0x260f   : > { %v14006_v50 = vmul.f32 0.5, %v7073_v63  ;;  %7285 = vmax.xlane.f32.xlu0 %v7284_v12 }
0x2611   : > { %v7287_v29 = vmax.f32 %v14004_v47, %v14006_v50  ;;  %v7077_v10 = vpop.f32.mrb[188].mxu0 }
0x2612   : > { %v14010_v16 = vmul.f32 0.5, %v7077_v10  ;;  %v7079_v54 = vpop.f32.mrb[189].mxu0 }
0x2613   : > { %v14012_v36 = vmul.f32 0.5, %v7079_v54  ;;  %7288 = vmax.xlane.f32.xlu1 %v7287_v29 }
0x2615   : > { %v7290_v8 = vmax.f32 %v14010_v16, %v14012_v36  ;;  %v7083_v28 = vpop.f32.mrb[190].mxu0 }
0x2616   : > { %v14016_v27 = vmul.f32 0.5, %v7083_v28  ;;  %v7085_v21 = vpop.f32.mrb[191].mxu0 }
0x2617   : > { %v14018_v63 = vmul.f32 0.5, %v7085_v21  ;;  %7291 = vmax.xlane.f32.xlu0 %v7290_v8 }
0x2619   : > { %v7293_v12 = vmax.f32 %v14016_v27, %v14018_v63  ;;  %v7089_v20 = vpop.f32.mrb[192].mxu0 }
0x261a   : > { %v14022_v10 = vmul.f32 0.5, %v7089_v20  ;;  %v7091_v3 = vpop.f32.mrb[193].mxu0 }
0x261b   : > { %v14024_v54 = vmul.f32 0.5, %v7091_v3  ;;  %7294 = vmax.xlane.f32.xlu1 %v7293_v12 }
0x261d   : > { %v7296_v29 = vmax.f32 %v14022_v10, %v14024_v54  ;;  %v7095_v58 = vpop.f32.mrb[194].mxu0 }
0x261e   : > { %v14028_v28 = vmul.f32 0.5, %v7095_v58  ;;  %v7097_v49 = vpop.f32.mrb[195].mxu0 }
0x261f   : > { %v14030_v21 = vmul.f32 0.5, %v7097_v49  ;;  %7297 = vmax.xlane.f32.xlu0 %v7296_v29 }
0x2621   : > { %15896 = vst [vmem:[#allocation72_spill] sm:$0xff] %v14030_v21  ;;  %v7299_v8 = vmax.f32 %v14028_v28, %v14030_v21  ;;  %v7101_v61 = vpop.f32.mrb[196].mxu0 }
0x2622   : > { %v14034_v20 = vmul.f32 0.5, %v7101_v61  ;;  %v7103_v22 = vpop.f32.mrb[197].mxu0 }
0x2623   : > { %v14036_v3 = vmul.f32 0.5, %v7103_v22  ;;  %7300 = vmax.xlane.f32.xlu1 %v7299_v8 }
0x2624   : > { %15897 = vst [vmem:[#allocation74_spill] sm:$0xff] %v14034_v20 }
0x2625   : > { %15898 = vst [vmem:[#allocation75_spill] sm:$0xff] %v14036_v3  ;;  %v7302_v12 = vmax.f32 %v14034_v20, %v14036_v3  ;;  %v7107_v55 = vpop.f32.mrb[198].mxu0 }
0x2626   : > { %v14040_v58 = vmul.f32 0.5, %v7107_v55  ;;  %v7109_v52 = vpop.f32.mrb[199].mxu0 }
0x2627   : > { %v14042_v49 = vmul.f32 0.5, %v7109_v52  ;;  %7303 = vmax.xlane.f32.xlu0 %v7302_v12 }
0x2628   : > { %15899 = vst [vmem:[#allocation98_spill] sm:$0xff] %v14040_v58 }
0x2629   : > { %15900 = vst [vmem:[#allocation100_spill] sm:$0xff] %v14042_v49  ;;  %v7305_v29 = vmax.f32 %v14040_v58, %v14042_v49  ;;  %v7113_v48 = vpop.f32.mrb[200].mxu0 }
0x262a   : > { %v14046_v61 = vmul.f32 0.5, %v7113_v48  ;;  %v7115_v60 = vpop.f32.mrb[201].mxu0 }
0x262b   : > { %v14048_v22 = vmul.f32 0.5, %v7115_v60  ;;  %7306 = vmax.xlane.f32.xlu1 %v7305_v29 }
0x262c   : > { %15901 = vst [vmem:[#allocation77_spill] sm:$0xff] %v14046_v61 }
0x262d   : > { %15902 = vst [vmem:[#allocation105_spill] sm:$0xff] %v14048_v22  ;;  %v7308_v8 = vmax.f32 %v14046_v61, %v14048_v22  ;;  %v7119_v1 = vpop.f32.mrb[202].mxu0 }
0x262e   : > { %v14052_v55 = vmul.f32 0.5, %v7119_v1  ;;  %v7121_v15 = vpop.f32.mrb[203].mxu0 }
0x262f   : > { %v14054_v52 = vmul.f32 0.5, %v7121_v15  ;;  %7309 = vmax.xlane.f32.xlu0 %v7308_v8 }
0x2630   : > { %15903 = vst [vmem:[#allocation103_spill] sm:$0xff] %v14052_v55 }
0x2631   : > { %15904 = vst [vmem:[#allocation76_spill] sm:$0xff] %v14054_v52  ;;  %v7311_v12 = vmax.f32 %v14052_v55, %v14054_v52  ;;  %v7125_v6 = vpop.f32.mrb[204].mxu0 }
0x2632   : > { %v14058_v48 = vmul.f32 0.5, %v7125_v6  ;;  %v7127_v62 = vpop.f32.mrb[205].mxu0 }
0x2633   : > { %v14060_v60 = vmul.f32 0.5, %v7127_v62  ;;  %7312 = vmax.xlane.f32.xlu1 %v7311_v12 }
0x2634   : > { %15905 = vst [vmem:[#allocation60_spill] sm:$0xff] %v14058_v48 }
0x2635   : > { %15906 = vst [vmem:[#allocation93_spill] sm:$0xff] %v14060_v60  ;;  %v7314_v29 = vmax.f32 %v14058_v48, %v14060_v60  ;;  %v7131_v43 = vpop.f32.mrb[206].mxu0 }
0x2636   : > { %v14064_v1 = vmul.f32 0.5, %v7131_v43  ;;  %v7133_v5 = vpop.f32.mrb[207].mxu0 }
0x2637   : > { %v14066_v15 = vmul.f32 0.5, %v7133_v5  ;;  %7315 = vmax.xlane.f32.xlu0 %v7314_v29 }
0x2638   : > { %15907 = vst [vmem:[#allocation61_spill] sm:$0xff] %v14064_v1 }
0x2639   : > { %15908 = vst [vmem:[#allocation54_spill] sm:$0xff] %v14066_v15  ;;  %v7317_v8 = vmax.f32 %v14064_v1, %v14066_v15  ;;  %v7137_v51 = vpop.f32.mrb[208].mxu0 }
0x263a   : > { %v7139_v6 = vpop.f32.mrb[209].mxu0 }
0x263b   : > { %7318 = vmax.xlane.f32.xlu1 %v7317_v8 }
0x263d   : > { %v7143_v11 = vpop.f32.mrb[210].mxu0 }
0x263e   : > { %v7145_v62 = vpop.f32.mrb[211].mxu0 }
0x2641   : > { %v7149_v38 = vpop.f32.mrb[212].mxu0 }
0x2642   : > { %v7151_v12 = vpop.f32.mrb[213].mxu0 }
0x2645   : > { %v14070_v17 = vpop.f32.mrb[214].mxu0 }
0x2646   : > { %v14072_v46 = vpop.f32.mrb[215].mxu0 }
0x2649   : > { %v14074_v43 = vpop.f32.mrb[216].mxu0 }
0x264a   : > { %v14076_v41 = vpop.f32.mrb[217].mxu0 }
0x264d   : > { %v14078_v5 = vpop.f32.mrb[218].mxu0 }
0x264e   : > { %v14080_v29 = vpop.f32.mrb[219].mxu0 }
0x2651   : > { %v14082_v9 = vpop.f32.mrb[220].mxu0 }
0x2652   : > { %v14084_v7 = vpop.f32.mrb[221].mxu0 }
0x2655   : > { %v14086_v8 = vpop.f32.mrb[222].mxu0 }
0x2656   : > { %v14088_v59 = vpop.f32.mrb[223].mxu0 }
0x266c   : > { %v7250_v15 = vpop.xlane.xlu1 %7249 }
0x266d   : > { %v7344_v1 = vsub.f32 %v13926_v40, %v7250_v15  ;;  %v7345_v60 = vsub.f32 %v13928_v53, %v7250_v15 }
0x266f   : > { %v7408_v48 = vmul.f32 1.442695, %v7344_v1  ;;  %v7410_v52 = vmul.f32 1.442695, %v7345_v60  ;;  %v14116_v60 = vmul.f32 0.5, %v7145_v62 }
0x2670   : > { %v7253_v55 = vpop.xlane.xlu0 %7252 }
0x2671   : > { %10853 = vpow2.f32 %v7408_v48  ;;  %v7346_v22 = vsub.f32 %v13932_v23, %v7253_v55  ;;  %v7347_v61 = vsub.f32 %v13934_v19, %v7253_v55  ;;  %v14098_v19 = vmul.f32 0.5, %v7137_v51 }
0x2672   : > { %10855 = vpow2.f32 %v7410_v52  ;;  %v14114_v52 = vmul.f32 0.5, %v7143_v11 }
0x2673   : > { %v7412_v49 = vmul.f32 1.442695, %v7346_v22  ;;  %v7414_v58 = vmul.f32 1.442695, %v7347_v61  ;;  %v14100_v22 = vmul.f32 0.5, %v7139_v6 }
0x2674   : > { %v7256_v3 = vpop.xlane.xlu0 %7255 }
0x2675   : > { %10857 = vpow2.f32 %v7412_v49  ;;  %v7348_v20 = vsub.f32 %v13938_v24, %v7256_v3  ;;  %v7349_v21 = vsub.f32 %v13940_v4, %v7256_v3  ;;  %v7320_v51 = vmax.f32 %v14098_v19, %v14100_v22 }
0x2676   : > { %10859 = vpow2.f32 %v7414_v58 }
0x2677   : > { %v7416_v40 = vmul.f32 1.442695, %v7348_v20  ;;  %v7418_v53 = vmul.f32 1.442695, %v7349_v21 }
0x2678   : > { %v7259_v1 = vpop.xlane.xlu1 %7258 }
0x2679   : > { %10861 = vpow2.f32 %v7416_v40  ;;  %v7350_v48 = vsub.f32 %v13944_v25, %v7259_v1  ;;  %v7351_v23 = vsub.f32 %v13946_v13, %v7259_v1  ;;  %v14126_v1 = vmul.f32 0.5, %v7151_v12 }
0x267a   : > { %10863 = vpow2.f32 %v7418_v53  ;;  %v14124_v53 = vmul.f32 0.5, %v7149_v38 }
0x267b   : > { %v14102_v61 = vpop.eup %10853  ;;  %v7420_v49 = vmul.f32 1.442695, %v7350_v48  ;;  %v7422_v24 = vmul.f32 1.442695, %v7351_v23  ;;  %v7323_v23 = vmax.f32 %v14114_v52, %v14116_v60 }
0x267c   : > { %v14104_v55 = vpop.eup %10855  ;;  %v7262_v4 = vpop.xlane.xlu0 %7261 }
0x267d   : > { %10865 = vpow2.f32 %v7420_v49  ;;  %v7352_v21 = vsub.f32 %v13950_v37, %v7262_v4  ;;  %v7353_v20 = vsub.f32 %v13952_v35, %v7262_v4  ;;  %v7536_v25 = vadd.f32 %v14104_v55, %v14102_v61 }
0x267e   : > { %10867 = vpow2.f32 %v7422_v24  ;;  %v7326_v24 = vmax.f32 %v14124_v53, %v14126_v1 }
0x267f   : > { %v14112_v13 = vpop.eup %10857  ;;  %v7424_v3 = vmul.f32 1.442695, %v7352_v21  ;;  %v7426_v58 = vmul.f32 1.442695, %v7353_v20  ;;  %7537 = vadd.xlane.f32.xlu0 %v7536_v25  ;;  %v14143_v25 = vmul.f32 0.5, %v14070_v17  ;;  %v14158_v17 = vmul.f32 0.5, %v14076_v41 }
0x2680   : > { %v14118_v15 = vpop.eup %10859  ;;  %v7265_v37 = vpop.xlane.xlu1 %7264 }
0x2681   : > { %10869 = vpow2.f32 %v7424_v3  ;;  %v7354_v35 = vsub.f32 %v13956_v30, %v7265_v37  ;;  %v7355_v6 = vsub.f32 %v13958_v14, %v7265_v37  ;;  %v7539_v40 = vadd.f32 %v14118_v15, %v14112_v13 }
0x2682   : > { %10871 = vpow2.f32 %v7426_v58 }
0x2683   : > { %v14128_v11 = vpop.eup %10861  ;;  %v7428_v62 = vmul.f32 1.442695, %v7354_v35  ;;  %v7430_v48 = vmul.f32 1.442695, %v7355_v6  ;;  %7540 = vadd.xlane.f32.xlu1 %v7539_v40  ;;  %7321 = vmax.xlane.f32.xlu0 %v7320_v51  ;;  %v14155_v35 = vmul.f32 0.5, %v14074_v43 }
0x2684   : > { %v14132_v30 = vpop.eup %10863  ;;  %v7268_v14 = vpop.xlane.xlu0 %7267 }
0x2685   : > { %10873 = vpow2.f32 %v7428_v62  ;;  %v7356_v49 = vsub.f32 %v13962_v33, %v7268_v14  ;;  %v7357_v38 = vsub.f32 %v13964_v56, %v7268_v14  ;;  %v7542_v12 = vadd.f32 %v14132_v30, %v14128_v11 }
0x2686   : > { %10875 = vpow2.f32 %v7430_v48  ;;  %v14146_v33 = vmul.f32 0.5, %v14072_v46 }
0x2687   : > { %v14140_v4 = vpop.eup %10865  ;;  %v7432_v21 = vmul.f32 1.442695, %v7356_v49  ;;  %v7434_v20 = vmul.f32 1.442695, %v7357_v38  ;;  %7543 = vadd.xlane.f32.xlu0 %v7542_v12  ;;  %7324 = vmax.xlane.f32.xlu1 %v7323_v23  ;;  %v7332_v23 = vmax.f32 %v14155_v35, %v14158_v17  ;;  %v14175_v12 = vmul.f32 0.5, %v14078_v5 }
0x2688   : > { %v14148_v56 = vpop.eup %10867  ;;  %v7271_v51 = vpop.xlane.xlu1 %7270  ;;  %v7329_v62 = vmax.f32 %v14143_v25, %v14146_v33  ;;  %v14190_v5 = vmul.f32 0.5, %v14084_v7 }
0x2689   : > { %10877 = vpow2.f32 %v7432_v21  ;;  %v7358_v3 = vsub.f32 %v13968_v32, %v7271_v51  ;;  %v7359_v58 = vsub.f32 %v13970_v44, %v7271_v51  ;;  %v7545_v37 = vadd.f32 %v14148_v56, %v14140_v4 }
0x268a   : > { %10879 = vpow2.f32 %v7434_v20 }
0x268b   : > { %v14160_v46 = vpop.eup %10869  ;;  %v7436_v6 = vmul.f32 1.442695, %v7358_v3  ;;  %v7438_v40 = vmul.f32 1.442695, %v7359_v58  ;;  %7546 = vadd.xlane.f32.xlu1 %v7545_v37  ;;  %7327 = vmax.xlane.f32.xlu0 %v7326_v24  ;;  %v14187_v3 = vmul.f32 0.5, %v14082_v9 }
0x268c   : > { %v14164_v32 = vpop.eup %10871  ;;  %v7274_v44 = vpop.xlane.xlu0 %7273 }
0x268d   : > { %10881 = vpow2.f32 %v7436_v6  ;;  %v7360_v48 = vsub.f32 %v13974_v18, %v7274_v44  ;;  %v7361_v43 = vsub.f32 %v13976_v34, %v7274_v44  ;;  %v7548_v41 = vadd.f32 %v14164_v32, %v14160_v46 }
0x268e   : > { %10883 = vpow2.f32 %v7438_v40  ;;  %v14178_v18 = vmul.f32 0.5, %v14080_v29 }
0x268f   : > { %v14172_v14 = vpop.eup %10873  ;;  %v7440_v49 = vmul.f32 1.442695, %v7360_v48  ;;  %v7442_v38 = vmul.f32 1.442695, %v7361_v43  ;;  %7549 = vadd.xlane.f32.xlu0 %v7548_v41  ;;  %7330 = vmax.xlane.f32.xlu1 %v7329_v62  ;;  %v7338_v62 = vmax.f32 %v14187_v3, %v14190_v5  ;;  %v14207_v41 = vmul.f32 0.5, %v14086_v8 }
0x2690   : > { %v14180_v34 = vpop.eup %10875  ;;  %v7277_v24 = vpop.xlane.xlu1 %7276  ;;  %v7335_v6 = vmax.f32 %v14175_v12, %v14178_v18 }
0x2691   : > { %10885 = vpow2.f32 %v7440_v49  ;;  %v7362_v21 = vsub.f32 %v13980_v2, %v7277_v24  ;;  %v7363_v20 = vsub.f32 %v13982_v26, %v7277_v24  ;;  %v7551_v51 = vadd.f32 %v14180_v34, %v14172_v14 }
0x2692   : > { %10887 = vpow2.f32 %v7442_v38 }
0x2693   : > { %v14192_v29 = vpop.eup %10877  ;;  %v7444_v58 = vmul.f32 1.442695, %v7362_v21  ;;  %v7446_v37 = vmul.f32 1.442695, %v7363_v20  ;;  %7552 = vadd.xlane.f32.xlu1 %v7551_v51  ;;  %7333 = vmax.xlane.f32.xlu0 %v7332_v23 }
0x2694   : > { %v14196_v2 = vpop.eup %10879  ;;  %v7280_v26 = vpop.xlane.xlu0 %7279 }
0x2695   : > { %10889 = vpow2.f32 %v7444_v58  ;;  %v7364_v40 = vsub.f32 %v13986_v45, %v7280_v26  ;;  %v7365_v9 = vsub.f32 %v13988_v42, %v7280_v26  ;;  %v7554_v7 = vadd.f32 %v14196_v2, %v14192_v29 }
0x2696   : > { %10891 = vpow2.f32 %v7446_v37  ;;  %v14210_v45 = vmul.f32 0.5, %v14088_v59 }
0x2697   : > { %v14204_v44 = vpop.eup %10881  ;;  %v7448_v48 = vmul.f32 1.442695, %v7364_v40  ;;  %v7450_v43 = vmul.f32 1.442695, %v7365_v9  ;;  %7555 = vadd.xlane.f32.xlu0 %v7554_v7  ;;  %7336 = vmax.xlane.f32.xlu1 %v7335_v6 }
0x2698   : > { %v14212_v42 = vpop.eup %10883  ;;  %v7283_v23 = vpop.xlane.xlu1 %7282  ;;  %v7341_v59 = vmax.f32 %v14207_v41, %v14210_v45 }
0x2699   : > { %10893 = vpow2.f32 %v7448_v48  ;;  %v7366_v49 = vsub.f32 %v13992_v39, %v7283_v23  ;;  %v7367_v38 = vsub.f32 %v13994_v0, %v7283_v23  ;;  %v7557_v24 = vadd.f32 %v14212_v42, %v14204_v44 }
0x269a   : > { %10895 = vpow2.f32 %v7450_v43 }
0x269b   : > { %v14218_v21 = vpop.eup %10885  ;;  %v7452_v20 = vmul.f32 1.442695, %v7366_v49  ;;  %v7454_v8 = vmul.f32 1.442695, %v7367_v38  ;;  %7558 = vadd.xlane.f32.xlu1 %v7557_v24  ;;  %7339 = vmax.xlane.f32.xlu0 %v7338_v62 }
0x269c   : > { %v14222_v51 = vpop.eup %10887  ;;  %v7286_v58 = vpop.xlane.xlu0 %7285 }
0x269d   : > { %10897 = vpow2.f32 %v7452_v20  ;;  %v7368_v39 = vsub.f32 %v13998_v57, %v7286_v58  ;;  %v7369_v0 = vsub.f32 %v14000_v31, %v7286_v58  ;;  %v7560_v37 = vadd.f32 %v14222_v51, %v14218_v21 }
0x269e   : > { %10899 = vpow2.f32 %v7454_v8 }
0x269f   : > { %v14228_v6 = vpop.eup %10889  ;;  %v7456_v26 = vmul.f32 1.442695, %v7368_v39  ;;  %v7458_v40 = vmul.f32 1.442695, %v7369_v0  ;;  %7561 = vadd.xlane.f32.xlu0 %v7560_v37  ;;  %7342 = vmax.xlane.f32.xlu1 %v7341_v59 }
0x26a0   : > { %v14230_v9 = vpop.eup %10891  ;;  %v7289_v7 = vpop.xlane.xlu1 %7288 }
0x26a1   : > { %10901 = vpow2.f32 %v7456_v26  ;;  %v7370_v62 = vsub.f32 %v14004_v47, %v7289_v7  ;;  %v7371_v57 = vsub.f32 %v14006_v50, %v7289_v7  ;;  %v7563_v31 = vadd.f32 %v14230_v9, %v14228_v6 }
0x26a2   : > { %10903 = vpow2.f32 %v7458_v40 }
0x26a3   : > { %v14236_v48 = vpop.eup %10893  ;;  %v7460_v43 = vmul.f32 1.442695, %v7370_v62  ;;  %v7462_v23 = vmul.f32 1.442695, %v7371_v57  ;;  %7564 = vadd.xlane.f32.xlu1 %v7563_v31 }
0x26a4   : > { %v14238_v49 = vpop.eup %10895  ;;  %v7292_v38 = vpop.xlane.xlu0 %7291 }
0x26a5   : > { %10905 = vpow2.f32 %v7460_v43  ;;  %v7372_v24 = vsub.f32 %v14010_v16, %v7292_v38  ;;  %v7373_v20 = vsub.f32 %v14012_v36, %v7292_v38  ;;  %v7566_v47 = vadd.f32 %v14238_v49, %v14236_v48 }
0x26a6   : > { %10907 = vpow2.f32 %v7462_v23 }
0x26a7   : > { %v14244_v50 = vpop.eup %10897  ;;  %v7464_v8 = vmul.f32 1.442695, %v7372_v24  ;;  %v7466_v59 = vmul.f32 1.442695, %v7373_v20  ;;  %7567 = vadd.xlane.f32.xlu0 %v7566_v47  ;;  %v15909_v47 = vld [vmem:[#allocation72_spill] sm:$0xff] }
0x26a8   : > { %v14246_v58 = vpop.eup %10899  ;;  %v7295_v39 = vpop.xlane.xlu1 %7294 }
0x26a9   : > { %10909 = vpow2.f32 %v7464_v8  ;;  %v7374_v0 = vsub.f32 %v14016_v27, %v7295_v39  ;;  %v7375_v37 = vsub.f32 %v14018_v63, %v7295_v39  ;;  %v7569_v16 = vadd.f32 %v14246_v58, %v14244_v50 }
0x26aa   : > { %10911 = vpow2.f32 %v7466_v59 }
0x26ab   : > { %v14252_v36 = vpop.eup %10901  ;;  %v7468_v26 = vmul.f32 1.442695, %v7374_v0  ;;  %v7470_v40 = vmul.f32 1.442695, %v7375_v37  ;;  %7570 = vadd.xlane.f32.xlu1 %v7569_v16  ;;  %v15911_v16 = vld [vmem:[#allocation74_spill] sm:$0xff] }
0x26ac   : > { %v14254_v7 = vpop.eup %10903  ;;  %v7298_v62 = vpop.xlane.xlu0 %7297 }
0x26ad   : > { %10913 = vpow2.f32 %v7468_v26  ;;  %v7376_v57 = vsub.f32 %v14022_v10, %v7298_v62  ;;  %v7377_v31 = vsub.f32 %v14024_v54, %v7298_v62  ;;  %v7572_v27 = vadd.f32 %v14254_v7, %v14252_v36 }
0x26ae   : > { %10915 = vpow2.f32 %v7470_v40  ;;  %v15912_v40 = vld [vmem:[#allocation75_spill] sm:$0xff] }
0x26af   : > { %v14260_v63 = vpop.eup %10905  ;;  %v7472_v43 = vmul.f32 1.442695, %v7376_v57  ;;  %v7474_v23 = vmul.f32 1.442695, %v7377_v31  ;;  %7573 = vadd.xlane.f32.xlu0 %v7572_v27 }
0x26b0   : > { %v14262_v38 = vpop.eup %10907  ;;  %v7301_v24 = vpop.xlane.xlu1 %7300 }
0x26b1   : > { %10917 = vpow2.f32 %v7472_v43  ;;  %v7378_v20 = vsub.f32 %v14028_v28, %v7301_v24  ;;  %v7379_v8 = vsub.f32 %v15909_v47, %v7301_v24  ;;  %v7575_v10 = vadd.f32 %v14262_v38, %v14260_v63  ;;  %v15914_v24 = vld [vmem:[#allocation98_spill] sm:$0xff]  ;;  %v15915_v47 = vld [vmem:[#allocation100_spill] sm:$0xff] }
0x26b2   : > { %10919 = vpow2.f32 %v7474_v23 }
0x26b3   : > { %v14268_v54 = vpop.eup %10909  ;;  %v7476_v59 = vmul.f32 1.442695, %v7378_v20  ;;  %v7478_v39 = vmul.f32 1.442695, %v7379_v8  ;;  %7576 = vadd.xlane.f32.xlu1 %v7575_v10 }
0x26b4   : > { %15910 = vst [vmem:[#allocation55_spill] sm:$0xff] %v14268_v54  ;;  %v14270_v0 = vpop.eup %10911  ;;  %v7304_v37 = vpop.xlane.xlu0 %7303 }
0x26b5   : > { %10921 = vpow2.f32 %v7476_v59  ;;  %v7380_v26 = vsub.f32 %v15911_v16, %v7304_v37  ;;  %v7381_v62 = vsub.f32 %v15912_v40, %v7304_v37  ;;  %v7578_v28 = vadd.f32 %v14270_v0, %v14268_v54  ;;  %v15918_v40 = vld [vmem:[#allocation77_spill] sm:$0xff] }
0x26b6   : > { %10923 = vpow2.f32 %v7478_v39 }
0x26b7   : > { %v14276_v57 = vpop.eup %10913  ;;  %v7480_v31 = vmul.f32 1.442695, %v7380_v26  ;;  %v7482_v27 = vmul.f32 1.442695, %v7381_v62  ;;  %7579 = vadd.xlane.f32.xlu0 %v7578_v28  ;;  %v15919_v28 = vld [vmem:[#allocation105_spill] sm:$0xff] }
0x26b8   : > { %15913 = vst [vmem:[#allocation53_spill] sm:$0xff] %v14276_v57  ;;  %v14278_v43 = vpop.eup %10915  ;;  %v7307_v23 = vpop.xlane.xlu1 %7306 }
0x26b9   : > { %10925 = vpow2.f32 %v7480_v31  ;;  %v7382_v20 = vsub.f32 %v15914_v24, %v7307_v23  ;;  %v7383_v8 = vsub.f32 %v15915_v47, %v7307_v23  ;;  %v7581_v10 = vadd.f32 %v14278_v43, %v14276_v57 }
0x26ba   : > { %10927 = vpow2.f32 %v7482_v27 }
0x26bb   : > { %v14284_v59 = vpop.eup %10917  ;;  %v7484_v39 = vmul.f32 1.442695, %v7382_v20  ;;  %v7486_v37 = vmul.f32 1.442695, %v7383_v8  ;;  %7582 = vadd.xlane.f32.xlu1 %v7581_v10  ;;  %v15922_v10 = vld [vmem:[#allocation103_spill] sm:$0xff] }
0x26bc   : > { %15916 = vst [vmem:[#allocation72_spill] sm:$0xff] %v14284_v59  ;;  %v14286_v16 = vpop.eup %10919  ;;  %v7310_v26 = vpop.xlane.xlu0 %7309 }
0x26bd   : > { %15917 = vst [vmem:[#allocation74_spill] sm:$0xff] %v14286_v16  ;;  %10929 = vpow2.f32 %v7484_v39  ;;  %v7384_v62 = vsub.f32 %v15918_v40, %v7310_v26  ;;  %v7385_v31 = vsub.f32 %v15919_v28, %v7310_v26  ;;  %v7584_v23 = vadd.f32 %v14286_v16, %v14284_v59  ;;  %v15923_v39 = vld [vmem:[#allocation76_spill] sm:$0xff] }
0x26be   : > { %10931 = vpow2.f32 %v7486_v37 }
0x26bf   : > { %v14292_v24 = vpop.eup %10921  ;;  %v7488_v27 = vmul.f32 1.442695, %v7384_v62  ;;  %v7490_v47 = vmul.f32 1.442695, %v7385_v31  ;;  %7585 = vadd.xlane.f32.xlu0 %v7584_v23  ;;  %v15924_v23 = vld [vmem:[#allocation60_spill] sm:$0xff] }
0x26c0   : > { %15920 = vst [vmem:[#allocation75_spill] sm:$0xff] %v14292_v24  ;;  %v14294_v20 = vpop.eup %10923  ;;  %v7313_v8 = vpop.xlane.xlu1 %7312 }
0x26c1   : > { %15921 = vst [vmem:[#allocation98_spill] sm:$0xff] %v14294_v20  ;;  %10933 = vpow2.f32 %v7488_v27  ;;  %v7386_v54 = vsub.f32 %v15922_v10, %v7313_v8  ;;  %v7387_v57 = vsub.f32 %v15923_v39, %v7313_v8  ;;  %v7587_v26 = vadd.f32 %v14294_v20, %v14292_v24  ;;  %v15925_v27 = vld [vmem:[#allocation93_spill] sm:$0xff] }
0x26c2   : > { %10935 = vpow2.f32 %v7490_v47 }
0x26c3   : > { %v14300_v40 = vpop.eup %10925  ;;  %v7492_v37 = vmul.f32 1.442695, %v7386_v54  ;;  %v7494_v28 = vmul.f32 1.442695, %v7387_v57  ;;  %7588 = vadd.xlane.f32.xlu1 %v7587_v26  ;;  %v15926_v26 = vld [vmem:[#allocation61_spill] sm:$0xff] }
0x26c4   : > { %v14302_v62 = vpop.eup %10927  ;;  %v7316_v31 = vpop.xlane.xlu0 %7315 }
0x26c5   : > { %10937 = vpow2.f32 %v7492_v37  ;;  %v7388_v59 = vsub.f32 %v15924_v23, %v7316_v31  ;;  %v7389_v16 = vsub.f32 %v15925_v27, %v7316_v31  ;;  %v7590_v8 = vadd.f32 %v14302_v62, %v14300_v40  ;;  %v15927_v37 = vld [vmem:[#allocation54_spill] sm:$0xff] }
0x26c6   : > { %10939 = vpow2.f32 %v7494_v28 }
0x26c7   : > { %v14308_v10 = vpop.eup %10929  ;;  %v7496_v47 = vmul.f32 1.442695, %v7388_v59  ;;  %v7498_v39 = vmul.f32 1.442695, %v7389_v16  ;;  %7591 = vadd.xlane.f32.xlu0 %v7590_v8 }
0x26c8   : > { %v14310_v54 = vpop.eup %10931  ;;  %v7319_v57 = vpop.xlane.xlu1 %7318 }
0x26c9   : > { %10941 = vpow2.f32 %v7496_v47  ;;  %v7390_v24 = vsub.f32 %v15926_v26, %v7319_v57  ;;  %v7391_v20 = vsub.f32 %v15927_v37, %v7319_v57  ;;  %v7593_v31 = vadd.f32 %v14310_v54, %v14308_v10 }
0x26ca   : > { %10943 = vpow2.f32 %v7498_v39 }
0x26cb   : > { %v14316_v23 = vpop.eup %10933  ;;  %v7500_v28 = vmul.f32 1.442695, %v7390_v24  ;;  %v7502_v27 = vmul.f32 1.442695, %v7391_v20  ;;  %7594 = vadd.xlane.f32.xlu1 %v7593_v31 }
0x26cc   : > { %15928 = vst [vmem:[#allocation100_spill] sm:$0xff] %v14316_v23  ;;  %v14318_v59 = vpop.eup %10935 }
0x26cd   : > { %15929 = vst [vmem:[#allocation77_spill] sm:$0xff] %v14318_v59  ;;  %10945 = vpow2.f32 %v7500_v28  ;;  %v7596_v16 = vadd.f32 %v14318_v59, %v14316_v23 }
0x26ce   : > { %10947 = vpow2.f32 %v7502_v27 }
0x26cf   : > { %v14322_v8 = vpop.eup %10937  ;;  %7597 = vadd.xlane.f32.xlu0 %v7596_v16 }
0x26d0   : > { %15930 = vst [vmem:[#allocation105_spill] sm:$0xff] %v14322_v8  ;;  %v14324_v47 = vpop.eup %10939 }
0x26d1   : > { %15931 = vst [vmem:[#allocation103_spill] sm:$0xff] %v14324_v47  ;;  %v7599_v39 = vadd.f32 %v14324_v47, %v14322_v8 }
0x26d3   : > { %v14328_v57 = vpop.eup %10941  ;;  %7600 = vadd.xlane.f32.xlu1 %v7599_v39 }
0x26d4   : > { %15932 = vst [vmem:[#allocation76_spill] sm:$0xff] %v14328_v57  ;;  %v14330_v24 = vpop.eup %10943 }
0x26d5   : > { %15933 = vst [vmem:[#allocation60_spill] sm:$0xff] %v14330_v24  ;;  %v7602_v20 = vadd.f32 %v14330_v24, %v14328_v57 }
0x26d7   : > { %v14334_v26 = vpop.eup %10945  ;;  %7603 = vadd.xlane.f32.xlu0 %v7602_v20 }
0x26d8   : > { %15934 = vst [vmem:[#allocation93_spill] sm:$0xff] %v14334_v26  ;;  %v14336_v37 = vpop.eup %10947 }
0x26d9   : > { %15935 = vst [vmem:[#allocation61_spill] sm:$0xff] %v14336_v37  ;;  %v7605_v31 = vadd.f32 %v14336_v37, %v14334_v26 }
0x26db   : > { %7606 = vadd.xlane.f32.xlu1 %v7605_v31 }
0x270c   : > { %v7538_v28 = vpop.xlane.xlu0 %7537 }
0x270d   : > { %10949 = vrcp.f32 %v7538_v28 }
0x2710   : > { %v7541_v27 = vpop.xlane.xlu1 %7540  ;;  %v7322_v16 = vpop.xlane.xlu0 %7321 }
0x2711   : > { %10951 = vrcp.f32 %v7541_v27  ;;  %v7392_v39 = vsub.f32 %v14098_v19, %v7322_v16  ;;  %v7393_v23 = vsub.f32 %v14100_v22, %v7322_v16 }
0x2713   : > { %v7504_v8 = vmul.f32 1.442695, %v7392_v39  ;;  %v7506_v57 = vmul.f32 1.442695, %v7393_v23 }
0x2714   : > { %v7544_v24 = vpop.xlane.xlu0 %7543  ;;  %v7325_v47 = vpop.xlane.xlu1 %7324 }
0x2715   : > { %10953 = vpow2.f32 %v7504_v8  ;;  %v7394_v20 = vsub.f32 %v14114_v52, %v7325_v47  ;;  %v7395_v59 = vsub.f32 %v14116_v60, %v7325_v47 }
0x2716   : > { %10955 = vpow2.f32 %v7506_v57 }
0x2717   : > { %10957 = vrcp.f32 %v7544_v24  ;;  %v7508_v31 = vmul.f32 1.442695, %v7394_v20  ;;  %v7510_v28 = vmul.f32 1.442695, %v7395_v59  ;;  %v10950_v27 = vpop.eup %10949 }
0x2718   : > { %v7547_v26 = vpop.xlane.xlu1 %7546  ;;  %v7328_v37 = vpop.xlane.xlu0 %7327  ;;  %v7697_v60 = vmul.f32 %v10950_v27, %v14104_v55  ;;  %v7696_v59 = vmul.f32 %v10950_v27, %v14102_v61 }
0x2719   : > { %10959 = vpow2.f32 %v7508_v31  ;;  %v7396_v19 = vsub.f32 %v14124_v53, %v7328_v37  ;;  %v7397_v22 = vsub.f32 %v14126_v1, %v7328_v37 }
0x271a   : > { %10961 = vpow2.f32 %v7510_v28 }
0x271b   : > { %v10952_v23 = vpop.eup %10951  ;;  %10963 = vrcp.f32 %v7547_v26  ;;  %v7512_v8 = vmul.f32 1.442695, %v7396_v19  ;;  %v7514_v16 = vmul.f32 1.442695, %v7397_v22 }
0x271c   : > { %v7550_v52 = vpop.xlane.xlu0 %7549  ;;  %v7331_v39 = vpop.xlane.xlu1 %7330  ;;  %v7699_v47 = vmul.f32 %v10952_v23, %v14118_v15  ;;  %v7698_v57 = vmul.f32 %v10952_v23, %v14112_v13 }
0x271d   : > { %10965 = vpow2.f32 %v7512_v8  ;;  %v7398_v53 = vsub.f32 %v14143_v25, %v7331_v39  ;;  %v7399_v1 = vsub.f32 %v14146_v33, %v7331_v39 }
0x271e   : > { %10967 = vpow2.f32 %v7514_v16  ;;  %v10165_v24 = vpack.c.bf16 %v7699_v47, %v7697_v60  ;;  %v10167_v26 = vpack.c.bf16 %v7698_v57, %v7696_v59 }
0x271f   : > { %v14352_v37 = vpop.eup %10953  ;;  %10969 = vrcp.f32 %v7550_v52  ;;  %v7516_v20 = vmul.f32 1.442695, %v7398_v53  ;;  %v7518_v31 = vmul.f32 1.442695, %v7399_v1 }
0x2720   : > { %v14354_v55 = vpop.eup %10955  ;;  %10166 = vmatprep.subr.bf16.mxu1 %v10165_v24  ;;  %v7553_v15 = vpop.xlane.xlu1 %7552 }
0x2721   : > { %v7334_v61 = vpop.xlane.xlu0 %7333  ;;  %v10958_v28 = vpop.eup %10957  ;;  %10971 = vpow2.f32 %v7516_v20  ;;  %10168 = vmatpush1.bf16.xpose.msra.mxu1 %v10167_v26  ;;  %v7608_v33 = vadd.f32 %v14354_v55, %v14352_v37 }
0x2722   : > { %v7400_v13 = vsub.f32 %v14155_v35, %v7334_v61  ;;  %v7401_v25 = vsub.f32 %v14158_v17, %v7334_v61  ;;  %10973 = vpow2.f32 %v7518_v31  ;;  %v7701_v52 = vmul.f32 %v10958_v28, %v14132_v30 }
0x2723   : > { %v14360_v27 = vpop.eup %10959  ;;  %10975 = vrcp.f32 %v7553_v15  ;;  %7609 = vadd.xlane.f32.xlu0 %v7608_v33  ;;  %v7700_v59 = vmul.f32 %v10958_v28, %v14128_v11 }
0x2724   : > { %v7520_v19 = vmul.f32 1.442695, %v7400_v13  ;;  %v7522_v22 = vmul.f32 1.442695, %v7401_v25  ;;  %v14362_v23 = vpop.eup %10961  ;;  %v7337_v16 = vpop.xlane.xlu1 %7336 }
0x2725   : > { %v7556_v8 = vpop.xlane.xlu0 %7555  ;;  %v10964_v35 = vpop.eup %10963  ;;  %v7402_v17 = vsub.f32 %v14175_v12, %v7337_v16  ;;  %v7403_v39 = vsub.f32 %v14178_v18, %v7337_v16  ;;  %v7611_v60 = vadd.f32 %v14362_v23, %v14360_v27 }
0x2726   : > { %10977 = vpow2.f32 %v7520_v19  ;;  %v7703_v47 = vmul.f32 %v10964_v35, %v14148_v56  ;;  %v7702_v57 = vmul.f32 %v10964_v35, %v14140_v4 }
0x2727   : > { %10979 = vpow2.f32 %v7522_v22  ;;  %v14372_v53 = vpop.eup %10965  ;;  %v7524_v1 = vmul.f32 1.442695, %v7402_v17  ;;  %v7526_v30 = vmul.f32 1.442695, %v7403_v39  ;;  %7612 = vadd.xlane.f32.xlu1 %v7611_v60 }
0x2728   : > { %v14374_v24 = vpop.eup %10967  ;;  %10981 = vrcp.f32 %v7556_v8  ;;  %v10169_v12 = vpack.c.bf16 %v7703_v47, %v7701_v52  ;;  %v7559_v18 = vpop.xlane.xlu1 %7558  ;;  %v10171_v20 = vpack.c.bf16 %v7702_v57, %v7700_v59 }
0x2729   : > { %v7340_v26 = vpop.xlane.xlu0 %7339  ;;  %v10970_v31 = vpop.eup %10969  ;;  %10983 = vpow2.f32 %v7524_v1  ;;  %v7614_v4 = vadd.f32 %v14374_v24, %v14372_v53 }
0x272a   : > { %v7404_v56 = vsub.f32 %v14187_v3, %v7340_v26  ;;  %v7405_v11 = vsub.f32 %v14190_v5, %v7340_v26  ;;  %10985 = vpow2.f32 %v7526_v30  ;;  %10170 = vmatprep.subr.bf16.mxu1 %v10169_v12  ;;  %v7705_v33 = vmul.f32 %v10970_v31, %v14164_v32 }
0x272b   : > { %v14380_v15 = vpop.eup %10971  ;;  %10987 = vrcp.f32 %v7559_v18  ;;  %10172 = vmatpush1.bf16.xpose.msra.mxu1 %v10171_v20  ;;  %7615 = vadd.xlane.f32.xlu0 %v7614_v4  ;;  %v7704_v52 = vmul.f32 %v10970_v31, %v14160_v46 }
0x272c   : > { %v7528_v61 = vmul.f32 1.442695, %v7404_v56  ;;  %v7530_v28 = vmul.f32 1.442695, %v7405_v11  ;;  %v14382_v13 = vpop.eup %10973  ;;  %v7343_v25 = vpop.xlane.xlu1 %7342 }
0x272d   : > { %v10976_v3 = vpop.eup %10975  ;;  %v7562_v5 = vpop.xlane.xlu0 %7561  ;;  %v7406_v19 = vsub.f32 %v14207_v41, %v7343_v25  ;;  %v7407_v22 = vsub.f32 %v14210_v45, %v7343_v25  ;;  %v7617_v8 = vadd.f32 %v14382_v13, %v14380_v15 }
0x272e   : > { %10989 = vpow2.f32 %v7528_v61  ;;  %v7707_v16 = vmul.f32 %v10976_v3, %v14180_v34  ;;  %v7706_v35 = vmul.f32 %v10976_v3, %v14172_v14 }
0x272f   : > { %10991 = vpow2.f32 %v7530_v28  ;;  %v7532_v32 = vmul.f32 1.442695, %v7406_v19  ;;  %v7534_v39 = vmul.f32 1.442695, %v7407_v22  ;;  %7618 = vadd.xlane.f32.xlu1 %v7617_v8 }
0x2730   : > { %v14392_v17 = vpop.eup %10977  ;;  %10993 = vrcp.f32 %v7562_v5  ;;  %v10173_v41 = vpack.c.bf16 %v7707_v16, %v7705_v33  ;;  %v7565_v45 = vpop.xlane.xlu1 %7564  ;;  %v10175_v47 = vpack.c.bf16 %v7706_v35, %v7704_v52 }
0x2731   : > { %v14394_v60 = vpop.eup %10979  ;;  %10995 = vpow2.f32 %v7532_v32 }
0x2732   : > { %v7620_v59 = vadd.f32 %v14394_v60, %v14392_v17  ;;  %v10982_v34 = vpop.eup %10981  ;;  %10997 = vpow2.f32 %v7534_v39  ;;  %10174 = vmatprep.subr.bf16.mxu1 %v10173_v41 }
0x2733   : > { %v14398_v46 = vpop.eup %10983  ;;  %10999 = vrcp.f32 %v7565_v45  ;;  %10176 = vmatpush1.bf16.xpose.msra.mxu1 %v10175_v47  ;;  %v7709_v12 = vmul.f32 %v10982_v34, %v14196_v2  ;;  %v7708_v26 = vmul.f32 %v10982_v34, %v14192_v29 }
0x2734   : > { %7621 = vadd.xlane.f32.xlu0 %v7620_v59  ;;  %v14400_v14 = vpop.eup %10985  ;;  %v7568_v57 = vpop.xlane.xlu0 %7567 }
0x2735   : > { %v10988_v1 = vpop.eup %10987  ;;  %v7623_v30 = vadd.f32 %v14400_v14, %v14398_v46  ;;  %11001 = vrcp.f32 %v7568_v57 }
0x2736   : > { %v7711_v18 = vmul.f32 %v10988_v1, %v14212_v42  ;;  %v7710_v20 = vmul.f32 %v10988_v1, %v14204_v44 }
0x2737   : > { %7624 = vadd.xlane.f32.xlu1 %v7623_v30  ;;  %v6358_v30 = vld [vmem:[%s15936_s11] sm:$0xff]  ;;  %s16054_s11 = sld [smem:[#allocation35_spill]] }
0x2738   : > { %v14408_v31 = vpop.eup %10989  ;;  %v10177_v11 = vpack.c.bf16 %v7711_v18, %v7709_v12  ;;  %v7571_v4 = vpop.xlane.xlu1 %7570  ;;  %v10179_v61 = vpack.c.bf16 %v7710_v20, %v7708_v26  ;;  %v15938_v18 = vld [vmem:[#allocation82_spill] sm:$0xff] }
0x2739   : > { %v14410_v56 = vpop.eup %10991  ;;  %11003 = vrcp.f32 %v7571_v4  ;;  %v15940_v4 = vld [vmem:[#allocation53_spill] sm:$0xff] }
0x273a   : > { %v7626_v28 = vadd.f32 %v14410_v56, %v14408_v31  ;;  %v10994_v2 = vpop.eup %10993  ;;  %10178 = vmatprep.subr.bf16.mxu1 %v10177_v11 }
0x273b   : > { %v14414_v42 = vpop.eup %10995  ;;  %10180 = vmatpush1.bf16.xpose.msra.mxu1 %v10179_v61  ;;  %v7713_v3 = vmul.f32 %v10994_v2, %v14222_v51  ;;  %v7712_v19 = vmul.f32 %v10994_v2, %v14218_v21  ;;  %v15942_v2 = vld [vmem:[#allocation55_spill] sm:$0xff] }
0x273c   : > { %7627 = vadd.xlane.f32.xlu0 %v7626_v28  ;;  %v14416_v29 = vpop.eup %10997  ;;  %v7574_v44 = vpop.xlane.xlu0 %7573  ;;  %v15941_v28 = vld [vmem:[#allocation84_spill] sm:$0xff] }
0x273d   : > { %v11000_v25 = vpop.eup %10999  ;;  %v7629_v33 = vadd.f32 %v14416_v29, %v14414_v42  ;;  %11005 = vrcp.f32 %v7574_v44 }
0x273e   : > { %v7715_v5 = vmul.f32 %v11000_v25, %v14230_v9  ;;  %v7714_v22 = vmul.f32 %v11000_v25, %v14228_v6 }
0x273f   : > { %7630 = vadd.xlane.f32.xlu1 %v7629_v33  ;;  %v11002_v35 = vpop.eup %11001 }
0x2740   : > { %v10181_v8 = vpack.c.bf16 %v7715_v5, %v7713_v3  ;;  %v7577_v16 = vpop.xlane.xlu1 %7576  ;;  %v10183_v52 = vpack.c.bf16 %v7714_v22, %v7712_v19  ;;  %v7717_v41 = vmul.f32 %v11002_v35, %v14238_v49  ;;  %v7716_v21 = vmul.f32 %v11002_v35, %v14236_v48  ;;  %v15943_v3 = vld [vmem:[#allocation85_spill] sm:$0xff]  ;;  %v15945_v22 = vld [vmem:[#allocation87_spill] sm:$0xff]  ;;  %v15947_v35 = vld [vmem:[#allocation98_spill] sm:$0xff] }
0x2741   : > { %11007 = vrcp.f32 %v7577_v16  ;;  %v15946_v16 = vld [vmem:[#allocation74_spill] sm:$0xff] }
0x2742   : > { %10182 = vmatprep.subr.bf16.mxu1 %v10181_v8 }
0x2743   : > { %v11004_v32 = vpop.eup %11003  ;;  %10184 = vmatpush1.bf16.xpose.msra.mxu1 %v10183_v52 }
0x2744   : > { %v7580_v39 = vpop.xlane.xlu0 %7579  ;;  %v7719_v51 = vmul.f32 %v11004_v32, %v14246_v58  ;;  %v7718_v9 = vmul.f32 %v11004_v32, %v14244_v50 }
0x2745   : > { %11009 = vrcp.f32 %v7580_v39  ;;  %v15948_v39 = vld [vmem:[#allocation75_spill] sm:$0xff] }
0x2746   : > { %v10185_v6 = vpack.c.bf16 %v7719_v51, %v7717_v41  ;;  %v10187_v45 = vpack.c.bf16 %v7718_v9, %v7716_v21  ;;  %v15949_v51 = vld [vmem:[#allocation88_spill] sm:$0xff] }
0x2747   : > { %v11006_v59 = vpop.eup %11005  ;;  %v15950_v9 = vld [vmem:[#allocation72_spill] sm:$0xff] }
0x2748   : > { %10186 = vmatprep.subr.bf16.mxu1 %v10185_v6  ;;  %v7583_v47 = vpop.xlane.xlu1 %7582  ;;  %v7721_v1 = vmul.f32 %v11006_v59, %v14254_v7  ;;  %v7720_v50 = vmul.f32 %v11006_v59, %v14252_v36  ;;  %v15939_v7 = vld [vmem:[#allocation83_spill] sm:$0xff] }
0x2749   : > { %11011 = vrcp.f32 %v7583_v47  ;;  %v15951_v47 = vld [vmem:[#allocation89_spill] sm:$0xff] }
0x274b   : > { %v11008_v34 = vpop.eup %11007  ;;  %10188 = vmatpush1.bf16.xpose.msra.mxu1 %v10187_v45 }
0x274c   : > { %v7586_v57 = vpop.xlane.xlu0 %7585  ;;  %v7723_v49 = vmul.f32 %v11008_v34, %v14262_v38  ;;  %v7722_v58 = vmul.f32 %v11008_v34, %v14260_v63 }
0x274d   : > { %11013 = vrcp.f32 %v7586_v57  ;;  %v15952_v57 = vld [vmem:[#allocation90_spill] sm:$0xff] }
0x274e   : > { %v10189_v48 = vpack.c.bf16 %v7723_v49, %v7721_v1  ;;  %v10191_v12 = vpack.c.bf16 %v7722_v58, %v7720_v50  ;;  %v15953_v49 = vld [vmem:[#allocation91_spill] sm:$0xff] }
0x274f   : > { %v11010_v20 = vpop.eup %11009 }
0x2750   : > { %7831 = vrot.lane.b32.xlu1 %v15938_v18, %s15937_s7  ;;  %10190 = vmatprep.subr.bf16.mxu1 %v10189_v48  ;;  %v7589_v26 = vpop.xlane.xlu1 %7588  ;;  %v7725_v36 = vmul.f32 %v11010_v20, %v14270_v0  ;;  %v7724_v44 = vmul.f32 %v11010_v20, %v15942_v2  ;;  %v15944_v0 = vld [vmem:[#allocation86_spill] sm:$0xff] }
0x2751   : > { %11015 = vrcp.f32 %v7589_v26  ;;  %v15961_v2 = vld [vmem:[#allocation62_spill] sm:$0xff] }
0x2752   : > { %6523 = vperm.xlu0 %10416, %v6358_v30  }
0x2753   : > { %v11012_v11 = vpop.eup %11011  ;;  %10192 = vmatpush1.bf16.xpose.msra.mxu1 %v10191_v12  ;;  %v15954_v12 = vld [vmem:[#allocation59_spill] sm:$0xff] }
0x2754   : > { %7833 = vrot.lane.b32.xlu1 %v15939_v7, %s15937_s7  ;;  %v7592_v63 = vpop.xlane.xlu0 %7591  ;;  %v7727_v38 = vmul.f32 %v11012_v11, %v14278_v43  ;;  %v7726_v61 = vmul.f32 %v11012_v11, %v15940_v4  ;;  %v15955_v11 = vld [vmem:[#allocation56_spill] sm:$0xff] }
0x2755   : > { %11017 = vrcp.f32 %v7592_v63 }
0x2756   : > { %7835 = vrot.lane.b32.xlu0 %v15941_v28, %s15937_s7  ;;  %v10193_v25 = vpack.c.bf16 %v7727_v38, %v7725_v36  ;;  %v10195_v33 = vpack.c.bf16 %v7726_v61, %v7724_v44  ;;  %v15958_v36 = vld [vmem:[#allocation77_spill] sm:$0xff]  ;;  %v15959_v38 = vld [vmem:[#allocation103_spill] sm:$0xff]  ;;  %v15962_v44 = vld [vmem:[#allocation100_spill] sm:$0xff] }
0x2757   : > { %v11014_v19 = vpop.eup %11013  ;;  %v15960_v61 = vld [vmem:[#allocation105_spill] sm:$0xff] }
0x2758   : > { %7837 = vrot.lane.b32.xlu1 %v15943_v3, %s15937_s7  ;;  %10194 = vmatprep.subr.bf16.mxu1 %v10193_v25  ;;  %v7595_v5 = vpop.xlane.xlu1 %7594  ;;  %v7729_v52 = vmul.f32 %v11014_v19, %v15946_v16  ;;  %v7728_v21 = vmul.f32 %v11014_v19, %v15950_v9 }
0x2759   : > { %11019 = vrcp.f32 %v7595_v5  ;;  %v15963_v5 = vld [vmem:[#allocation92_spill] sm:$0xff] }
0x275a   : > { %7839 = vrot.lane.b32.xlu0 %v15944_v0, %s15937_s7  ;;  %v15964_v0 = vld [vmem:[#allocation63_spill] sm:$0xff] }
0x275b   : > { %v11016_v43 = vpop.eup %11015  ;;  %10196 = vmatpush1.bf16.xpose.msra.mxu1 %v10195_v33 }
0x275c   : > { %7841 = vrot.lane.b32.xlu1 %v15945_v22, %s15937_s7  ;;  %v7598_v8 = vpop.xlane.xlu0 %7597  ;;  %v7731_v32 = vmul.f32 %v11016_v43, %v15947_v35  ;;  %v7730_v41 = vmul.f32 %v11016_v43, %v15948_v39  ;;  %v15965_v22 = vld [vmem:[#allocation64_spill] sm:$0xff] }
0x275d   : > { %11021 = vrcp.f32 %v7598_v8  ;;  %v15966_v8 = vld [vmem:[#allocation60_spill] sm:$0xff] }
0x275e   : > { %7843 = vrot.lane.b32.xlu0 %v15949_v51, %s15937_s7  ;;  %v10197_v6 = vpack.c.bf16 %v7731_v32, %v7729_v52  ;;  %v10199_v45 = vpack.c.bf16 %v7730_v41, %v7728_v21  ;;  %v15967_v52 = vld [vmem:[#allocation61_spill] sm:$0xff]  ;;  %v15970_v51 = vld [vmem:[#allocation76_spill] sm:$0xff] }
0x275f   : > { %v11018_v34 = vpop.eup %11017  ;;  %v15968_v32 = vld [vmem:[#allocation93_spill] sm:$0xff] }
0x2760   : > { %7845 = vrot.lane.b32.xlu1 %v15951_v47, %s15937_s7  ;;  %10198 = vmatprep.subr.bf16.mxu1 %v10197_v6  ;;  %v7601_v59 = vpop.xlane.xlu1 %7600  ;;  %v7733_v50 = vmul.f32 %v11018_v34, %v14302_v62  ;;  %v7732_v18 = vmul.f32 %v11018_v34, %v14300_v40  ;;  %v15956_v62 = vld [vmem:[#allocation58_spill] sm:$0xff]  ;;  %v15969_v41 = vld [vmem:[#allocation65_spill] sm:$0xff] }
0x2761   : > { %11023 = vrcp.f32 %v7601_v59  ;;  %v15972_v47 = vld [vmem:[#allocation97_spill] sm:$0xff]  ;;  %v15973_v59 = vld [vmem:[#allocation96_spill] sm:$0xff]  ;;  %v15974_v34 = vld [vmem:[#allocation66_spill] sm:$0xff] }
0x2762   : > { %7847 = vrot.lane.b32.xlu0 %v15952_v57, %s15937_s7  ;;  %v15975_v57 = vld [vmem:[#allocation94_spill] sm:$0xff] }
0x2763   : > { %v11020_v1 = vpop.eup %11019  ;;  %10200 = vmatpush1.bf16.xpose.msra.mxu1 %v10199_v45  ;;  %v15971_v45 = vld [vmem:[#allocation95_spill] sm:$0xff] }
0x2764   : > { %7849 = vrot.lane.b32.xlu1 %v15953_v49, %s15937_s7  ;;  %v7604_v58 = vpop.xlane.xlu0 %7603  ;;  %v7735_v30 = vmul.f32 %v11020_v1, %v14310_v54  ;;  %v7734_v48 = vmul.f32 %v11020_v1, %v14308_v10  ;;  %v15957_v10 = vld [vmem:[#allocation57_spill] sm:$0xff]  ;;  %v15976_v1 = vld [vmem:[#allocation67_spill] sm:$0xff]  ;;  %v15977_v49 = vld [vmem:[#allocation68_spill] sm:$0xff] }
0x2765   : > { %11025 = vrcp.f32 %v7604_v58  ;;  %v15978_v58 = vld [vmem:[#allocation69_spill] sm:$0xff] }
0x2766   : > { %7851 = vrot.lane.b32.xlu0 %v15954_v12, %s15937_s7  ;;  %v10201_v26 = vpack.c.bf16 %v7735_v30, %v7733_v50  ;;  %v10203_v20 = vpack.c.bf16 %v7734_v48, %v7732_v18  ;;  %v15979_v50 = vld [vmem:[#allocation71_spill] sm:$0xff]  ;;  %v15980_v30 = vld [vmem:[#allocation70_spill] sm:$0xff]  ;;  %v15981_v48 = vld [vmem:[#allocation73_spill] sm:$0xff] }
0x2767   : > { %v11022_v63 = vpop.eup %11021  ;;  %v15982_v12 = vld [vmem:[#allocation101_spill] sm:$0xff]  ;;  %v15983_v18 = vld [vmem:[#allocation99_spill] sm:$0xff] }
0x2768   : > { %7853 = vrot.lane.b32.xlu1 %v15955_v11, %s15937_s7  ;;  %10202 = vmatprep.subr.bf16.mxu1 %v10201_v26  ;;  %v7607_v7 = vpop.xlane.xlu1 %7606  ;;  %v7737_v40 = vmul.f32 %v11022_v63, %v15958_v36  ;;  %v7736_v25 = vmul.f32 %v11022_v63, %v15962_v44 }
0x2769   : > { %11027 = vrcp.f32 %v7607_v7 }
0x276a   : > { %7855 = vrot.lane.b32.xlu0 %v15956_v62, %s15937_s7 }
0x276b   : > { %v11024_v54 = vpop.eup %11023  ;;  %10204 = vmatpush1.bf16.xpose.msra.mxu1 %v10203_v20 }
0x276c   : > { %7857 = vrot.lane.b32.xlu1 %v15957_v10, %s15937_s7  ;;  %v7739_v4 = vmul.f32 %v11024_v54, %v15959_v38  ;;  %v7738_v28 = vmul.f32 %v11024_v54, %v15960_v61 }
0x276e   : > { %7859 = vrot.lane.b32.xlu0 %v15961_v2, %s15937_s7  ;;  %v10205_v33 = vpack.c.bf16 %v7739_v4, %v7737_v40  ;;  %v10207_v3 = vpack.c.bf16 %v7738_v28, %v7736_v25 }
0x276f   : > { %v11026_v19 = vpop.eup %11025 }
0x2770   : > { %7861 = vrot.lane.b32.xlu1 %v15963_v5, %s15937_s7  ;;  %10206 = vmatprep.subr.bf16.mxu1 %v10205_v33  ;;  %v7741_v16 = vmul.f32 %v11026_v19, %v15966_v8  ;;  %v7740_v9 = vmul.f32 %v11026_v19, %v15970_v51  ;;  %v15984_v8 = vld [vmem:[#allocation81_spill] sm:$0xff]  ;;  %v15985_v51 = vld [vmem:[#allocation102_spill] sm:$0xff] }
0x2772   : > { %7863 = vrot.lane.b32.xlu0 %v15964_v0, %s15937_s7 }
0x2773   : > { %v11028_v43 = vpop.eup %11027  ;;  %10208 = vmatpush1.bf16.xpose.msra.mxu1 %v10207_v3 }
0x2774   : > { %7865 = vrot.lane.b32.xlu1 %v15965_v22, %s15937_s7  ;;  %v7743_v35 = vmul.f32 %v11028_v43, %v15967_v52  ;;  %v7742_v39 = vmul.f32 %v11028_v43, %v15968_v32 }
0x2776   : > { %7867 = vrot.lane.b32.xlu0 %v15969_v41, %s15937_s7  ;;  %v10209_v21 = vpack.c.bf16 %v7743_v35, %v7741_v16  ;;  %v10211_v6 = vpack.c.bf16 %v7742_v39, %v7740_v9  ;;  %v7896_v9 = vrot.slane %v15985_v51, 4 }
0x2778   : > { %7869 = vrot.lane.b32.xlu1 %v15971_v45, %s15937_s7  ;;  %10210 = vmatprep.subr.bf16.mxu1 %v10209_v21  ;;  %v15986_v21 = vld [vmem:[#allocation80_spill] sm:$0xff]  ;;  %v15988_v45 = vld [vmem:[#allocation79_spill] sm:$0xff] }
0x277a   : > { %7871 = vrot.lane.b32.xlu0 %v15972_v47, %s15937_s7  ;;  %v7895_v47 = vrot.slane %v15988_v45, 4 }
0x277b   : > { %10212 = vmatpush1.bf16.xpose.msra.mxu1 %v10211_v6 }
0x277c   : > { %7873 = vrot.lane.b32.xlu1 %v15973_v59, %s15937_s7 }
0x277e   : > { %7875 = vrot.lane.b32.xlu0 %v15974_v34, %s15937_s7 }
0x2780   : > { %7877 = vrot.lane.b32.xlu1 %v15975_v57, %s15937_s7 }
0x2782   : > { %7879 = vrot.lane.b32.xlu0 %v15976_v1, %s15937_s7 }
0x2784   : > { %7881 = vrot.lane.b32.xlu1 %v15977_v49, %s15937_s7 }
0x2786   : > { %7883 = vrot.lane.b32.xlu0 %v15978_v58, %s15937_s7 }
0x2788   : > { %7885 = vrot.lane.b32.xlu1 %v15979_v50, %s15937_s7 }
0x278a   : > { %7887 = vrot.lane.b32.xlu0 %v15980_v30, %s15937_s7 }
0x278c   : > { %7889 = vrot.lane.b32.xlu1 %v15981_v48, %s15937_s7 }
0x278e   : > { %7891 = vrot.lane.b32.xlu0 %v15982_v12, %s15937_s7 }
0x2790   : > { %7893 = vrot.lane.b32.xlu1 %v15983_v18, %s15937_s7 }
0x27b0   : > { %v7610_v26 = vpop.xlane.xlu0 %7609 }
0x27b1   : > { %11029 = vrcp.f32 %v7610_v26 }
0x27b4   : > { %v7613_v20 = vpop.xlane.xlu1 %7612 }
0x27b5   : > { %11031 = vrcp.f32 %v7613_v20 }
0x27b8   : > { %v7616_v11 = vpop.xlane.xlu0 %7615 }
0x27b9   : > { %11033 = vrcp.f32 %v7616_v11 }
0x27bb   : > { %v11030_v63 = vpop.eup %11029 }
0x27bc   : > { %v7619_v7 = vpop.xlane.xlu1 %7618  ;;  %v7745_v10 = vmul.f32 %v11030_v63, %v14354_v55  ;;  %v7744_v40 = vmul.f32 %v11030_v63, %v14352_v37 }
0x27bd   : > { %11035 = vrcp.f32 %v7619_v7 }
0x27bf   : > { %v11032_v62 = vpop.eup %11031 }
0x27c0   : > { %v7747_v36 = vmul.f32 %v11032_v62, %v14362_v23  ;;  %v7746_v38 = vmul.f32 %v11032_v62, %v14360_v27 }
0x27c1   : > { %v7622_v54 = vpop.xlane.xlu0 %7621 }
0x27c2   : > { %v10213_v4 = vpack.c.bf16 %v7747_v36, %v7745_v10  ;;  %v10215_v61 = vpack.c.bf16 %v7746_v38, %v7744_v40  ;;  %11037 = vrcp.f32 %v7622_v54 }
0x27c3   : > { %v11034_v2 = vpop.eup %11033 }
0x27c4   : > { %10214 = vmatprep.subr.bf16.mxu1 %v10213_v4  ;;  %v7625_v28 = vpop.xlane.xlu1 %7624  ;;  %v7749_v33 = vmul.f32 %v11034_v2, %v14374_v24  ;;  %v7748_v23 = vmul.f32 %v11034_v2, %v14372_v53 }
0x27c5   : > { %11039 = vrcp.f32 %v7625_v28  ;;  %10216 = vmatpush1.bf16.xpose.msra.mxu1 %v10215_v61 }
0x27c7   : > { %v11036_v44 = vpop.eup %11035 }
0x27c8   : > { %v7751_v55 = vmul.f32 %v11036_v44, %v14382_v13  ;;  %v7750_v37 = vmul.f32 %v11036_v44, %v14380_v15 }
0x27c9   : > { %v7628_v25 = vpop.xlane.xlu0 %7627 }
0x27ca   : > { %v10217_v3 = vpack.c.bf16 %v7751_v55, %v7749_v33  ;;  %v10219_v27 = vpack.c.bf16 %v7750_v37, %v7748_v23  ;;  %11041 = vrcp.f32 %v7628_v25 }
0x27cc   : > { %10218 = vmatprep.subr.bf16.mxu1 %v10217_v3  ;;  %v7631_v5 = vpop.xlane.xlu1 %7630  ;;  %v11038_v19 = vpop.eup %11037 }
0x27cd   : > { %11043 = vrcp.f32 %v7631_v5  ;;  %10220 = vmatpush1.bf16.xpose.msra.mxu1 %v10219_v27  ;;  %v7753_v22 = vmul.f32 %v11038_v19, %v14394_v60  ;;  %v7752_v13 = vmul.f32 %v11038_v19, %v14392_v17 }
0x27cf   : > { %v11040_v0 = vpop.eup %11039 }
0x27d0   : > { %v7755_v24 = vmul.f32 %v11040_v0, %v14400_v14  ;;  %v7754_v53 = vmul.f32 %v11040_v0, %v14398_v46 }
0x27d1   : > { %v6524_v43 = vpop.permute.xlu0 %6523 }
0x27d2   : > { %v14530_v15 = vadd.f32 %v15984_v8, %v6524_v43  ;;  %v10221_v16 = vpack.c.bf16 %v7755_v24, %v7753_v22  ;;  %v10223_v52 = vpack.c.bf16 %v7754_v53, %v7752_v13  ;;  %v14540_v6 = vadd.f32 %v15986_v21, %v6524_v43 }
0x27d4   : > { %7824 = vmatprep.mubr.f32.mxu1 %v14530_v15  ;;  %10222 = vmatprep.subr.bf16.mxu1 %v10221_v16  ;;  %v11042_v35 = vpop.eup %11041  ;;  %15987 = vst [vmem:[#allocation54_spill] sm:$0xff] %v14540_v6  ;;  %v8801_v55 = vrot.slane %v14530_v15, 4 }
0x27d5   : > { %10224 = vmatpush1.bf16.xpose.msra.mxu1 %v10223_v52  ;;  %v7757_v39 = vmul.f32 %v11042_v35, %v14410_v56  ;;  %v7756_v14 = vmul.f32 %v11042_v35, %v14408_v31  ;;  %v7832_v56 = vpop.permute.xlu1 %7831  ;;  %v15989_v31 = vmov 0.0  }
0x27d7   : > { %v11044_v32 = vpop.eup %11043 }
0x27d8   : > { %v7759_v60 = vmul.f32 %v11044_v32, %v14416_v29  ;;  %v7758_v17 = vmul.f32 %v11044_v32, %v14414_v42  ;;  %v7836_v29 = vpop.permute.xlu0 %7835 }
0x27d9   : > { %v7834_v42 = vpop.permute.xlu1 %7833 }
0x27da   : > { %v10225_v46 = vpack.c.bf16 %v7759_v60, %v7757_v39  ;;  %v10227_v41 = vpack.c.bf16 %v7758_v17, %v7756_v14 }
0x27dc   : > { %10226 = vmatprep.subr.bf16.mxu1 %v10225_v46  ;;  %v7840_v34 = vpop.permute.xlu0 %7839 }
0x27dd   : > { %10228 = vmatpush1.bf16.xpose.msra.mxu1 %v10227_v41  ;;  %v7838_v59 = vpop.permute.xlu1 %7837 }
0x27de   : > { %9781 = vmatprep.subr.msk.mxu1 %vm2561_vm12, %v7896_v9 }
0x27e0   : > { %v7844_v1 = vpop.permute.xlu0 %7843 }
0x27e1   : > { %v7842_v57 = vpop.permute.xlu1 %7841 }
0x27e4   : > { %7825 = vmatmul.mubr.f32.vlgmr.msra.gmra.mrb[148].mxu1 %v14540_v6  ;;  %v7848_v58 = vpop.permute.xlu0 %7847 }
0x27e5   : > { %9782 = vmatpush1.msk.msra.mxu1 %vm2561_vm12, %v7895_v47  ;;  %8029 = vmatprep.mubr.f32.mxu1 %v15989_v31  ;;  %v7846_v49 = vpop.permute.xlu1 %7845 }
0x27e8   : > { %9783 = vmatmul.mubr.msk.f32.vlgmr.msra.gmra.mrb[150].mxu1 %vm2557_vm13, %v7832_v56  ;;  %v7852_v30 = vpop.permute.xlu0 %7851 }
0x27e9   : > { %8035 = vmatprep.mubr.f32.mxu1 %v15989_v31  ;;  %v7850_v50 = vpop.permute.xlu1 %7849 }
0x27ec   : > { %9784 = vmatmul.mubr.msk.f32.gmra.mrb[152].mxu1 %vm2557_vm13, %v7834_v42  ;;  %v7856_v12 = vpop.permute.xlu0 %7855 }
0x27ed   : > { %8041 = vmatprep.mubr.f32.mxu1 %v15989_v31  ;;  %v7854_v48 = vpop.permute.xlu1 %7853 }
0x27f0   : > { %9785 = vmatmul.mubr.msk.f32.gmra.mrb[154].mxu1 %vm2557_vm13, %v7836_v29  ;;  %v7860_v26 = vpop.permute.xlu0 %7859 }
0x27f1   : > { %8047 = vmatprep.mubr.f32.mxu1 %v15989_v31  ;;  %v7858_v18 = vpop.permute.xlu1 %7857 }
0x27f4   : > { %9786 = vmatmul.mubr.msk.f32.gmra.mrb[156].mxu1 %vm2557_vm13, %v7838_v59  ;;  %v7864_v11 = vpop.permute.xlu0 %7863 }
0x27f5   : > { %8053 = vmatprep.mubr.f32.mxu1 %v15989_v31  ;;  %v7862_v20 = vpop.permute.xlu1 %7861 }
0x27f8   : > { %9787 = vmatmul.mubr.msk.f32.gmra.mrb[158].mxu1 %vm2557_vm13, %v7840_v34  ;;  %v7868_v63 = vpop.permute.xlu0 %7867 }
0x27f9   : > { %8059 = vmatprep.mubr.f32.mxu1 %v15989_v31  ;;  %v7866_v7 = vpop.permute.xlu1 %7865 }
0x27fc   : > { %9788 = vmatmul.mubr.msk.f32.gmra.mrb[160].mxu1 %vm2557_vm13, %v7842_v57  ;;  %v7872_v54 = vpop.permute.xlu0 %7871 }
0x27fd   : > { %8065 = vmatprep.mubr.f32.mxu1 %v15989_v31  ;;  %v7870_v62 = vpop.permute.xlu1 %7869 }
0x2800   : > { %9789 = vmatmul.mubr.msk.f32.gmra.mrb[162].mxu1 %vm2557_vm13, %v7844_v1  ;;  %v7876_v36 = vpop.permute.xlu0 %7875 }
0x2801   : > { %8071 = vmatprep.mubr.f32.mxu1 %v15989_v31  ;;  %v7874_v10 = vpop.permute.xlu1 %7873 }
0x2804   : > { %9790 = vmatmul.mubr.msk.f32.gmra.mrb[164].mxu1 %vm2557_vm13, %v7846_v49  ;;  %v7880_v38 = vpop.permute.xlu0 %7879 }
0x2805   : > { %8077 = vmatprep.mubr.f32.mxu1 %v15989_v31  ;;  %v7878_v40 = vpop.permute.xlu1 %7877 }
0x2808   : > { %9791 = vmatmul.mubr.msk.f32.gmra.mrb[166].mxu1 %vm2557_vm13, %v7848_v58  ;;  %v7884_v61 = vpop.permute.xlu0 %7883 }
0x2809   : > { %8083 = vmatprep.mubr.f32.mxu1 %v15989_v31  ;;  %v7882_v4 = vpop.permute.xlu1 %7881 }
0x280c   : > { %9792 = vmatmul.mubr.msk.f32.gmra.mrb[168].mxu1 %vm2557_vm13, %v7850_v50  ;;  %v7888_v2 = vpop.permute.xlu0 %7887 }
0x280d   : > { %8089 = vmatprep.mubr.f32.mxu1 %v15989_v31  ;;  %v7886_v28 = vpop.permute.xlu1 %7885 }
0x2810   : > { %9793 = vmatmul.mubr.msk.f32.gmra.mrb[170].mxu1 %vm2557_vm13, %v7852_v30  ;;  %v7892_v25 = vpop.permute.xlu0 %7891 }
0x2811   : > { %8095 = vmatprep.mubr.f32.mxu1 %v15989_v31  ;;  %v7890_v44 = vpop.permute.xlu1 %7889 }
0x2814   : > { %9794 = vmatmul.mubr.msk.f32.gmra.mrb[172].mxu1 %vm2557_vm13, %v7854_v48 }
0x2815   : > { %8101 = vmatprep.mubr.f32.mxu1 %v15989_v31  ;;  %v7894_v33 = vpop.permute.xlu1 %7893 }
0x2818   : > { %9795 = vmatmul.mubr.msk.f32.gmra.mrb[174].mxu1 %vm2557_vm13, %v7856_v12 }
0x2819   : > { %8107 = vmatprep.mubr.f32.mxu1 %v15989_v31 }
0x281c   : > { %9796 = vmatmul.mubr.msk.f32.gmra.mrb[176].mxu1 %vm2557_vm13, %v7858_v18 }
0x281d   : > { %8113 = vmatprep.mubr.f32.mxu1 %v15989_v31 }
0x2820   : > { %9797 = vmatmul.mubr.msk.f32.gmra.mrb[178].mxu1 %vm2557_vm13, %v7860_v26 }
0x2821   : > { %8119 = vmatprep.mubr.f32.mxu1 %v15989_v31 }
0x2824   : > { %9798 = vmatmul.mubr.msk.f32.gmra.mrb[180].mxu1 %vm2557_vm13, %v7862_v20 }
0x2825   : > { %8125 = vmatprep.mubr.f32.mxu1 %v15989_v31 }
0x2828   : > { %9799 = vmatmul.mubr.msk.f32.gmra.mrb[182].mxu1 %vm2557_vm13, %v7864_v11 }
0x2829   : > { %8131 = vmatprep.mubr.f32.mxu1 %v15989_v31 }
0x282c   : > { %9800 = vmatmul.mubr.msk.f32.gmra.mrb[184].mxu1 %vm2557_vm13, %v7866_v7 }
0x282d   : > { %8137 = vmatprep.mubr.f32.mxu1 %v15989_v31 }
0x2830   : > { %9801 = vmatmul.mubr.msk.f32.gmra.mrb[186].mxu1 %vm2557_vm13, %v7868_v63 }
0x2831   : > { %8143 = vmatprep.mubr.f32.mxu1 %v15989_v31 }
0x2834   : > { %9802 = vmatmul.mubr.msk.f32.gmra.mrb[188].mxu1 %vm2557_vm13, %v7870_v62 }
0x2835   : > { %8149 = vmatprep.mubr.f32.mxu1 %v15989_v31 }
0x2838   : > { %9803 = vmatmul.mubr.msk.f32.gmra.mrb[190].mxu1 %vm2557_vm13, %v7872_v54 }
0x2839   : > { %8155 = vmatprep.mubr.f32.mxu1 %v15989_v31 }
0x283c   : > { %9804 = vmatmul.mubr.msk.f32.gmra.mrb[192].mxu1 %vm2557_vm13, %v7874_v10 }
0x283d   : > { %8161 = vmatprep.mubr.f32.mxu1 %v15989_v31 }
0x2840   : > { %9805 = vmatmul.mubr.msk.f32.gmra.mrb[194].mxu1 %vm2557_vm13, %v7876_v36 }
0x2841   : > { %8167 = vmatprep.mubr.f32.mxu1 %v15989_v31 }
0x2844   : > { %9806 = vmatmul.mubr.msk.f32.gmra.mrb[196].mxu1 %vm2557_vm13, %v7878_v40 }
0x2845   : > { %8173 = vmatprep.mubr.f32.mxu1 %v15989_v31 }
0x2848   : > { %9807 = vmatmul.mubr.msk.f32.gmra.mrb[198].mxu1 %vm2557_vm13, %v7880_v38 }
0x2849   : > { %8179 = vmatprep.mubr.f32.mxu1 %v15989_v31 }
0x284c   : > { %9808 = vmatmul.mubr.msk.f32.gmra.mrb[200].mxu1 %vm2557_vm13, %v7882_v4 }
0x284d   : > { %8185 = vmatprep.mubr.f32.mxu1 %v15989_v31 }
0x2850   : > { %9809 = vmatmul.mubr.msk.f32.gmra.mrb[202].mxu1 %vm2557_vm13, %v7884_v61 }
0x2851   : > { %8191 = vmatprep.mubr.f32.mxu1 %v15989_v31 }
0x2854   : > { %9810 = vmatmul.mubr.msk.f32.gmra.mrb[204].mxu1 %vm2557_vm13, %v7886_v28 }
0x2855   : > { %8197 = vmatprep.mubr.f32.mxu1 %v15989_v31 }
0x2858   : > { %9811 = vmatmul.mubr.msk.f32.gmra.mrb[206].mxu1 %vm2557_vm13, %v7888_v2 }
0x2859   : > { %8203 = vmatprep.mubr.f32.mxu1 %v15989_v31 }
0x285c   : > { %9812 = vmatmul.mubr.msk.f32.gmra.mrb[208].mxu1 %vm2557_vm13, %v7890_v44 }
0x285d   : > { %8209 = vmatprep.mubr.f32.mxu1 %v15989_v31 }
0x2860   : > { %9813 = vmatmul.mubr.msk.f32.gmra.mrb[210].mxu1 %vm2557_vm13, %v7892_v25 }
0x2861   : > { %8215 = vmatprep.mubr.f32.mxu1 %v15989_v31 }
0x2864   : > { %9814 = vmatmul.mubr.msk.f32.gmra.mrb[212].mxu1 %vm2557_vm13, %v7894_v33 }
0x2865   : > { %8868 = vmatprep.mubr.f32.mxu1 %v8801_v55 }
0x28b7   : > { %v14610_v23 = vpop.f32.mrb[148].mxu1 }
0x28b8   : > { %15990 = vst [vmem:[#allocation82_spill] sm:$0xff] %v14610_v23  ;;  %v14612_v37 = vpop.f32.mrb[149].mxu1 }
0x28b9   : > { %15991 = vst [vmem:[#allocation83_spill] sm:$0xff] %v14612_v37 }
0x28bb   : > { %v8031_v3 = vpop.f32.mrb[150].mxu1 }
0x28bc   : > { %v14614_v27 = vmul.f32 0.5, %v8031_v3  ;;  %v8033_v5 = vpop.f32.mrb[151].mxu1 }
0x28bd   : > { %v14616_v19 = vmul.f32 0.5, %v8033_v5 }
0x28bf   : > { %v8286_v0 = vmax.f32 %v14614_v27, %v14616_v19  ;;  %v8037_v43 = vpop.f32.mrb[152].mxu1 }
0x28c0   : > { %v14620_v22 = vmul.f32 0.5, %v8037_v43  ;;  %v8039_v24 = vpop.f32.mrb[153].mxu1 }
0x28c1   : > { %v14622_v13 = vmul.f32 0.5, %v8039_v24  ;;  %8287 = vmax.xlane.f32.xlu0 %v8286_v0 }
0x28c3   : > { %v8289_v53 = vmax.f32 %v14620_v22, %v14622_v13  ;;  %v8043_v8 = vpop.f32.mrb[154].mxu1 }
0x28c4   : > { %v14626_v15 = vmul.f32 0.5, %v8043_v8  ;;  %v8045_v16 = vpop.f32.mrb[155].mxu1 }
0x28c5   : > { %v14628_v52 = vmul.f32 0.5, %v8045_v16  ;;  %8290 = vmax.xlane.f32.xlu1 %v8289_v53 }
0x28c7   : > { %v8292_v35 = vmax.f32 %v14626_v15, %v14628_v52  ;;  %v8049_v32 = vpop.f32.mrb[156].mxu1 }
0x28c8   : > { %v14632_v39 = vmul.f32 0.5, %v8049_v32  ;;  %v8051_v60 = vpop.f32.mrb[157].mxu1 }
0x28c9   : > { %v14634_v14 = vmul.f32 0.5, %v8051_v60  ;;  %8293 = vmax.xlane.f32.xlu0 %v8292_v35 }
0x28cb   : > { %v8295_v17 = vmax.f32 %v14632_v39, %v14634_v14  ;;  %v8055_v46 = vpop.f32.mrb[158].mxu1 }
0x28cc   : > { %v14638_v41 = vmul.f32 0.5, %v8055_v46  ;;  %v8057_v51 = vpop.f32.mrb[159].mxu1 }
0x28cd   : > { %v14640_v9 = vmul.f32 0.5, %v8057_v51  ;;  %8296 = vmax.xlane.f32.xlu0 %v8295_v17 }
0x28cf   : > { %v8298_v21 = vmax.f32 %v14638_v41, %v14640_v9  ;;  %v8061_v45 = vpop.f32.mrb[160].mxu1 }
0x28d0   : > { %v14644_v47 = vmul.f32 0.5, %v8061_v45  ;;  %v8063_v56 = vpop.f32.mrb[161].mxu1 }
0x28d1   : > { %v14646_v42 = vmul.f32 0.5, %v8063_v56  ;;  %8299 = vmax.xlane.f32.xlu1 %v8298_v21 }
0x28d3   : > { %v8301_v29 = vmax.f32 %v14644_v47, %v14646_v42  ;;  %v8067_v59 = vpop.f32.mrb[162].mxu1 }
0x28d4   : > { %v14650_v34 = vmul.f32 0.5, %v8067_v59  ;;  %v8069_v57 = vpop.f32.mrb[163].mxu1 }
0x28d5   : > { %v14652_v1 = vmul.f32 0.5, %v8069_v57  ;;  %8302 = vmax.xlane.f32.xlu0 %v8301_v29 }
0x28d7   : > { %v8304_v49 = vmax.f32 %v14650_v34, %v14652_v1  ;;  %v8073_v58 = vpop.f32.mrb[164].mxu1 }
0x28d8   : > { %v14656_v50 = vmul.f32 0.5, %v8073_v58  ;;  %v8075_v30 = vpop.f32.mrb[165].mxu1 }
0x28d9   : > { %v14658_v48 = vmul.f32 0.5, %v8075_v30  ;;  %8305 = vmax.xlane.f32.xlu1 %v8304_v49 }
0x28db   : > { %v8307_v12 = vmax.f32 %v14656_v50, %v14658_v48  ;;  %v8079_v18 = vpop.f32.mrb[166].mxu1 }
0x28dc   : > { %v14662_v26 = vmul.f32 0.5, %v8079_v18  ;;  %v8081_v20 = vpop.f32.mrb[167].mxu1 }
0x28dd   : > { %v14664_v11 = vmul.f32 0.5, %v8081_v20  ;;  %8308 = vmax.xlane.f32.xlu0 %v8307_v12 }
0x28df   : > { %v8310_v7 = vmax.f32 %v14662_v26, %v14664_v11  ;;  %v8085_v63 = vpop.f32.mrb[168].mxu1 }
0x28e0   : > { %v14668_v62 = vmul.f32 0.5, %v8085_v63  ;;  %v8087_v54 = vpop.f32.mrb[169].mxu1 }
0x28e1   : > { %v14670_v10 = vmul.f32 0.5, %v8087_v54  ;;  %8311 = vmax.xlane.f32.xlu1 %v8310_v7 }
0x28e3   : > { %v8313_v36 = vmax.f32 %v14668_v62, %v14670_v10  ;;  %v8091_v40 = vpop.f32.mrb[170].mxu1 }
0x28e4   : > { %v14674_v38 = vmul.f32 0.5, %v8091_v40  ;;  %v8093_v4 = vpop.f32.mrb[171].mxu1 }
0x28e5   : > { %v14676_v61 = vmul.f32 0.5, %v8093_v4  ;;  %8314 = vmax.xlane.f32.xlu0 %v8313_v36 }
0x28e7   : > { %v8316_v28 = vmax.f32 %v14674_v38, %v14676_v61  ;;  %v8097_v2 = vpop.f32.mrb[172].mxu1 }
0x28e8   : > { %v14680_v44 = vmul.f32 0.5, %v8097_v2  ;;  %v8099_v25 = vpop.f32.mrb[173].mxu1 }
0x28e9   : > { %v14682_v33 = vmul.f32 0.5, %v8099_v25  ;;  %8317 = vmax.xlane.f32.xlu1 %v8316_v28 }
0x28eb   : > { %v8319_v55 = vmax.f32 %v14680_v44, %v14682_v33  ;;  %v8103_v3 = vpop.f32.mrb[174].mxu1 }
0x28ec   : > { %v14686_v5 = vmul.f32 0.5, %v8103_v3  ;;  %v8105_v0 = vpop.f32.mrb[175].mxu1 }
0x28ed   : > { %v14688_v43 = vmul.f32 0.5, %v8105_v0  ;;  %8320 = vmax.xlane.f32.xlu0 %v8319_v55 }
0x28ef   : > { %v8322_v24 = vmax.f32 %v14686_v5, %v14688_v43  ;;  %v8109_v53 = vpop.f32.mrb[176].mxu1 }
0x28f0   : > { %v14692_v8 = vmul.f32 0.5, %v8109_v53  ;;  %v8111_v16 = vpop.f32.mrb[177].mxu1 }
0x28f1   : > { %v14694_v35 = vmul.f32 0.5, %v8111_v16  ;;  %8323 = vmax.xlane.f32.xlu1 %v8322_v24 }
0x28f3   : > { %v8325_v32 = vmax.f32 %v14692_v8, %v14694_v35  ;;  %v8115_v60 = vpop.f32.mrb[178].mxu1 }
0x28f4   : > { %v14698_v17 = vmul.f32 0.5, %v8115_v60  ;;  %v8117_v46 = vpop.f32.mrb[179].mxu1 }
0x28f5   : > { %v14700_v51 = vmul.f32 0.5, %v8117_v46  ;;  %8326 = vmax.xlane.f32.xlu0 %v8325_v32 }
0x28f7   : > { %v8328_v21 = vmax.f32 %v14698_v17, %v14700_v51  ;;  %v8121_v45 = vpop.f32.mrb[180].mxu1 }
0x28f8   : > { %v14704_v56 = vmul.f32 0.5, %v8121_v45  ;;  %v8123_v29 = vpop.f32.mrb[181].mxu1 }
0x28f9   : > { %v14706_v59 = vmul.f32 0.5, %v8123_v29  ;;  %8329 = vmax.xlane.f32.xlu1 %v8328_v21 }
0x28fb   : > { %v8331_v57 = vmax.f32 %v14704_v56, %v14706_v59  ;;  %v8127_v49 = vpop.f32.mrb[182].mxu1 }
0x28fc   : > { %v14710_v58 = vmul.f32 0.5, %v8127_v49  ;;  %v8129_v30 = vpop.f32.mrb[183].mxu1 }
0x28fd   : > { %v14712_v12 = vmul.f32 0.5, %v8129_v30  ;;  %8332 = vmax.xlane.f32.xlu0 %v8331_v57 }
0x28ff   : > { %v8334_v18 = vmax.f32 %v14710_v58, %v14712_v12  ;;  %v8133_v20 = vpop.f32.mrb[184].mxu1 }
0x2900   : > { %v14716_v7 = vmul.f32 0.5, %v8133_v20  ;;  %v8135_v63 = vpop.f32.mrb[185].mxu1 }
0x2901   : > { %v14718_v54 = vmul.f32 0.5, %v8135_v63  ;;  %8335 = vmax.xlane.f32.xlu1 %v8334_v18 }
0x2903   : > { %15992 = vst [vmem:[#allocation53_spill] sm:$0xff] %v14718_v54  ;;  %v8337_v36 = vmax.f32 %v14716_v7, %v14718_v54  ;;  %v8139_v40 = vpop.f32.mrb[186].mxu1 }
0x2904   : > { %v14722_v4 = vmul.f32 0.5, %v8139_v40  ;;  %v8141_v28 = vpop.f32.mrb[187].mxu1 }
0x2905   : > { %v14724_v2 = vmul.f32 0.5, %v8141_v28  ;;  %8338 = vmax.xlane.f32.xlu0 %v8337_v36 }
0x2906   : > { %15993 = vst [vmem:[#allocation84_spill] sm:$0xff] %v14722_v4 }
0x2907   : > { %15994 = vst [vmem:[#allocation55_spill] sm:$0xff] %v14724_v2  ;;  %v8340_v25 = vmax.f32 %v14722_v4, %v14724_v2  ;;  %v8145_v55 = vpop.f32.mrb[188].mxu1 }
0x2908   : > { %v14728_v3 = vmul.f32 0.5, %v8145_v55  ;;  %v8147_v0 = vpop.f32.mrb[189].mxu1 }
0x2909   : > { %v14730_v24 = vmul.f32 0.5, %v8147_v0  ;;  %8341 = vmax.xlane.f32.xlu1 %v8340_v25 }
0x290a   : > { %15995 = vst [vmem:[#allocation85_spill] sm:$0xff] %v14728_v3 }
0x290b   : > { %15996 = vst [vmem:[#allocation86_spill] sm:$0xff] %v14730_v24  ;;  %v8343_v53 = vmax.f32 %v14728_v3, %v14730_v24  ;;  %v8151_v16 = vpop.f32.mrb[190].mxu1 }
0x290c   : > { %v14734_v32 = vmul.f32 0.5, %v8151_v16  ;;  %v8153_v60 = vpop.f32.mrb[191].mxu1 }
0x290d   : > { %v14736_v46 = vmul.f32 0.5, %v8153_v60  ;;  %8344 = vmax.xlane.f32.xlu0 %v8343_v53 }
0x290e   : > { %15997 = vst [vmem:[#allocation87_spill] sm:$0xff] %v14734_v32 }
0x290f   : > { %15998 = vst [vmem:[#allocation74_spill] sm:$0xff] %v14736_v46  ;;  %v8346_v21 = vmax.f32 %v14734_v32, %v14736_v46  ;;  %v8157_v45 = vpop.f32.mrb[192].mxu1 }
0x2910   : > { %v14740_v29 = vmul.f32 0.5, %v8157_v45  ;;  %v8159_v57 = vpop.f32.mrb[193].mxu1 }
0x2911   : > { %v14742_v49 = vmul.f32 0.5, %v8159_v57  ;;  %8347 = vmax.xlane.f32.xlu1 %v8346_v21 }
0x2912   : > { %15999 = vst [vmem:[#allocation98_spill] sm:$0xff] %v14740_v29 }
0x2913   : > { %16000 = vst [vmem:[#allocation75_spill] sm:$0xff] %v14742_v49  ;;  %v8349_v30 = vmax.f32 %v14740_v29, %v14742_v49  ;;  %v8163_v18 = vpop.f32.mrb[194].mxu1 }
0x2914   : > { %v14746_v20 = vmul.f32 0.5, %v8163_v18  ;;  %v8165_v63 = vpop.f32.mrb[195].mxu1 }
0x2915   : > { %v14748_v36 = vmul.f32 0.5, %v8165_v63  ;;  %8350 = vmax.xlane.f32.xlu0 %v8349_v30 }
0x2916   : > { %16001 = vst [vmem:[#allocation88_spill] sm:$0xff] %v14746_v20 }
0x2917   : > { %16002 = vst [vmem:[#allocation72_spill] sm:$0xff] %v14748_v36  ;;  %v8352_v40 = vmax.f32 %v14746_v20, %v14748_v36  ;;  %v8169_v28 = vpop.f32.mrb[196].mxu1 }
0x2918   : > { %v14752_v25 = vmul.f32 0.5, %v8169_v28  ;;  %v8171_v55 = vpop.f32.mrb[197].mxu1 }
0x2919   : > { %v14754_v0 = vmul.f32 0.5, %v8171_v55  ;;  %8353 = vmax.xlane.f32.xlu1 %v8352_v40 }
0x291a   : > { %16003 = vst [vmem:[#allocation89_spill] sm:$0xff] %v14752_v25 }
0x291b   : > { %16004 = vst [vmem:[#allocation90_spill] sm:$0xff] %v14754_v0  ;;  %v8355_v53 = vmax.f32 %v14752_v25, %v14754_v0  ;;  %v8175_v16 = vpop.f32.mrb[198].mxu1 }
0x291c   : > { %v8177_v60 = vpop.f32.mrb[199].mxu1 }
0x291d   : > { %8356 = vmax.xlane.f32.xlu0 %v8355_v53 }
0x291f   : > { %v8181_v21 = vpop.f32.mrb[200].mxu1 }
0x2920   : > { %v8183_v45 = vpop.f32.mrb[201].mxu1 }
0x2923   : > { %v14758_v57 = vpop.f32.mrb[202].mxu1 }
0x2924   : > { %v14760_v30 = vpop.f32.mrb[203].mxu1 }
0x2927   : > { %v14762_v18 = vpop.f32.mrb[204].mxu1 }
0x2928   : > { %v14764_v63 = vpop.f32.mrb[205].mxu1 }
0x292b   : > { %v14766_v28 = vpop.f32.mrb[206].mxu1 }
0x292c   : > { %v14768_v55 = vpop.f32.mrb[207].mxu1 }
0x292f   : > { %v14770_v40 = vpop.f32.mrb[208].mxu1 }
0x2930   : > { %v14772_v23 = vpop.f32.mrb[209].mxu1 }
0x2933   : > { %v14774_v37 = vpop.f32.mrb[210].mxu1 }
0x2934   : > { %v14776_v53 = vpop.f32.mrb[211].mxu1 }
0x2937   : > { %v14778_v6 = vpop.f32.mrb[212].mxu1 }
0x2938   : > { %v14780_v31 = vpop.f32.mrb[213].mxu1 }
0x294e   : > { %v8288_v0 = vpop.xlane.xlu0 %8287 }
0x294f   : > { %v8382_v25 = vsub.f32 %v14614_v27, %v8288_v0  ;;  %v8383_v36 = vsub.f32 %v14616_v19, %v8288_v0  ;;  %v14808_v0 = vmul.f32 0.5, %v8181_v21 }
0x2951   : > { %v8446_v20 = vmul.f32 1.442695, %v8382_v25  ;;  %v8448_v49 = vmul.f32 1.442695, %v8383_v36 }
0x2952   : > { %v8291_v29 = vpop.xlane.xlu1 %8290 }
0x2953   : > { %11045 = vpow2.f32 %v8446_v20  ;;  %v8384_v46 = vsub.f32 %v14620_v22, %v8291_v29  ;;  %v8385_v32 = vsub.f32 %v14622_v13, %v8291_v29 }
0x2954   : > { %11047 = vpow2.f32 %v8448_v49 }
0x2955   : > { %v8450_v24 = vmul.f32 1.442695, %v8384_v46  ;;  %v8452_v3 = vmul.f32 1.442695, %v8385_v32 }
0x2956   : > { %v8294_v2 = vpop.xlane.xlu0 %8293 }
0x2957   : > { %11049 = vpow2.f32 %v8450_v24  ;;  %v8386_v4 = vsub.f32 %v14626_v15, %v8294_v2  ;;  %v8387_v54 = vsub.f32 %v14628_v52, %v8294_v2  ;;  %v14794_v24 = vmul.f32 0.5, %v8175_v16 }
0x2958   : > { %11051 = vpow2.f32 %v8452_v3  ;;  %v14796_v15 = vmul.f32 0.5, %v8177_v60  ;;  %v14810_v16 = vmul.f32 0.5, %v8183_v45 }
0x2959   : > { %v8454_v27 = vmul.f32 1.442695, %v8386_v4  ;;  %v8456_v19 = vmul.f32 1.442695, %v8387_v54 }
0x295a   : > { %v8297_v25 = vpop.xlane.xlu0 %8296  ;;  %v8358_v36 = vmax.f32 %v14794_v24, %v14796_v15  ;;  %v8361_v45 = vmax.f32 %v14808_v0, %v14810_v16 }
0x295b   : > { %11053 = vpow2.f32 %v8454_v27  ;;  %v8388_v20 = vsub.f32 %v14632_v39, %v8297_v25  ;;  %v8389_v22 = vsub.f32 %v14634_v14, %v8297_v25 }
0x295c   : > { %11055 = vpow2.f32 %v8456_v19 }
0x295d   : > { %v14790_v13 = vpop.eup %11045  ;;  %v8458_v46 = vmul.f32 1.442695, %v8388_v20  ;;  %v8460_v32 = vmul.f32 1.442695, %v8389_v22  ;;  %v14823_v22 = vmul.f32 0.5, %v14758_v57 }
0x295e   : > { %v14792_v29 = vpop.eup %11047  ;;  %v8300_v52 = vpop.xlane.xlu1 %8299 }
0x295f   : > { %11057 = vpow2.f32 %v8458_v46  ;;  %v8390_v54 = vsub.f32 %v14638_v41, %v8300_v52  ;;  %v8391_v4 = vsub.f32 %v14640_v9, %v8300_v52  ;;  %v8574_v39 = vadd.f32 %v14792_v29, %v14790_v13 }
0x2960   : > { %11059 = vpow2.f32 %v8460_v32 }
0x2961   : > { %v14802_v14 = vpop.eup %11049  ;;  %v8462_v2 = vmul.f32 1.442695, %v8390_v54  ;;  %v8464_v3 = vmul.f32 1.442695, %v8391_v4  ;;  %8575 = vadd.xlane.f32.xlu1 %v8574_v39 }
0x2962   : > { %v14804_v49 = vpop.eup %11051  ;;  %v8303_v41 = vpop.xlane.xlu0 %8302 }
0x2963   : > { %11061 = vpow2.f32 %v8462_v2  ;;  %v8392_v9 = vsub.f32 %v14644_v47, %v8303_v41  ;;  %v8393_v60 = vsub.f32 %v14646_v42, %v8303_v41  ;;  %v8577_v27 = vadd.f32 %v14804_v49, %v14802_v14 }
0x2964   : > { %11063 = vpow2.f32 %v8464_v3  ;;  %v14826_v47 = vmul.f32 0.5, %v14760_v30  ;;  %v14839_v2 = vmul.f32 0.5, %v14762_v18 }
0x2965   : > { %v14816_v19 = vpop.eup %11053  ;;  %v8466_v25 = vmul.f32 1.442695, %v8392_v9  ;;  %v8468_v20 = vmul.f32 1.442695, %v8393_v60  ;;  %8578 = vadd.xlane.f32.xlu0 %v8577_v27  ;;  %8359 = vmax.xlane.f32.xlu1 %v8358_v36 }
0x2966   : > { %v14818_v21 = vpop.eup %11055  ;;  %v8306_v42 = vpop.xlane.xlu1 %8305  ;;  %v8364_v30 = vmax.f32 %v14823_v22, %v14826_v47 }
0x2967   : > { %11065 = vpow2.f32 %v8466_v25  ;;  %v8394_v46 = vsub.f32 %v14650_v34, %v8306_v42  ;;  %v8395_v32 = vsub.f32 %v14652_v1, %v8306_v42  ;;  %v8580_v52 = vadd.f32 %v14818_v21, %v14816_v19 }
0x2968   : > { %11067 = vpow2.f32 %v8468_v20  ;;  %v14842_v34 = vmul.f32 0.5, %v14764_v63  ;;  %v14855_v25 = vmul.f32 0.5, %v14766_v28 }
0x2969   : > { %v14832_v54 = vpop.eup %11057  ;;  %v8470_v4 = vmul.f32 1.442695, %v8394_v46  ;;  %v8472_v39 = vmul.f32 1.442695, %v8395_v32  ;;  %8581 = vadd.xlane.f32.xlu1 %v8580_v52  ;;  %8362 = vmax.xlane.f32.xlu0 %v8361_v45 }
0x296a   : > { %v14834_v57 = vpop.eup %11059  ;;  %v8309_v1 = vpop.xlane.xlu0 %8308  ;;  %v8367_v63 = vmax.f32 %v14839_v2, %v14842_v34 }
0x296b   : > { %11069 = vpow2.f32 %v8470_v4  ;;  %v8396_v3 = vsub.f32 %v14656_v50, %v8309_v1  ;;  %v8397_v36 = vsub.f32 %v14658_v48, %v8309_v1  ;;  %v8583_v41 = vadd.f32 %v14834_v57, %v14832_v54 }
0x296c   : > { %11071 = vpow2.f32 %v8472_v39  ;;  %v14858_v50 = vmul.f32 0.5, %v14768_v55  ;;  %v14871_v4 = vmul.f32 0.5, %v14770_v40 }
0x296d   : > { %v14848_v9 = vpop.eup %11061  ;;  %v8474_v60 = vmul.f32 1.442695, %v8396_v3  ;;  %v8476_v27 = vmul.f32 1.442695, %v8397_v36  ;;  %8584 = vadd.xlane.f32.xlu0 %v8583_v41  ;;  %8365 = vmax.xlane.f32.xlu1 %v8364_v30 }
0x296e   : > { %v14850_v18 = vpop.eup %11063  ;;  %v8312_v48 = vpop.xlane.xlu1 %8311  ;;  %v8370_v55 = vmax.f32 %v14855_v25, %v14858_v50 }
0x296f   : > { %11073 = vpow2.f32 %v8474_v60  ;;  %v8398_v20 = vsub.f32 %v14662_v26, %v8312_v48  ;;  %v8399_v45 = vsub.f32 %v14664_v11, %v8312_v48  ;;  %v8586_v42 = vadd.f32 %v14850_v18, %v14848_v9 }
0x2970   : > { %11075 = vpow2.f32 %v8476_v27  ;;  %v14874_v26 = vmul.f32 0.5, %v14772_v23  ;;  %v14887_v60 = vmul.f32 0.5, %v14774_v37 }
0x2971   : > { %v14864_v46 = vpop.eup %11065  ;;  %v8478_v32 = vmul.f32 1.442695, %v8398_v20  ;;  %v8480_v52 = vmul.f32 1.442695, %v8399_v45  ;;  %8587 = vadd.xlane.f32.xlu1 %v8586_v42  ;;  %8368 = vmax.xlane.f32.xlu0 %v8367_v63 }
0x2972   : > { %v14866_v28 = vpop.eup %11067  ;;  %v8315_v11 = vpop.xlane.xlu0 %8314  ;;  %v8373_v23 = vmax.f32 %v14871_v4, %v14874_v26 }
0x2973   : > { %11077 = vpow2.f32 %v8478_v32  ;;  %v8400_v39 = vsub.f32 %v14668_v62, %v8315_v11  ;;  %v8401_v30 = vsub.f32 %v14670_v10, %v8315_v11  ;;  %v8589_v1 = vadd.f32 %v14866_v28, %v14864_v46 }
0x2974   : > { %11079 = vpow2.f32 %v8480_v52  ;;  %v14890_v62 = vmul.f32 0.5, %v14776_v53  ;;  %v14903_v32 = vmul.f32 0.5, %v14778_v6 }
0x2975   : > { %v14880_v3 = vpop.eup %11069  ;;  %v8482_v36 = vmul.f32 1.442695, %v8400_v39  ;;  %v8484_v41 = vmul.f32 1.442695, %v8401_v30  ;;  %8590 = vadd.xlane.f32.xlu0 %v8589_v1  ;;  %8371 = vmax.xlane.f32.xlu1 %v8370_v55 }
0x2976   : > { %v14882_v40 = vpop.eup %11071  ;;  %v8318_v10 = vpop.xlane.xlu1 %8317  ;;  %v8376_v53 = vmax.f32 %v14887_v60, %v14890_v62 }
0x2977   : > { %11081 = vpow2.f32 %v8482_v36  ;;  %v8402_v27 = vsub.f32 %v14674_v38, %v8318_v10  ;;  %v8403_v63 = vsub.f32 %v14676_v61, %v8318_v10  ;;  %v8592_v48 = vadd.f32 %v14882_v40, %v14880_v3 }
0x2978   : > { %11083 = vpow2.f32 %v8484_v41  ;;  %v14906_v38 = vmul.f32 0.5, %v14780_v31 }
0x2979   : > { %v14896_v20 = vpop.eup %11073  ;;  %v8486_v45 = vmul.f32 1.442695, %v8402_v27  ;;  %v8488_v42 = vmul.f32 1.442695, %v8403_v63  ;;  %8593 = vadd.xlane.f32.xlu1 %v8592_v48  ;;  %8374 = vmax.xlane.f32.xlu0 %v8373_v23 }
0x297a   : > { %v14898_v37 = vpop.eup %11075  ;;  %v8321_v61 = vpop.xlane.xlu0 %8320  ;;  %v8379_v31 = vmax.f32 %v14903_v32, %v14906_v38 }
0x297b   : > { %11085 = vpow2.f32 %v8486_v45  ;;  %v8404_v52 = vsub.f32 %v14680_v44, %v8321_v61  ;;  %v8405_v55 = vsub.f32 %v14682_v33, %v8321_v61  ;;  %v8595_v11 = vadd.f32 %v14898_v37, %v14896_v20 }
0x297c   : > { %11087 = vpow2.f32 %v8488_v42 }
0x297d   : > { %v14912_v39 = vpop.eup %11077  ;;  %v8490_v30 = vmul.f32 1.442695, %v8404_v52  ;;  %v8492_v1 = vmul.f32 1.442695, %v8405_v55  ;;  %8596 = vadd.xlane.f32.xlu0 %v8595_v11  ;;  %8377 = vmax.xlane.f32.xlu1 %v8376_v53 }
0x297e   : > { %v14914_v6 = vpop.eup %11079  ;;  %v8324_v36 = vpop.xlane.xlu1 %8323 }
0x297f   : > { %11089 = vpow2.f32 %v8490_v30  ;;  %v8406_v44 = vsub.f32 %v14686_v5, %v8324_v36  ;;  %v8407_v33 = vsub.f32 %v14688_v43, %v8324_v36  ;;  %v8598_v41 = vadd.f32 %v14914_v6, %v14912_v39 }
0x2980   : > { %11091 = vpow2.f32 %v8492_v1 }
0x2981   : > { %v14922_v23 = vpop.eup %11081  ;;  %v8494_v10 = vmul.f32 1.442695, %v8406_v44  ;;  %v8496_v27 = vmul.f32 1.442695, %v8407_v33  ;;  %8599 = vadd.xlane.f32.xlu1 %v8598_v41  ;;  %8380 = vmax.xlane.f32.xlu0 %v8379_v31 }
0x2982   : > { %v14924_v63 = vpop.eup %11083  ;;  %v8327_v48 = vpop.xlane.xlu0 %8326 }
0x2983   : > { %11093 = vpow2.f32 %v8494_v10  ;;  %v8408_v45 = vsub.f32 %v14692_v8, %v8327_v48  ;;  %v8409_v5 = vsub.f32 %v14694_v35, %v8327_v48  ;;  %v8601_v43 = vadd.f32 %v14924_v63, %v14922_v23 }
0x2984   : > { %11095 = vpow2.f32 %v8496_v27 }
0x2985   : > { %v14930_v42 = vpop.eup %11085  ;;  %v8498_v53 = vmul.f32 1.442695, %v8408_v45  ;;  %v8500_v61 = vmul.f32 1.442695, %v8409_v5  ;;  %8602 = vadd.xlane.f32.xlu0 %v8601_v43 }
0x2986   : > { %v14932_v52 = vpop.eup %11087  ;;  %v8330_v55 = vpop.xlane.xlu1 %8329 }
0x2987   : > { %11097 = vpow2.f32 %v8498_v53  ;;  %v8410_v11 = vsub.f32 %v14698_v17, %v8330_v55  ;;  %v8411_v30 = vsub.f32 %v14700_v51, %v8330_v55  ;;  %v8604_v8 = vadd.f32 %v14932_v52, %v14930_v42 }
0x2988   : > { %11099 = vpow2.f32 %v8500_v61 }
0x2989   : > { %v14938_v35 = vpop.eup %11089  ;;  %v8502_v1 = vmul.f32 1.442695, %v8410_v11  ;;  %v8504_v31 = vmul.f32 1.442695, %v8411_v30  ;;  %8605 = vadd.xlane.f32.xlu1 %v8604_v8  ;;  %v16005_v8 = vld [vmem:[#allocation53_spill] sm:$0xff] }
0x298a   : > { %v14940_v36 = vpop.eup %11091  ;;  %v8333_v44 = vpop.xlane.xlu0 %8332 }
0x298b   : > { %11101 = vpow2.f32 %v8502_v1  ;;  %v8412_v33 = vsub.f32 %v14704_v56, %v8333_v44  ;;  %v8413_v41 = vsub.f32 %v14706_v59, %v8333_v44  ;;  %v8607_v17 = vadd.f32 %v14940_v36, %v14938_v35 }
0x298c   : > { %11103 = vpow2.f32 %v8504_v31 }
0x298d   : > { %v14946_v51 = vpop.eup %11093  ;;  %v8506_v10 = vmul.f32 1.442695, %v8412_v33  ;;  %v8508_v27 = vmul.f32 1.442695, %v8413_v41  ;;  %8608 = vadd.xlane.f32.xlu0 %v8607_v17  ;;  %v16007_v17 = vld [vmem:[#allocation84_spill] sm:$0xff] }
0x298e   : > { %v14948_v48 = vpop.eup %11095  ;;  %v8336_v45 = vpop.xlane.xlu1 %8335 }
0x298f   : > { %11105 = vpow2.f32 %v8506_v10  ;;  %v8414_v5 = vsub.f32 %v14710_v58, %v8336_v45  ;;  %v8415_v43 = vsub.f32 %v14712_v12, %v8336_v45  ;;  %v8610_v56 = vadd.f32 %v14948_v48, %v14946_v51 }
0x2990   : > { %11107 = vpow2.f32 %v8508_v27  ;;  %v16008_v27 = vld [vmem:[#allocation55_spill] sm:$0xff] }
0x2991   : > { %v14954_v59 = vpop.eup %11097  ;;  %v8510_v53 = vmul.f32 1.442695, %v8414_v5  ;;  %v8512_v61 = vmul.f32 1.442695, %v8415_v43  ;;  %8611 = vadd.xlane.f32.xlu1 %v8610_v56 }
0x2992   : > { %v14956_v55 = vpop.eup %11099  ;;  %v8339_v11 = vpop.xlane.xlu0 %8338 }
0x2993   : > { %11109 = vpow2.f32 %v8510_v53  ;;  %v8416_v30 = vsub.f32 %v14716_v7, %v8339_v11  ;;  %v8417_v1 = vsub.f32 %v16005_v8, %v8339_v11  ;;  %v8613_v58 = vadd.f32 %v14956_v55, %v14954_v59  ;;  %v16010_v11 = vld [vmem:[#allocation85_spill] sm:$0xff]  ;;  %v16011_v8 = vld [vmem:[#allocation86_spill] sm:$0xff] }
0x2994   : > { %11111 = vpow2.f32 %v8512_v61 }
0x2995   : > { %v14962_v12 = vpop.eup %11101  ;;  %v8514_v31 = vmul.f32 1.442695, %v8416_v30  ;;  %v8516_v44 = vmul.f32 1.442695, %v8417_v1  ;;  %8614 = vadd.xlane.f32.xlu0 %v8613_v58 }
0x2996   : > { %16006 = vst [vmem:[#allocation91_spill] sm:$0xff] %v14962_v12  ;;  %v14964_v33 = vpop.eup %11103  ;;  %v8342_v41 = vpop.xlane.xlu1 %8341 }
0x2997   : > { %11113 = vpow2.f32 %v8514_v31  ;;  %v8418_v10 = vsub.f32 %v16007_v17, %v8342_v41  ;;  %v8419_v45 = vsub.f32 %v16008_v27, %v8342_v41  ;;  %v8616_v7 = vadd.f32 %v14964_v33, %v14962_v12  ;;  %v16014_v27 = vld [vmem:[#allocation87_spill] sm:$0xff] }
0x2998   : > { %11115 = vpow2.f32 %v8516_v44 }
0x2999   : > { %v14970_v5 = vpop.eup %11105  ;;  %v8518_v43 = vmul.f32 1.442695, %v8418_v10  ;;  %v8520_v56 = vmul.f32 1.442695, %v8419_v45  ;;  %8617 = vadd.xlane.f32.xlu1 %v8616_v7  ;;  %v16015_v7 = vld [vmem:[#allocation74_spill] sm:$0xff] }
0x299a   : > { %16009 = vst [vmem:[#allocation59_spill] sm:$0xff] %v14970_v5  ;;  %v14972_v53 = vpop.eup %11107  ;;  %v8345_v61 = vpop.xlane.xlu0 %8344 }
0x299b   : > { %11117 = vpow2.f32 %v8518_v43  ;;  %v8420_v30 = vsub.f32 %v16010_v11, %v8345_v61  ;;  %v8421_v1 = vsub.f32 %v16011_v8, %v8345_v61  ;;  %v8619_v58 = vadd.f32 %v14972_v53, %v14970_v5 }
0x299c   : > { %11119 = vpow2.f32 %v8520_v56 }
0x299d   : > { %v14978_v31 = vpop.eup %11109  ;;  %v8522_v44 = vmul.f32 1.442695, %v8420_v30  ;;  %v8524_v41 = vmul.f32 1.442695, %v8421_v1  ;;  %8620 = vadd.xlane.f32.xlu0 %v8619_v58  ;;  %v16018_v58 = vld [vmem:[#allocation98_spill] sm:$0xff] }
0x299e   : > { %16012 = vst [vmem:[#allocation56_spill] sm:$0xff] %v14978_v31  ;;  %v14980_v17 = vpop.eup %11111  ;;  %v8348_v10 = vpop.xlane.xlu1 %8347 }
0x299f   : > { %16013 = vst [vmem:[#allocation58_spill] sm:$0xff] %v14980_v17  ;;  %11121 = vpow2.f32 %v8522_v44  ;;  %v8422_v45 = vsub.f32 %v16014_v27, %v8348_v10  ;;  %v8423_v43 = vsub.f32 %v16015_v7, %v8348_v10  ;;  %v8622_v61 = vadd.f32 %v14980_v17, %v14978_v31  ;;  %v16019_v44 = vld [vmem:[#allocation75_spill] sm:$0xff] }
0x29a0   : > { %11123 = vpow2.f32 %v8524_v41 }
0x29a1   : > { %v14986_v11 = vpop.eup %11113  ;;  %v8526_v56 = vmul.f32 1.442695, %v8422_v45  ;;  %v8528_v8 = vmul.f32 1.442695, %v8423_v43  ;;  %8623 = vadd.xlane.f32.xlu1 %v8622_v61  ;;  %v16020_v61 = vld [vmem:[#allocation88_spill] sm:$0xff] }
0x29a2   : > { %16016 = vst [vmem:[#allocation57_spill] sm:$0xff] %v14986_v11  ;;  %v14988_v30 = vpop.eup %11115  ;;  %v8351_v1 = vpop.xlane.xlu0 %8350 }
0x29a3   : > { %16017 = vst [vmem:[#allocation77_spill] sm:$0xff] %v14988_v30  ;;  %11125 = vpow2.f32 %v8526_v56  ;;  %v8424_v12 = vsub.f32 %v16018_v58, %v8351_v1  ;;  %v8425_v5 = vsub.f32 %v16019_v44, %v8351_v1  ;;  %v8625_v10 = vadd.f32 %v14988_v30, %v14986_v11  ;;  %v16021_v56 = vld [vmem:[#allocation72_spill] sm:$0xff] }
0x29a4   : > { %11127 = vpow2.f32 %v8528_v8 }
0x29a5   : > { %v14994_v27 = vpop.eup %11117  ;;  %v8530_v41 = vmul.f32 1.442695, %v8424_v12  ;;  %v8532_v7 = vmul.f32 1.442695, %v8425_v5  ;;  %8626 = vadd.xlane.f32.xlu0 %v8625_v10  ;;  %v16022_v10 = vld [vmem:[#allocation89_spill] sm:$0xff] }
0x29a6   : > { %v14996_v45 = vpop.eup %11119  ;;  %v8354_v43 = vpop.xlane.xlu1 %8353 }
0x29a7   : > { %11129 = vpow2.f32 %v8530_v41  ;;  %v8426_v31 = vsub.f32 %v16020_v61, %v8354_v43  ;;  %v8427_v17 = vsub.f32 %v16021_v56, %v8354_v43  ;;  %v8628_v1 = vadd.f32 %v14996_v45, %v14994_v27  ;;  %v16023_v41 = vld [vmem:[#allocation90_spill] sm:$0xff] }
0x29a8   : > { %11131 = vpow2.f32 %v8532_v7 }
0x29a9   : > { %v15002_v58 = vpop.eup %11121  ;;  %v8534_v8 = vmul.f32 1.442695, %v8426_v31  ;;  %v8536_v44 = vmul.f32 1.442695, %v8427_v17  ;;  %8629 = vadd.xlane.f32.xlu1 %v8628_v1 }
0x29aa   : > { %v15004_v12 = vpop.eup %11123  ;;  %v8357_v5 = vpop.xlane.xlu0 %8356 }
0x29ab   : > { %11133 = vpow2.f32 %v8534_v8  ;;  %v8428_v11 = vsub.f32 %v16022_v10, %v8357_v5  ;;  %v8429_v30 = vsub.f32 %v16023_v41, %v8357_v5  ;;  %v8631_v43 = vadd.f32 %v15004_v12, %v15002_v58 }
0x29ac   : > { %11135 = vpow2.f32 %v8536_v44 }
0x29ad   : > { %v15010_v61 = vpop.eup %11125  ;;  %v8538_v7 = vmul.f32 1.442695, %v8428_v11  ;;  %v8540_v56 = vmul.f32 1.442695, %v8429_v30  ;;  %8632 = vadd.xlane.f32.xlu0 %v8631_v43 }
0x29ae   : > { %16024 = vst [vmem:[#allocation103_spill] sm:$0xff] %v15010_v61  ;;  %v15012_v31 = vpop.eup %11127 }
0x29af   : > { %16025 = vst [vmem:[#allocation105_spill] sm:$0xff] %v15012_v31  ;;  %11137 = vpow2.f32 %v8538_v7  ;;  %v8634_v17 = vadd.f32 %v15012_v31, %v15010_v61 }
0x29b0   : > { %11139 = vpow2.f32 %v8540_v56 }
0x29b1   : > { %v15016_v1 = vpop.eup %11129  ;;  %8635 = vadd.xlane.f32.xlu1 %v8634_v17 }
0x29b2   : > { %16026 = vst [vmem:[#allocation62_spill] sm:$0xff] %v15016_v1  ;;  %v15018_v8 = vpop.eup %11131 }
0x29b3   : > { %16027 = vst [vmem:[#allocation100_spill] sm:$0xff] %v15018_v8  ;;  %v8637_v44 = vadd.f32 %v15018_v8, %v15016_v1 }
0x29b5   : > { %v15022_v5 = vpop.eup %11133  ;;  %8638 = vadd.xlane.f32.xlu0 %v8637_v44 }
0x29b6   : > { %16028 = vst [vmem:[#allocation92_spill] sm:$0xff] %v15022_v5  ;;  %v15024_v11 = vpop.eup %11135 }
0x29b7   : > { %16029 = vst [vmem:[#allocation63_spill] sm:$0xff] %v15024_v11  ;;  %v8640_v30 = vadd.f32 %v15024_v11, %v15022_v5 }
0x29b9   : > { %v15028_v10 = vpop.eup %11137  ;;  %8641 = vadd.xlane.f32.xlu1 %v8640_v30 }
0x29ba   : > { %16030 = vst [vmem:[#allocation64_spill] sm:$0xff] %v15028_v10  ;;  %v15030_v41 = vpop.eup %11139 }
0x29bb   : > { %16031 = vst [vmem:[#allocation60_spill] sm:$0xff] %v15030_v41  ;;  %v8643_v43 = vadd.f32 %v15030_v41, %v15028_v10 }
0x29bd   : > { %8644 = vadd.xlane.f32.xlu0 %v8643_v43 }
0x29ee   : > { %v8576_v7 = vpop.xlane.xlu1 %8575 }
0x29ef   : > { %11141 = vrcp.f32 %v8576_v7 }
0x29f2   : > { %v8579_v56 = vpop.xlane.xlu0 %8578  ;;  %v8360_v17 = vpop.xlane.xlu1 %8359 }
0x29f3   : > { %11143 = vrcp.f32 %v8579_v56  ;;  %v8430_v44 = vsub.f32 %v14794_v24, %v8360_v17  ;;  %v8431_v61 = vsub.f32 %v14796_v15, %v8360_v17 }
0x29f5   : > { %v8542_v1 = vmul.f32 1.442695, %v8430_v44  ;;  %v8544_v5 = vmul.f32 1.442695, %v8431_v61 }
0x29f6   : > { %v8582_v11 = vpop.xlane.xlu1 %8581  ;;  %v8363_v8 = vpop.xlane.xlu0 %8362 }
0x29f7   : > { %11145 = vpow2.f32 %v8542_v1  ;;  %v8432_v30 = vsub.f32 %v14808_v0, %v8363_v8  ;;  %v8433_v31 = vsub.f32 %v14810_v16, %v8363_v8 }
0x29f8   : > { %11147 = vpow2.f32 %v8544_v5 }
0x29f9   : > { %11149 = vrcp.f32 %v8582_v11  ;;  %v8546_v43 = vmul.f32 1.442695, %v8432_v30  ;;  %v8548_v7 = vmul.f32 1.442695, %v8433_v31  ;;  %v11142_v56 = vpop.eup %11141 }
0x29fa   : > { %v8585_v10 = vpop.xlane.xlu0 %8584  ;;  %v8366_v41 = vpop.xlane.xlu1 %8365  ;;  %v8735_v16 = vmul.f32 %v11142_v56, %v14792_v29  ;;  %v8734_v31 = vmul.f32 %v11142_v56, %v14790_v13 }
0x29fb   : > { %11151 = vpow2.f32 %v8546_v43  ;;  %v8434_v24 = vsub.f32 %v14823_v22, %v8366_v41  ;;  %v8435_v15 = vsub.f32 %v14826_v47, %v8366_v41 }
0x29fc   : > { %11153 = vpow2.f32 %v8548_v7 }
0x29fd   : > { %v11144_v61 = vpop.eup %11143  ;;  %11155 = vrcp.f32 %v8585_v10  ;;  %v8550_v1 = vmul.f32 1.442695, %v8434_v24  ;;  %v8552_v17 = vmul.f32 1.442695, %v8435_v15 }
0x29fe   : > { %v8588_v0 = vpop.xlane.xlu1 %8587  ;;  %v8369_v44 = vpop.xlane.xlu0 %8368  ;;  %v8737_v8 = vmul.f32 %v11144_v61, %v14804_v49  ;;  %v8736_v5 = vmul.f32 %v11144_v61, %v14802_v14 }
0x29ff   : > { %11157 = vpow2.f32 %v8550_v1  ;;  %v8436_v22 = vsub.f32 %v14839_v2, %v8369_v44  ;;  %v8437_v47 = vsub.f32 %v14842_v34, %v8369_v44 }
0x2a00   : > { %11159 = vpow2.f32 %v8552_v17  ;;  %v10229_v11 = vpack.c.bf16 %v8737_v8, %v8735_v16  ;;  %v10231_v10 = vpack.c.bf16 %v8736_v5, %v8734_v31 }
0x2a01   : > { %v15046_v41 = vpop.eup %11145  ;;  %11161 = vrcp.f32 %v8588_v0  ;;  %v8554_v30 = vmul.f32 1.442695, %v8436_v22  ;;  %v8556_v43 = vmul.f32 1.442695, %v8437_v47 }
0x2a02   : > { %v15048_v29 = vpop.eup %11147  ;;  %10230 = vmatprep.subr.bf16.mxu1 %v10229_v11  ;;  %v8591_v49 = vpop.xlane.xlu0 %8590 }
0x2a03   : > { %v8372_v13 = vpop.xlane.xlu1 %8371  ;;  %v11150_v7 = vpop.eup %11149  ;;  %11163 = vpow2.f32 %v8554_v30  ;;  %10232 = vmatpush1.bf16.xpose.msra.mxu1 %v10231_v10  ;;  %v8646_v34 = vadd.f32 %v15048_v29, %v15046_v41 }
0x2a04   : > { %v8438_v14 = vsub.f32 %v14855_v25, %v8372_v13  ;;  %v8439_v2 = vsub.f32 %v14858_v50, %v8372_v13  ;;  %11165 = vpow2.f32 %v8556_v43  ;;  %v8739_v0 = vmul.f32 %v11150_v7, %v14818_v21 }
0x2a05   : > { %v15054_v56 = vpop.eup %11151  ;;  %11167 = vrcp.f32 %v8591_v49  ;;  %8647 = vadd.xlane.f32.xlu1 %v8646_v34  ;;  %v8738_v31 = vmul.f32 %v11150_v7, %v14816_v19 }
0x2a06   : > { %v8558_v24 = vmul.f32 1.442695, %v8438_v14  ;;  %v8560_v15 = vmul.f32 1.442695, %v8439_v2  ;;  %v15056_v61 = vpop.eup %11153  ;;  %v8375_v17 = vpop.xlane.xlu0 %8374 }
0x2a07   : > { %v8594_v1 = vpop.xlane.xlu1 %8593  ;;  %v11156_v25 = vpop.eup %11155  ;;  %v8440_v50 = vsub.f32 %v14871_v4, %v8375_v17  ;;  %v8441_v44 = vsub.f32 %v14874_v26, %v8375_v17  ;;  %v8649_v16 = vadd.f32 %v15056_v61, %v15054_v56 }
0x2a08   : > { %11169 = vpow2.f32 %v8558_v24  ;;  %v8741_v8 = vmul.f32 %v11156_v25, %v14834_v57  ;;  %v8740_v5 = vmul.f32 %v11156_v25, %v14832_v54 }
0x2a09   : > { %11171 = vpow2.f32 %v8560_v15  ;;  %v15066_v22 = vpop.eup %11157  ;;  %v8562_v47 = vmul.f32 1.442695, %v8440_v50  ;;  %v8564_v21 = vmul.f32 1.442695, %v8441_v44  ;;  %8650 = vadd.xlane.f32.xlu0 %v8649_v16 }
0x2a0a   : > { %v15068_v11 = vpop.eup %11159  ;;  %11173 = vrcp.f32 %v8594_v1  ;;  %v10233_v4 = vpack.c.bf16 %v8741_v8, %v8739_v0  ;;  %v8597_v26 = vpop.xlane.xlu0 %8596  ;;  %v10235_v30 = vpack.c.bf16 %v8740_v5, %v8738_v31 }
0x2a0b   : > { %v8378_v10 = vpop.xlane.xlu1 %8377  ;;  %v11162_v43 = vpop.eup %11161  ;;  %11175 = vpow2.f32 %v8562_v47  ;;  %v8652_v54 = vadd.f32 %v15068_v11, %v15066_v22 }
0x2a0c   : > { %v8442_v57 = vsub.f32 %v14887_v60, %v8378_v10  ;;  %v8443_v19 = vsub.f32 %v14890_v62, %v8378_v10  ;;  %11177 = vpow2.f32 %v8564_v21  ;;  %10234 = vmatprep.subr.bf16.mxu1 %v10233_v4  ;;  %v8743_v34 = vmul.f32 %v11162_v43, %v14850_v18 }
0x2a0d   : > { %v15074_v49 = vpop.eup %11163  ;;  %11179 = vrcp.f32 %v8597_v26  ;;  %10236 = vmatpush1.bf16.xpose.msra.mxu1 %v10235_v30  ;;  %8653 = vadd.xlane.f32.xlu1 %v8652_v54  ;;  %v8742_v0 = vmul.f32 %v11162_v43, %v14848_v9 }
0x2a0e   : > { %v8566_v13 = vmul.f32 1.442695, %v8442_v57  ;;  %v8568_v7 = vmul.f32 1.442695, %v8443_v19  ;;  %v15076_v14 = vpop.eup %11165  ;;  %v8381_v2 = vpop.xlane.xlu0 %8380 }
0x2a0f   : > { %v11168_v60 = vpop.eup %11167  ;;  %v8600_v62 = vpop.xlane.xlu1 %8599  ;;  %v8444_v24 = vsub.f32 %v14903_v32, %v8381_v2  ;;  %v8445_v15 = vsub.f32 %v14906_v38, %v8381_v2  ;;  %v8655_v1 = vadd.f32 %v15076_v14, %v15074_v49 }
0x2a10   : > { %11181 = vpow2.f32 %v8566_v13  ;;  %v8745_v17 = vmul.f32 %v11168_v60, %v14866_v28  ;;  %v8744_v25 = vmul.f32 %v11168_v60, %v14864_v46 }
0x2a11   : > { %11183 = vpow2.f32 %v8568_v7  ;;  %v8570_v18 = vmul.f32 1.442695, %v8444_v24  ;;  %v8572_v44 = vmul.f32 1.442695, %v8445_v15  ;;  %8656 = vadd.xlane.f32.xlu0 %v8655_v1 }
0x2a12   : > { %v15086_v50 = vpop.eup %11169  ;;  %11185 = vrcp.f32 %v8600_v62  ;;  %v10237_v32 = vpack.c.bf16 %v8745_v17, %v8743_v34  ;;  %v8603_v38 = vpop.xlane.xlu0 %8602  ;;  %v10239_v8 = vpack.c.bf16 %v8744_v25, %v8742_v0 }
0x2a13   : > { %v15088_v16 = vpop.eup %11171  ;;  %11187 = vpow2.f32 %v8570_v18 }
0x2a14   : > { %v8658_v31 = vadd.f32 %v15088_v16, %v15086_v50  ;;  %v11174_v28 = vpop.eup %11173  ;;  %11189 = vpow2.f32 %v8572_v44  ;;  %10238 = vmatprep.subr.bf16.mxu1 %v10237_v32 }
0x2a15   : > { %v15092_v9 = vpop.eup %11175  ;;  %11191 = vrcp.f32 %v8603_v38  ;;  %10240 = vmatpush1.bf16.xpose.msra.mxu1 %v10239_v8  ;;  %v8747_v4 = vmul.f32 %v11174_v28, %v14882_v40  ;;  %v8746_v10 = vmul.f32 %v11174_v28, %v14880_v3 }
0x2a16   : > { %8659 = vadd.xlane.f32.xlu1 %v8658_v31  ;;  %v15094_v46 = vpop.eup %11177  ;;  %v8606_v5 = vpop.xlane.xlu1 %8605 }
0x2a17   : > { %v11180_v47 = vpop.eup %11179  ;;  %v8661_v21 = vadd.f32 %v15094_v46, %v15092_v9  ;;  %11193 = vrcp.f32 %v8606_v5 }
0x2a18   : > { %v8749_v26 = vmul.f32 %v11180_v47, %v14898_v37  ;;  %v8748_v30 = vmul.f32 %v11180_v47, %v14896_v20 }
0x2a19   : > { %8662 = vadd.xlane.f32.xlu0 %v8661_v21 }
0x2a1a   : > { %v15102_v43 = vpop.eup %11181  ;;  %v10241_v19 = vpack.c.bf16 %v8749_v26, %v8747_v4  ;;  %v8609_v54 = vpop.xlane.xlu0 %8608  ;;  %v10243_v13 = vpack.c.bf16 %v8748_v30, %v8746_v10  ;;  %v6360_v10 = vld [vmem:[%s16032_s1] sm:$0xff]  ;;  %s16058_s1 = smov 1  }
0x2a1b   : > { %v15104_v57 = vpop.eup %11183  ;;  %11195 = vrcp.f32 %v8609_v54 }
0x2a1c   : > { %v8664_v7 = vadd.f32 %v15104_v57, %v15102_v43  ;;  %v11186_v40 = vpop.eup %11185  ;;  %10242 = vmatprep.subr.bf16.mxu1 %v10241_v19 }
0x2a1d   : > { %v15108_v37 = vpop.eup %11187  ;;  %10244 = vmatpush1.bf16.xpose.msra.mxu1 %v10243_v13  ;;  %v8751_v60 = vmul.f32 %v11186_v40, %v14914_v6  ;;  %v8750_v24 = vmul.f32 %v11186_v40, %v14912_v39 }
0x2a1e   : > { %8665 = vadd.xlane.f32.xlu1 %v8664_v7  ;;  %v15110_v3 = vpop.eup %11189  ;;  %v8612_v20 = vpop.xlane.xlu1 %8611 }
0x2a1f   : > { %v11192_v2 = vpop.eup %11191  ;;  %v8667_v34 = vadd.f32 %v15110_v3, %v15108_v37  ;;  %11197 = vrcp.f32 %v8612_v20 }
0x2a20   : > { %v8753_v62 = vmul.f32 %v11192_v2, %v14924_v63  ;;  %v8752_v15 = vmul.f32 %v11192_v2, %v14922_v23 }
0x2a21   : > { %8668 = vadd.xlane.f32.xlu0 %v8667_v34  ;;  %v11194_v25 = vpop.eup %11193 }
0x2a22   : > { %v10245_v1 = vpack.c.bf16 %v8753_v62, %v8751_v60  ;;  %v8615_v17 = vpop.xlane.xlu0 %8614  ;;  %v10247_v0 = vpack.c.bf16 %v8752_v15, %v8750_v24  ;;  %v8755_v32 = vmul.f32 %v11194_v25, %v14932_v52  ;;  %v8754_v39 = vmul.f32 %v11194_v25, %v14930_v42  ;;  %v16035_v62 = vld [vmem:[#allocation58_spill] sm:$0xff] }
0x2a23   : > { %11199 = vrcp.f32 %v8615_v17  ;;  %v16039_v17 = vld [vmem:[#allocation56_spill] sm:$0xff] }
0x2a24   : > { %10246 = vmatprep.subr.bf16.mxu1 %v10245_v1 }
0x2a25   : > { %v11196_v18 = vpop.eup %11195  ;;  %10248 = vmatpush1.bf16.xpose.msra.mxu1 %v10247_v0 }
0x2a26   : > { %v8618_v44 = vpop.xlane.xlu1 %8617  ;;  %v8757_v6 = vmul.f32 %v11196_v18, %v14940_v36  ;;  %v8756_v63 = vmul.f32 %v11196_v18, %v14938_v35 }
0x2a27   : > { %11201 = vrcp.f32 %v8618_v44 }
0x2a28   : > { %v10249_v23 = vpack.c.bf16 %v8757_v6, %v8755_v32  ;;  %v10251_v38 = vpack.c.bf16 %v8756_v63, %v8754_v39 }
0x2a29   : > { %v11198_v31 = vpop.eup %11197 }
0x2a2a   : > { %10250 = vmatprep.subr.bf16.mxu1 %v10249_v23  ;;  %v8621_v8 = vpop.xlane.xlu0 %8620  ;;  %v8759_v47 = vmul.f32 %v11198_v31, %v14948_v48  ;;  %v8758_v35 = vmul.f32 %v11198_v31, %v14946_v51 }
0x2a2b   : > { %11203 = vrcp.f32 %v8621_v8  ;;  %v15139_v8 = vld [vmem:[%s16038_s2] sm:$0xff]  ;;  %s16059_s2 = smov 127  }
0x2a2d   : > { %v11200_v28 = vpop.eup %11199  ;;  %10252 = vmatpush1.bf16.xpose.msra.mxu1 %v10251_v38 }
0x2a2e   : > { %v8624_v5 = vpop.xlane.xlu1 %8623  ;;  %v8761_v52 = vmul.f32 %v11200_v28, %v14956_v55  ;;  %v8760_v36 = vmul.f32 %v11200_v28, %v14954_v59  ;;  %v16033_v55 = vld [vmem:[#allocation59_spill] sm:$0xff] }
0x2a2f   : > { %11205 = vrcp.f32 %v8624_v5  ;;  %v16034_v59 = vld [vmem:[#allocation91_spill] sm:$0xff]  ;;  %8876 = vrot.lane.b32.xlu1 %v15139_v8, %s15937_s7  ;;  %s16057_s7 = sld [smem:[#allocation4_spill]] }
0x2a30   : > { %v10253_v42 = vpack.c.bf16 %v8761_v52, %v8759_v47  ;;  %v10255_v21 = vpack.c.bf16 %v8760_v36, %v8758_v35  ;;  %v16041_v35 = vld [vmem:[#allocation100_spill] sm:$0xff] }
0x2a31   : > { %v11202_v26 = vpop.eup %11201 }
0x2a32   : > { %10254 = vmatprep.subr.bf16.mxu1 %v10253_v42  ;;  %v8627_v4 = vpop.xlane.xlu0 %8626  ;;  %v8763_v54 = vmul.f32 %v11202_v26, %v14964_v33  ;;  %v8762_v51 = vmul.f32 %v11202_v26, %v16034_v59  ;;  %v16036_v33 = vld [vmem:[#allocation77_spill] sm:$0xff]  ;;  %v16042_v42 = vld [vmem:[#allocation62_spill] sm:$0xff]  ;;  %v16046_v59 = vld [vmem:[#allocation64_spill] sm:$0xff] }
0x2a33   : > { %11207 = vrcp.f32 %v8627_v4  ;;  %v16043_v4 = vld [vmem:[#allocation103_spill] sm:$0xff] }
0x2a35   : > { %v11204_v30 = vpop.eup %11203  ;;  %10256 = vmatpush1.bf16.xpose.msra.mxu1 %v10255_v21 }
0x2a36   : > { %v8630_v19 = vpop.xlane.xlu1 %8629  ;;  %v8765_v48 = vmul.f32 %v11204_v30, %v14972_v53  ;;  %v8764_v13 = vmul.f32 %v11204_v30, %v16033_v55  ;;  %v16037_v53 = vld [vmem:[#allocation57_spill] sm:$0xff]  ;;  %v16045_v55 = vld [vmem:[#allocation60_spill] sm:$0xff] }
0x2a37   : > { %9038 = vperm.xlu0 %10416, %v6360_v10   ;;  %11209 = vrcp.f32 %v8630_v19 }
0x2a38   : > { %v10257_v7 = vpack.c.bf16 %v8765_v48, %v8763_v54  ;;  %v10259_v40 = vpack.c.bf16 %v8764_v13, %v8762_v51  ;;  %v16044_v54 = vld [vmem:[#allocation63_spill] sm:$0xff] }
0x2a39   : > { %v11206_v2 = vpop.eup %11205 }
0x2a3a   : > { %10258 = vmatprep.subr.bf16.mxu1 %v10257_v7  ;;  %v8633_v20 = vpop.xlane.xlu0 %8632  ;;  %v8767_v24 = vmul.f32 %v11206_v2, %v16035_v62  ;;  %v8766_v0 = vmul.f32 %v11206_v2, %v16039_v17  ;;  %v16047_v7 = vld [vmem:[#allocation92_spill] sm:$0xff] }
0x2a3b   : > { %11211 = vrcp.f32 %v8633_v20 }
0x2a3d   : > { %v11208_v34 = vpop.eup %11207  ;;  %10260 = vmatpush1.bf16.xpose.msra.mxu1 %v10259_v40 }
0x2a3e   : > { %v8636_v60 = vpop.xlane.xlu1 %8635  ;;  %v8769_v15 = vmul.f32 %v11208_v34, %v16036_v33  ;;  %v8768_v1 = vmul.f32 %v11208_v34, %v16037_v53 }
0x2a3f   : > { %11213 = vrcp.f32 %v8636_v60 }
0x2a40   : > { %v10261_v25 = vpack.c.bf16 %v8769_v15, %v8767_v24  ;;  %v10263_v18 = vpack.c.bf16 %v8768_v1, %v8766_v0 }
0x2a41   : > { %v11210_v32 = vpop.eup %11209 }
0x2a42   : > { %10262 = vmatprep.subr.bf16.mxu1 %v10261_v25  ;;  %v8639_v44 = vpop.xlane.xlu0 %8638  ;;  %v8771_v39 = vmul.f32 %v11210_v32, %v14996_v45  ;;  %v8770_v31 = vmul.f32 %v11210_v32, %v14994_v27  ;;  %v16040_v45 = vld [vmem:[#allocation105_spill] sm:$0xff] }
0x2a43   : > { %11215 = vrcp.f32 %v8639_v44 }
0x2a45   : > { %v11212_v6 = vpop.eup %11211  ;;  %10264 = vmatpush1.bf16.xpose.msra.mxu1 %v10263_v18 }
0x2a46   : > { %v8642_v63 = vpop.xlane.xlu1 %8641  ;;  %v8773_v23 = vmul.f32 %v11212_v6, %v15004_v12  ;;  %v8772_v38 = vmul.f32 %v11212_v6, %v15002_v58 }
0x2a47   : > { %11217 = vrcp.f32 %v8642_v63 }
0x2a48   : > { %v10265_v28 = vpack.c.bf16 %v8773_v23, %v8771_v39  ;;  %v10267_v5 = vpack.c.bf16 %v8772_v38, %v8770_v31 }
0x2a49   : > { %v11214_v52 = vpop.eup %11213 }
0x2a4a   : > { %10266 = vmatprep.subr.bf16.mxu1 %v10265_v28  ;;  %v8645_v47 = vpop.xlane.xlu0 %8644  ;;  %v8775_v12 = vmul.f32 %v11214_v52, %v16040_v45  ;;  %v8774_v27 = vmul.f32 %v11214_v52, %v16043_v4 }
0x2a4b   : > { %11219 = vrcp.f32 %v8645_v47 }
0x2a4d   : > { %v11216_v36 = vpop.eup %11215  ;;  %10268 = vmatpush1.bf16.xpose.msra.mxu1 %v10267_v5 }
0x2a4e   : > { %v8777_v58 = vmul.f32 %v11216_v36, %v16041_v35  ;;  %v8776_v21 = vmul.f32 %v11216_v36, %v16042_v42 }
0x2a50   : > { %v10269_v26 = vpack.c.bf16 %v8777_v58, %v8775_v12  ;;  %v10271_v10 = vpack.c.bf16 %v8776_v21, %v8774_v27 }
0x2a51   : > { %v11218_v30 = vpop.eup %11217 }
0x2a52   : > { %10270 = vmatprep.subr.bf16.mxu1 %v10269_v26  ;;  %v8779_v48 = vmul.f32 %v11218_v30, %v16044_v54  ;;  %v8778_v40 = vmul.f32 %v11218_v30, %v16047_v7  ;;  %v16052_v54 = vld [vmem:[#allocation104_spill] sm:$0xff]  ;;  %v11306_v7 = vld [vmem:[%s11403_s17] sm:$0xff] }
0x2a55   : > { %v11220_v19 = vpop.eup %11219  ;;  %10272 = vmatpush1.bf16.xpose.msra.mxu1 %v10271_v10 }
0x2a56   : > { %v8781_v13 = vmul.f32 %v11220_v19, %v16045_v55  ;;  %v8780_v51 = vmul.f32 %v11220_v19, %v16046_v59  ;;  %v16053_v55 = vld [vmem:[#allocation78_spill] sm:$0xff] }
0x2a58   : > { %v10273_v20 = vpack.c.bf16 %v8781_v13, %v8779_v48  ;;  %v10275_v2 = vpack.c.bf16 %v8780_v51, %v8778_v40 }
0x2a5a   : > { %10274 = vmatprep.subr.bf16.mxu1 %v10273_v20 }
0x2a5d   : > { %10276 = vmatpush1.bf16.xpose.msra.mxu1 %v10275_v2 }
0x2a92   : > { %v8648_v34 = vpop.xlane.xlu1 %8647 }
0x2a93   : > { %11221 = vrcp.f32 %v8648_v34 }
0x2a96   : > { %v8651_v60 = vpop.xlane.xlu0 %8650 }
0x2a97   : > { %11223 = vrcp.f32 %v8651_v60 }
0x2a9a   : > { %v8654_v62 = vpop.xlane.xlu1 %8653 }
0x2a9b   : > { %11225 = vrcp.f32 %v8654_v62 }
0x2a9d   : > { %v11222_v33 = vpop.eup %11221 }
0x2a9e   : > { %v8657_v24 = vpop.xlane.xlu0 %8656  ;;  %v8783_v1 = vmul.f32 %v11222_v33, %v15048_v29  ;;  %v8782_v0 = vmul.f32 %v11222_v33, %v15046_v41 }
0x2a9f   : > { %11227 = vrcp.f32 %v8657_v24 }
0x2aa1   : > { %v11224_v15 = vpop.eup %11223 }
0x2aa2   : > { %v8785_v17 = vmul.f32 %v11224_v15, %v15056_v61  ;;  %v8784_v25 = vmul.f32 %v11224_v15, %v15054_v56  ;;  %v6361_v15 = vld [vmem:[%s16054_s11] sm:$0xff] }
0x2aa3   : > { %v8660_v53 = vpop.xlane.xlu1 %8659 }
0x2aa4   : > { %v10277_v18 = vpack.c.bf16 %v8785_v17, %v8783_v1  ;;  %v10279_v44 = vpack.c.bf16 %v8784_v25, %v8782_v0  ;;  %11229 = vrcp.f32 %v8660_v53 }
0x2aa5   : > { %v11226_v6 = vpop.eup %11225 }
0x2aa6   : > { %10278 = vmatprep.subr.bf16.mxu1 %v10277_v18  ;;  %v8663_v32 = vpop.xlane.xlu0 %8662  ;;  %v8787_v23 = vmul.f32 %v11226_v6, %v15068_v11  ;;  %v8786_v61 = vmul.f32 %v11226_v6, %v15066_v22 }
0x2aa7   : > { %11231 = vrcp.f32 %v8663_v32  ;;  %10280 = vmatpush1.bf16.xpose.msra.mxu1 %v10279_v44  ;;  %v6362_v44 = vld [vmem:[%s11623_s27] sm:$0xff] }
0x2aa9   : > { %v11228_v63 = vpop.eup %11227 }
0x2aaa   : > { %v8789_v29 = vmul.f32 %v11228_v63, %v15076_v14  ;;  %v8788_v41 = vmul.f32 %v11228_v63, %v15074_v49 }
0x2aab   : > { %v8666_v39 = vpop.xlane.xlu1 %8665 }
0x2aac   : > { %v10281_v38 = vpack.c.bf16 %v8789_v29, %v8787_v23  ;;  %v10283_v56 = vpack.c.bf16 %v8788_v41, %v8786_v61  ;;  %11233 = vrcp.f32 %v8666_v39 }
0x2aae   : > { %10282 = vmatprep.subr.bf16.mxu1 %v10281_v38  ;;  %v8669_v31 = vpop.xlane.xlu0 %8668  ;;  %v11230_v28 = vpop.eup %11229 }
0x2aaf   : > { %11235 = vrcp.f32 %v8669_v31  ;;  %10284 = vmatpush1.bf16.xpose.msra.mxu1 %v10283_v56  ;;  %v8791_v47 = vmul.f32 %v11230_v28, %v15088_v16  ;;  %v8790_v11 = vmul.f32 %v11230_v28, %v15086_v50  ;;  %v16048_v50 = vmov 0.0   ;;  %v8877_v27 = vpop.permute.xlu1 %8876  ;;  %v16055_v56 = vld [vmem:[#allocation38_spill] sm:$0xff]  ;;  %v16056_v28 = vld [vmem:[#allocation39_spill] sm:$0xff] }
0x2ab1   : > { %v11232_v5 = vpop.eup %11231 }
0x2ab2   : > { %v8793_v52 = vmul.f32 %v11232_v5, %v15094_v46  ;;  %v8792_v14 = vmul.f32 %v11232_v5, %v15092_v9  ;;  %v16049_v9 = vld [vmem:[#allocation54_spill] sm:$0xff] }
0x2ab3   : > { %v8800_v21 = vrot.slane %v16049_v9, 4 }
0x2ab4   : > { %v10285_v22 = vpack.c.bf16 %v8793_v52, %v8791_v47  ;;  %v10287_v36 = vpack.c.bf16 %v8792_v14, %v8790_v11  ;;  %v9434_v47 = vld [vmem:[%s11633_s4] sm:$0xff]  ;;  %v9419_v11 = vld [vmem:[%s16057_s7 + $0x88] sm:$0xff] }
0x2ab5   : > { %v9418_v52 = vld [vmem:[%s16057_s7 + $0x80] sm:$0xff] }
0x2ab6   : > { %10286 = vmatprep.subr.bf16.mxu1 %v10285_v22  ;;  %v11234_v49 = vpop.eup %11233  ;;  %v9402_v14 = vld [vmem:[%s16057_s7] sm:$0xff]  ;;  %v10309_v22 = vpack.c.bf16 %v9419_v11, %v9418_v52  ;;  %v16064_v52 = vld [vmem:[#allocation37_spill] sm:$0xff] }
0x2ab7   : > { %10288 = vmatpush1.bf16.xpose.msra.mxu1 %v10287_v36  ;;  %v8795_v12 = vmul.f32 %v11234_v49, %v15104_v57  ;;  %v8794_v58 = vmul.f32 %v11234_v49, %v15102_v43  ;;  %v16050_v43 = vld [vmem:[#allocation83_spill] sm:$0xff]  ;;  %v9420_v49 = vld [vmem:[%s16057_s7 + $0x90] sm:$0xff] }
0x2ab8   : > { %v9403_v36 = vld [vmem:[%s16057_s7 + $0x8] sm:$0xff] }
0x2ab9   : > { %v11236_v45 = vpop.eup %11235 }
0x2aba   : > { %v8797_v35 = vmul.f32 %v11236_v45, %v15110_v3  ;;  %v8796_v16 = vmul.f32 %v11236_v45, %v15108_v37  ;;  %v16051_v37 = vld [vmem:[#allocation82_spill] sm:$0xff]  ;;  %v9039_v3 = vpop.permute.xlu0 %9038  ;;  %v9421_v45 = vld [vmem:[%s16057_s7 + $0x98] sm:$0xff] }
0x2abc   : > { %v10289_v42 = vpack.c.bf16 %v8797_v35, %v8795_v12  ;;  %v10291_v46 = vpack.c.bf16 %v8796_v16, %v8794_v58  ;;  %v10311_v12 = vpack.c.bf16 %v9403_v36, %v9402_v14  ;;  %v10313_v35 = vpack.c.bf16 %v9421_v45, %v9420_v49  ;;  %v9404_v58 = vld [vmem:[%s16057_s7 + $0x10] sm:$0xff]  ;;  %v9405_v16 = vld [vmem:[%s16057_s7 + $0x18] sm:$0xff] }
0x2abe   : > { %10290 = vmatprep.subr.bf16.mxu1 %v10289_v42  ;;  %v9422_v42 = vld [vmem:[%s16057_s7 + $0xa0] sm:$0xff] }
0x2abf   : > { %10292 = vmatpush1.bf16.xpose.msra.mxu1 %v10291_v46  ;;  %v9423_v46 = vld [vmem:[%s16057_s7 + $0xa8] sm:$0xff] }
0x2ac0   : > { %9957 = vmatprep.subr.mxu1 %v16048_v50  ;;  %v10317_v9 = vpack.c.bf16 %v9423_v46, %v9422_v42 }
0x2ac6   : > { %8869 = vmatmul.mubr.f32.vlgmr.msra.gmra.mrb[214].mxu1 %v8800_v21  ;;  %v9406_v21 = vld [vmem:[%s16057_s7 + $0x20] sm:$0xff] }
0x2ac7   : > { %9959 = vmatprep.mubr.msk.f32.mxu1 %vm11377_vm9, %v16048_v50 }
0x2b99   : > { %v8870_v4 = vpop.f32.mrb[214].mxu1 }
0x2b9a   : > { %v8872_v57 = vpop.f32.mrb[215].mxu1 }
0x2b9b   : > { %9815 = vmatprep.subr.msk.mxu0 %vm2561_vm12, %v8872_v57  ;;  %v9424_v57 = vld [vmem:[%s16057_s7 + $0xb0] sm:$0xff] }
0x2b9c   : > { %9816 = vmatpush1.msk.msra.mxu0 %vm2561_vm12, %v8870_v4  ;;  %v9407_v4 = vld [vmem:[%s16057_s7 + $0x28] sm:$0xff] }
0x2b9d   : > { %9817 = vmatmul.mubr.msk.f32.vlgmr.msra.gmra.mrb[224].mxu0 %vm2557_vm13, %v8877_v27  ;;  %9818 = vmatprep.subr.msk.mxu0 %vm2561_vm12, %v16050_v43  ;;  %v9425_v27 = vld [vmem:[%s16057_s7 + $0xb8] sm:$0xff]  ;;  %v10319_v43 = vpack.c.bf16 %v9407_v4, %v9406_v21  ;;  %v16067_v21 = vld [vmem:[#allocation44_spill] sm:$0xff] }
0x2b9e   : > { %9819 = vmatpush1.msk.msra.mxu0 %vm2561_vm12, %v16051_v37  ;;  %9029 = vmatprep.mubr.f32.mxu0 %v16048_v50  ;;  %v10321_v37 = vpack.c.bf16 %v9425_v27, %v9424_v57  ;;  %v16068_v57 = vld [vmem:[#allocation45_spill] sm:$0xff] }
0x2ba5   : > { %9820 = vmatmul.mubr.msk.f32.vlgmr.msra.gmra.mrb[224].mxu0 %vm2557_vm13, %v15139_v8 }
0x2ba6   : > { %9395 = vmatprep.mubr.f32.mxu0 %v16048_v50 }
0x2c78   : > { %v9031_v26 = vpop.f32.mrb[224].mxu0 }
0x2c79   : > { %v9041_v10 = vadd.f32 %v9039_v3, %v9031_v26  ;;  %v9033_v30 = vpop.f32.mrb[225].mxu0  ;;  %v9409_v26 = vld [vmem:[%s16057_s7 + $0x38] sm:$0xff] }
0x2c7a   : > { %v9042_v19 = vadd.f32 %v9039_v3, %v9033_v30  ;;  %v9408_v3 = vld [vmem:[%s16057_s7 + $0x30] sm:$0xff]  ;;  %v9427_v30 = vld [vmem:[%s16057_s7 + $0xc8] sm:$0xff] }
0x2c7b   : > { %v9043_v48 = vadd.f32 %v9041_v10, %v16052_v54  ;;  %v9426_v10 = vld [vmem:[%s16057_s7 + $0xc0] sm:$0xff] }
0x2c7c   : > { %v9044_v13 = vadd.f32 %v9042_v19, %v16053_v55  ;;  %v10323_v19 = vpack.c.bf16 %v9409_v26, %v9408_v3  ;;  %v10325_v54 = vpack.c.bf16 %v9427_v30, %v9426_v10  ;;  %v9411_v55 = vld [vmem:[%s16057_s7 + $0x48] sm:$0xff] }
0x2c7e   : > { %v9045_v59 = vadd.f32 %v9044_v13, %v9043_v48 }
0x2c80   : > { %9046 = vadd.xlane.f32.xlu1 %v9045_v59  ;;  %v9429_v59 = vld [vmem:[%s16057_s7 + $0xd8] sm:$0xff] }
0x2d0d   : > { %v9047_v51 = vpop.xlane.xlu1 %9046 }
0x2d0e   : > { %9958 = vmatpush3.msra.mxu1 %v9047_v51 }
0x2d0f   : > { %9960 = vmatmul.mubr.msk.f32.vlgmr.msra.gmra.mrb[216].mxu1 %vm1893_vm10, %v11306_v7  ;;  %9962 = vmatprep.subr.mxu1 %v16048_v50 }
0x2d10   : > { %9964 = vmatprep.mubr.msk.f32.mxu1 %vm11377_vm9, %v16048_v50  ;;  %v10315_v50 = vpack.c.bf16 %v9405_v16, %v9404_v58  ;;  %v16066_v16 = vld [vmem:[#allocation41_spill] sm:$0xff] }
0x2de2   : > { %v9114_v8 = vpop.f32.mrb[216].mxu1 }
0x2de3   : > { %v9118_v40 = vmul.f32 0.001953125, %v9114_v8  ;;  %v9961_v20 = vpop.f32.mrb[217].mxu1  ;;  %v9412_v8 = vld [vmem:[%s16057_s7 + $0x50] sm:$0xff] }
0x2de4   : > { %v9430_v20 = vld [vmem:[%s16057_s7 + $0xe0] sm:$0xff] }
0x2de5   : > { %9121 = vperm.xlu0 %10416, %v9118_v40   ;;  %v9413_v40 = vld [vmem:[%s16057_s7 + $0x58] sm:$0xff] }
0x2e64   : > { %v9122_v2 = vpop.permute.xlu0 %9121 }
0x2e65   : > { %v9124_v34 = vsub.f32 %v9043_v48, %v9122_v2  ;;  %v9125_v60 = vsub.f32 %v9044_v13, %v9122_v2  ;;  %v9410_v48 = vld [vmem:[%s16057_s7 + $0x40] sm:$0xff]  ;;  %v9428_v13 = vld [vmem:[%s16057_s7 + $0xd0] sm:$0xff]  ;;  %v9431_v2 = vld [vmem:[%s16057_s7 + $0xe8] sm:$0xff] }
0x2e66   : > { %v10327_v51 = vpack.c.bf16 %v9411_v55, %v9410_v48  ;;  %v16070_v48 = vld [vmem:[#allocation47_spill] sm:$0xff] }
0x2e67   : > { %v9126_v62 = vmul.f32 %v9124_v34, %v9124_v34  ;;  %v9127_v24 = vmul.f32 %v9125_v60, %v9125_v60 }
0x2e69   : > { %v9128_v33 = vadd.f32 %v9127_v24, %v9126_v62  ;;  %v9414_v62 = vld [vmem:[%s16057_s7 + $0x60] sm:$0xff]  ;;  %v9415_v24 = vld [vmem:[%s16057_s7 + $0x68] sm:$0xff] }
0x2e6b   : > { %9129 = vadd.xlane.f32.xlu0 %v9128_v33  ;;  %v9432_v33 = vld [vmem:[%s16057_s7 + $0xf0] sm:$0xff] }
0x2e81   : > { %9213 = vperm.xlu0 %10416, %v6361_v15   ;;  %v9433_v15 = vld [vmem:[%s16057_s7 + $0xf8] sm:$0xff] }
0x2ef8   : > { %v9130_v53 = vpop.xlane.xlu0 %9129 }
0x2ef9   : > { %9963 = vmatpush3.msra.mxu1 %v9130_v53  ;;  %v10335_v53 = vpack.c.bf16 %v9415_v24, %v9414_v62  ;;  %v16073_v24 = vld [vmem:[#allocation50_spill] sm:$0xff] }
0x2efa   : > { %9965 = vmatmul.mubr.msk.f32.vlgmr.msra.gmra.mrb[218].mxu1 %vm1893_vm10, %v11306_v7  ;;  %10310 = vmatprep.subr.bf16.mxu1 %v10309_v22  ;;  %v10329_v7 = vpack.c.bf16 %v9429_v59, %v9428_v13 }
0x2efb   : > { %10312 = vmatpush3.bf16.msra.mxu1 %v10311_v12 }
0x2efc   : > { %10314 = vmatprep.subr.bf16.mxu1 %v10313_v35  ;;  %v16065_v35 = vld [vmem:[#allocation40_spill] sm:$0xff] }
0x2eff   : > { %10316 = vmatpush3.bf16.msra.mxu1 %v10315_v50 }
0x2f00   : > { %v9214_v39 = vpop.permute.xlu0 %9213  ;;  %10318 = vmatprep.subr.bf16.mxu1 %v10317_v9 }
0x2f03   : > { %10320 = vmatpush3.bf16.msra.mxu1 %v10319_v43 }
0x2f04   : > { %10322 = vmatprep.subr.bf16.mxu1 %v10321_v37 }
0x2f07   : > { %10324 = vmatpush3.bf16.msra.mxu1 %v10323_v19  ;;  %v16069_v19 = vld [vmem:[#allocation46_spill] sm:$0xff] }
0x2f08   : > { %10326 = vmatprep.subr.bf16.mxu1 %v10325_v54 }
0x2f0b   : > { %10328 = vmatpush3.bf16.msra.mxu1 %v10327_v51 }
0x2f0c   : > { %10330 = vmatprep.subr.bf16.mxu1 %v10329_v7 }
0x2fcd   : > { %v9197_v1 = vpop.f32.mrb[218].mxu1 }
0x2fce   : > { %v9201_v17 = vmul.f32 0.001953125, %v9197_v1  ;;  %v9966_v0 = vpop.f32.mrb[219].mxu1  ;;  %v10337_v1 = vpack.c.bf16 %v9433_v15, %v9432_v33  ;;  %v16074_v15 = vld [vmem:[#allocation51_spill] sm:$0xff] }
0x2fd0   : > { %v9202_v25 = vadd.f32 1e-05, %v9201_v17 }
0x2fd2   : > { %11237 = vrsqrt.f32 %v9202_v25 }
0x2fdc   : > { %v11238_v18 = vpop.eup %11237 }
0x2fdd   : > { %9206 = vperm.xlu1 %10417, %v11238_v18  }
0x2fe1   : > { %9220 = vperm.xlu1 %10417, %v6362_v44  }
0x305c   : > { %v9207_v32 = vpop.permute.xlu1 %9206 }
0x305d   : > { %v9209_v6 = vmul.f32 %v9207_v32, %v9124_v34  ;;  %v9210_v63 = vmul.f32 %v9207_v32, %v9125_v60  ;;  %v10331_v34 = vpack.c.bf16 %v9413_v40, %v9412_v8  ;;  %v10333_v60 = vpack.c.bf16 %v9431_v2, %v9430_v20  ;;  %v16071_v20 = vld [vmem:[#allocation48_spill] sm:$0xff] }
0x305f   : > { %v9216_v23 = vmul.f32 %v9214_v39, %v9209_v6  ;;  %v9217_v29 = vmul.f32 %v9214_v39, %v9210_v63  ;;  %10332 = vmatpush3.bf16.msra.mxu1 %v10331_v34  ;;  %v16061_v63 = vld [vmem:[#allocation42_spill] sm:$0xff]  ;;  %v16072_v34 = vld [vmem:[#allocation49_spill] sm:$0xff] }
0x3060   : > { %v9221_v61 = vpop.permute.xlu1 %9220  ;;  %10334 = vmatprep.subr.bf16.mxu1 %v10333_v60 }
0x3061   : > { %v9223_v41 = vadd.f32 %v9221_v61, %v9216_v23  ;;  %v9224_v38 = vadd.f32 %v9221_v61, %v9217_v29  ;;  %v16062_v23 = vld [vmem:[#allocation43_spill] sm:$0xff] }
0x3063   : > { %v15194_v31 = vmul.f32 %v9223_v41, %v16055_v56  ;;  %9236 = vrot.lane.b32.xlu0 %v9223_v41, %s11368_s23  ;;  %9226 = vrot.lane.b32.xlu1 %v9223_v41, %s11369_s26  ;;  %v15199_v5 = vmul.f32 %v9224_v38, %v16056_v28  ;;  %v16063_v28 = vld [vmem:[#allocation36_spill] sm:$0xff] }
0x3064   : > { %10336 = vmatpush3.bf16.msra.mxu1 %v10335_v53 }
0x3065   : > { %9268 = vst [vmem:[#allocation2 + $0x40] sm:$0xff] %v15194_v31  ;;  %9269 = vst [vmem:[#allocation2 + $0x48] sm:$0xff] %v15199_v5  ;;  %10338 = vmatprep.subr.bf16.mxu1 %v10337_v1 }
0x3067   : > { %9246 = vrot.lane.b32.xlu0 %v9223_v41, %s11370_s28  ;;  %9228 = vrot.lane.b32.xlu1 %v9224_v38, %s11369_s26 }
0x306b   : > { %9256 = vrot.lane.b32.xlu0 %v9223_v41, %s16058_s1  ;;  %9238 = vrot.lane.b32.xlu1 %v9224_v38, %s11368_s23  ;;  %s16075_s23 = sshll.u32 %s16077_s16, 3 }
0x306c   : > { %s1508_s26 = scalar_lea.vmem %s11638_s25, %s16075_s23 }
0x306f   : > { %9270 = vrot.lane.b32.xlu0 %v9223_v41, %s16059_s2  ;;  %9248 = vrot.lane.b32.xlu1 %v9224_v38, %s11370_s28 }
0x3073   : > { %9280 = vrot.lane.b32.xlu0 %v9223_v41, %s15848_s10  ;;  %9258 = vrot.lane.b32.xlu1 %v9224_v38, %s16058_s1 }
0x3077   : > { %9290 = vrot.lane.b32.xlu0 %v9223_v41, %s15849_s0  ;;  %9272 = vrot.lane.b32.xlu1 %v9224_v38, %s16059_s2 }
0x307b   : > { %9300 = vrot.lane.b32.xlu0 %v9223_v41, %s15822_s18  ;;  %9282 = vrot.lane.b32.xlu1 %v9224_v38, %s15848_s10 }
0x307f   : > { %9437 = vperm.xlu0 %10416, %v9434_v47   ;;  %9292 = vrot.lane.b32.xlu1 %v9224_v38, %s15849_s0 }
0x3083   : > { %9302 = vrot.lane.b32.xlu1 %v9224_v38, %s15822_s18 }
0x30d5   : > { %v9237_v17 = vpop.permute.xlu0 %9236  ;;  %v9227_v0 = vpop.permute.xlu1 %9226 }
0x30d9   : > { %v9247_v25 = vpop.permute.xlu0 %9246  ;;  %v9229_v18 = vpop.permute.xlu1 %9228 }
0x30da   : > { %v9230_v32 = vsel %vm1623_vm2, %v9227_v0, %v9229_v18  ;;  %v9231_v6 = vsel %vm1623_vm2, %v9229_v18, %v9227_v0 }
0x30db   : > { %v9232_v39 = vmul.f32 %v9231_v6, %v16061_v63  ;;  %v9233_v29 = vmul.f32 %v9230_v32, %v16062_v23  ;;  %v11307_v6 = vld [vmem:[%s11398_s13 + $0x10] ss:$0 sm:$0xff] }
0x30dd   : > { %9234 = vst [vmem:[#allocation2] sm:$0xff] %v9232_v39  ;;  %9235 = vst [vmem:[#allocation2 + $0x8] sm:$0xff] %v9233_v29  ;;  %v9257_v61 = vpop.permute.xlu0 %9256  ;;  %v9239_v41 = vpop.permute.xlu1 %9238 }
0x30de   : > { %v9240_v38 = vsel %vm1642_vm0, %v9237_v17, %v9239_v41  ;;  %v9241_v56 = vsel %vm1642_vm0, %v9239_v41, %v9237_v17  ;;  %v9417_v41 = vld [vmem:[%s16057_s7 + $0x78] sm:$0xff] }
0x30df   : > { %v9242_v47 = vmul.f32 %v9241_v56, %v16063_v28  ;;  %v9243_v11 = vmul.f32 %v9240_v38, %v16064_v52 }
0x30e1   : > { %9244 = vst [vmem:[#allocation2 + $0x10] sm:$0xff] %v9242_v47  ;;  %9245 = vst [vmem:[#allocation2 + $0x18] sm:$0xff] %v9243_v11  ;;  %v9249_v14 = vpop.permute.xlu1 %9248  ;;  %v10293_v22 = vpack.c.bf16 %v9243_v11, %v9233_v29  ;;  %v10295_v36 = vpack.c.bf16 %v9242_v47, %v9232_v39  ;;  %v9271_v12 = vpop.permute.xlu0 %9270  ;;  %v11308_v39 = vld [vmem:[%s11398_s13 + $0x18] ss:$0 sm:$0xff]  ;;  %v9225_v29 = vld [vmem:[%s11628_s20] sm:$0xff] }
0x30e2   : > { %v9250_v49 = vsel %vm1661_vm1, %v9247_v25, %v9249_v14  ;;  %v9251_v45 = vsel %vm1661_vm1, %v9249_v14, %v9247_v25 }
0x30e3   : > { %v9252_v58 = vmul.f32 %v9251_v45, %v16065_v35  ;;  %v9253_v42 = vmul.f32 %v9250_v49, %v16066_v16  ;;  %10294 = vmatprep.subr.bf16.mxu0 %v10293_v22 }
0x30e4   : > { %10296 = vmatpush1.bf16.msra.mxu0 %v10295_v36 }
0x30e5   : > { %9254 = vst [vmem:[#allocation2 + $0x20] sm:$0xff] %v9252_v58  ;;  %9255 = vst [vmem:[#allocation2 + $0x28] sm:$0xff] %v9253_v42  ;;  %v9259_v46 = vpop.permute.xlu1 %9258  ;;  %v9281_v43 = vpop.permute.xlu0 %9280 }
0x30e6   : > { %v9260_v50 = vsel %vm1680_vm3, %v9257_v61, %v9259_v46  ;;  %v9261_v9 = vsel %vm1680_vm3, %v9259_v46, %v9257_v61  ;;  %v9416_v61 = vld [vmem:[%s16057_s7 + $0x70] sm:$0xff] }
0x30e7   : > { %v9262_v4 = vmul.f32 %v9261_v9, %v16067_v21  ;;  %v9263_v27 = vmul.f32 %v9260_v50, %v16068_v57  ;;  %v10339_v38 = vpack.c.bf16 %v9417_v41, %v9416_v61 }
0x30e9   : > { %9264 = vst [vmem:[#allocation2 + $0x30] sm:$0xff] %v9262_v4  ;;  %9265 = vst [vmem:[#allocation2 + $0x38] sm:$0xff] %v9263_v27  ;;  %v9273_v37 = vpop.permute.xlu1 %9272  ;;  %v10297_v3 = vpack.c.bf16 %v9263_v27, %v9253_v42  ;;  %v10299_v26 = vpack.c.bf16 %v9262_v4, %v9252_v58  ;;  %v9291_v40 = vpop.permute.xlu0 %9290  ;;  %10340 = vmatpush3.bf16.msra.mxu1 %v10339_v38 }
0x30ea   : > { %v9274_v10 = vsel %vm1717_vm4, %v9271_v12, %v9273_v37  ;;  %v9275_v30 = vsel %vm1717_vm4, %v9273_v37, %v9271_v12 }
0x30eb   : > { %v9276_v54 = vmul.f32 %v9274_v10, %v16069_v19  ;;  %v9277_v55 = vmul.f32 %v9275_v30, %v16070_v48  ;;  %10298 = vmatprep.subr.bf16.mxu0 %v10297_v3 }
0x30ec   : > { %10300 = vmatpush1.bf16.msra.mxu0 %v10299_v26 }
0x30ed   : > { %9278 = vst [vmem:[#allocation2 + $0x50] sm:$0xff] %v9276_v54  ;;  %9279 = vst [vmem:[#allocation2 + $0x58] sm:$0xff] %v9277_v55  ;;  %v9283_v13 = vpop.permute.xlu1 %9282  ;;  %v10301_v59 = vpack.c.bf16 %v9277_v55, %v15199_v5  ;;  %v10303_v51 = vpack.c.bf16 %v9276_v54, %v15194_v31  ;;  %v9301_v1 = vpop.permute.xlu0 %9300 }
0x30ee   : > { %v9284_v7 = vsel %vm1736_vm5, %v9281_v43, %v9283_v13  ;;  %v9285_v8 = vsel %vm1736_vm5, %v9283_v13, %v9281_v43 }
0x30ef   : > { %v9286_v2 = vmul.f32 %v9284_v7, %v16071_v20  ;;  %v9287_v60 = vmul.f32 %v9285_v8, %v16072_v34  ;;  %10302 = vmatprep.subr.bf16.mxu0 %v10301_v59 }
0x30f0   : > { %10304 = vmatpush1.bf16.msra.mxu0 %v10303_v51 }
0x30f1   : > { %9288 = vst [vmem:[#allocation2 + $0x60] sm:$0xff] %v9286_v2  ;;  %9289 = vst [vmem:[#allocation2 + $0x68] sm:$0xff] %v9287_v60  ;;  %v9293_v5 = vpop.permute.xlu1 %9292 }
0x30f2   : > { %v9294_v31 = vsel %vm1755_vm6, %v9291_v40, %v9293_v5  ;;  %v9295_v62 = vsel %vm1755_vm6, %v9293_v5, %v9291_v40 }
0x30f3   : > { %v9296_v33 = vmul.f32 %v9294_v31, %v16073_v24  ;;  %v9297_v53 = vmul.f32 %v9295_v62, %v16074_v15 }
0x30f5   : > { %9298 = vst [vmem:[#allocation2 + $0x70] sm:$0xff] %v9296_v33  ;;  %9299 = vst [vmem:[#allocation2 + $0x78] sm:$0xff] %v9297_v53  ;;  %v9303_v17 = vpop.permute.xlu1 %9302  ;;  %v10305_v0 = vpack.c.bf16 %v9297_v53, %v9287_v60  ;;  %v10307_v25 = vpack.c.bf16 %v9296_v33, %v9286_v2 }
0x30f6   : > { %v9304_v18 = vsel %vm1774_vm7, %v9301_v1, %v9303_v17  ;;  %v9305_v32 = vsel %vm1774_vm7, %v9303_v17, %v9301_v1 }
0x30f7   : > { %v9306_v63 = vmul.f32 %v11307_v6, %v9304_v18  ;;  %v9307_v23 = vmul.f32 %v11308_v39, %v9305_v32  ;;  %10306 = vmatprep.subr.bf16.mxu0 %v10305_v0 }
0x30f8   : > { %10308 = vmatpush1.bf16.msra.mxu0 %v10307_v25 }
0x30f9   : > { %9308 = vst [vmem:[#allocation2 + $0x80] sm:$0xff] %v9306_v63  ;;  %9309 = vst [vmem:[#allocation2 + $0x88] sm:$0xff] %v9307_v23  ;;  %9347 = vmatprep.subr.mxu0 %v9307_v23 }
0x30fc   : > { %9348 = vmatpush1.msra.mxu0 %v9306_v63 }
0x30fd   : > { %9823 = vmatmul.mubr.msk.f32.vlgmr.msra.gmra.mrb[226].mxu0 %vm1813_vm8, %v9225_v29 }
0x30fe   : > { %v9438_v11 = vpop.permute.xlu0 %9437 }
0x31d0   : > { %v9397_v44 = vpop.f32.mrb[226].mxu0 }
0x31d1   : > { %v9399_v56 = vpop.f32.mrb[227].mxu0 }
0x31d2   : > { %9504 = vmatprep.mubr.f32.mxu1 %v9399_v56 }
0x31d3   : > { %9505 = vmatmul.mubr.f32.vlgmr.msra.gmra.mrb[220].mxu1 %v9397_v44 }
0x32a6   : > { %v9890_v28 = vpop.f32.mrb[220].mxu1 }
0x32a7   : > { %v9891_v47 = vpop.f32.mrb[221].mxu1 }
0x32a8   : > { %v9892_v52 = vadd.f32 %v9891_v47, %v9890_v28 }
0x32aa   : > { %v9507_v14 = vadd.f32 %v9892_v52, %v9438_v11 }
0x32ac   : > { %9510 = vst [vmem:[%s1508_s26] sm:$0xff] %v9507_v14 }
0x32ad PF: > { %s111_s15 = sadd.s32 1, %s11315_s15  }
0x32ae   : > { %p108_p4 = scmp.ge.s32.totalorder %s111_s15, 4  }
0x32b0   :  { %110 = sbr.rel (!%p108_p4) target bundleno = 100 (0x64), region = 303 }

</bundles_post_ra>
